<compile_context>
chip_gen: v7x
topology: tpu7x:2x2x1
jax: 0.10.0
libtpu: 0.0.40
codegen_flags: <defaults>
</compile_context>

<pallas_src>
import numpy as np
import jax
import jax.numpy as jnp
from jax import lax
from jax.experimental import pallas as pl
from jax.experimental.pallas import tpu as pltpu


# Static network geometry (fc1 expects 32*5*5 -> input must be 40x40).
H1 = W1 = 40                 # conv1 spatial
H2 = W2 = 20                 # conv2 spatial (after pool1)
H3 = W3 = 10                 # conv3 spatial (after pool2)
C1, C2, C3 = 128, 64, 32     # conv output channels
HID, OUT = 40, 2
FEAT = 25 * C3               # 800

# Flattened "padded row" geometry for stages 2/3.
WP1 = W2 + 2                 # padded row width of stage-2 input grid (22)
WP2 = W3 + 2                 # padded row width of stage-3 input grid (12)
PAD1 = (H2 + 2) * WP1 + 2    # 486  flattened padded act1 rows (+2 slack rows)
PAD2 = (H3 + 2) * WP2 + 2    # 146
M2 = H2 * WP1                # 440  conv2 output rows (incl. junk pad columns)
M3 = H3 * WP2                # 120
P1LEN = H1 * W1 - W1 - 1     # 1559 rows after the two shifted pooling maxes
P2LEN = M2 - WP1 - 1         # 417
P3LEN = M3 - WP2 - 1         # 107
OFF2 = tuple(dy * WP1 + dx for dy in range(3) for dx in range(3))
OFF3 = tuple(dy * WP2 + dx for dy in range(3) for dx in range(3))


# ----------------------------------------------------------------------------
# Fused network kernel (one grid step == one sample)
# ----------------------------------------------------------------------------
def _net_kernel(x1_ref, w1_ref, b1_ref, s1_ref,
                w2_ref, b2_ref, s2_ref,
                w3_ref, b3_ref, r32_ref, msk_ref,
                wf1_ref, bf1_ref, wf2_ref, bf2_ref,
                o_ref):
    f32 = jnp.float32
    bf16 = jnp.bfloat16

    # ---- stage 1: conv1 (host im2col, K=9) -> 2x2 max -> bias+relu ----------
    conv1 = jnp.dot(x1_ref[0], w1_ref[...],
                    preferred_element_type=f32)          # (1600, 128)
    mh1 = jnp.maximum(conv1[:H1 * W1 - W1], conv1[W1:])  # pool over h pairs
    m1 = jnp.maximum(mh1[:P1LEN], mh1[1:])               # pool over w pairs
    a1 = jnp.maximum(m1 + b1_ref[...], 0.0).astype(bf16)  # (1559, 128)
    # selection matmul: gather pooled rows + lay out SAME-padded act1
    p1 = jnp.dot(s1_ref[...], a1,
                 preferred_element_type=f32)             # (486, 128)

    # ---- stage 2: flattened-row im2col (K=1152), pool, bias+relu ------------
    taps2 = [p1[o:o + M2, :].astype(bf16) for o in OFF2]
    a2c = jnp.concatenate(taps2, axis=1)                 # (440, 1152)
    conv2 = jnp.dot(a2c, w2_ref[...],
                    preferred_element_type=f32)          # (440, 64)
    mh2 = jnp.maximum(conv2[:M2 - WP1], conv2[WP1:])
    m2 = jnp.maximum(mh2[:P2LEN], mh2[1:])
    a2 = jnp.maximum(m2 + b2_ref[...], 0.0).astype(bf16)  # (417, 64)
    p2 = jnp.dot(s2_ref[...], a2,
                 preferred_element_type=f32)             # (146, 64)

    # ---- stage 3: flattened-row im2col (K=576), pool, bias+relu -------------
    taps3 = [p2[o:o + M3, :].astype(bf16) for o in OFF3]
    a3c = jnp.concatenate(taps3, axis=1)                 # (120, 576)
    conv3 = jnp.dot(a3c, w3_ref[...],
                    preferred_element_type=f32)          # (120, 32)
    mh3 = jnp.maximum(conv3[:M3 - WP2], conv3[WP2:])
    m3 = jnp.maximum(mh3[:P3LEN], mh3[1:])
    a3 = jnp.maximum(m3 + b3_ref[...], 0.0).astype(bf16)  # (107, 32)

    # ---- flatten (h, w, c)-major via replicate + mask + sublane reduce ------
    rep = jnp.dot(a3, r32_ref[...],
                  preferred_element_type=f32)            # (107, 800)
    feat = jnp.sum(rep * msk_ref[...], axis=0, keepdims=True)   # (1, 800)

    # ---- MLP head fused in the same kernel ----------------------------------
    h = jnp.maximum(
        jnp.dot(feat.astype(bf16), wf1_ref[...],
                preferred_element_type=f32) + bf1_ref[...], 0.0)    # (1, 40)
    out = jnp.dot(h.astype(bf16), wf2_ref[...],
                  preferred_element_type=f32) + bf2_ref[...]        # (1, 2)
    o_ref[0] = out.astype(o_ref.dtype)


# ----------------------------------------------------------------------------
# Host-side glue (tiny, one-time per call)
# ----------------------------------------------------------------------------
def _stage1_im2col(x_nchw):
    """(N, 1, 40, 40) -> (N, 1600, 9): 9 stride-1 shifted taps of the padded
    single-channel input (the K dim of the stage-1 im2col matmul)."""
    img = x_nchw[:, 0]                                   # (N, 40, 40)
    xp = jnp.pad(img, ((0, 0), (1, 1), (1, 1)))
    taps = [xp[:, dy:dy + H1, dx:dx + W1]
            for dy in range(3) for dx in range(3)]
    return jnp.stack(taps, axis=-1).reshape(x_nchw.shape[0], H1 * W1, 9)


def prepare_params(params):
    """One-time weight re-layout: bf16 matmul weights, selection matrices for
    pool-compaction / SAME-padding layout, and the flatten helpers."""
    bf16 = jnp.bfloat16
    w1r = params["w1"].reshape(9, C1).astype(bf16)             # (9, 128)
    w2r = params["w2"].reshape(9 * C1, C2).astype(bf16)        # (1152, 64)
    w3r = params["w3"].reshape(9 * C2, C3).astype(bf16)        # (576, 32)
    b1r = params["b1"].reshape(1, C1)
    b2r = params["b2"].reshape(1, C2)
    b3r = params["b3"].reshape(1, C3)

    # Selection matrices: gather the valid pooled rows and place them in the
    # flattened zero-padded grid of the next stage (borders stay exactly 0).
    s1 = np.zeros((PAD1, P1LEN), np.float32)
    for y in range(1, H2 + 1):
        for x in range(1, W2 + 1):
            s1[y * WP1 + x, 2 * (y - 1) * W1 + 2 * (x - 1)] = 1.0
    s2 = np.zeros((PAD2, P2LEN), np.float32)
    for y in range(1, H3 + 1):
        for x in range(1, W3 + 1):
            s2[y * WP2 + x, 2 * (y - 1) * WP1 + 2 * (x - 1)] = 1.0

    # Channel replication + position mask for the (h, w, c)-major flatten.
    r32 = np.zeros((C3, FEAT), np.float32)
    msk = np.zeros((P3LEN, FEAT), np.float32)
    for k in range(25):
        ph, pw = divmod(k, 5)
        p = 2 * ph * WP2 + 2 * pw
        for c in range(C3):
            r32[c, k * C3 + c] = 1.0
        msk[p, k * C3:(k + 1) * C3] = 1.0

    # PyTorch flattens (c, h, w); the kernel produces (h, w, c)-major features,
    # so permute fc1's input rows once: new row hw*32 + c == old row c*25 + hw.
    wf1p = (params["wf1"].reshape(C3, 25, HID)
            .transpose(1, 0, 2).reshape(FEAT, HID)).astype(bf16)
    bf1r = params["bf1"].reshape(1, HID)
    wf2b = params["wf2"].astype(bf16)
    bf2r = params["bf2"].reshape(1, OUT)

    return dict(w1r=w1r, b1r=b1r, s1=jnp.asarray(s1, bf16),
                w2r=w2r, b2r=b2r, s2=jnp.asarray(s2, bf16),
                w3r=w3r, b3r=b3r,
                r32=jnp.asarray(r32, bf16), msk=jnp.asarray(msk, jnp.float32),
                wf1p=wf1p, bf1r=bf1r, wf2b=wf2b, bf2r=bf2r)


def _resident(arr):
    zero = (0,) * arr.ndim
    return pl.BlockSpec(arr.shape, lambda i, _z=zero: _z)


def net_forward(x_nchw, prep):
    n = x_nchw.shape[0]
    x1 = _stage1_im2col(x_nchw.astype(jnp.float32)).astype(jnp.bfloat16)

    out = pl.pallas_call(
        _net_kernel,
        out_shape=jax.ShapeDtypeStruct((n, 1, OUT), jnp.float32),
        grid=(n,),
        in_specs=[
            pl.BlockSpec((1, H1 * W1, 9), lambda i: (i, 0, 0)),   # stage-1 im2col
            _resident(prep["w1r"]), _resident(prep["b1r"]), _resident(prep["s1"]),
            _resident(prep["w2r"]), _resident(prep["b2r"]), _resident(prep["s2"]),
            _resident(prep["w3r"]), _resident(prep["b3r"]),
            _resident(prep["r32"]), _resident(prep["msk"]),
            _resident(prep["wf1p"]), _resident(prep["bf1r"]),
            _resident(prep["wf2b"]), _resident(prep["bf2r"]),
        ],
        out_specs=pl.BlockSpec((1, 1, OUT), lambda i: (i, 0, 0)),
        compiler_params=pltpu.CompilerParams(
            dimension_semantics=("parallel",),
            vmem_limit_bytes=32 * 1024 * 1024),
    )(x1, prep["w1r"], prep["b1r"], prep["s1"],
      prep["w2r"], prep["b2r"], prep["s2"],
      prep["w3r"], prep["b3r"], prep["r32"], prep["msk"],
      prep["wf1p"], prep["bf1r"], prep["wf2b"], prep["bf2r"])
    return out[:, 0, :]


# ----------------------------------------------------------------------------
# Pure-JAX reference and parameter init (unchanged semantics)
# ----------------------------------------------------------------------------
def net_reference(x_nchw, params):
    x = jnp.transpose(x_nchw, (0, 2, 3, 1))

    def stage(x, w, b):
        y = lax.conv_general_dilated(
            x, w, (1, 1), "SAME",
            dimension_numbers=("NHWC", "HWIO", "NHWC"),
            precision=lax.Precision.HIGHEST)
        y = jnp.maximum(y + b.reshape(1, 1, 1, -1), 0.0)
        y = lax.reduce_window(y, -jnp.inf, lax.max,
                              (1, 2, 2, 1), (1, 2, 2, 1), "VALID")
        return y

    x = stage(x, params["w1"], params["b1"])
    x = stage(x, params["w2"], params["b2"])
    x = stage(x, params["w3"], params["b3"])
    n = x.shape[0]
    feat = jnp.transpose(x, (0, 3, 1, 2)).reshape(n, C3 * 25)   # PyTorch flatten
    h = jnp.maximum(feat @ params["wf1"] + params["bf1"], 0.0)
    return h @ params["wf2"] + params["bf2"]


def init_params():
    def conv_init(key, cin, cout, k=3):
        k1, k2 = jax.random.split(key)
        bound = 1.0 / np.sqrt(cin * k * k)
        w = jax.random.uniform(k1, (k, k, cin, cout), jnp.float32, -bound, bound)
        b = jax.random.uniform(k2, (cout,), jnp.float32, -bound, bound)
        return w, b

    def linear_init(key, fin, fout):
        k1, k2 = jax.random.split(key)
        bound = 1.0 / np.sqrt(fin)
        w = jax.random.uniform(k1, (fin, fout), jnp.float32, -bound, bound)
        b = jax.random.uniform(k2, (fout,), jnp.float32, -bound, bound)
        return w, b

    keys = jax.random.split(jax.random.PRNGKey(42), 5)
    w1, b1 = conv_init(keys[0], 1, C1)
    w2, b2 = conv_init(keys[1], C1, C2)
    w3, b3 = conv_init(keys[2], C2, C3)
    wf1, bf1 = linear_init(keys[3], FEAT, HID)
    wf2, bf2 = linear_init(keys[4], HID, OUT)
    return dict(w1=w1, b1=b1, w2=w2, b2=b2, w3=w3, b3=b3,
                wf1=wf1, bf1=bf1, wf2=wf2, bf2=bf2)


if __name__ == "__main__":
    # fc1 expects 32 * 5 * 5 features after three 2x2 pools -> spatial 40x40.
    x = jax.random.normal(jax.random.PRNGKey(0), (2, 1, 40, 40), jnp.float32)
    params = init_params()
    prep = prepare_params(params)

    out = jax.block_until_ready(jax.jit(net_forward)(x, prep))
    ref = jax.block_until_ready(net_reference(x, params))

    assert out.shape == (2, 2), out.shape
    assert jnp.allclose(out, ref, rtol=2e-2, atol=2e-2), (out, ref)

    print("KERNEL_OK")
</pallas_src>

<mosaic_0001>
module attributes {stable_mosaic.version = 11 : i64} {
  func.func @_net_kernel(%arg0: i32, %arg1: memref<1x1600x9xbf16, #tpu.memory_space<vmem>>, %arg2: memref<9x128xbf16, #tpu.memory_space<vmem>>, %arg3: memref<1x128xf32, #tpu.memory_space<vmem>>, %arg4: memref<486x1559xbf16, #tpu.memory_space<vmem>>, %arg5: memref<1152x64xbf16, #tpu.memory_space<vmem>>, %arg6: memref<1x64xf32, #tpu.memory_space<vmem>>, %arg7: memref<146x417xbf16, #tpu.memory_space<vmem>>, %arg8: memref<576x32xbf16, #tpu.memory_space<vmem>>, %arg9: memref<1x32xf32, #tpu.memory_space<vmem>>, %arg10: memref<32x800xbf16, #tpu.memory_space<vmem>>, %arg11: memref<107x800xf32, #tpu.memory_space<vmem>>, %arg12: memref<800x40xbf16, #tpu.memory_space<vmem>>, %arg13: memref<1x40xf32, #tpu.memory_space<vmem>>, %arg14: memref<40x2xbf16, #tpu.memory_space<vmem>>, %arg15: memref<1x2xf32, #tpu.memory_space<vmem>>, %arg16: memref<1x1x2xf32, #tpu.memory_space<vmem>>) attributes {dimension_semantics = [#tpu.dimension_semantics<parallel>], iteration_bounds = array<i64: 2>, scalar_prefetch = 0 : i64, scratch_operands = 0 : i64, tpu.core_type = #tpu.core_type<tc>, window_params = [{transform_indices = @transform_0, window_bounds = array<i64: 1, 1600, 9>}, {pipeline_mode = #tpu.pipeline_mode<synchronous>, transform_indices = @transform_1, window_bounds = array<i64: 9, 128>}, {pipeline_mode = #tpu.pipeline_mode<synchronous>, transform_indices = @transform_2, window_bounds = array<i64: 1, 128>}, {pipeline_mode = #tpu.pipeline_mode<synchronous>, transform_indices = @transform_3, window_bounds = array<i64: 486, 1559>}, {pipeline_mode = #tpu.pipeline_mode<synchronous>, transform_indices = @transform_4, window_bounds = array<i64: 1152, 64>}, {pipeline_mode = #tpu.pipeline_mode<synchronous>, transform_indices = @transform_5, window_bounds = array<i64: 1, 64>}, {pipeline_mode = #tpu.pipeline_mode<synchronous>, transform_indices = @transform_6, window_bounds = array<i64: 146, 417>}, {pipeline_mode = #tpu.pipeline_mode<synchronous>, transform_indices = @transform_7, window_bounds = array<i64: 576, 32>}, {pipeline_mode = #tpu.pipeline_mode<synchronous>, transform_indices = @transform_8, window_bounds = array<i64: 1, 32>}, {pipeline_mode = #tpu.pipeline_mode<synchronous>, transform_indices = @transform_9, window_bounds = array<i64: 32, 800>}, {pipeline_mode = #tpu.pipeline_mode<synchronous>, transform_indices = @transform_10, window_bounds = array<i64: 107, 800>}, {pipeline_mode = #tpu.pipeline_mode<synchronous>, transform_indices = @transform_11, window_bounds = array<i64: 800, 40>}, {pipeline_mode = #tpu.pipeline_mode<synchronous>, transform_indices = @transform_12, window_bounds = array<i64: 1, 40>}, {pipeline_mode = #tpu.pipeline_mode<synchronous>, transform_indices = @transform_13, window_bounds = array<i64: 40, 2>}, {pipeline_mode = #tpu.pipeline_mode<synchronous>, transform_indices = @transform_14, window_bounds = array<i64: 1, 2>}, {transform_indices = @transform_15, window_bounds = array<i64: 1, 1, 2>}]} {
    %c0 = arith.constant 0 : index
    %c0_0 = arith.constant 0 : index
    %c0_1 = arith.constant 0 : index
    %0 = vector.load %arg1[%c0, %c0_0, %c0_1] : memref<1x1600x9xbf16, #tpu.memory_space<vmem>>, vector<1x1600x9xbf16>
    %1 = vector.shape_cast %0 : vector<1x1600x9xbf16> to vector<1600x9xbf16>
    %c0_2 = arith.constant 0 : index
    %c0_3 = arith.constant 0 : index
    %2 = vector.load %arg2[%c0_2, %c0_3] : memref<9x128xbf16, #tpu.memory_space<vmem>>, vector<9x128xbf16>
    %cst = arith.constant dense<0.000000e+00> : vector<1600x128xf32>
    %3 = tpu.matmul %1, %2, %cst {dimension_numbers = #tpu.dot_dimension_numbers<[1], [0], [0], [1], [0, 0, 1, 1], [], []>} : vector<1600x9xbf16>, vector<9x128xbf16>, vector<1600x128xf32> -> vector<1600x128xf32>
    %4 = vector.extract_strided_slice %3 {offsets = [0, 0], sizes = [1560, 128], strides = [1, 1]} : vector<1600x128xf32> to vector<1560x128xf32>
    %5 = vector.extract_strided_slice %3 {offsets = [40, 0], sizes = [1560, 128], strides = [1, 1]} : vector<1600x128xf32> to vector<1560x128xf32>
    %6 = arith.maximumf %4, %5 : vector<1560x128xf32>
    %7 = vector.extract_strided_slice %6 {offsets = [0, 0], sizes = [1559, 128], strides = [1, 1]} : vector<1560x128xf32> to vector<1559x128xf32>
    %8 = vector.extract_strided_slice %6 {offsets = [1, 0], sizes = [1559, 128], strides = [1, 1]} : vector<1560x128xf32> to vector<1559x128xf32>
    %9 = arith.maximumf %7, %8 : vector<1559x128xf32>
    %c0_4 = arith.constant 0 : index
    %c0_5 = arith.constant 0 : index
    %10 = vector.load %arg3[%c0_4, %c0_5] : memref<1x128xf32, #tpu.memory_space<vmem>>, vector<1x128xf32>
    %11 = vector.broadcast %10 : vector<1x128xf32> to vector<1559x128xf32>
    %12 = arith.addf %9, %11 : vector<1559x128xf32>
    %cst_6 = arith.constant 0.000000e+00 : f32
    %13 = vector.broadcast %cst_6 : f32 to vector<1559x128xf32>
    %14 = arith.maximumf %12, %13 : vector<1559x128xf32>
    %15 = arith.truncf %14 : vector<1559x128xf32> to vector<1559x128xbf16>
    %c0_7 = arith.constant 0 : index
    %c0_8 = arith.constant 0 : index
    %16 = vector.load %arg4[%c0_7, %c0_8] : memref<486x1559xbf16, #tpu.memory_space<vmem>>, vector<486x1559xbf16>
    %cst_9 = arith.constant dense<0.000000e+00> : vector<486x128xf32>
    %17 = tpu.matmul %16, %15, %cst_9 {dimension_numbers = #tpu.dot_dimension_numbers<[1], [0], [0], [1], [0, 0, 1, 1], [], []>} : vector<486x1559xbf16>, vector<1559x128xbf16>, vector<486x128xf32> -> vector<486x128xf32>
    %18 = vector.extract_strided_slice %17 {offsets = [0, 0], sizes = [440, 128], strides = [1, 1]} : vector<486x128xf32> to vector<440x128xf32>
    %19 = arith.truncf %18 : vector<440x128xf32> to vector<440x128xbf16>
    %20 = vector.extract_strided_slice %17 {offsets = [1, 0], sizes = [440, 128], strides = [1, 1]} : vector<486x128xf32> to vector<440x128xf32>
    %21 = arith.truncf %20 : vector<440x128xf32> to vector<440x128xbf16>
    %22 = vector.extract_strided_slice %17 {offsets = [2, 0], sizes = [440, 128], strides = [1, 1]} : vector<486x128xf32> to vector<440x128xf32>
    %23 = arith.truncf %22 : vector<440x128xf32> to vector<440x128xbf16>
    %24 = vector.extract_strided_slice %17 {offsets = [22, 0], sizes = [440, 128], strides = [1, 1]} : vector<486x128xf32> to vector<440x128xf32>
    %25 = arith.truncf %24 : vector<440x128xf32> to vector<440x128xbf16>
    %26 = vector.extract_strided_slice %17 {offsets = [23, 0], sizes = [440, 128], strides = [1, 1]} : vector<486x128xf32> to vector<440x128xf32>
    %27 = arith.truncf %26 : vector<440x128xf32> to vector<440x128xbf16>
    %28 = vector.extract_strided_slice %17 {offsets = [24, 0], sizes = [440, 128], strides = [1, 1]} : vector<486x128xf32> to vector<440x128xf32>
    %29 = arith.truncf %28 : vector<440x128xf32> to vector<440x128xbf16>
    %30 = vector.extract_strided_slice %17 {offsets = [44, 0], sizes = [440, 128], strides = [1, 1]} : vector<486x128xf32> to vector<440x128xf32>
    %31 = arith.truncf %30 : vector<440x128xf32> to vector<440x128xbf16>
    %32 = vector.extract_strided_slice %17 {offsets = [45, 0], sizes = [440, 128], strides = [1, 1]} : vector<486x128xf32> to vector<440x128xf32>
    %33 = arith.truncf %32 : vector<440x128xf32> to vector<440x128xbf16>
    %34 = vector.extract_strided_slice %17 {offsets = [46, 0], sizes = [440, 128], strides = [1, 1]} : vector<486x128xf32> to vector<440x128xf32>
    %35 = arith.truncf %34 : vector<440x128xf32> to vector<440x128xbf16>
    %36 = tpu.concatenate %19, %21, %23, %25, %27, %29, %31, %33, %35 in 1 : vector<440x128xbf16>, vector<440x128xbf16>, vector<440x128xbf16>, vector<440x128xbf16>, vector<440x128xbf16>, vector<440x128xbf16>, vector<440x128xbf16>, vector<440x128xbf16>, vector<440x128xbf16> -> vector<440x1152xbf16>
    %c0_10 = arith.constant 0 : index
    %c0_11 = arith.constant 0 : index
    %37 = vector.load %arg5[%c0_10, %c0_11] : memref<1152x64xbf16, #tpu.memory_space<vmem>>, vector<1152x64xbf16>
    %cst_12 = arith.constant dense<0.000000e+00> : vector<440x64xf32>
    %38 = tpu.matmul %36, %37, %cst_12 {dimension_numbers = #tpu.dot_dimension_numbers<[1], [0], [0], [1], [0, 0, 1, 1], [], []>} : vector<440x1152xbf16>, vector<1152x64xbf16>, vector<440x64xf32> -> vector<440x64xf32>
    %39 = vector.extract_strided_slice %38 {offsets = [0, 0], sizes = [418, 64], strides = [1, 1]} : vector<440x64xf32> to vector<418x64xf32>
    %40 = vector.extract_strided_slice %38 {offsets = [22, 0], sizes = [418, 64], strides = [1, 1]} : vector<440x64xf32> to vector<418x64xf32>
    %41 = arith.maximumf %39, %40 : vector<418x64xf32>
    %42 = vector.extract_strided_slice %41 {offsets = [0, 0], sizes = [417, 64], strides = [1, 1]} : vector<418x64xf32> to vector<417x64xf32>
    %43 = vector.extract_strided_slice %41 {offsets = [1, 0], sizes = [417, 64], strides = [1, 1]} : vector<418x64xf32> to vector<417x64xf32>
    %44 = arith.maximumf %42, %43 : vector<417x64xf32>
    %c0_13 = arith.constant 0 : index
    %c0_14 = arith.constant 0 : index
    %45 = vector.load %arg6[%c0_13, %c0_14] : memref<1x64xf32, #tpu.memory_space<vmem>>, vector<1x64xf32>
    %46 = vector.broadcast %45 : vector<1x64xf32> to vector<417x64xf32>
    %47 = arith.addf %44, %46 : vector<417x64xf32>
    %cst_15 = arith.constant 0.000000e+00 : f32
    %48 = vector.broadcast %cst_15 : f32 to vector<417x64xf32>
    %49 = arith.maximumf %47, %48 : vector<417x64xf32>
    %50 = arith.truncf %49 : vector<417x64xf32> to vector<417x64xbf16>
    %c0_16 = arith.constant 0 : index
    %c0_17 = arith.constant 0 : index
    %51 = vector.load %arg7[%c0_16, %c0_17] : memref<146x417xbf16, #tpu.memory_space<vmem>>, vector<146x417xbf16>
    %cst_18 = arith.constant dense<0.000000e+00> : vector<146x64xf32>
    %52 = tpu.matmul %51, %50, %cst_18 {dimension_numbers = #tpu.dot_dimension_numbers<[1], [0], [0], [1], [0, 0, 1, 1], [], []>} : vector<146x417xbf16>, vector<417x64xbf16>, vector<146x64xf32> -> vector<146x64xf32>
    %53 = vector.extract_strided_slice %52 {offsets = [0, 0], sizes = [120, 64], strides = [1, 1]} : vector<146x64xf32> to vector<120x64xf32>
    %54 = arith.truncf %53 : vector<120x64xf32> to vector<120x64xbf16>
    %55 = vector.extract_strided_slice %52 {offsets = [1, 0], sizes = [120, 64], strides = [1, 1]} : vector<146x64xf32> to vector<120x64xf32>
    %56 = arith.truncf %55 : vector<120x64xf32> to vector<120x64xbf16>
    %57 = vector.extract_strided_slice %52 {offsets = [2, 0], sizes = [120, 64], strides = [1, 1]} : vector<146x64xf32> to vector<120x64xf32>
    %58 = arith.truncf %57 : vector<120x64xf32> to vector<120x64xbf16>
    %59 = vector.extract_strided_slice %52 {offsets = [12, 0], sizes = [120, 64], strides = [1, 1]} : vector<146x64xf32> to vector<120x64xf32>
    %60 = arith.truncf %59 : vector<120x64xf32> to vector<120x64xbf16>
    %61 = vector.extract_strided_slice %52 {offsets = [13, 0], sizes = [120, 64], strides = [1, 1]} : vector<146x64xf32> to vector<120x64xf32>
    %62 = arith.truncf %61 : vector<120x64xf32> to vector<120x64xbf16>
    %63 = vector.extract_strided_slice %52 {offsets = [14, 0], sizes = [120, 64], strides = [1, 1]} : vector<146x64xf32> to vector<120x64xf32>
    %64 = arith.truncf %63 : vector<120x64xf32> to vector<120x64xbf16>
    %65 = vector.extract_strided_slice %52 {offsets = [24, 0], sizes = [120, 64], strides = [1, 1]} : vector<146x64xf32> to vector<120x64xf32>
    %66 = arith.truncf %65 : vector<120x64xf32> to vector<120x64xbf16>
    %67 = vector.extract_strided_slice %52 {offsets = [25, 0], sizes = [120, 64], strides = [1, 1]} : vector<146x64xf32> to vector<120x64xf32>
    %68 = arith.truncf %67 : vector<120x64xf32> to vector<120x64xbf16>
    %69 = vector.extract_strided_slice %52 {offsets = [26, 0], sizes = [120, 64], strides = [1, 1]} : vector<146x64xf32> to vector<120x64xf32>
    %70 = arith.truncf %69 : vector<120x64xf32> to vector<120x64xbf16>
    %71 = tpu.concatenate %54, %56, %58, %60, %62, %64, %66, %68, %70 in 1 : vector<120x64xbf16>, vector<120x64xbf16>, vector<120x64xbf16>, vector<120x64xbf16>, vector<120x64xbf16>, vector<120x64xbf16>, vector<120x64xbf16>, vector<120x64xbf16>, vector<120x64xbf16> -> vector<120x576xbf16>
    %c0_19 = arith.constant 0 : index
    %c0_20 = arith.constant 0 : index
    %72 = vector.load %arg8[%c0_19, %c0_20] : memref<576x32xbf16, #tpu.memory_space<vmem>>, vector<576x32xbf16>
    %cst_21 = arith.constant dense<0.000000e+00> : vector<120x32xf32>
    %73 = tpu.matmul %71, %72, %cst_21 {dimension_numbers = #tpu.dot_dimension_numbers<[1], [0], [0], [1], [0, 0, 1, 1], [], []>} : vector<120x576xbf16>, vector<576x32xbf16>, vector<120x32xf32> -> vector<120x32xf32>
    %74 = vector.extract_strided_slice %73 {offsets = [0, 0], sizes = [108, 32], strides = [1, 1]} : vector<120x32xf32> to vector<108x32xf32>
    %75 = vector.extract_strided_slice %73 {offsets = [12, 0], sizes = [108, 32], strides = [1, 1]} : vector<120x32xf32> to vector<108x32xf32>
    %76 = arith.maximumf %74, %75 : vector<108x32xf32>
    %77 = vector.extract_strided_slice %76 {offsets = [0, 0], sizes = [107, 32], strides = [1, 1]} : vector<108x32xf32> to vector<107x32xf32>
    %78 = vector.extract_strided_slice %76 {offsets = [1, 0], sizes = [107, 32], strides = [1, 1]} : vector<108x32xf32> to vector<107x32xf32>
    %79 = arith.maximumf %77, %78 : vector<107x32xf32>
    %c0_22 = arith.constant 0 : index
    %c0_23 = arith.constant 0 : index
    %80 = vector.load %arg9[%c0_22, %c0_23] : memref<1x32xf32, #tpu.memory_space<vmem>>, vector<1x32xf32>
    %81 = vector.broadcast %80 : vector<1x32xf32> to vector<107x32xf32>
    %82 = arith.addf %79, %81 : vector<107x32xf32>
    %cst_24 = arith.constant 0.000000e+00 : f32
    %83 = vector.broadcast %cst_24 : f32 to vector<107x32xf32>
    %84 = arith.maximumf %82, %83 : vector<107x32xf32>
    %85 = arith.truncf %84 : vector<107x32xf32> to vector<107x32xbf16>
    %c0_25 = arith.constant 0 : index
    %c0_26 = arith.constant 0 : index
    %86 = vector.load %arg10[%c0_25, %c0_26] : memref<32x800xbf16, #tpu.memory_space<vmem>>, vector<32x800xbf16>
    %cst_27 = arith.constant dense<0.000000e+00> : vector<107x800xf32>
    %87 = tpu.matmul %85, %86, %cst_27 {dimension_numbers = #tpu.dot_dimension_numbers<[1], [0], [0], [1], [0, 0, 1, 1], [], []>} : vector<107x32xbf16>, vector<32x800xbf16>, vector<107x800xf32> -> vector<107x800xf32>
    %c0_28 = arith.constant 0 : index
    %c0_29 = arith.constant 0 : index
    %88 = vector.load %arg11[%c0_28, %c0_29] : memref<107x800xf32, #tpu.memory_space<vmem>>, vector<107x800xf32>
    %89 = arith.mulf %87, %88 : vector<107x800xf32>
    %cst_30 = arith.constant dense<0.000000e+00> : vector<800xf32>
    %90 = vector.multi_reduction <add>, %89, %cst_30 [0] : vector<107x800xf32> to vector<800xf32>
    %91 = vector.shape_cast %90 : vector<800xf32> to vector<1x800xf32>
    %92 = arith.truncf %91 : vector<1x800xf32> to vector<1x800xbf16>
    %c0_31 = arith.constant 0 : index
    %c0_32 = arith.constant 0 : index
    %93 = vector.load %arg12[%c0_31, %c0_32] : memref<800x40xbf16, #tpu.memory_space<vmem>>, vector<800x40xbf16>
    %cst_33 = arith.constant dense<0.000000e+00> : vector<1x40xf32>
    %94 = tpu.matmul %92, %93, %cst_33 {dimension_numbers = #tpu.dot_dimension_numbers<[1], [0], [0], [1], [0, 0, 1, 1], [], []>} : vector<1x800xbf16>, vector<800x40xbf16>, vector<1x40xf32> -> vector<1x40xf32>
    %c0_34 = arith.constant 0 : index
    %c0_35 = arith.constant 0 : index
    %95 = vector.load %arg13[%c0_34, %c0_35] : memref<1x40xf32, #tpu.memory_space<vmem>>, vector<1x40xf32>
    %96 = arith.addf %94, %95 : vector<1x40xf32>
    %cst_36 = arith.constant 0.000000e+00 : f32
    %97 = vector.broadcast %cst_36 : f32 to vector<1x40xf32>
    %98 = arith.maximumf %96, %97 : vector<1x40xf32>
    %99 = arith.truncf %98 : vector<1x40xf32> to vector<1x40xbf16>
    %c0_37 = arith.constant 0 : index
    %c0_38 = arith.constant 0 : index
    %100 = vector.load %arg14[%c0_37, %c0_38] : memref<40x2xbf16, #tpu.memory_space<vmem>>, vector<40x2xbf16>
    %cst_39 = arith.constant dense<0.000000e+00> : vector<1x2xf32>
    %101 = tpu.matmul %99, %100, %cst_39 {dimension_numbers = #tpu.dot_dimension_numbers<[1], [0], [0], [1], [0, 0, 1, 1], [], []>} : vector<1x40xbf16>, vector<40x2xbf16>, vector<1x2xf32> -> vector<1x2xf32>
    %c0_40 = arith.constant 0 : index
    %c0_41 = arith.constant 0 : index
    %102 = vector.load %arg15[%c0_40, %c0_41] : memref<1x2xf32, #tpu.memory_space<vmem>>, vector<1x2xf32>
    %103 = arith.addf %101, %102 : vector<1x2xf32>
    %c0_42 = arith.constant 0 : index
    %c0_43 = arith.constant 0 : index
    %c0_44 = arith.constant 0 : index
    %104 = vector.load %arg16[%c0_42, %c0_43, %c0_44] : memref<1x1x2xf32, #tpu.memory_space<vmem>>, vector<1x1x2xf32>
    %105 = vector.shape_cast %104 : vector<1x1x2xf32> to vector<1x2xf32>
    %106 = vector.shape_cast %103 : vector<1x2xf32> to vector<1x1x2xf32>
    tpu.vector_store %arg16[%c0_42, %c0_43, %c0_44], %106 {strides = array<i32>} : memref<1x1x2xf32, #tpu.memory_space<vmem>>, vector<1x1x2xf32>,
    return
  }
  func.func @transform_0(%arg0: i32) -> (i32, i32, i32) {
    %c0_i32 = arith.constant 0 : i32
    %c0_i32_0 = arith.constant 0 : i32
    %c0_i32_1 = arith.constant 0 : i32
    return %arg0, %c0_i32, %c0_i32_0 : i32, i32, i32
  }
  func.func @transform_1(%arg0: i32) -> (i32, i32) {
    %c0_i32 = arith.constant 0 : i32
    %c0_i32_0 = arith.constant 0 : i32
    %c0_i32_1 = arith.constant 0 : i32
    return %c0_i32, %c0_i32_0 : i32, i32
  }
  func.func @transform_2(%arg0: i32) -> (i32, i32) {
    %c0_i32 = arith.constant 0 : i32
    %c0_i32_0 = arith.constant 0 : i32
    %c0_i32_1 = arith.constant 0 : i32
    return %c0_i32, %c0_i32_0 : i32, i32
  }
  func.func @transform_3(%arg0: i32) -> (i32, i32) {
    %c0_i32 = arith.constant 0 : i32
    %c0_i32_0 = arith.constant 0 : i32
    %c0_i32_1 = arith.constant 0 : i32
    return %c0_i32, %c0_i32_0 : i32, i32
  }
  func.func @transform_4(%arg0: i32) -> (i32, i32) {
    %c0_i32 = arith.constant 0 : i32
    %c0_i32_0 = arith.constant 0 : i32
    %c0_i32_1 = arith.constant 0 : i32
    return %c0_i32, %c0_i32_0 : i32, i32
  }
  func.func @transform_5(%arg0: i32) -> (i32, i32) {
    %c0_i32 = arith.constant 0 : i32
    %c0_i32_0 = arith.constant 0 : i32
    %c0_i32_1 = arith.constant 0 : i32
    return %c0_i32, %c0_i32_0 : i32, i32
  }
  func.func @transform_6(%arg0: i32) -> (i32, i32) {
    %c0_i32 = arith.constant 0 : i32
    %c0_i32_0 = arith.constant 0 : i32
    %c0_i32_1 = arith.constant 0 : i32
    return %c0_i32, %c0_i32_0 : i32, i32
  }
  func.func @transform_7(%arg0: i32) -> (i32, i32) {
    %c0_i32 = arith.constant 0 : i32
    %c0_i32_0 = arith.constant 0 : i32
    %c0_i32_1 = arith.constant 0 : i32
    return %c0_i32, %c0_i32_0 : i32, i32
  }
  func.func @transform_8(%arg0: i32) -> (i32, i32) {
    %c0_i32 = arith.constant 0 : i32
    %c0_i32_0 = arith.constant 0 : i32
    %c0_i32_1 = arith.constant 0 : i32
    return %c0_i32, %c0_i32_0 : i32, i32
  }
  func.func @transform_9(%arg0: i32) -> (i32, i32) {
    %c0_i32 = arith.constant 0 : i32
    %c0_i32_0 = arith.constant 0 : i32
    %c0_i32_1 = arith.constant 0 : i32
    return %c0_i32, %c0_i32_0 : i32, i32
  }
  func.func @transform_10(%arg0: i32) -> (i32, i32) {
    %c0_i32 = arith.constant 0 : i32
    %c0_i32_0 = arith.constant 0 : i32
    %c0_i32_1 = arith.constant 0 : i32
    return %c0_i32, %c0_i32_0 : i32, i32
  }
  func.func @transform_11(%arg0: i32) -> (i32, i32) {
    %c0_i32 = arith.constant 0 : i32
    %c0_i32_0 = arith.constant 0 : i32
    %c0_i32_1 = arith.constant 0 : i32
    return %c0_i32, %c0_i32_0 : i32, i32
  }
  func.func @transform_12(%arg0: i32) -> (i32, i32) {
    %c0_i32 = arith.constant 0 : i32
    %c0_i32_0 = arith.constant 0 : i32
    %c0_i32_1 = arith.constant 0 : i32
    return %c0_i32, %c0_i32_0 : i32, i32
  }
  func.func @transform_13(%arg0: i32) -> (i32, i32) {
    %c0_i32 = arith.constant 0 : i32
    %c0_i32_0 = arith.constant 0 : i32
    %c0_i32_1 = arith.constant 0 : i32
    return %c0_i32, %c0_i32_0 : i32, i32
  }
  func.func @transform_14(%arg0: i32) -> (i32, i32) {
    %c0_i32 = arith.constant 0 : i32
    %c0_i32_0 = arith.constant 0 : i32
    %c0_i32_1 = arith.constant 0 : i32
    return %c0_i32, %c0_i32_0 : i32, i32
  }
  func.func @transform_15(%arg0: i32) -> (i32, i32, i32) {
    %c0_i32 = arith.constant 0 : i32
    %c0_i32_0 = arith.constant 0 : i32
    %c0_i32_1 = arith.constant 0 : i32
    return %arg0, %c0_i32, %c0_i32_0 : i32, i32, i32
  }
}

</mosaic_0001>

<bundles_post_ra>
// kernel: net_forward.1
= control target key start
LH: loop header
LB: loop body
LE: loop exit
PB: predicated region body
PF: predicated region fallthrough
CT: control target
= control target key end

     0   :  { %s25491_s0 = inlined_call_operand.vmem [shape: bf16[2,1600,9], index: 0, kind: input, shape index: {}]   ;;  %s25492_s1 = inlined_call_operand.vmem [shape: bf16[9,128], index: 1, kind: input, shape index: {}]   ;;  %s25493_s2 = inlined_call_operand.vmem [shape: f32[1,128], index: 2, kind: input, shape index: {}]   ;;  %s25494_s3 = inlined_call_operand.vmem [shape: bf16[486,1559], index: 3, kind: input, shape index: {}]   ;;  %s25495_s4 = inlined_call_operand.vmem [shape: bf16[1152,64], index: 4, kind: input, shape index: {}]   ;;  %s25496_s5 = inlined_call_operand.vmem [shape: f32[1,64], index: 5, kind: input, shape index: {}]   ;;  %s25497_s6 = inlined_call_operand.vmem [shape: bf16[146,417], index: 6, kind: input, shape index: {}]   ;;  %s25498_s7 = inlined_call_operand.vmem [shape: bf16[576,32], index: 7, kind: input, shape index: {}]   ;;  %s25499_s8 = inlined_call_operand.vmem [shape: f32[1,32], index: 8, kind: input, shape index: {}]   ;;  %s25500_s9 = inlined_call_operand.vmem [shape: bf16[32,800], index: 9, kind: input, shape index: {}]   ;;  %s25501_s10 = inlined_call_operand.vmem [shape: f32[107,800], index: 10, kind: input, shape index: {}]   ;;  %s25502_s11 = inlined_call_operand.vmem [shape: bf16[800,40], index: 11, kind: input, shape index: {}]   ;;  %s25503_s12 = inlined_call_operand.vmem [shape: f32[1,40], index: 12, kind: input, shape index: {}]   ;;  %s25504_s13 = inlined_call_operand.vmem [shape: bf16[40,2], index: 13, kind: input, shape index: {}]   ;;  %s25505_s14 = inlined_call_operand.vmem [shape: f32[1,2], index: 14, kind: input, shape index: {}]   ;;  %s25506_s15 = inlined_call_operand.hbm [shape: f32[2,1,2], index: 15, kind: output, shape index: {}]  }
   0x1   :  { %25546 = sst [smem:[#allocation73_spill]] %s25491_s0 }
   0x2   :  { %25547 = sst [smem:[#allocation74_spill]] %s25492_s1 }
   0x3   :  { %20 = vsyncpa [#allocation3], 0 }
   0x4   :  { %22 = vsyncpa [#allocation3 + $0x1], 0  ;;  %s19455_s18 = smov 0   ;;  %s19457_s19 = smov 0  }
   0x5   :  { %s19459_s20 = smov 0   ;;  %s19461_s21 = smov 0  }
   0x6 LB: > { %25548 = sst [smem:[#allocation5_spill]] %s19363_s20  ;;  %s19476_s22 = sadd.s32 4294967295, %s19367_s21   ;;  %s19367_s21 = sphi %s19461_s21, %s25720_s21   ;;  %s19363_s20 = sphi %s19459_s20, %s25722_s20   ;;  %s19359_s19 = sphi %s19457_s19, %s25724_s19   ;;  %s19355_s18 = sphi %s19455_s18, %s25723_s18  }
   0x7   : > { %s15411_s23 = sadd.s32 4294967294, %s19367_s21   ;;  %s19480_s24 = sadd.s32 1, %s19367_s21  }
   0x8   : > { %25549 = sst [smem:[#allocation6_spill]] %s19480_s24  ;;  %s355_s25 = sadd.s32 1, %s19363_s20 }
   0x9   : > { %s352_s26 = ssub.s32 %s19367_s21, %s19480_s24  ;;  %p365_p0 = scmp.ne.s32.totalorder %s19363_s20, %s19359_s19 }
   0xa   : > { %p353_p1 = scmp.eq.s32.totalorder %s352_s26, 0  ;;  %p366_p2 = scmp.eq.s32.totalorder %s19476_s22, 1 }
   0xb   : > { %p371_p3 = scmp.ne.s32.totalorder %s19359_s19, %s19355_s18  ;;  %p372_p4 = scmp.eq.s32.totalorder %s15411_s23, 1 }
   0xc   : > { %s19491_s27 = scalar_select %p353_p1, %s19363_s20, %s355_s25  }
   0xd   : > { %p19493_p5 = por %p366_p2, %p365_p0  ;;  %p19497_p6 = por %p372_p4, %p371_p3 }
   0xe   : > { %25550 = sst [smem:[#allocation7_spill]] %s19491_s27  ;;  %p15414_p7 = scmp.ge.s32.totalorder %s19367_s21, 1 }
   0xf   : > { %p440_p8 = scmp.lt.s32.totalorder %s19367_s21, 3 }
  0x11   : > { %p441_p9 = pnand %p15414_p7, %p440_p8 }
  0x13   : > { %444 = sbr.rel (%p441_p9) target bundleno = 4923 (0x133b), region = 80 }
  0x1a   : > { %s25553_s1 = sld [smem:[#allocation74_spill]]  ;;  %vm1501_vm0 = vcmask 1043456   ;;  %vm1502_vm1 = vcmask 1044480   ;;  %p487_p10 = scmp.lt.s32.totalorder %s19476_s22, 1  ;;  %v19369_v1 = vmov 65535   ;;  %vm1200_vm2 = vcmask 72704  }
  0x1b   : > { %v1503_v2 = vsel %vm1501_vm0, 4294967295, %v19369_v1  ;;  %s25554_s0 = sld [smem:[#allocation73_spill]]  ;;  %v25518_v35 = vmov 0   ;;  %v18416_v42 = vld [vmem:[%s25494_s3 + $0x4] ss:$52 sps:$4 sm:$0xff]   ;;  %vm2731_vm3 = vcmask 1046528  }
  0x1c   : > { %v1504_v3 = vsel %vm1502_vm1, %v1503_v2, 0  ;;  %s488_s17 = scalar_select %p487_p10, %s19476_s22, 1  ;;  %6528 = vmatprep.subr.bf16.mxu1 %v25518_v35  ;;  %6560 = vmatprep.mubr.bf16.mxu1 %v18416_v42  ;;  %v19604_v60 = vld [vmem:[%s25493_s2] ss:$0 sm:$0xff]  ;;  %vm6522_vm4 = vcmask 1042432   ;;  %vm19372_vm5 = vmmov 0  }
  0x1d   : > { %vm6428_vm6 = vcmask 187392   ;;  %vm8548_vm7 = vsmask.f32 7424  ;;  %vm8997_vm8 = vsmask.f32 4352  ;;  %vm9170_vm9 = vcmask 1045504  }
  0x1e   : > { %s18332_s23 = smul.u32 800, %s488_s17  ;;  %vm9254_vm10 = vsmask.f32 5376  ;;  %vm11526_vm11 = vcmask 1041408   ;;  %vm12395_vm12 = vcmask 1040384   ;;  %vm12364_vm13 = vcmask 269312  }
  0x1f   : > { %vm12947_vm14 = vcmask 523264   ;;  %vm13930_vm15 = vcmask 261120   ;;  %s485_s20 = sand.u32 1, %s19359_s19  }
  0x20   : > { %v18377_v0 = vld [vmem:[%s25553_s1] sm:$0x1f]   ;;  %s486_s1 = scalar_lea.vmem [#allocation2], %s485_s20 }
  0x21   : > { %v1506_v4 = vand.u32 %v18377_v0, %v1504_v3  ;;  %s19514_s30 = scalar_lea.vmem %s25554_s0, %s18332_s23  ;;  %s16317_s23 = sshll.u32 %s19476_s22, 4 }
  0x22   : > { %v18378_v5 = vld [vmem:[%s19514_s30] sm:$0xff]   ;;  %v18379_v6 = vld [vmem:[%s19514_s30 + $0x8] sm:$0xff]   ;;  %v18380_v7 = vld [vmem:[%s19514_s30 + $0x10] sm:$0xff]   ;;  %s15356_s27 = sshll.u32 %s486_s1, 4  ;;  %s25449_s26 = scalar_lea.hbm %s25506_s15, %s16317_s23  ;;  %s25451_s27 = int_to_ptr.vmem [resolvable:$true] %s15356_s27 }
  0x23   : > { %16788 = vmatprep.subr.bf16.mxu0 %v1506_v4  ;;  %16790 = vmatprep.mubr.msk.bf16.mxu0 %vm1200_vm2, %v18378_v5  ;;  %v18381_v8 = vld [vmem:[%s19514_s30 + $0x18] sm:$0xff]   ;;  %v18382_v9 = vld [vmem:[%s19514_s30 + $0x20] sm:$0xff]   ;;  %v18383_v10 = vld [vmem:[%s19514_s30 + $0x28] sm:$0xff]   ;;  %s15344_s22 = scalar_lea.sflag [#allocation3], %s485_s20  ;;  %s19305_s16 = scalar_lea.vmem %s25451_s27, 16 }
  0x24   : > { %16789 = vmatpush3.bf16.msra.mxu0 %v1506_v4  ;;  %v18384_v11 = vld [vmem:[%s19514_s30 + $0x30] sm:$0xff]   ;;  %v18385_v12 = vld [vmem:[%s19514_s30 + $0x38] sm:$0xff]   ;;  %v18386_v13 = vld [vmem:[%s19514_s30 + $0x40] sm:$0xff]   ;;  %p19306_p11 = scmp.ne.s32.totalorder %s25451_s27, %s19305_s16 }
  0x25   : > { %v18387_v14 = vld [vmem:[%s19514_s30 + $0x48] sm:$0xff]   ;;  %v18388_v15 = vld [vmem:[%s19514_s30 + $0x50] sm:$0xff]   ;;  %v18389_v16 = vld [vmem:[%s19514_s30 + $0x58] sm:$0xff]   ;;  %10193 = vmatprep.subr.bf16.mxu0 %v25518_v35 }
  0x26   : > { %v18390_v17 = vld [vmem:[%s19514_s30 + $0x60] sm:$0xff]   ;;  %v18391_v18 = vld [vmem:[%s19514_s30 + $0x68] sm:$0xff]   ;;  %v18392_v19 = vld [vmem:[%s19514_s30 + $0x70] sm:$0xff]   ;;  %p19307_p12 = pnand %p19306_p11, %p19493_p5 }
  0x27   : > { %16791 = vmatmul.mubr.msk.bf16.vlgmr.msra.gmra.mrb[0].mxu0 %vm1200_vm2, %v18379_v6  ;;  %v18393_v20 = vld [vmem:[%s19514_s30 + $0x78] sm:$0xff]   ;;  %v18394_v21 = vld [vmem:[%s19514_s30 + $0x80] sm:$0xff]   ;;  %v18395_v22 = vld [vmem:[%s19514_s30 + $0x88] sm:$0xff]  }
  0x28   : > { %16794 = vmatprep.mubr.msk.bf16.mxu0 %vm1200_vm2, %v18380_v7  ;;  %v18396_v23 = vld [vmem:[%s19514_s30 + $0x90] sm:$0xff]   ;;  %v18397_v24 = vld [vmem:[%s19514_s30 + $0x98] sm:$0xff]   ;;  %v18398_v25 = vld [vmem:[%s19514_s30 + $0xa0] sm:$0xff]   ;;  %p19308_p13 = pneg %p19307_p12 }
  0x29   : > { %v18399_v26 = vld [vmem:[%s19514_s30 + $0xa8] sm:$0xff]   ;;  %v18400_v27 = vld [vmem:[%s19514_s30 + $0xb0] sm:$0xff]   ;;  %v18401_v28 = vld [vmem:[%s19514_s30 + $0xb8] sm:$0xff]  }
  0x2a   : > { %v18402_v29 = vld [vmem:[%s19514_s30 + $0xc0] sm:$0xff]   ;;  %v18403_v30 = vld [vmem:[%s19514_s30 + $0xc8] sm:$0xff]   ;;  %v18404_v31 = vld [vmem:[%s19514_s30 + $0xd0] sm:$0xff]  }
  0x2b   : > { %v18405_v32 = vld [vmem:[%s19514_s30 + $0xd8] sm:$0xff]   ;;  %v18406_v33 = vld [vmem:[%s19514_s30 + $0xe0] sm:$0xff]   ;;  %v18407_v34 = vld [vmem:[%s19514_s30 + $0xe8] sm:$0xff]  }
  0x2c   : > { %v18408_v36 = vld [vmem:[%s19514_s30 + $0xf0] sm:$0xff]   ;;  %v18409_v37 = vld [vmem:[%s19514_s30 + $0xf8] sm:$0xff]   ;;  %v18410_v38 = vld [vmem:[%s19514_s30 + $0x100] sm:$0xff]  }
  0x2d   : > { %v18411_v39 = vld [vmem:[%s19514_s30 + $0x108] sm:$0xff]   ;;  %v18412_v40 = vld [vmem:[%s19514_s30 + $0x110] sm:$0xff]   ;;  %v18413_v41 = vld [vmem:[%s19514_s30 + $0x118] sm:$0xff]  }
  0x2e   : > { %v18417_v43 = vld [vmem:[%s19514_s30 + $0x120] sm:$0xff]   ;;  %v18418_v44 = vld [vmem:[%s19514_s30 + $0x128] sm:$0xff]   ;;  %v18422_v45 = vld [vmem:[%s19514_s30 + $0x130] sm:$0xff]  }
  0x2f   : > { %16795 = vmatmul.mubr.msk.bf16.gmra.mrb[4].mxu0 %vm1200_vm2, %v18381_v8  ;;  %v18423_v46 = vld [vmem:[%s19514_s30 + $0x138] sm:$0xff]  }
  0x30   : > { %16798 = vmatprep.mubr.msk.bf16.mxu0 %vm1200_vm2, %v18382_v9 }
  0x37   : > { %16799 = vmatmul.mubr.msk.bf16.gmra.mrb[8].mxu0 %vm1200_vm2, %v18383_v10 }
  0x38   : > { %16802 = vmatprep.mubr.msk.bf16.mxu0 %vm1200_vm2, %v18384_v11 }
  0x3f   : > { %16803 = vmatmul.mubr.msk.bf16.gmra.mrb[12].mxu0 %vm1200_vm2, %v18385_v12 }
  0x40   : > { %16806 = vmatprep.mubr.msk.bf16.mxu0 %vm1200_vm2, %v18386_v13 }
  0x47   : > { %16807 = vmatmul.mubr.msk.bf16.gmra.mrb[16].mxu0 %vm1200_vm2, %v18387_v14 }
  0x48   : > { %16810 = vmatprep.mubr.msk.bf16.mxu0 %vm1200_vm2, %v18388_v15 }
  0x4f   : > { %16811 = vmatmul.mubr.msk.bf16.gmra.mrb[20].mxu0 %vm1200_vm2, %v18389_v16 }
  0x50   : > { %16814 = vmatprep.mubr.msk.bf16.mxu0 %vm1200_vm2, %v18390_v17 }
  0x57   : > { %16815 = vmatmul.mubr.msk.bf16.gmra.mrb[24].mxu0 %vm1200_vm2, %v18391_v18 }
  0x58   : > { %16818 = vmatprep.mubr.msk.bf16.mxu0 %vm1200_vm2, %v18392_v19 }
  0x5f   : > { %16819 = vmatmul.mubr.msk.bf16.gmra.mrb[28].mxu0 %vm1200_vm2, %v18393_v20 }
  0x60   : > { %16822 = vmatprep.mubr.msk.bf16.mxu0 %vm1200_vm2, %v18394_v21 }
  0x67   : > { %16823 = vmatmul.mubr.msk.bf16.gmra.mrb[32].mxu0 %vm1200_vm2, %v18395_v22 }
  0x68   : > { %16826 = vmatprep.mubr.msk.bf16.mxu0 %vm1200_vm2, %v18396_v23 }
  0x6f   : > { %16827 = vmatmul.mubr.msk.bf16.gmra.mrb[36].mxu0 %vm1200_vm2, %v18397_v24 }
  0x70   : > { %16830 = vmatprep.mubr.msk.bf16.mxu0 %vm1200_vm2, %v18398_v25 }
  0x77   : > { %16831 = vmatmul.mubr.msk.bf16.gmra.mrb[40].mxu0 %vm1200_vm2, %v18399_v26 }
  0x78   : > { %16834 = vmatprep.mubr.msk.bf16.mxu0 %vm1200_vm2, %v18400_v27 }
  0x7f   : > { %16835 = vmatmul.mubr.msk.bf16.gmra.mrb[44].mxu0 %vm1200_vm2, %v18401_v28 }
  0x80   : > { %16838 = vmatprep.mubr.msk.bf16.mxu0 %vm1200_vm2, %v18402_v29 }
  0x87   : > { %16839 = vmatmul.mubr.msk.bf16.gmra.mrb[48].mxu0 %vm1200_vm2, %v18403_v30 }
  0x88   : > { %16842 = vmatprep.mubr.msk.bf16.mxu0 %vm1200_vm2, %v18404_v31 }
  0x8f   : > { %16843 = vmatmul.mubr.msk.bf16.gmra.mrb[52].mxu0 %vm1200_vm2, %v18405_v32 }
  0x90   : > { %16846 = vmatprep.mubr.msk.bf16.mxu0 %vm1200_vm2, %v18406_v33 }
  0x97   : > { %16847 = vmatmul.mubr.msk.bf16.gmra.mrb[56].mxu0 %vm1200_vm2, %v18407_v34 }
  0x98   : > { %16850 = vmatprep.mubr.msk.bf16.mxu0 %vm1200_vm2, %v18408_v36 }
  0x9f   : > { %16851 = vmatmul.mubr.msk.bf16.gmra.mrb[60].mxu0 %vm1200_vm2, %v18409_v37 }
  0xa0   : > { %16854 = vmatprep.mubr.msk.bf16.mxu0 %vm1200_vm2, %v18410_v38 }
  0xa7   : > { %16855 = vmatmul.mubr.msk.bf16.gmra.mrb[64].mxu0 %vm1200_vm2, %v18411_v39 }
  0xa8   : > { %16858 = vmatprep.mubr.msk.bf16.mxu0 %vm1200_vm2, %v18412_v40 }
  0xaf   : > { %16859 = vmatmul.mubr.msk.bf16.gmra.mrb[68].mxu0 %vm1200_vm2, %v18413_v41 }
  0xb0   : > { %16862 = vmatprep.mubr.msk.bf16.mxu0 %vm1200_vm2, %v18417_v43 }
  0xb7   : > { %16863 = vmatmul.mubr.msk.bf16.gmra.mrb[72].mxu0 %vm1200_vm2, %v18418_v44 }
  0xb8   : > { %16866 = vmatprep.mubr.msk.bf16.mxu0 %vm1200_vm2, %v18422_v45 }
  0xbf   : > { %16867 = vmatmul.mubr.msk.bf16.gmra.mrb[76].mxu0 %vm1200_vm2, %v18423_v46 }
  0xfa   : > { %v16792_v47 = vpop.f32.mrb[0].mxu0 }
  0xfb   : > { %v1542_v48 = vpop.f32.mrb[1].mxu0 }
  0xfc   : > { %v16793_v49 = vpop.f32.mrb[2].mxu0 }
  0xfd   : > { %v1545_v50 = vpop.f32.mrb[3].mxu0 }
 0x102   : > { %v16796_v51 = vpop.f32.mrb[4].mxu0 }
 0x103   : > { %v1558_v52 = vpop.f32.mrb[5].mxu0  ;;  %v2342_v53 = vmax.f32 %v1545_v50, %v16796_v51 }
 0x104   : > { %v16797_v54 = vpop.f32.mrb[6].mxu0 }
 0x105   : > { %v1561_v55 = vpop.f32.mrb[7].mxu0  ;;  %v2343_v56 = vmax.f32 %v16792_v47, %v16797_v54  ;;  %v2733_v58 = vrot.slane %v2342_v53, 1 }
 0x106   : > { %v2341_v57 = vmax.f32 %v1542_v48, %v1561_v55 }
 0x107   : > { %v2735_v59 = vrot.slane %v2343_v56, 1 }
 0x108   : > { %v2732_v61 = vrot.slane %v2341_v57, 1 }
 0x109   : > { %v2736_v62 = vsel %vm2731_vm3, %v2733_v58, %v2735_v59 }
 0x10a   : > { %v16800_v63 = vpop.f32.mrb[8].mxu0  ;;  %v2734_v0 = vsel %vm2731_vm3, %v2732_v61, %v2733_v58  ;;  %v3317_v2 = vmax.f32 %v2342_v53, %v2736_v62 }
 0x10b   : > { %v1574_v3 = vpop.f32.mrb[9].mxu0  ;;  %v3316_v4 = vmax.f32 %v2341_v57, %v2734_v0  ;;  %v2346_v5 = vmax.f32 %v1561_v55, %v16800_v63 }
 0x10c   : > { %v16801_v6 = vpop.f32.mrb[10].mxu0  ;;  %v3519_v7 = vadd.f32 %v19604_v60, %v3317_v2  ;;  %v2344_v8 = vmax.f32 %v16793_v49, %v1574_v3 }
 0x10d   : > { %v2347_v9 = vmax.f32 %v16796_v51, %v16801_v6  ;;  %v1577_v10 = vpop.f32.mrb[11].mxu0  ;;  %v3518_v11 = vadd.f32 %v19604_v60, %v3316_v4  ;;  %v2741_v16 = vrot.slane %v2346_v5, 1 }
 0x10e   : > { %v2345_v12 = vmax.f32 %v1558_v52, %v1577_v10  ;;  %v3714_v13 = vmax.f32 %v3519_v7, 0.0  ;;  %v2737_v14 = vrot.slane %v2344_v8, 1 }
 0x10f   : > { %v3713_v15 = vmax.f32 %v3518_v11, 0.0  ;;  %v2743_v17 = vrot.slane %v2347_v9, 1 }
 0x110   : > { %v2738_v18 = vsel %vm2731_vm3, %v2735_v59, %v2737_v14  ;;  %v2739_v19 = vrot.slane %v2345_v12, 1 }
 0x111   : > { %v3908_v20 = vpack.c.bf16 %v3714_v13, %v3713_v15  ;;  %v3318_v21 = vmax.f32 %v2343_v56, %v2738_v18  ;;  %v2744_v22 = vsel %vm2731_vm3, %v2741_v16, %v2743_v17 }
 0x112   : > { %v16804_v23 = vpop.f32.mrb[12].mxu0  ;;  %v2740_v24 = vsel %vm2731_vm3, %v2737_v14, %v2739_v19  ;;  %v2742_v25 = vsel %vm2731_vm3, %v2739_v19, %v2741_v16  ;;  %v3321_v26 = vmax.f32 %v2346_v5, %v2744_v22 }
 0x113   : > { %v1590_v27 = vpop.f32.mrb[13].mxu0  ;;  %6529 = vmatpush1.bf16.msra.mxu1 %v3908_v20  ;;  %v3319_v28 = vmax.f32 %v2344_v8, %v2740_v24  ;;  %v3520_v29 = vadd.f32 %v19604_v60, %v3318_v21  ;;  %v3320_v30 = vmax.f32 %v2345_v12, %v2742_v25  ;;  %v2350_v31 = vmax.f32 %v1577_v10, %v16804_v23 }
 0x114   : > { %v19615_v32 = vpop.f32.mrb[14].mxu0  ;;  %6530 = vmatprep.subr.bf16.mxu1 %v25518_v35  ;;  %v3523_v33 = vadd.f32 %v19604_v60, %v3321_v26  ;;  %v2348_v34 = vmax.f32 %v16797_v54, %v1590_v27 }
 0x115   : > { %v2351_v36 = vmax.f32 %v16800_v63, %v19615_v32  ;;  %v1593_v37 = vpop.f32.mrb[15].mxu0  ;;  %v3521_v38 = vadd.f32 %v19604_v60, %v3319_v28  ;;  %v3522_v39 = vadd.f32 %v19604_v60, %v3320_v30  ;;  %v3715_v41 = vmax.f32 %v3520_v29, 0.0 }
 0x116   : > { %v2349_v40 = vmax.f32 %v1574_v3, %v1593_v37  ;;  %v3718_v42 = vmax.f32 %v3523_v33, 0.0  ;;  %v2745_v43 = vrot.slane %v2348_v34, 1  ;;  %v2749_v46 = vrot.slane %v2350_v31, 1 }
 0x117   : > { %v3716_v44 = vmax.f32 %v3521_v38, 0.0  ;;  %v3717_v45 = vmax.f32 %v3522_v39, 0.0  ;;  %v2751_v47 = vrot.slane %v2351_v36, 1 }
 0x118   : > { %v2746_v48 = vsel %vm2731_vm3, %v2743_v17, %v2745_v43  ;;  %v2747_v49 = vrot.slane %v2349_v40, 1 }
 0x119   : > { %v3909_v50 = vpack.c.bf16 %v3716_v44, %v3715_v41  ;;  %v3910_v51 = vpack.c.bf16 %v3718_v42, %v3717_v45  ;;  %v3322_v52 = vmax.f32 %v2347_v9, %v2746_v48  ;;  %v2752_v53 = vsel %vm2731_vm3, %v2749_v46, %v2751_v47 }
 0x11a   : > { %v16808_v54 = vpop.f32.mrb[16].mxu0  ;;  %v2748_v55 = vsel %vm2731_vm3, %v2745_v43, %v2747_v49  ;;  %v2750_v56 = vsel %vm2731_vm3, %v2747_v49, %v2749_v46  ;;  %v3325_v57 = vmax.f32 %v2350_v31, %v2752_v53 }
 0x11b   : > { %v1606_v58 = vpop.f32.mrb[17].mxu0  ;;  %6531 = vmatpush1.bf16.msra.mxu1 %v3909_v50  ;;  %v3323_v59 = vmax.f32 %v2348_v34, %v2748_v55  ;;  %v3524_v61 = vadd.f32 %v19604_v60, %v3322_v52  ;;  %v3324_v62 = vmax.f32 %v2349_v40, %v2750_v56  ;;  %v2354_v63 = vmax.f32 %v1593_v37, %v16808_v54 }
 0x11c   : > { %v19627_v0 = vpop.f32.mrb[18].mxu0  ;;  %6532 = vmatprep.subr.bf16.mxu1 %v25518_v35  ;;  %v3527_v2 = vadd.f32 %v19604_v60, %v3325_v57  ;;  %v2352_v3 = vmax.f32 %v16801_v6, %v1606_v58 }
 0x11d   : > { %v2355_v4 = vmax.f32 %v16804_v23, %v19627_v0  ;;  %v1609_v5 = vpop.f32.mrb[19].mxu0  ;;  %v3525_v7 = vadd.f32 %v19604_v60, %v3323_v59  ;;  %v3526_v8 = vadd.f32 %v19604_v60, %v3324_v62  ;;  %v3719_v10 = vmax.f32 %v3524_v61, 0.0 }
 0x11e   : > { %v2353_v9 = vmax.f32 %v1590_v27, %v1609_v5  ;;  %v3722_v11 = vmax.f32 %v3527_v2, 0.0  ;;  %v2753_v12 = vrot.slane %v2352_v3, 1  ;;  %v2757_v15 = vrot.slane %v2354_v63, 1 }
 0x11f   : > { %6533 = vmatpush1.bf16.msra.mxu1 %v3910_v51  ;;  %v3720_v13 = vmax.f32 %v3525_v7, 0.0  ;;  %v3721_v14 = vmax.f32 %v3526_v8, 0.0  ;;  %v2759_v16 = vrot.slane %v2355_v4, 1 }
 0x120   : > { %6534 = vmatprep.subr.bf16.mxu1 %v25518_v35  ;;  %v2754_v6 = vsel %vm2731_vm3, %v2751_v47, %v2753_v12  ;;  %v2755_v17 = vrot.slane %v2353_v9, 1 }
 0x121   : > { %v3911_v18 = vpack.c.bf16 %v3720_v13, %v3719_v10  ;;  %v3912_v19 = vpack.c.bf16 %v3722_v11, %v3721_v14  ;;  %v3326_v20 = vmax.f32 %v2351_v36, %v2754_v6  ;;  %v2760_v21 = vsel %vm2731_vm3, %v2757_v15, %v2759_v16 }
 0x122   : > { %v16812_v22 = vpop.f32.mrb[20].mxu0  ;;  %v2756_v23 = vsel %vm2731_vm3, %v2753_v12, %v2755_v17  ;;  %v2758_v24 = vsel %vm2731_vm3, %v2755_v17, %v2757_v15  ;;  %v3329_v25 = vmax.f32 %v2354_v63, %v2760_v21 }
 0x123   : > { %v1622_v26 = vpop.f32.mrb[21].mxu0  ;;  %6535 = vmatpush1.bf16.msra.mxu1 %v3911_v18  ;;  %v3327_v27 = vmax.f32 %v2352_v3, %v2756_v23  ;;  %v3528_v28 = vadd.f32 %v19604_v60, %v3326_v20  ;;  %v3328_v29 = vmax.f32 %v2353_v9, %v2758_v24  ;;  %v2358_v30 = vmax.f32 %v1609_v5, %v16812_v22 }
 0x124   : > { %v19640_v31 = vpop.f32.mrb[22].mxu0  ;;  %6536 = vmatprep.subr.bf16.mxu1 %v25518_v35  ;;  %v3531_v33 = vadd.f32 %v19604_v60, %v3329_v25  ;;  %v2356_v34 = vmax.f32 %v19615_v32, %v1622_v26 }
 0x125   : > { %v2359_v36 = vmax.f32 %v16808_v54, %v19640_v31  ;;  %v1625_v37 = vpop.f32.mrb[23].mxu0  ;;  %v3529_v38 = vadd.f32 %v19604_v60, %v3327_v27  ;;  %v3530_v39 = vadd.f32 %v19604_v60, %v3328_v29  ;;  %v3723_v41 = vmax.f32 %v3528_v28, 0.0 }
 0x126   : > { %v2357_v40 = vmax.f32 %v1606_v58, %v1625_v37  ;;  %v3726_v42 = vmax.f32 %v3531_v33, 0.0  ;;  %v2761_v43 = vrot.slane %v2356_v34, 1  ;;  %v2765_v46 = vrot.slane %v2358_v30, 1 }
 0x127   : > { %6537 = vmatpush1.bf16.msra.mxu1 %v3912_v19  ;;  %v3724_v44 = vmax.f32 %v3529_v38, 0.0  ;;  %v3725_v45 = vmax.f32 %v3530_v39, 0.0  ;;  %v2767_v47 = vrot.slane %v2359_v36, 1 }
 0x128   : > { %6538 = vmatprep.subr.bf16.mxu1 %v25518_v35  ;;  %v2762_v32 = vsel %vm2731_vm3, %v2759_v16, %v2761_v43  ;;  %v2763_v48 = vrot.slane %v2357_v40, 1 }
 0x129   : > { %v3913_v49 = vpack.c.bf16 %v3724_v44, %v3723_v41  ;;  %v3914_v50 = vpack.c.bf16 %v3726_v42, %v3725_v45  ;;  %v3330_v51 = vmax.f32 %v2355_v4, %v2762_v32  ;;  %v2768_v52 = vsel %vm2731_vm3, %v2765_v46, %v2767_v47 }
 0x12a   : > { %v16816_v53 = vpop.f32.mrb[24].mxu0  ;;  %v2764_v54 = vsel %vm2731_vm3, %v2761_v43, %v2763_v48  ;;  %v2766_v55 = vsel %vm2731_vm3, %v2763_v48, %v2765_v46  ;;  %v3333_v56 = vmax.f32 %v2358_v30, %v2768_v52 }
 0x12b   : > { %v1638_v57 = vpop.f32.mrb[25].mxu0  ;;  %6539 = vmatpush1.bf16.msra.mxu1 %v3913_v49  ;;  %v3331_v58 = vmax.f32 %v2356_v34, %v2764_v54  ;;  %v3532_v59 = vadd.f32 %v19604_v60, %v3330_v51  ;;  %v3332_v61 = vmax.f32 %v2357_v40, %v2766_v55  ;;  %v2362_v62 = vmax.f32 %v1625_v37, %v16816_v53 }
 0x12c   : > { %v19654_v63 = vpop.f32.mrb[26].mxu0  ;;  %6540 = vmatprep.subr.bf16.mxu1 %v25518_v35  ;;  %v3535_v2 = vadd.f32 %v19604_v60, %v3333_v56  ;;  %v2360_v3 = vmax.f32 %v19627_v0, %v1638_v57 }
 0x12d   : > { %v2363_v4 = vmax.f32 %v16812_v22, %v19654_v63  ;;  %v1641_v5 = vpop.f32.mrb[27].mxu0  ;;  %v3533_v7 = vadd.f32 %v19604_v60, %v3331_v58  ;;  %v3534_v8 = vadd.f32 %v19604_v60, %v3332_v61  ;;  %v3727_v10 = vmax.f32 %v3532_v59, 0.0 }
 0x12e   : > { %v2361_v9 = vmax.f32 %v1622_v26, %v1641_v5  ;;  %v3730_v11 = vmax.f32 %v3535_v2, 0.0  ;;  %v2769_v12 = vrot.slane %v2360_v3, 1  ;;  %v2773_v15 = vrot.slane %v2362_v62, 1 }
 0x12f   : > { %6541 = vmatpush1.bf16.msra.mxu1 %v3914_v50  ;;  %v3728_v13 = vmax.f32 %v3533_v7, 0.0  ;;  %v3729_v14 = vmax.f32 %v3534_v8, 0.0  ;;  %v2775_v16 = vrot.slane %v2363_v4, 1 }
 0x130   : > { %6542 = vmatprep.subr.bf16.mxu1 %v25518_v35  ;;  %v2770_v0 = vsel %vm2731_vm3, %v2767_v47, %v2769_v12  ;;  %v2771_v6 = vrot.slane %v2361_v9, 1 }
 0x131   : > { %v3915_v17 = vpack.c.bf16 %v3728_v13, %v3727_v10  ;;  %v3916_v18 = vpack.c.bf16 %v3730_v11, %v3729_v14  ;;  %v3334_v19 = vmax.f32 %v2359_v36, %v2770_v0  ;;  %v2776_v20 = vsel %vm2731_vm3, %v2773_v15, %v2775_v16  ;;  %v18460_v13 = vld [vmem:[%s19514_s30 + $0x140] sm:$0xff]   ;;  %v18461_v14 = vld [vmem:[%s19514_s30 + $0x148] sm:$0xff]  }
 0x132   : > { %v16820_v21 = vpop.f32.mrb[28].mxu0  ;;  %v2772_v22 = vsel %vm2731_vm3, %v2769_v12, %v2771_v6  ;;  %v2774_v23 = vsel %vm2731_vm3, %v2771_v6, %v2773_v15  ;;  %v3337_v24 = vmax.f32 %v2362_v62, %v2776_v20  ;;  %16870 = vmatprep.mubr.msk.bf16.mxu0 %vm1200_vm2, %v18460_v13 }
 0x133   : > { %v1654_v25 = vpop.f32.mrb[29].mxu0  ;;  %6543 = vmatpush1.bf16.msra.mxu1 %v3915_v17  ;;  %v3335_v26 = vmax.f32 %v2360_v3, %v2772_v22  ;;  %v3536_v27 = vadd.f32 %v19604_v60, %v3334_v19  ;;  %v3336_v28 = vmax.f32 %v2361_v9, %v2774_v23  ;;  %v2366_v29 = vmax.f32 %v1641_v5, %v16820_v21 }
 0x134   : > { %v19668_v30 = vpop.f32.mrb[30].mxu0  ;;  %6544 = vmatprep.subr.bf16.mxu1 %v25518_v35  ;;  %v3539_v33 = vadd.f32 %v19604_v60, %v3337_v24  ;;  %v2364_v34 = vmax.f32 %v19640_v31, %v1654_v25  ;;  %16871 = vmatmul.mubr.msk.bf16.gmra.mrb[80].mxu0 %vm1200_vm2, %v18461_v14 }
 0x135   : > { %v19674_v36 = vmax.f32 %v16816_v53, %v19668_v30  ;;  %v1657_v37 = vpop.f32.mrb[31].mxu0  ;;  %v3537_v38 = vadd.f32 %v19604_v60, %v3335_v26  ;;  %v3538_v39 = vadd.f32 %v19604_v60, %v3336_v28  ;;  %v3731_v41 = vmax.f32 %v3536_v27, 0.0 }
 0x136   : > { %v2365_v40 = vmax.f32 %v1638_v57, %v1657_v37  ;;  %v3734_v42 = vmax.f32 %v3539_v33, 0.0  ;;  %v2777_v43 = vrot.slane %v2364_v34, 1  ;;  %v2781_v46 = vrot.slane %v2366_v29, 1 }
 0x137   : > { %6545 = vmatpush1.bf16.msra.mxu1 %v3916_v18  ;;  %v3732_v44 = vmax.f32 %v3537_v38, 0.0  ;;  %v3733_v45 = vmax.f32 %v3538_v39, 0.0  ;;  %v2783_v47 = vrot.slane %v19674_v36, 1 }
 0x138   : > { %6546 = vmatprep.subr.bf16.mxu1 %v25518_v35  ;;  %v2778_v31 = vsel %vm2731_vm3, %v2775_v16, %v2777_v43  ;;  %v2779_v32 = vrot.slane %v2365_v40, 1 }
 0x139   : > { %v3917_v48 = vpack.c.bf16 %v3732_v44, %v3731_v41  ;;  %v3918_v49 = vpack.c.bf16 %v3734_v42, %v3733_v45  ;;  %v3338_v50 = vmax.f32 %v2363_v4, %v2778_v31  ;;  %v2784_v51 = vsel %vm2731_vm3, %v2781_v46, %v2783_v47 }
 0x13a   : > { %v16824_v52 = vpop.f32.mrb[32].mxu0  ;;  %v2780_v53 = vsel %vm2731_vm3, %v2777_v43, %v2779_v32  ;;  %v2782_v54 = vsel %vm2731_vm3, %v2779_v32, %v2781_v46  ;;  %v3341_v55 = vmax.f32 %v2366_v29, %v2784_v51 }
 0x13b   : > { %v1670_v56 = vpop.f32.mrb[33].mxu0  ;;  %6547 = vmatpush1.bf16.msra.mxu1 %v3917_v48  ;;  %v3339_v57 = vmax.f32 %v2364_v34, %v2780_v53  ;;  %v3540_v58 = vadd.f32 %v19604_v60, %v3338_v50  ;;  %v3340_v59 = vmax.f32 %v2365_v40, %v2782_v54  ;;  %v2370_v61 = vmax.f32 %v1657_v37, %v16824_v52 }
 0x13c   : > { %v19685_v62 = vpop.f32.mrb[34].mxu0  ;;  %6548 = vmatprep.subr.bf16.mxu1 %v25518_v35  ;;  %v3543_v2 = vadd.f32 %v19604_v60, %v3341_v55  ;;  %v2368_v3 = vmax.f32 %v19654_v63, %v1670_v56 }
 0x13d   : > { %v19691_v4 = vmax.f32 %v16820_v21, %v19685_v62  ;;  %v1673_v5 = vpop.f32.mrb[35].mxu0  ;;  %v3541_v7 = vadd.f32 %v19604_v60, %v3339_v57  ;;  %v3542_v8 = vadd.f32 %v19604_v60, %v3340_v59  ;;  %v3735_v10 = vmax.f32 %v3540_v58, 0.0 }
 0x13e   : > { %v2369_v9 = vmax.f32 %v1654_v25, %v1673_v5  ;;  %v3738_v11 = vmax.f32 %v3543_v2, 0.0  ;;  %v2785_v12 = vrot.slane %v2368_v3, 1  ;;  %v2789_v0 = vrot.slane %v2370_v61, 1 }
 0x13f   : > { %6549 = vmatpush1.bf16.msra.mxu1 %v3918_v49  ;;  %v3736_v15 = vmax.f32 %v3541_v7, 0.0  ;;  %v3737_v16 = vmax.f32 %v3542_v8, 0.0  ;;  %v2791_v63 = vrot.slane %v19691_v4, 1 }
 0x140   : > { %6550 = vmatprep.subr.bf16.mxu1 %v25518_v35  ;;  %v2786_v6 = vsel %vm2731_vm3, %v2783_v47, %v2785_v12  ;;  %v2787_v17 = vrot.slane %v2369_v9, 1 }
 0x141   : > { %v3919_v18 = vpack.c.bf16 %v3736_v15, %v3735_v10  ;;  %v3920_v19 = vpack.c.bf16 %v3738_v11, %v3737_v16  ;;  %v3342_v20 = vmax.f32 %v19674_v36, %v2786_v6  ;;  %v2792_v21 = vsel %vm2731_vm3, %v2789_v0, %v2791_v63 }
 0x142   : > { %v16828_v22 = vpop.f32.mrb[36].mxu0  ;;  %v2788_v23 = vsel %vm2731_vm3, %v2785_v12, %v2787_v17  ;;  %v2790_v24 = vsel %vm2731_vm3, %v2787_v17, %v2789_v0  ;;  %v3345_v25 = vmax.f32 %v2370_v61, %v2792_v21  ;;  %v18419_v21 = vld [vmem:[%s25494_s3 + $0x6c] ss:$52 sps:$4 sm:$0xff]  }
 0x143   : > { %v1686_v26 = vpop.f32.mrb[37].mxu0  ;;  %6551 = vmatpush1.bf16.msra.mxu1 %v3919_v18  ;;  %v3343_v27 = vmax.f32 %v2368_v3, %v2788_v23  ;;  %v3544_v28 = vadd.f32 %v19604_v60, %v3342_v20  ;;  %v3344_v29 = vmax.f32 %v2369_v9, %v2790_v24  ;;  %v2374_v33 = vmax.f32 %v1673_v5, %v16828_v22 }
 0x144   : > { %v19707_v34 = vpop.f32.mrb[38].mxu0  ;;  %6552 = vmatprep.subr.bf16.mxu1 %v25518_v35  ;;  %v3547_v36 = vadd.f32 %v19604_v60, %v3345_v25  ;;  %v2372_v37 = vmax.f32 %v19668_v30, %v1686_v26 }
 0x145   : > { %v19713_v38 = vmax.f32 %v16824_v52, %v19707_v34  ;;  %v1689_v39 = vpop.f32.mrb[39].mxu0  ;;  %v3545_v40 = vadd.f32 %v19604_v60, %v3343_v27  ;;  %v3546_v41 = vadd.f32 %v19604_v60, %v3344_v29  ;;  %v3739_v43 = vmax.f32 %v3544_v28, 0.0 }
 0x146   : > { %v2373_v42 = vmax.f32 %v1670_v56, %v1689_v39  ;;  %v3742_v44 = vmax.f32 %v3547_v36, 0.0  ;;  %v2793_v45 = vrot.slane %v2372_v37, 1  ;;  %v2797_v31 = vrot.slane %v2374_v33, 1 }
 0x147   : > { %6553 = vmatpush1.bf16.msra.mxu1 %v3920_v19  ;;  %v3740_v46 = vmax.f32 %v3545_v40, 0.0  ;;  %v3741_v47 = vmax.f32 %v3546_v41, 0.0  ;;  %v2799_v32 = vrot.slane %v19713_v38, 1 }
 0x148   : > { %6554 = vmatprep.subr.bf16.mxu1 %v25518_v35  ;;  %v2794_v30 = vsel %vm2731_vm3, %v2791_v63, %v2793_v45  ;;  %v2795_v48 = vrot.slane %v2373_v42, 1 }
 0x149   : > { %v3921_v49 = vpack.c.bf16 %v3740_v46, %v3739_v43  ;;  %v3922_v50 = vpack.c.bf16 %v3742_v44, %v3741_v47  ;;  %v3346_v51 = vmax.f32 %v19691_v4, %v2794_v30  ;;  %v2800_v52 = vsel %vm2731_vm3, %v2797_v31, %v2799_v32 }
 0x14a   : > { %v16832_v53 = vpop.f32.mrb[40].mxu0  ;;  %v2796_v54 = vsel %vm2731_vm3, %v2793_v45, %v2795_v48  ;;  %v2798_v55 = vsel %vm2731_vm3, %v2795_v48, %v2797_v31  ;;  %v3349_v56 = vmax.f32 %v2374_v33, %v2800_v52  ;;  %v18421_v48 = vld [vmem:[%s25494_s3 + $0x68] ss:$52 sps:$4 sm:$0xff]  }
 0x14b   : > { %v1702_v57 = vpop.f32.mrb[41].mxu0  ;;  %6555 = vmatpush1.bf16.msra.mxu1 %v3921_v49  ;;  %v3347_v58 = vmax.f32 %v2372_v37, %v2796_v54  ;;  %v3548_v59 = vadd.f32 %v19604_v60, %v3346_v51  ;;  %v3348_v61 = vmax.f32 %v2373_v42, %v2798_v55  ;;  %v2378_v2 = vmax.f32 %v1689_v39, %v16832_v53 }
 0x14c   : > { %v19725_v3 = vpop.f32.mrb[42].mxu0  ;;  %6556 = vmatprep.subr.bf16.mxu1 %v25518_v35  ;;  %v3551_v4 = vadd.f32 %v19604_v60, %v3349_v56  ;;  %v2376_v5 = vmax.f32 %v19685_v62, %v1702_v57  ;;  %v18414_v62 = vld [vmem:[%s25494_s3] ss:$52 sps:$4 sm:$0xff]  }
 0x14d   : > { %v19731_v7 = vmax.f32 %v16828_v22, %v19725_v3  ;;  %v1705_v8 = vpop.f32.mrb[43].mxu0  ;;  %v3549_v9 = vadd.f32 %v19604_v60, %v3347_v58  ;;  %v3550_v10 = vadd.f32 %v19604_v60, %v3348_v61  ;;  %v3743_v12 = vmax.f32 %v3548_v59, 0.0  ;;  %v19775_v61 = vld [vmem:[%s25493_s2] ss:$0 sm:$0xff] }
 0x14e   : > { %v2377_v11 = vmax.f32 %v1686_v26, %v1705_v8  ;;  %v3746_v13 = vmax.f32 %v3551_v4, 0.0  ;;  %v2801_v14 = vrot.slane %v2376_v5, 1  ;;  %v2805_v0 = vrot.slane %v2378_v2, 1 }
 0x14f   : > { %6557 = vmatpush1.bf16.msra.mxu1 %v3922_v50  ;;  %v3744_v15 = vmax.f32 %v3549_v9, 0.0  ;;  %v3745_v16 = vmax.f32 %v3550_v10, 0.0  ;;  %v2807_v63 = vrot.slane %v19731_v7, 1 }
 0x150   : > { %6558 = vmatprep.subr.bf16.mxu1 %v25518_v35  ;;  %v2802_v6 = vsel %vm2731_vm3, %v2799_v32, %v2801_v14  ;;  %v2803_v17 = vrot.slane %v2377_v11, 1 }
 0x151   : > { %v3923_v18 = vpack.c.bf16 %v3744_v15, %v3743_v12  ;;  %v3924_v19 = vpack.c.bf16 %v3746_v13, %v3745_v16  ;;  %v3350_v20 = vmax.f32 %v19713_v38, %v2802_v6  ;;  %v2808_v22 = vsel %vm2731_vm3, %v2805_v0, %v2807_v63  ;;  %v18475_v6 = vld [vmem:[%s19514_s30 + $0x158] sm:$0xff]  }
 0x152   : > { %v16836_v23 = vpop.f32.mrb[44].mxu0  ;;  %v2804_v24 = vsel %vm2731_vm3, %v2801_v14, %v2803_v17  ;;  %v2806_v25 = vsel %vm2731_vm3, %v2803_v17, %v2805_v0  ;;  %v3353_v26 = vmax.f32 %v2378_v2, %v2808_v22 }
 0x153   : > { %v1718_v27 = vpop.f32.mrb[45].mxu0  ;;  %6559 = vmatpush1.bf16.msra.mxu1 %v3923_v18  ;;  %v3351_v28 = vmax.f32 %v2376_v5, %v2804_v24  ;;  %v3552_v29 = vadd.f32 %v19604_v60, %v3350_v20  ;;  %v3352_v33 = vmax.f32 %v2377_v11, %v2806_v25  ;;  %v2382_v36 = vmax.f32 %v1705_v8, %v16836_v23  ;;  %v18426_v20 = vld [vmem:[%s25494_s3 + $0xd0] ss:$52 sps:$4 sm:$0xff]  }
 0x154   : > { %v19749_v37 = vpop.f32.mrb[46].mxu0  ;;  %6808 = vmatprep.subr.bf16.mxu1 %v25518_v35  ;;  %v3555_v38 = vadd.f32 %v19604_v60, %v3353_v26  ;;  %v2380_v39 = vmax.f32 %v19707_v34, %v1718_v27  ;;  %v18427_v24 = vld [vmem:[%s25494_s3 + $0x13c] ss:$52 sps:$4 sm:$0xff]  }
 0x155   : > { %v19755_v40 = vmax.f32 %v16832_v53, %v19749_v37  ;;  %v1721_v41 = vpop.f32.mrb[47].mxu0  ;;  %v3553_v42 = vadd.f32 %v19604_v60, %v3351_v28  ;;  %v3554_v43 = vadd.f32 %v19604_v60, %v3352_v33  ;;  %v2813_v47 = vrot.slane %v2382_v36, 1  ;;  %v18424_v53 = vld [vmem:[%s25494_s3 + $0xd4] ss:$52 sps:$4 sm:$0xff]  }
 0x156   : > { %v2381_v44 = vmax.f32 %v1702_v57, %v1721_v41  ;;  %6561 = vmatmul.mubr.bf16.vlgmr.msra.gmra.mrb[0].mxu1 %v18414_v62  ;;  %v3750_v45 = vmax.f32 %v3555_v38, 0.0  ;;  %v2809_v46 = vrot.slane %v2380_v39, 1  ;;  %v3747_v31 = vmax.f32 %v3552_v29, 0.0  ;;  %v18474_v62 = vld [vmem:[%s19514_s30 + $0x150] sm:$0xff]  }
 0x157   : > { %6809 = vmatpush1.bf16.msra.mxu1 %v3924_v19  ;;  %v3748_v32 = vmax.f32 %v3553_v42, 0.0  ;;  %6568 = vmatprep.mubr.bf16.mxu1 %v18419_v21  ;;  %v3749_v30 = vmax.f32 %v3554_v43, 0.0  ;;  %v2815_v34 = vrot.slane %v19755_v40, 1 }
 0x158   : > { %6810 = vmatprep.subr.bf16.mxu1 %v25518_v35  ;;  %v2810_v60 = vsel %vm2731_vm3, %v2807_v63, %v2809_v46  ;;  %v2811_v49 = vrot.slane %v2381_v44, 1  ;;  %16874 = vmatprep.mubr.msk.bf16.mxu0 %vm1200_vm2, %v18474_v62 }
 0x159   : > { %v3925_v50 = vpack.c.bf16 %v3748_v32, %v3747_v31  ;;  %v3926_v51 = vpack.c.bf16 %v3750_v45, %v3749_v30  ;;  %v3354_v52 = vmax.f32 %v19731_v7, %v2810_v60  ;;  %v2816_v54 = vsel %vm2731_vm3, %v2813_v47, %v2815_v34  ;;  %16875 = vmatmul.mubr.msk.bf16.gmra.mrb[84].mxu0 %vm1200_vm2, %v18475_v6 }
 0x15a   : > { %v2812_v55 = vsel %vm2731_vm3, %v2809_v46, %v2811_v49  ;;  %v16840_v56 = vpop.f32.mrb[48].mxu0  ;;  %v2814_v57 = vsel %vm2731_vm3, %v2811_v49, %v2813_v47  ;;  %v3357_v58 = vmax.f32 %v2382_v36, %v2816_v54 }
 0x15b   : > { %6811 = vmatpush1.bf16.msra.mxu1 %v3925_v50  ;;  %v3355_v59 = vmax.f32 %v2380_v39, %v2812_v55  ;;  %v3556_v2 = vadd.f32 %v19775_v61, %v3354_v52  ;;  %v1734_v4 = vpop.f32.mrb[49].mxu0  ;;  %v3356_v5 = vmax.f32 %v2381_v44, %v2814_v57  ;;  %v2386_v7 = vmax.f32 %v1721_v41, %v16840_v56  ;;  %v18430_v55 = vld [vmem:[%s25494_s3 + $0x1a4] ss:$52 sps:$4 sm:$0xff]  }
 0x15c   : > { %6812 = vmatprep.subr.bf16.mxu1 %v25518_v35  ;;  %v19779_v8 = vpop.f32.mrb[50].mxu0  ;;  %v3559_v9 = vadd.f32 %v19775_v61, %v3357_v58  ;;  %v2384_v10 = vmax.f32 %v19725_v3, %v1734_v4 }
 0x15d   : > { %v3557_v11 = vadd.f32 %v19775_v61, %v3355_v59  ;;  %v19785_v12 = vmax.f32 %v16836_v23, %v19779_v8  ;;  %v1737_v13 = vpop.f32.mrb[51].mxu0  ;;  %v3558_v14 = vadd.f32 %v19775_v61, %v3356_v5  ;;  %v2821_v63 = vrot.slane %v2386_v7, 1 }
 0x15e   : > { %6569 = vmatmul.mubr.bf16.gmra.mrb[4].mxu1 %v18421_v48  ;;  %v2385_v15 = vmax.f32 %v1718_v27, %v1737_v13  ;;  %v3754_v16 = vmax.f32 %v3559_v9, 0.0  ;;  %v2817_v0 = vrot.slane %v2384_v10, 1  ;;  %v3751_v17 = vmax.f32 %v3556_v2, 0.0 }
 0x15f   : > { %6813 = vmatpush1.bf16.msra.mxu1 %v3926_v51  ;;  %v3752_v18 = vmax.f32 %v3557_v11, 0.0  ;;  %6576 = vmatprep.mubr.bf16.mxu1 %v18424_v53  ;;  %v3753_v3 = vmax.f32 %v3558_v14, 0.0  ;;  %v2823_v19 = vrot.slane %v19785_v12, 1  ;;  %v18429_v51 = vld [vmem:[%s25494_s3 + $0x138] ss:$52 sps:$4 sm:$0xff]  }
 0x160   : > { %6814 = vmatprep.subr.bf16.mxu1 %v25518_v35  ;;  %v2818_v21 = vsel %vm2731_vm3, %v2815_v34, %v2817_v0  ;;  %v2819_v22 = vrot.slane %v2385_v15, 1 }
 0x161   : > { %v3927_v23 = vpack.c.bf16 %v3752_v18, %v3751_v17  ;;  %v3928_v25 = vpack.c.bf16 %v3754_v16, %v3753_v3  ;;  %v3358_v26 = vmax.f32 %v19755_v40, %v2818_v21  ;;  %v2824_v27 = vsel %vm2731_vm3, %v2821_v63, %v2823_v19 }
 0x162   : > { %v2820_v28 = vsel %vm2731_vm3, %v2817_v0, %v2819_v22  ;;  %v16844_v29 = vpop.f32.mrb[52].mxu0  ;;  %v2822_v33 = vsel %vm2731_vm3, %v2819_v22, %v2821_v63  ;;  %v3361_v36 = vmax.f32 %v2386_v7, %v2824_v27  ;;  %v18432_v22 = vld [vmem:[%s25494_s3 + $0x1a0] ss:$52 sps:$4 sm:$0xff]  }
 0x163   : > { %6815 = vmatpush1.bf16.msra.mxu1 %v3927_v23  ;;  %v3359_v38 = vmax.f32 %v2384_v10, %v2820_v28  ;;  %v3560_v39 = vadd.f32 %v19775_v61, %v3358_v26  ;;  %v2390_v41 = vmax.f32 %v1737_v13, %v16844_v29  ;;  %v1750_v42 = vpop.f32.mrb[53].mxu0  ;;  %v3360_v43 = vmax.f32 %v2385_v15, %v2822_v33  ;;  %v18433_v26 = vld [vmem:[%s25494_s3 + $0x20c] ss:$52 sps:$4 sm:$0xff]  }
 0x164   : > { %6816 = vmatprep.subr.bf16.mxu1 %v25518_v35  ;;  %v2388_v40 = vmax.f32 %v19749_v37, %v1750_v42  ;;  %v19808_v44 = vpop.f32.mrb[54].mxu0  ;;  %v3563_v45 = vadd.f32 %v19775_v61, %v3361_v36 }
 0x165   : > { %v3561_v46 = vadd.f32 %v19775_v61, %v3359_v38  ;;  %v3755_v47 = vmax.f32 %v3560_v39, 0.0  ;;  %v2829_v31 = vrot.slane %v2390_v41, 1  ;;  %v19813_v32 = vmax.f32 %v16840_v56, %v19808_v44  ;;  %v1753_v30 = vpop.f32.mrb[55].mxu0 }
 0x166   : > { %6577 = vmatmul.mubr.bf16.gmra.mrb[8].mxu1 %v18426_v20  ;;  %v2825_v34 = vrot.slane %v2388_v40, 1  ;;  %v2389_v48 = vmax.f32 %v1734_v4, %v1753_v30  ;;  %v3562_v60 = vadd.f32 %v19775_v61, %v3360_v43  ;;  %v3758_v49 = vmax.f32 %v3563_v45, 0.0 }
 0x167   : > { %6584 = vmatprep.mubr.bf16.mxu1 %v18427_v24  ;;  %6817 = vmatpush1.bf16.msra.mxu1 %v3928_v25  ;;  %v3756_v37 = vmax.f32 %v3561_v46, 0.0  ;;  %v2831_v50 = vrot.slane %v19813_v32, 1  ;;  %v18435_v46 = vld [vmem:[%s25494_s3 + $0x208] ss:$52 sps:$4 sm:$0xff]  }
 0x168   : > { %6818 = vmatprep.subr.bf16.mxu1 %v25518_v35  ;;  %v2826_v52 = vsel %vm2731_vm3, %v2823_v19, %v2825_v34  ;;  %v2827_v53 = vrot.slane %v2389_v48, 1  ;;  %v3757_v54 = vmax.f32 %v3562_v60, 0.0 }
 0x169   : > { %v3929_v56 = vpack.c.bf16 %v3756_v37, %v3755_v47  ;;  %v2832_v57 = vsel %vm2731_vm3, %v2829_v31, %v2831_v50  ;;  %v3362_v58 = vmax.f32 %v19785_v12, %v2826_v52  ;;  %v18436_v47 = vld [vmem:[%s25494_s3 + $0x274] ss:$52 sps:$4 sm:$0xff]   ;;  %v18439_v37 = vld [vmem:[%s25494_s3 + $0x2dc] ss:$52 sps:$4 sm:$0xff]  }
 0x16a   : > { %v2828_v59 = vsel %vm2731_vm3, %v2825_v34, %v2827_v53  ;;  %v2830_v2 = vsel %vm2731_vm3, %v2827_v53, %v2829_v31  ;;  %v3930_v4 = vpack.c.bf16 %v3758_v49, %v3757_v54  ;;  %v19829_v5 = vpop.f32.mrb[56].mxu0  ;;  %v3365_v7 = vmax.f32 %v2390_v41, %v2832_v57 }
 0x16b   : > { %6819 = vmatpush1.bf16.msra.mxu1 %v3929_v56  ;;  %v3364_v9 = vmax.f32 %v2389_v48, %v2830_v2  ;;  %v3363_v10 = vmax.f32 %v2388_v40, %v2828_v59  ;;  %v3564_v11 = vadd.f32 %v19775_v61, %v3362_v58  ;;  %v19833_v13 = vmax.f32 %v1753_v30, %v19829_v5  ;;  %v19835_v14 = vpop.f32.mrb[57].mxu0  ;;  %v18489_v30 = vld [vmem:[%s19514_s30 + $0x168] sm:$0xff]   ;;  %v18438_v48 = vld [vmem:[%s25494_s3 + $0x270] ss:$52 sps:$4 sm:$0xff]  }
 0x16c   : > { %6820 = vmatprep.subr.bf16.mxu1 %v25518_v35  ;;  %v2392_v12 = vmax.f32 %v19779_v8, %v19835_v14  ;;  %v19840_v15 = vpop.f32.mrb[58].mxu0  ;;  %v3567_v16 = vadd.f32 %v19775_v61, %v3365_v7 }
 0x16d   : > { %v3566_v0 = vadd.f32 %v19775_v61, %v3364_v9  ;;  %v3565_v63 = vadd.f32 %v19775_v61, %v3363_v10  ;;  %v3759_v62 = vmax.f32 %v3564_v11, 0.0  ;;  %v2837_v6 = vrot.slane %v19833_v13, 1  ;;  %v1769_v17 = vpop.f32.mrb[59].mxu0  ;;  %v18441_v10 = vld [vmem:[%s25494_s3 + $0x2d8] ss:$52 sps:$4 sm:$0xff]  }
 0x16e   : > { %6585 = vmatmul.mubr.bf16.gmra.mrb[12].mxu1 %v18429_v51  ;;  %v2833_v18 = vrot.slane %v2392_v12, 1  ;;  %v19847_v3 = vmax.f32 %v16844_v29, %v19840_v15  ;;  %v2393_v19 = vmax.f32 %v1750_v42, %v1769_v17  ;;  %v3762_v20 = vmax.f32 %v3567_v16, 0.0 }
 0x16f   : > { %6592 = vmatprep.mubr.bf16.mxu1 %v18430_v55  ;;  %6821 = vmatpush1.bf16.msra.mxu1 %v3930_v4  ;;  %v3760_v8 = vmax.f32 %v3565_v63, 0.0  ;;  %v3761_v21 = vmax.f32 %v3566_v0, 0.0 }
 0x170   : > { %6822 = vmatprep.subr.bf16.mxu1 %v25518_v35  ;;  %v2834_v23 = vsel %vm2731_vm3, %v2831_v50, %v2833_v18  ;;  %v2839_v24 = vrot.slane %v19847_v3, 1  ;;  %v2835_v25 = vrot.slane %v2393_v19, 1 }
 0x171   : > { %v3931_v27 = vpack.c.bf16 %v3760_v8, %v3759_v62  ;;  %v3932_v28 = vpack.c.bf16 %v3762_v20, %v3761_v21  ;;  %v3366_v29 = vmax.f32 %v19813_v32, %v2834_v23  ;;  %v18488_v32 = vld [vmem:[%s19514_s30 + $0x160] sm:$0xff]   ;;  %v18447_v8 = vld [vmem:[%s25494_s3 + $0x3a8] ss:$52 sps:$4 sm:$0xff]  }
 0x172   : > { %v2840_v33 = vsel %vm2731_vm3, %v2837_v6, %v2839_v24  ;;  %v2836_v36 = vsel %vm2731_vm3, %v2833_v18, %v2835_v25  ;;  %v2838_v38 = vsel %vm2731_vm3, %v2835_v25, %v2837_v6  ;;  %v16852_v34 = vpop.f32.mrb[60].mxu0  ;;  %16878 = vmatprep.mubr.msk.bf16.mxu0 %vm1200_vm2, %v18488_v32  ;;  %v18444_v62 = vld [vmem:[%s25494_s3 + $0x340] ss:$52 sps:$4 sm:$0xff]  }
 0x173   : > { %6823 = vmatpush1.bf16.msra.mxu1 %v3931_v27  ;;  %v3368_v39 = vmax.f32 %v2393_v19, %v2838_v38  ;;  %v3367_v41 = vmax.f32 %v2392_v12, %v2836_v36  ;;  %v3568_v42 = vadd.f32 %v19775_v61, %v3366_v29  ;;  %v19878_v60 = vmax.f32 %v1769_v17, %v16852_v34  ;;  %v19880_v49 = vpop.f32.mrb[61].mxu0  ;;  %v18442_v12 = vld [vmem:[%s25494_s3 + $0x344] ss:$52 sps:$4 sm:$0xff]   ;;  %v18445_v18 = vld [vmem:[%s25494_s3 + $0x3ac] ss:$52 sps:$4 sm:$0xff]   ;;  %v18502_v25 = vld [vmem:[%s19514_s30 + $0x170] sm:$0xff]  }
 0x174   : > { %6824 = vmatprep.subr.bf16.mxu1 %v25518_v35  ;;  %v2396_v50 = vmax.f32 %v19808_v44, %v19880_v49  ;;  %v19888_v51 = vpop.f32.mrb[62].mxu0  ;;  %16879 = vmatmul.mubr.msk.bf16.gmra.mrb[88].mxu0 %vm1200_vm2, %v18489_v30  ;;  %v3369_v4 = vmax.f32 %v19833_v13, %v2840_v33  ;;  %v18448_v21 = vld [vmem:[%s25494_s3 + $0x414] ss:$52 sps:$4 sm:$0xff]   ;;  %v18450_v29 = vld [vmem:[%s25494_s3 + $0x410] ss:$52 sps:$4 sm:$0xff]  }
 0x175   : > { %v3569_v43 = vadd.f32 %v19775_v61, %v3367_v41  ;;  %v3763_v40 = vmax.f32 %v3568_v42, 0.0  ;;  %v2845_v52 = vrot.slane %v19878_v60, 1  ;;  %v19894_v53 = vmax.f32 %v19829_v5, %v19888_v51  ;;  %v1785_v54 = vpop.f32.mrb[63].mxu0  ;;  %16882 = vmatprep.mubr.msk.bf16.mxu0 %vm1200_vm2, %v18502_v25 }
 0x176   : > { %6593 = vmatmul.mubr.bf16.gmra.mrb[16].mxu1 %v18432_v22  ;;  %v3570_v55 = vadd.f32 %v19775_v61, %v3368_v39  ;;  %v2841_v56 = vrot.slane %v2396_v50, 1  ;;  %v2397_v57 = vmax.f32 %v19835_v14, %v1785_v54  ;;  %v3571_v14 = vadd.f32 %v19775_v61, %v3369_v4  ;;  %v18451_v39 = vld [vmem:[%s25494_s3 + $0x47c] ss:$52 sps:$4 sm:$0xff]  }
 0x177   : > { %6600 = vmatprep.mubr.bf16.mxu1 %v18433_v26  ;;  %6825 = vmatpush1.bf16.msra.mxu1 %v3932_v28  ;;  %v3764_v45 = vmax.f32 %v3569_v43, 0.0  ;;  %v2847_v58 = vrot.slane %v19894_v53, 1  ;;  %v18503_v26 = vld [vmem:[%s19514_s30 + $0x178] sm:$0xff]  }
 0x178   : > { %6826 = vmatprep.subr.bf16.mxu1 %v25518_v35  ;;  %v2842_v44 = vsel %vm2731_vm3, %v2839_v24, %v2841_v56  ;;  %v2843_v59 = vrot.slane %v2397_v57, 1  ;;  %v3765_v9 = vmax.f32 %v3570_v55, 0.0  ;;  %v3766_v16 = vmax.f32 %v3571_v14, 0.0 }
 0x179   : > { %v3933_v31 = vpack.c.bf16 %v3764_v45, %v3763_v40  ;;  %v2848_v2 = vsel %vm2731_vm3, %v2845_v52, %v2847_v58  ;;  %v3370_v13 = vmax.f32 %v19847_v3, %v2842_v44 }
 0x17a   : > { %v2844_v5 = vsel %vm2731_vm3, %v2841_v56, %v2843_v59  ;;  %v2846_v7 = vsel %vm2731_vm3, %v2843_v59, %v2845_v52  ;;  %v3934_v0 = vpack.c.bf16 %v3766_v16, %v3765_v9  ;;  %v16856_v22 = vpop.f32.mrb[64].mxu0  ;;  %v3373_v40 = vmax.f32 %v19878_v60, %v2848_v2 }
 0x17b   : > { %6827 = vmatpush1.bf16.msra.mxu1 %v3933_v31  ;;  %v3372_v11 = vmax.f32 %v2397_v57, %v2846_v7  ;;  %v3371_v63 = vmax.f32 %v2396_v50, %v2844_v5  ;;  %v3572_v6 = vadd.f32 %v19775_v61, %v3370_v13  ;;  %v2402_v23 = vmax.f32 %v1785_v54, %v16856_v22  ;;  %v1798_v24 = vpop.f32.mrb[65].mxu0  ;;  %v18453_v57 = vld [vmem:[%s25494_s3 + $0x478] ss:$52 sps:$4 sm:$0xff]  }
 0x17c   : > { %6828 = vmatprep.subr.bf16.mxu1 %v25518_v35  ;;  %v2400_v27 = vmax.f32 %v19840_v15, %v1798_v24  ;;  %v19931_v28 = vpop.f32.mrb[66].mxu0  ;;  %16883 = vmatmul.mubr.msk.bf16.gmra.mrb[92].mxu0 %vm1200_vm2, %v18503_v26  ;;  %v3575_v31 = vadd.f32 %v19775_v61, %v3373_v40 }
 0x17d   : > { %v3573_v17 = vadd.f32 %v19775_v61, %v3371_v63  ;;  %v3767_v3 = vmax.f32 %v3572_v6, 0.0  ;;  %v2853_v33 = vrot.slane %v2402_v23, 1  ;;  %v19937_v36 = vmax.f32 %v16852_v34, %v19931_v28  ;;  %v1801_v38 = vpop.f32.mrb[67].mxu0 }
 0x17e   : > { %6601 = vmatmul.mubr.bf16.gmra.mrb[20].mxu1 %v18435_v46  ;;  %v2849_v41 = vrot.slane %v2400_v27, 1  ;;  %v2401_v15 = vmax.f32 %v19880_v49, %v1801_v38  ;;  %v3574_v42 = vadd.f32 %v19775_v61, %v3372_v11  ;;  %v3770_v52 = vmax.f32 %v3575_v31, 0.0 }
 0x17f   : > { %6608 = vmatprep.mubr.bf16.mxu1 %v18436_v47  ;;  %6829 = vmatpush1.bf16.msra.mxu1 %v3934_v0  ;;  %v3768_v19 = vmax.f32 %v3573_v17, 0.0  ;;  %v2855_v43 = vrot.slane %v19937_v36, 1 }
 0x180   : > { %6830 = vmatprep.subr.bf16.mxu1 %v25518_v35  ;;  %v2850_v45 = vsel %vm2731_vm3, %v2847_v58, %v2849_v41  ;;  %v2851_v46 = vrot.slane %v2401_v15, 1  ;;  %v3769_v50 = vmax.f32 %v3574_v42, 0.0  ;;  %v18457_v42 = vld [vmem:[%s25494_s3 + $0x54c] ss:$52 sps:$4 sm:$0xff]  }
 0x181   : > { %v3935_v20 = vpack.c.bf16 %v3768_v19, %v3767_v3  ;;  %v2856_v47 = vsel %vm2731_vm3, %v2853_v33, %v2855_v43  ;;  %v3374_v55 = vmax.f32 %v19894_v53, %v2850_v45 }
 0x182   : > { %v2852_v32 = vsel %vm2731_vm3, %v2849_v41, %v2851_v46  ;;  %v2854_v30 = vsel %vm2731_vm3, %v2851_v46, %v2853_v33  ;;  %v16860_v34 = vpop.f32.mrb[68].mxu0  ;;  %v3936_v2 = vpack.c.bf16 %v3770_v52, %v3769_v50  ;;  %v3377_v11 = vmax.f32 %v2402_v23, %v2856_v47 }
 0x183   : > { %6831 = vmatpush1.bf16.msra.mxu1 %v3935_v20  ;;  %v19953_v49 = vmax.f32 %v1801_v38, %v16860_v34  ;;  %v3375_v56 = vmax.f32 %v2400_v27, %v2852_v32  ;;  %v3576_v53 = vadd.f32 %v19775_v61, %v3374_v55 }
 0x184   : > { %6832 = vmatprep.subr.bf16.mxu1 %v25518_v35  ;;  %v3579_v63 = vadd.f32 %v19775_v61, %v3377_v11  ;;  %v18462_v11 = vld [vmem:[%s25494_s3 + $0x5b4] ss:$52 sps:$4 sm:$0xff]  }
 0x185   : > { %v2861_v58 = vrot.slane %v19953_v49, 1  ;;  %v3577_v7 = vadd.f32 %v19775_v61, %v3375_v56  ;;  %v3771_v16 = vmax.f32 %v3576_v53, 0.0  ;;  %v18459_v53 = vld [vmem:[%s25494_s3 + $0x548] ss:$52 sps:$4 sm:$0xff]  }
 0x186   : > { %6609 = vmatmul.mubr.bf16.gmra.mrb[24].mxu1 %v18438_v48  ;;  %v3376_v48 = vmax.f32 %v2401_v15, %v2854_v30 }
 0x187   : > { %6616 = vmatprep.mubr.bf16.mxu1 %v18439_v37  ;;  %v1814_v37 = vpop.f32.mrb[69].mxu0  ;;  %6833 = vmatpush1.bf16.msra.mxu1 %v3936_v2  ;;  %v3772_v0 = vmax.f32 %v3577_v7, 0.0 }
 0x188   : > { %v2404_v60 = vmax.f32 %v19888_v51, %v1814_v37  ;;  %v19956_v54 = vpop.f32.mrb[70].mxu0  ;;  %v18454_v51 = vld [vmem:[%s25494_s3 + $0x4e4] ss:$52 sps:$4 sm:$0xff]   ;;  %v3578_v9 = vadd.f32 %v19775_v61, %v3376_v48  ;;  %6834 = vmatprep.subr.bf16.mxu1 %v25518_v35 }
 0x189   : > { %v19964_v44 = vmax.f32 %v16856_v22, %v19956_v54  ;;  %v1817_v59 = vpop.f32.mrb[71].mxu0 }
 0x18a   : > { %v2857_v4 = vrot.slane %v2404_v60, 1  ;;  %v2405_v5 = vmax.f32 %v1798_v24, %v1817_v59  ;;  %v16864_v17 = vpop.f32.mrb[72].mxu0 }
 0x18b   : > { %v19979_v19 = vmax.f32 %v1817_v59, %v16864_v17  ;;  %v1830_v20 = vpop.f32.mrb[73].mxu0 }
 0x18c   : > { %v2858_v14 = vsel %vm2731_vm3, %v2855_v43, %v2857_v4  ;;  %v2408_v22 = vmax.f32 %v19931_v28, %v1830_v20  ;;  %v19982_v23 = vpop.f32.mrb[74].mxu0 }
 0x18d   : > { %v3378_v24 = vmax.f32 %v19937_v36, %v2858_v14  ;;  %v2869_v26 = vrot.slane %v19979_v19, 1  ;;  %v19987_v27 = vmax.f32 %v16860_v34, %v19982_v23  ;;  %v18456_v36 = vld [vmem:[%s25494_s3 + $0x4e0] ss:$52 sps:$4 sm:$0xff]  }
 0x18e   : > { %6617 = vmatmul.mubr.bf16.gmra.mrb[28].mxu1 %v18441_v10  ;;  %v2863_v10 = vrot.slane %v19964_v44, 1  ;;  %v2865_v38 = vrot.slane %v2408_v22, 1 }
 0x18f   : > { %6624 = vmatprep.mubr.bf16.mxu1 %v18442_v12  ;;  %v2859_v12 = vrot.slane %v2405_v5, 1  ;;  %v3580_v41 = vadd.f32 %v19775_v61, %v3378_v24  ;;  %v2871_v15 = vrot.slane %v19987_v27, 1 }
 0x190   : > { %v2864_v13 = vsel %vm2731_vm3, %v2861_v58, %v2863_v10  ;;  %v2866_v43 = vsel %vm2731_vm3, %v2863_v10, %v2865_v38 }
 0x191   : > { %v2862_v6 = vsel %vm2731_vm3, %v2859_v12, %v2861_v58  ;;  %v3775_v45 = vmax.f32 %v3580_v41, 0.0  ;;  %v2872_v47 = vsel %vm2731_vm3, %v2869_v26, %v2871_v15  ;;  %v3382_v55 = vmax.f32 %v19964_v44, %v2866_v43  ;;  %v18465_v41 = vld [vmem:[%s25494_s3 + $0x61c] ss:$52 sps:$4 sm:$0xff]   ;;  %v18468_v43 = vld [vmem:[%s25494_s3 + $0x684] ss:$52 sps:$4 sm:$0xff]  }
 0x192   : > { %v3380_v3 = vmax.f32 %v2405_v5, %v2862_v6 }
 0x194   : > { %v3582_v31 = vadd.f32 %v19775_v61, %v3380_v3 }
 0x196   : > { %6625 = vmatmul.mubr.bf16.gmra.mrb[32].mxu1 %v18444_v62  ;;  %v2860_v62 = vsel %vm2731_vm3, %v2857_v4, %v2859_v12 }
 0x197   : > { %6632 = vmatprep.mubr.bf16.mxu1 %v18445_v18  ;;  %v3937_v18 = vpack.c.bf16 %v3772_v0, %v3771_v16  ;;  %v3379_v25 = vmax.f32 %v2404_v60, %v2860_v62  ;;  %v3381_v60 = vmax.f32 %v19953_v49, %v2864_v13 }
 0x199   : > { %6835 = vmatpush1.bf16.msra.mxu1 %v3937_v18  ;;  %v3581_v28 = vadd.f32 %v19775_v61, %v3379_v25  ;;  %v3583_v49 = vadd.f32 %v19775_v61, %v3381_v60  ;;  %v18479_v60 = vld [vmem:[%s25494_s3 + $0x7bc] ss:$52 sps:$4 sm:$0xff]  }
 0x19a   : > { %6836 = vmatprep.subr.bf16.mxu1 %v25518_v35 }
 0x19b   : > { %v3776_v46 = vmax.f32 %v3581_v28, 0.0  ;;  %v3778_v10 = vmax.f32 %v3583_v49, 0.0  ;;  %v18487_v49 = vld [vmem:[%s25494_s3 + $0x888] ss:$52 sps:$4 sm:$0xff]  }
 0x19d   : > { %v3939_v48 = vpack.c.bf16 %v3776_v46, %v3775_v45  ;;  %v18526_v45 = vld [vmem:[%s19514_s30 + $0x1a8] sm:$0xff]   ;;  %v18470_v46 = vld [vmem:[%s25494_s3 + $0x680] ss:$52 sps:$4 sm:$0xff]  }
 0x19e   : > { %6633 = vmatmul.mubr.bf16.gmra.mrb[36].mxu1 %v18447_v8  ;;  %v3773_v8 = vmax.f32 %v3578_v9, 0.0  ;;  %v3777_v9 = vmax.f32 %v3582_v31, 0.0  ;;  %v18530_v31 = vld [vmem:[%s19514_s30 + $0x1b0] sm:$0xff]  }
 0x19f   : > { %6640 = vmatprep.mubr.bf16.mxu1 %v18448_v21  ;;  %v3774_v21 = vmax.f32 %v3579_v63, 0.0 }
 0x1a0   : > { %v20045_v63 = vpack.c.bf16 %v3778_v10, %v3777_v9  ;;  %v18496_v9 = vld [vmem:[%s25494_s3 + $0x9c4] ss:$52 sps:$4 sm:$0xff]   ;;  %v18498_v10 = vld [vmem:[%s25494_s3 + $0x9c0] ss:$52 sps:$4 sm:$0xff]  }
 0x1a1   : > { %v3938_v33 = vpack.c.bf16 %v3774_v21, %v3773_v8  ;;  %v18517_v8 = vld [vmem:[%s19514_s30 + $0x188] sm:$0xff]   ;;  %v3385_v21 = vmax.f32 %v19979_v19, %v2872_v47  ;;  %v18464_v19 = vld [vmem:[%s25494_s3 + $0x5b0] ss:$52 sps:$4 sm:$0xff]  }
 0x1a2   : > { %v18471_v47 = vld [vmem:[%s25494_s3 + $0x6ec] ss:$52 sps:$4 sm:$0xff]  }
 0x1a3   : > { %6837 = vmatpush1.bf16.msra.mxu1 %v3938_v33  ;;  %v3587_v25 = vadd.f32 %v19775_v61, %v3385_v21  ;;  %v18501_v21 = vld [vmem:[%s25494_s3 + $0xa28] ss:$52 sps:$4 sm:$0xff]  }
 0x1a4   : > { %6838 = vmatprep.subr.bf16.mxu1 %v25518_v35 }
 0x1a6   : > { %6641 = vmatmul.mubr.bf16.gmra.mrb[40].mxu1 %v18450_v29  ;;  %v1833_v29 = vpop.f32.mrb[75].mxu0 }
 0x1a7   : > { %6648 = vmatprep.mubr.bf16.mxu1 %v18451_v39  ;;  %v2409_v39 = vmax.f32 %v1814_v37, %v1833_v29  ;;  %v20005_v34 = vpop.f32.mrb[76].mxu0  ;;  %6839 = vmatpush1.bf16.msra.mxu1 %v3939_v48  ;;  %v18476_v48 = vld [vmem:[%s25494_s3 + $0x754] ss:$52 sps:$4 sm:$0xff]  }
 0x1a8   : > { %v20008_v50 = vmax.f32 %v1833_v29, %v20005_v34  ;;  %v20010_v52 = vpop.f32.mrb[77].mxu0  ;;  %7088 = vmatprep.subr.bf16.mxu1 %v25518_v35 }
 0x1a9   : > { %v2867_v40 = vrot.slane %v2409_v39, 1  ;;  %v2412_v56 = vmax.f32 %v19956_v54, %v20010_v52  ;;  %v3584_v54 = vadd.f32 %v19775_v61, %v3382_v55  ;;  %v18481_v55 = vld [vmem:[%s25494_s3 + $0x7b8] ss:$52 sps:$4 sm:$0xff]  }
 0x1aa   : > { %v2877_v59 = vrot.slane %v20008_v50, 1 }
 0x1ab   : > { %v2868_v32 = vsel %vm2731_vm3, %v2865_v38, %v2867_v40  ;;  %v2870_v30 = vsel %vm2731_vm3, %v2867_v40, %v2869_v26  ;;  %v2873_v44 = vrot.slane %v2412_v56, 1  ;;  %v3779_v16 = vmax.f32 %v3584_v54, 0.0  ;;  %v18525_v40 = vld [vmem:[%s19514_s30 + $0x1a0] sm:$0xff]  }
 0x1ac   : > { %v3384_v37 = vmax.f32 %v2409_v39, %v2870_v30  ;;  %v3383_v58 = vmax.f32 %v2408_v22, %v2868_v32  ;;  %v18531_v32 = vld [vmem:[%s19514_s30 + $0x1b8] sm:$0xff]   ;;  %v18492_v54 = vld [vmem:[%s25494_s3 + $0x8f0] ss:$52 sps:$4 sm:$0xff]  }
 0x1ad   : > { %v2874_v14 = vsel %vm2731_vm3, %v2871_v15, %v2873_v44  ;;  %v18521_v15 = vld [vmem:[%s19514_s30 + $0x198] sm:$0xff]  }
 0x1ae   : > { %6649 = vmatmul.mubr.bf16.gmra.mrb[44].mxu1 %v18453_v57  ;;  %v20016_v57 = vpop.f32.mrb[78].mxu0  ;;  %v3585_v5 = vadd.f32 %v19775_v61, %v3383_v58  ;;  %v3586_v62 = vadd.f32 %v19775_v61, %v3384_v37  ;;  %v3386_v22 = vmax.f32 %v19987_v27, %v2874_v14  ;;  %v3782_v27 = vmax.f32 %v3587_v25, 0.0  ;;  %v18473_v30 = vld [vmem:[%s25494_s3 + $0x6e8] ss:$52 sps:$4 sm:$0xff]   ;;  %v18478_v37 = vld [vmem:[%s25494_s3 + $0x750] ss:$52 sps:$4 sm:$0xff]  }
 0x1af   : > { %6656 = vmatprep.mubr.bf16.mxu1 %v18454_v51  ;;  %v20020_v2 = vmax.f32 %v16864_v17, %v20016_v57  ;;  %v20022_v51 = vpop.f32.mrb[79].mxu0  ;;  %v18484_v58 = vld [vmem:[%s25494_s3 + $0x820] ss:$52 sps:$4 sm:$0xff]  }
 0x1b0   : > { %v20027_v4 = vmax.f32 %v1830_v20, %v20022_v51  ;;  %v3780_v0 = vmax.f32 %v3585_v5, 0.0  ;;  %v18516_v20 = vld [vmem:[%s19514_s30 + $0x180] sm:$0xff]   ;;  %v3588_v26 = vadd.f32 %v19775_v61, %v3386_v22  ;;  %v3781_v33 = vmax.f32 %v3586_v62, 0.0  ;;  %v18493_v5 = vld [vmem:[%s25494_s3 + $0x95c] ss:$52 sps:$4 sm:$0xff]  }
 0x1b1   : > { %v2879_v7 = vrot.slane %v20020_v2, 1  ;;  %16886 = vmatprep.mubr.msk.bf16.mxu0 %vm1200_vm2, %v18516_v20 }
 0x1b2   : > { %v2875_v12 = vrot.slane %v20027_v4, 1  ;;  %v20052_v18 = vpack.c.bf16 %v3780_v0, %v3779_v16  ;;  %16887 = vmatmul.mubr.msk.bf16.gmra.mrb[96].mxu0 %vm1200_vm2, %v18517_v8  ;;  %v3783_v38 = vmax.f32 %v3588_v26, 0.0  ;;  %v20071_v28 = vpack.c.bf16 %v3782_v27, %v3781_v33  ;;  %v20172_v26 = vld [vmem:[%s25493_s2] ss:$0 sm:$0xff] }
 0x1b3   : > { %v20043_v13 = vsel %vm2731_vm3, %v2877_v59, %v2879_v7 }
 0x1b4   : > { %v2876_v6 = vsel %vm2731_vm3, %v2873_v44, %v2875_v12  ;;  %v20050_v17 = vsel %vm2731_vm3, %v2875_v12, %v2877_v59  ;;  %v18485_v59 = vld [vmem:[%s25494_s3 + $0x88c] ss:$52 sps:$4 sm:$0xff]   ;;  %v18490_v44 = vld [vmem:[%s25494_s3 + $0x8f4] ss:$52 sps:$4 sm:$0xff]   ;;  %v3389_v27 = vmax.f32 %v20008_v50, %v20043_v13 }
 0x1b5   : > { %v3388_v3 = vmax.f32 %v20027_v4, %v20050_v17  ;;  %v3387_v24 = vmax.f32 %v2412_v56, %v2876_v6  ;;  %v18482_v56 = vld [vmem:[%s25494_s3 + $0x824] ss:$52 sps:$4 sm:$0xff]   ;;  %v18507_v17 = vld [vmem:[%s25494_s3 + $0xafc] ss:$52 sps:$4 sm:$0xff]  }
 0x1b6   : > { %6657 = vmatmul.mubr.bf16.gmra.mrb[48].mxu1 %v18456_v36  ;;  %v18506_v4 = vld [vmem:[%s25494_s3 + $0xa90] ss:$52 sps:$4 sm:$0xff]  }
 0x1b7   : > { %6664 = vmatprep.mubr.bf16.mxu1 %v18457_v42  ;;  %v3589_v29 = vadd.f32 %v19775_v61, %v3387_v24  ;;  %v18520_v61 = vld [vmem:[%s19514_s30 + $0x190] sm:$0xff]   ;;  %v18467_v42 = vld [vmem:[%s25494_s3 + $0x618] ss:$52 sps:$4 sm:$0xff]  }
 0x1b8   : > { %16890 = vmatprep.mubr.msk.bf16.mxu0 %vm1200_vm2, %v18520_v61 }
 0x1b9   : > { %v3784_v39 = vmax.f32 %v3589_v29, 0.0 }
 0x1ba   : > { %16891 = vmatmul.mubr.msk.bf16.gmra.mrb[100].mxu0 %vm1200_vm2, %v18521_v15 }
 0x1bb   : > { %v20073_v36 = vpack.c.bf16 %v3784_v39, %v3783_v38  ;;  %16894 = vmatprep.mubr.msk.bf16.mxu0 %vm1200_vm2, %v18525_v40  ;;  %v3591_v38 = vadd.f32 %v20172_v26, %v3389_v27  ;;  %v18527_v27 = vld [vmem:[%s25494_s3 + $0x74] ss:$52 sps:$4 sm:$0xff]  }
 0x1be   : > { %6665 = vmatmul.mubr.bf16.gmra.mrb[52].mxu1 %v18459_v53  ;;  %v18495_v53 = vld [vmem:[%s25494_s3 + $0x958] ss:$52 sps:$4 sm:$0xff]  }
 0x1bf   : > { %6672 = vmatprep.mubr.bf16.mxu1 %v18462_v11  ;;  %v18499_v11 = vld [vmem:[%s25494_s3 + $0xa2c] ss:$52 sps:$4 sm:$0xff]  }
 0x1c2   : > { %16895 = vmatmul.mubr.msk.bf16.gmra.mrb[104].mxu0 %vm1200_vm2, %v18526_v45  ;;  %v18510_v45 = vld [vmem:[%s25494_s3 + $0xb64] ss:$52 sps:$4 sm:$0xff]  }
 0x1c3   : > { %16898 = vmatprep.mubr.msk.bf16.mxu0 %vm1200_vm2, %v18530_v31 }
 0x1c6   : > { %6673 = vmatmul.mubr.bf16.gmra.mrb[56].mxu1 %v18464_v19 }
 0x1c7   : > { %6680 = vmatprep.mubr.bf16.mxu1 %v18465_v41 }
 0x1ca   : > { %16899 = vmatmul.mubr.msk.bf16.gmra.mrb[108].mxu0 %vm1200_vm2, %v18531_v32  ;;  %v18568_v32 = vld [vmem:[%s19514_s30 + $0x1c0] sm:$0xff]  }
 0x1cb   : > { %16902 = vmatprep.mubr.msk.bf16.mxu0 %vm1200_vm2, %v18568_v32 }
 0x1ce   : > { %6681 = vmatmul.mubr.bf16.gmra.mrb[60].mxu1 %v18467_v42  ;;  %v18509_v42 = vld [vmem:[%s25494_s3 + $0xaf8] ss:$52 sps:$4 sm:$0xff]  }
 0x1cf   : > { %6688 = vmatprep.mubr.bf16.mxu1 %v18468_v43 }
 0x1d6   : > { %6689 = vmatmul.mubr.bf16.gmra.mrb[64].mxu1 %v18470_v46 }
 0x1d7   : > { %6696 = vmatprep.mubr.bf16.mxu1 %v18471_v47  ;;  %v18513_v47 = vld [vmem:[%s25494_s3 + $0xbcc] ss:$52 sps:$4 sm:$0xff]  }
 0x1de   : > { %6697 = vmatmul.mubr.bf16.gmra.mrb[68].mxu1 %v18473_v30  ;;  %v18569_v30 = vld [vmem:[%s19514_s30 + $0x1c8] sm:$0xff]  }
 0x1df   : > { %6704 = vmatprep.mubr.bf16.mxu1 %v18476_v48  ;;  %16903 = vmatmul.mubr.msk.bf16.gmra.mrb[112].mxu0 %vm1200_vm2, %v18569_v30 }
 0x1e6   : > { %6705 = vmatmul.mubr.bf16.gmra.mrb[72].mxu1 %v18478_v37 }
 0x1e7   : > { %6712 = vmatprep.mubr.bf16.mxu1 %v18479_v60  ;;  %v4426_v60 = vld [vmem:[%s25494_s3 + $0xc30] sm:$0x77] }
 0x1ee   : > { %6713 = vmatmul.mubr.bf16.gmra.mrb[76].mxu1 %v18481_v55 }
 0x1ef   : > { %6720 = vmatprep.mubr.bf16.mxu1 %v18482_v56 }
 0x1f6   : > { %6721 = vmatmul.mubr.bf16.gmra.mrb[80].mxu1 %v18484_v58 }
 0x1f7   : > { %6728 = vmatprep.mubr.bf16.mxu1 %v18485_v59 }
 0x1fe   : > { %6729 = vmatmul.mubr.bf16.gmra.mrb[84].mxu1 %v18487_v49 }
 0x1ff   : > { %6736 = vmatprep.mubr.bf16.mxu1 %v18490_v44  ;;  %v18515_v44 = vld [vmem:[%s25494_s3 + $0xbc8] ss:$52 sps:$4 sm:$0xff]  }
 0x206   : > { %6737 = vmatmul.mubr.bf16.gmra.mrb[88].mxu1 %v18492_v54 }
 0x207   : > { %6744 = vmatprep.mubr.bf16.mxu1 %v18493_v5  ;;  %v16872_v14 = vpop.f32.mrb[80].mxu0 }
 0x208   : > { %v20148_v12 = vmax.f32 %v20022_v51, %v16872_v14  ;;  %v1862_v16 = vpop.f32.mrb[81].mxu0 }
 0x209   : > { %v2416_v0 = vmax.f32 %v19982_v23, %v1862_v16  ;;  %v20151_v62 = vpop.f32.mrb[82].mxu0  ;;  %v18504_v23 = vld [vmem:[%s25494_s3 + $0xa94] ss:$52 sps:$4 sm:$0xff]  }
 0x20a   : > { %v2885_v6 = vrot.slane %v20148_v12, 1  ;;  %v20156_v20 = vmax.f32 %v20005_v34, %v20151_v62  ;;  %v1865_v8 = vpop.f32.mrb[83].mxu0 }
 0x20b   : > { %v2881_v22 = vrot.slane %v2416_v0, 1  ;;  %v2417_v51 = vmax.f32 %v20010_v52, %v1865_v8  ;;  %v3590_v52 = vadd.f32 %v20172_v26, %v3388_v3  ;;  %v3786_v3 = vmax.f32 %v3591_v38, 0.0 }
 0x20c   : > { %v2887_v24 = vrot.slane %v20156_v20, 1 }
 0x20d   : > { %v2882_v25 = vsel %vm2731_vm3, %v2879_v7, %v2881_v22  ;;  %v2883_v34 = vrot.slane %v2417_v51, 1  ;;  %v3785_v39 = vmax.f32 %v3590_v52, 0.0 }
 0x20e   : > { %6745 = vmatmul.mubr.bf16.gmra.mrb[92].mxu1 %v18495_v53  ;;  %v2888_v29 = vsel %vm2731_vm3, %v2885_v6, %v2887_v24  ;;  %v3390_v61 = vmax.f32 %v20020_v2, %v2882_v25  ;;  %v18512_v2 = vld [vmem:[%s25494_s3 + $0xb60] ss:$52 sps:$4 sm:$0xff]  }
 0x20f   : > { %6752 = vmatprep.mubr.bf16.mxu1 %v18496_v9  ;;  %v2884_v19 = vsel %vm2731_vm3, %v2881_v22, %v2883_v34  ;;  %v2886_v33 = vsel %vm2731_vm3, %v2883_v34, %v2885_v6  ;;  %v20190_v41 = vpack.c.bf16 %v3786_v3, %v3785_v39  ;;  %v18532_v39 = vld [vmem:[%s25494_s3 + $0xdc] ss:$52 sps:$4 sm:$0xff]  }
 0x210   : > { %v3392_v7 = vmax.f32 %v2417_v51, %v2886_v33  ;;  %v3391_v15 = vmax.f32 %v2416_v0, %v2884_v19  ;;  %v3592_v50 = vadd.f32 %v20172_v26, %v3390_v61  ;;  %v16008_v51 = vcombine.low %v4426_v60, %v4426_v60  ;;  %v18522_v19 = vld [vmem:[%s25494_s3 + $0x8] ss:$52 sps:$4 sm:$0xff]   ;;  %v18582_v3 = vld [vmem:[%s19514_s30 + $0x1d0] sm:$0xff]  }
 0x211   : > { %v18583_v61 = vld [vmem:[%s19514_s30 + $0x1d8] sm:$0xff]   ;;  %16906 = vmatprep.mubr.msk.bf16.mxu0 %vm1200_vm2, %v18582_v3 }
 0x212   : > { %v3593_v13 = vadd.f32 %v20172_v26, %v3391_v15  ;;  %v3787_v43 = vmax.f32 %v3592_v50, 0.0  ;;  %v3594_v9 = vadd.f32 %v20172_v26, %v3392_v7  ;;  %16907 = vmatmul.mubr.msk.bf16.gmra.mrb[116].mxu0 %vm1200_vm2, %v18583_v61 }
 0x214   : > { %v3788_v40 = vmax.f32 %v3593_v13, 0.0  ;;  %v3789_v22 = vmax.f32 %v3594_v9, 0.0 }
 0x216   : > { %6753 = vmatmul.mubr.bf16.gmra.mrb[96].mxu1 %v18498_v10  ;;  %v20201_v46 = vpack.c.bf16 %v3788_v40, %v3787_v43 }
 0x217   : > { %6760 = vmatprep.mubr.bf16.mxu1 %v18499_v11 }
 0x21e   : > { %6761 = vmatmul.mubr.bf16.gmra.mrb[100].mxu1 %v18501_v21 }
 0x21f   : > { %6768 = vmatprep.mubr.bf16.mxu1 %v18504_v23 }
 0x226   : > { %6769 = vmatmul.mubr.bf16.gmra.mrb[104].mxu1 %v18506_v4 }
 0x227   : > { %6776 = vmatprep.mubr.bf16.mxu1 %v18507_v17 }
 0x22c   : > { %v20209_v31 = vpop.f32.mrb[84].mxu0 }
 0x22d   : > { %v20214_v48 = vmax.f32 %v1865_v8, %v20209_v31  ;;  %v20216_v37 = vpop.f32.mrb[85].mxu0 }
 0x22e   : > { %6777 = vmatmul.mubr.bf16.gmra.mrb[108].mxu1 %v18509_v42  ;;  %v2420_v55 = vmax.f32 %v20016_v57, %v20216_v37  ;;  %v20223_v56 = vpop.f32.mrb[86].mxu0  ;;  %v16009_v57 = vcombine.high %v4426_v60, %v4426_v60 }
 0x22f   : > { %6784 = vmatprep.mubr.bf16.mxu1 %v18510_v45  ;;  %v2893_v58 = vrot.slane %v20214_v48, 1  ;;  %v20228_v59 = vmax.f32 %v16872_v14, %v20223_v56  ;;  %v1881_v49 = vpop.f32.mrb[87].mxu0  ;;  %v18535_v45 = vld [vmem:[%s25494_s3 + $0x144] ss:$52 sps:$4 sm:$0xff]  }
 0x230   : > { %v2889_v54 = vrot.slane %v2420_v55, 1  ;;  %v20234_v5 = vmax.f32 %v1862_v16, %v1881_v49  ;;  %v3393_v16 = vmax.f32 %v20148_v12, %v2888_v29 }
 0x231   : > { %v2895_v53 = vrot.slane %v20228_v59, 1 }
 0x232   : > { %v2890_v10 = vsel %vm2731_vm3, %v2887_v24, %v2889_v54  ;;  %v2891_v11 = vrot.slane %v20234_v5, 1  ;;  %v3595_v21 = vadd.f32 %v20172_v26, %v3393_v16  ;;  %v18524_v24 = vld [vmem:[%s25494_s3 + $0xc] ss:$52 sps:$4 sm:$0xff]  }
 0x233   : > { %v20241_v14 = vsel %vm2731_vm3, %v2893_v58, %v2895_v53  ;;  %v3394_v34 = vmax.f32 %v20156_v20, %v2890_v10  ;;  %v18529_v20 = vld [vmem:[%s25494_s3 + $0x70] ss:$52 sps:$4 sm:$0xff]  }
 0x234   : > { %v2892_v0 = vsel %vm2731_vm3, %v2889_v54, %v2891_v11  ;;  %v2894_v6 = vsel %vm2731_vm3, %v2891_v11, %v2893_v58  ;;  %v3790_v23 = vmax.f32 %v3595_v21, 0.0  ;;  %v3397_v60 = vmax.f32 %v20214_v48, %v20241_v14  ;;  %v18538_v54 = vld [vmem:[%s25494_s3 + $0x1ac] ss:$52 sps:$4 sm:$0xff]   ;;  %v18543_v14 = vld [vmem:[%s25494_s3 + $0x210] ss:$52 sps:$4 sm:$0xff]  }
 0x235   : > { %v3396_v8 = vmax.f32 %v20234_v5, %v2894_v6  ;;  %v3395_v52 = vmax.f32 %v2420_v55, %v2892_v0  ;;  %v3596_v12 = vadd.f32 %v20172_v26, %v3394_v34  ;;  %v18544_v0 = vld [vmem:[%s25494_s3 + $0x27c] ss:$52 sps:$4 sm:$0xff]  }
 0x236   : > { %6785 = vmatmul.mubr.bf16.gmra.mrb[112].mxu1 %v18512_v2  ;;  %v20251_v25 = vpack.c.bf16 %v3790_v23, %v3789_v22  ;;  %v3599_v55 = vadd.f32 %v20172_v26, %v3397_v60  ;;  %v18597_v23 = vld [vmem:[%s19514_s30 + $0x1e8] sm:$0xff]  }
 0x237   : > { %6792 = vmatprep.mubr.bf16.mxu1 %v18513_v47  ;;  %v3597_v29 = vadd.f32 %v20172_v26, %v3395_v52  ;;  %v3791_v33 = vmax.f32 %v3596_v12, 0.0 }
 0x239   : > { %v3792_v7 = vmax.f32 %v3597_v29, 0.0 }
 0x23b   : > { %v20262_v38 = vpack.c.bf16 %v3792_v7, %v3791_v33  ;;  %v18547_v7 = vld [vmem:[%s25494_s3 + $0x2e4] ss:$52 sps:$4 sm:$0xff]  }
 0x23e   : > { %6793 = vmatmul.mubr.bf16.gmra.mrb[116].mxu1 %v18515_v44  ;;  %v3794_v44 = vmax.f32 %v3599_v55, 0.0 }
 0x23f   : > { %6800 = vmatprep.mubr.bf16.mxu1 %v16009_v57 }
 0x246   : > { %6801 = vmatmul.mubr.bf16.gmra.mrb[120].mxu1 %v16008_v51  ;;  %v18596_v51 = vld [vmem:[%s19514_s30 + $0x1e0] sm:$0xff]  }
 0x247   : > { %6840 = vmatprep.mubr.bf16.mxu1 %v18524_v24  ;;  %v20274_v4 = vpop.f32.mrb[88].mxu0  ;;  %16910 = vmatprep.mubr.msk.bf16.mxu0 %vm1200_vm2, %v18596_v51 }
 0x248   : > { %v20277_v17 = vmax.f32 %v1881_v49, %v20274_v4  ;;  %v18537_v49 = vld [vmem:[%s25494_s3 + $0x140] ss:$52 sps:$4 sm:$0xff]   ;;  %16911 = vmatmul.mubr.msk.bf16.gmra.mrb[120].mxu0 %vm1200_vm2, %v18597_v23 }
 0x24a   : > { %v2901_v50 = vrot.slane %v20277_v17, 1 }
 0x24e   : > { %6841 = vmatmul.mubr.bf16.vlgmr.msra.gmra.mrb[0].mxu1 %v18522_v19 }
 0x24f   : > { %7089 = vmatpush1.bf16.msra.mxu1 %v20045_v63  ;;  %6848 = vmatprep.mubr.bf16.mxu1 %v18527_v27  ;;  %v20279_v63 = vpop.f32.mrb[89].mxu0 }
 0x250   : > { %7090 = vmatprep.subr.bf16.mxu1 %v25518_v35  ;;  %v20286_v15 = vpop.f32.mrb[90].mxu0 }
 0x251   : > { %v20292_v13 = vmax.f32 %v20209_v31, %v20286_v15  ;;  %v1897_v42 = vpop.f32.mrb[91].mxu0  ;;  %v3598_v31 = vadd.f32 %v20172_v26, %v3396_v8 }
 0x252   : > { %v20352_v6 = vpop.f32.mrb[92].mxu0 }
 0x253   : > { %7091 = vmatpush1.bf16.msra.mxu1 %v20052_v18  ;;  %v2424_v18 = vmax.f32 %v20151_v62, %v20279_v63  ;;  %v18534_v62 = vld [vmem:[%s25494_s3 + $0xd8] ss:$52 sps:$4 sm:$0xff]   ;;  %v2903_v40 = vrot.slane %v20292_v13, 1  ;;  %v3793_v58 = vmax.f32 %v3598_v31, 0.0  ;;  %v20356_v16 = vmax.f32 %v1897_v42, %v20352_v6  ;;  %v20358_v8 = vpop.f32.mrb[93].mxu0 }
 0x254   : > { %7092 = vmatprep.subr.bf16.mxu1 %v25518_v35  ;;  %v2428_v21 = vmax.f32 %v20223_v56, %v20358_v8  ;;  %v20362_v22 = vpop.f32.mrb[94].mxu0  ;;  %v18546_v56 = vld [vmem:[%s25494_s3 + $0x278] ss:$52 sps:$4 sm:$0xff]  }
 0x255   : > { %v2897_v43 = vrot.slane %v2424_v18, 1  ;;  %v20314_v32 = vsel %vm2731_vm3, %v2901_v50, %v2903_v40  ;;  %v3948_v48 = vpack.c.bf16 %v3794_v44, %v3793_v58  ;;  %v2909_v24 = vrot.slane %v20356_v16, 1  ;;  %v1913_v34 = vpop.f32.mrb[95].mxu0  ;;  %v18611_v44 = vld [vmem:[%s19514_s30 + $0x1f8] sm:$0xff]  }
 0x256   : > { %6849 = vmatmul.mubr.bf16.gmra.mrb[4].mxu1 %v18529_v20  ;;  %v2905_v52 = vrot.slane %v2428_v21, 1  ;;  %v2429_v12 = vmax.f32 %v20279_v63, %v1913_v34  ;;  %v3401_v63 = vmax.f32 %v20277_v17, %v20314_v32  ;;  %v18555_v32 = vld [vmem:[%s25494_s3 + $0x3b0] ss:$52 sps:$4 sm:$0xff]  }
 0x257   : > { %7093 = vmatpush1.bf16.msra.mxu1 %v20071_v28  ;;  %6856 = vmatprep.mubr.bf16.mxu1 %v18532_v39  ;;  %v20296_v28 = vmax.f32 %v20216_v37, %v1897_v42  ;;  %v2898_v2 = vsel %vm2731_vm3, %v2895_v53, %v2897_v43  ;;  %v18550_v42 = vld [vmem:[%s25494_s3 + $0x34c] ss:$52 sps:$4 sm:$0xff]  }
 0x258   : > { %7094 = vmatprep.subr.bf16.mxu1 %v25518_v35  ;;  %v2906_v19 = vsel %vm2731_vm3, %v2903_v40, %v2905_v52  ;;  %v2907_v33 = vrot.slane %v2429_v12, 1  ;;  %v3603_v3 = vadd.f32 %v20172_v26, %v3401_v63 }
 0x259   : > { %v2899_v47 = vrot.slane %v20296_v28, 1 }
 0x25a   : > { %v2908_v20 = vsel %vm2731_vm3, %v2905_v52, %v2907_v33  ;;  %v2910_v39 = vsel %vm2731_vm3, %v2907_v33, %v2909_v24 }
 0x25b   : > { %7095 = vmatpush1.bf16.msra.mxu1 %v20073_v36  ;;  %v2900_v30 = vsel %vm2731_vm3, %v2897_v43, %v2899_v47  ;;  %v2902_v36 = vsel %vm2731_vm3, %v2899_v47, %v2901_v50  ;;  %v3798_v50 = vmax.f32 %v3603_v3, 0.0 }
 0x25c   : > { %7096 = vmatprep.subr.bf16.mxu1 %v25518_v35  ;;  %v3400_v37 = vmax.f32 %v20296_v28, %v2902_v36  ;;  %v3399_v5 = vmax.f32 %v2424_v18, %v2900_v30  ;;  %v18549_v18 = vld [vmem:[%s25494_s3 + $0x2e0] ss:$52 sps:$4 sm:$0xff]   ;;  %v3402_v28 = vmax.f32 %v20292_v13, %v2906_v19  ;;  %v18556_v30 = vld [vmem:[%s25494_s3 + $0x41c] ss:$52 sps:$4 sm:$0xff]  }
 0x25d   : > { %v18553_v13 = vld [vmem:[%s25494_s3 + $0x3b4] ss:$52 sps:$4 sm:$0xff]  }
 0x25e   : > { %6857 = vmatmul.mubr.bf16.gmra.mrb[8].mxu1 %v18534_v62  ;;  %v3601_v53 = vadd.f32 %v20172_v26, %v3399_v5  ;;  %v3403_v62 = vmax.f32 %v2428_v21, %v2908_v20  ;;  %v3604_v17 = vadd.f32 %v20172_v26, %v3402_v28 }
 0x25f   : > { %6864 = vmatprep.mubr.bf16.mxu1 %v18535_v45  ;;  %7097 = vmatpush1.bf16.msra.mxu1 %v20190_v41  ;;  %v3398_v41 = vmax.f32 %v20228_v59, %v2898_v2  ;;  %v18541_v59 = vld [vmem:[%s25494_s3 + $0x214] ss:$52 sps:$4 sm:$0xff]  }
 0x260   : > { %7098 = vmatprep.subr.bf16.mxu1 %v25518_v35  ;;  %v3796_v10 = vmax.f32 %v3601_v53, 0.0  ;;  %v3605_v40 = vadd.f32 %v20172_v26, %v3403_v62  ;;  %v18552_v45 = vld [vmem:[%s25494_s3 + $0x348] ss:$52 sps:$4 sm:$0xff]   ;;  %v3799_v2 = vmax.f32 %v3604_v17, 0.0 }
 0x261   : > { %v3600_v57 = vadd.f32 %v20172_v26, %v3398_v41 }
 0x262   : > { %v3800_v47 = vmax.f32 %v3605_v40, 0.0 }
 0x263   : > { %7099 = vmatpush1.bf16.msra.mxu1 %v20201_v46  ;;  %v18540_v46 = vld [vmem:[%s25494_s3 + $0x1a8] ss:$52 sps:$4 sm:$0xff]   ;;  %v3795_v9 = vmax.f32 %v3600_v57, 0.0 }
 0x264   : > { %7100 = vmatprep.subr.bf16.mxu1 %v25518_v35  ;;  %v3951_v31 = vpack.c.bf16 %v3800_v47, %v3799_v2 }
 0x265   : > { %v3949_v11 = vpack.c.bf16 %v3796_v10, %v3795_v9 }
 0x266   : > { %6865 = vmatmul.mubr.bf16.gmra.mrb[12].mxu1 %v18537_v49  ;;  %v18610_v49 = vld [vmem:[%s19514_s30 + $0x1f0] sm:$0xff]  }
 0x267   : > { %6872 = vmatprep.mubr.bf16.mxu1 %v18538_v54  ;;  %7101 = vmatpush1.bf16.msra.mxu1 %v20251_v25  ;;  %v20369_v25 = vmax.f32 %v20274_v4, %v20362_v22  ;;  %v3404_v4 = vmax.f32 %v2429_v12, %v2910_v39 }
 0x268   : > { %7102 = vmatprep.subr.bf16.mxu1 %v25518_v35  ;;  %16914 = vmatprep.mubr.msk.bf16.mxu0 %vm1200_vm2, %v18610_v49 }
 0x269   : > { %v2911_v29 = vrot.slane %v20369_v25, 1  ;;  %16915 = vmatmul.mubr.msk.bf16.gmra.mrb[124].mxu0 %vm1200_vm2, %v18611_v44 }
 0x26b   : > { %7103 = vmatpush1.bf16.msra.mxu1 %v20262_v38  ;;  %v2912_v27 = vsel %vm2731_vm3, %v2909_v24, %v2911_v29  ;;  %v3602_v38 = vadd.f32 %v20172_v26, %v3400_v37 }
 0x26c   : > { %7104 = vmatprep.subr.bf16.mxu1 %v25518_v35 }
 0x26d   : > { %v3797_v61 = vmax.f32 %v3602_v38, 0.0 }
 0x26e   : > { %6873 = vmatmul.mubr.bf16.gmra.mrb[16].mxu1 %v18540_v46  ;;  %v3606_v46 = vadd.f32 %v20172_v26, %v3404_v4 }
 0x26f   : > { %6880 = vmatprep.mubr.bf16.mxu1 %v18541_v59  ;;  %7105 = vmatpush1.bf16.msra.mxu1 %v3948_v48  ;;  %v3950_v43 = vpack.c.bf16 %v3798_v50, %v3797_v61  ;;  %v3405_v59 = vmax.f32 %v20356_v16, %v2912_v27 }
 0x270   : > { %7106 = vmatprep.subr.bf16.mxu1 %v25518_v35  ;;  %v3801_v52 = vmax.f32 %v3606_v46, 0.0 }
 0x271   : > { %v3607_v21 = vadd.f32 %v20172_v26, %v3405_v59 }
 0x273   : > { %7107 = vmatpush1.bf16.msra.mxu1 %v3949_v11  ;;  %v18559_v11 = vld [vmem:[%s25494_s3 + $0x484] ss:$52 sps:$4 sm:$0xff]   ;;  %v3802_v12 = vmax.f32 %v3607_v21, 0.0 }
 0x274   : > { %7108 = vmatprep.subr.bf16.mxu1 %v25518_v35 }
 0x275   : > { %v3952_v20 = vpack.c.bf16 %v3802_v12, %v3801_v52 }
 0x276   : > { %6881 = vmatmul.mubr.bf16.gmra.mrb[20].mxu1 %v18543_v14 }
 0x277   : > { %6888 = vmatprep.mubr.bf16.mxu1 %v18544_v0  ;;  %7109 = vmatpush1.bf16.msra.mxu1 %v3950_v43 }
 0x278   : > { %7110 = vmatprep.subr.bf16.mxu1 %v25518_v35 }
 0x27b   : > { %7111 = vmatpush1.bf16.msra.mxu1 %v3951_v31 }
 0x27c   : > { %7112 = vmatprep.subr.bf16.mxu1 %v25518_v35 }
 0x27e   : > { %6889 = vmatmul.mubr.bf16.gmra.mrb[24].mxu1 %v18546_v56 }
 0x27f   : > { %6896 = vmatprep.mubr.bf16.mxu1 %v18547_v7  ;;  %7113 = vmatpush1.bf16.msra.mxu1 %v3952_v20 }
 0x280   : > { %7114 = vmatprep.subr.bf16.mxu1 %v25518_v35 }
 0x285   : > { %v16888_v36 = vpop.f32.mrb[96].mxu0 }
 0x286   : > { %6897 = vmatmul.mubr.bf16.gmra.mrb[28].mxu1 %v18549_v18  ;;  %v2434_v37 = vmax.f32 %v1913_v34, %v16888_v36  ;;  %v1926_v60 = vpop.f32.mrb[97].mxu0 }
 0x287   : > { %6904 = vmatprep.mubr.bf16.mxu1 %v18550_v42  ;;  %v2432_v55 = vmax.f32 %v20286_v15, %v1926_v60  ;;  %v20415_v58 = vpop.f32.mrb[98].mxu0  ;;  %v18558_v15 = vld [vmem:[%s25494_s3 + $0x418] ss:$52 sps:$4 sm:$0xff]  }
 0x288   : > { %v2917_v54 = vrot.slane %v2434_v37, 1  ;;  %v20421_v48 = vmax.f32 %v20352_v6, %v20415_v58  ;;  %v1929_v41 = vpop.f32.mrb[99].mxu0  ;;  %v18562_v42 = vld [vmem:[%s25494_s3 + $0x4ec] ss:$52 sps:$4 sm:$0xff]  }
 0x289   : > { %v2913_v5 = vrot.slane %v2432_v55, 1  ;;  %v2433_v57 = vmax.f32 %v20358_v8, %v1929_v41 }
 0x28a   : > { %v2919_v53 = vrot.slane %v20421_v48, 1 }
 0x28b   : > { %v2914_v9 = vsel %vm2731_vm3, %v2911_v29, %v2913_v5  ;;  %v2915_v10 = vrot.slane %v2433_v57, 1 }
 0x28c   : > { %v2920_v14 = vsel %vm2731_vm3, %v2917_v54, %v2919_v53  ;;  %v3406_v29 = vmax.f32 %v20369_v25, %v2914_v9  ;;  %v18561_v25 = vld [vmem:[%s25494_s3 + $0x480] ss:$52 sps:$4 sm:$0xff]  }
 0x28d   : > { %v2916_v0 = vsel %vm2731_vm3, %v2913_v5, %v2915_v10  ;;  %v2918_v6 = vsel %vm2731_vm3, %v2915_v10, %v2917_v54  ;;  %v16892_v8 = vpop.f32.mrb[100].mxu0  ;;  %v3409_v50 = vmax.f32 %v2434_v37, %v2920_v14  ;;  %v18565_v9 = vld [vmem:[%s25494_s3 + $0x554] ss:$52 sps:$4 sm:$0xff]  }
 0x28e   : > { %6905 = vmatmul.mubr.bf16.gmra.mrb[32].mxu1 %v18552_v45  ;;  %v3408_v51 = vmax.f32 %v2433_v57, %v2918_v6  ;;  %v20440_v23 = vmax.f32 %v1929_v41, %v16892_v8  ;;  %v1942_v24 = vpop.f32.mrb[101].mxu0  ;;  %v3407_v7 = vmax.f32 %v2432_v55, %v2916_v0  ;;  %v3608_v39 = vadd.f32 %v20172_v26, %v3406_v29 }
 0x28f   : > { %6912 = vmatprep.mubr.bf16.mxu1 %v18553_v13  ;;  %v2436_v16 = vmax.f32 %v20362_v22, %v1942_v24  ;;  %v20443_v34 = vpop.f32.mrb[102].mxu0  ;;  %v3611_v40 = vadd.f32 %v20172_v26, %v3409_v50 }
 0x290   : > { %v2925_v56 = vrot.slane %v20440_v23, 1  ;;  %v20448_v19 = vmax.f32 %v16888_v36, %v20443_v34  ;;  %v1945_v33 = vpop.f32.mrb[103].mxu0  ;;  %v3610_v22 = vadd.f32 %v20172_v26, %v3408_v51  ;;  %v3609_v63 = vadd.f32 %v20172_v26, %v3407_v7 }
 0x291   : > { %v2921_v27 = vrot.slane %v2436_v16, 1  ;;  %v2437_v38 = vmax.f32 %v1926_v60, %v1945_v33  ;;  %v3803_v18 = vmax.f32 %v3608_v39, 0.0 }
 0x292   : > { %v2927_v4 = vrot.slane %v20448_v19, 1  ;;  %v3804_v28 = vmax.f32 %v3609_v63, 0.0 }
 0x293   : > { %v2922_v3 = vsel %vm2731_vm3, %v2919_v53, %v2921_v27  ;;  %v2923_v61 = vrot.slane %v2437_v38, 1 }
 0x294   : > { %v2928_v43 = vsel %vm2731_vm3, %v2925_v56, %v2927_v4  ;;  %v3953_v47 = vpack.c.bf16 %v3804_v28, %v3803_v18  ;;  %v3410_v36 = vmax.f32 %v20421_v48, %v2922_v3 }
 0x295   : > { %v2924_v62 = vsel %vm2731_vm3, %v2921_v27, %v2923_v61  ;;  %v2926_v17 = vsel %vm2731_vm3, %v2923_v61, %v2925_v56  ;;  %v16896_v2 = vpop.f32.mrb[104].mxu0  ;;  %v3413_v12 = vmax.f32 %v20440_v23, %v2928_v43  ;;  %v18570_v61 = vld [vmem:[%s25494_s3 + $0x5bc] ss:$52 sps:$4 sm:$0xff]  }
 0x296   : > { %6913 = vmatmul.mubr.bf16.gmra.mrb[36].mxu1 %v18555_v32  ;;  %v3412_v45 = vmax.f32 %v2437_v38, %v2926_v17  ;;  %v20466_v13 = vmax.f32 %v1945_v33, %v16896_v2  ;;  %v1958_v31 = vpop.f32.mrb[105].mxu0  ;;  %v3805_v32 = vmax.f32 %v3610_v22, 0.0  ;;  %v3411_v55 = vmax.f32 %v2436_v16, %v2924_v62 }
 0x297   : > { %6920 = vmatprep.mubr.bf16.mxu1 %v18556_v30  ;;  %v3806_v30 = vmax.f32 %v3611_v40, 0.0  ;;  %v2440_v37 = vmax.f32 %v20415_v58, %v1958_v31  ;;  %7115 = vmatpush1.bf16.msra.mxu1 %v3953_v47  ;;  %v20470_v60 = vpop.f32.mrb[106].mxu0  ;;  %v3612_v5 = vadd.f32 %v20172_v26, %v3410_v36  ;;  %v18564_v58 = vld [vmem:[%s25494_s3 + $0x4e8] ss:$52 sps:$4 sm:$0xff]   ;;  %v3615_v23 = vadd.f32 %v20172_v26, %v3413_v12  ;;  %v18586_v12 = vld [vmem:[%s25494_s3 + $0x758] ss:$52 sps:$4 sm:$0xff]  }
 0x298   : > { %v2933_v49 = vrot.slane %v20466_v13, 1  ;;  %v20474_v44 = vmax.f32 %v16892_v8, %v20470_v60  ;;  %v1961_v54 = vpop.f32.mrb[107].mxu0  ;;  %7116 = vmatprep.subr.bf16.mxu1 %v25518_v35  ;;  %v3613_v53 = vadd.f32 %v20172_v26, %v3411_v55  ;;  %v3614_v0 = vadd.f32 %v20172_v26, %v3412_v45 }
 0x299   : > { %v3954_v41 = vpack.c.bf16 %v3806_v30, %v3805_v32  ;;  %v2929_v57 = vrot.slane %v2440_v37, 1  ;;  %v2441_v48 = vmax.f32 %v1942_v24, %v1961_v54  ;;  %v3807_v46 = vmax.f32 %v3612_v5, 0.0  ;;  %v18625_v32 = vld [vmem:[%s19514_s30 + $0x208] sm:$0xff]  }
 0x29a   : > { %v3810_v3 = vmax.f32 %v3615_v23, 0.0  ;;  %v18593_v23 = vld [vmem:[%s25494_s3 + $0x894] ss:$52 sps:$4 sm:$0xff]  }
 0x29b   : > { %v2930_v10 = vsel %vm2731_vm3, %v2927_v4, %v2929_v57  ;;  %v2931_v59 = vrot.slane %v2441_v48, 1  ;;  %7117 = vmatpush1.bf16.msra.mxu1 %v3954_v41  ;;  %v18567_v4 = vld [vmem:[%s25494_s3 + $0x550] ss:$52 sps:$4 sm:$0xff]  }
 0x29c   : > { %7118 = vmatprep.subr.bf16.mxu1 %v25518_v35  ;;  %v3414_v29 = vmax.f32 %v20448_v19, %v2930_v10  ;;  %v18576_v10 = vld [vmem:[%s25494_s3 + $0x68c] ss:$52 sps:$4 sm:$0xff]  }
 0x29d   : > { %v2932_v6 = vsel %vm2731_vm3, %v2929_v57, %v2931_v59  ;;  %v2934_v8 = vsel %vm2731_vm3, %v2931_v59, %v2933_v49  ;;  %v20492_v21 = vpop.f32.mrb[108].mxu0  ;;  %v18633_v59 = vld [vmem:[%s19514_s30 + $0x220] sm:$0xff]  }
 0x29e   : > { %6921 = vmatmul.mubr.bf16.gmra.mrb[40].mxu1 %v18558_v15  ;;  %v2935_v15 = vrot.slane %v20474_v44, 1  ;;  %v3416_v24 = vmax.f32 %v2441_v48, %v2934_v8  ;;  %v20495_v16 = vmax.f32 %v1961_v54, %v20492_v21  ;;  %v20497_v52 = vpop.f32.mrb[109].mxu0  ;;  %v3415_v7 = vmax.f32 %v2440_v37, %v2932_v6  ;;  %v18573_v48 = vld [vmem:[%s25494_s3 + $0x624] ss:$52 sps:$4 sm:$0xff]   ;;  %v18638_v6 = vld [vmem:[%s19514_s30 + $0x230] sm:$0xff]  }
 0x29f   : > { %6928 = vmatprep.mubr.bf16.mxu1 %v18559_v11  ;;  %v3808_v11 = vmax.f32 %v3613_v53, 0.0  ;;  %v2444_v56 = vmax.f32 %v20443_v34, %v20497_v52  ;;  %v20503_v33 = vpop.f32.mrb[110].mxu0  ;;  %v3616_v34 = vadd.f32 %v20172_v26, %v3414_v29  ;;  %v18639_v8 = vld [vmem:[%s19514_s30 + $0x238] sm:$0xff]  }
 0x2a0   : > { %v2936_v14 = vsel %vm2731_vm3, %v2933_v49, %v2935_v15  ;;  %v2941_v27 = vrot.slane %v20495_v16, 1  ;;  %v20507_v38 = vmax.f32 %v16896_v2, %v20503_v33  ;;  %v20509_v20 = vpop.f32.mrb[111].mxu0  ;;  %v3617_v22 = vadd.f32 %v20172_v26, %v3415_v7  ;;  %v18587_v29 = vld [vmem:[%s25494_s3 + $0x7c4] ss:$52 sps:$4 sm:$0xff]   ;;  %v18590_v7 = vld [vmem:[%s25494_s3 + $0x82c] ss:$52 sps:$4 sm:$0xff]  }
 0x2a1   : > { %v3955_v51 = vpack.c.bf16 %v3808_v11, %v3807_v46  ;;  %v2937_v19 = vrot.slane %v2444_v56, 1  ;;  %v20514_v39 = vmax.f32 %v1958_v31, %v20509_v20  ;;  %v3618_v17 = vadd.f32 %v20172_v26, %v3416_v24  ;;  %v18624_v31 = vld [vmem:[%s19514_s30 + $0x200] sm:$0xff]   ;;  %v18629_v46 = vld [vmem:[%s19514_s30 + $0x218] sm:$0xff]   ;;  %v18634_v11 = vld [vmem:[%s19514_s30 + $0x228] sm:$0xff]  }
 0x2a2   : > { %v2943_v63 = vrot.slane %v20507_v38, 1  ;;  %v3812_v43 = vmax.f32 %v3617_v22, 0.0  ;;  %v3417_v30 = vmax.f32 %v20466_v13, %v2936_v14  ;;  %16918 = vmatprep.mubr.msk.bf16.mxu0 %vm1200_vm2, %v18624_v31  ;;  %v18572_v13 = vld [vmem:[%s25494_s3 + $0x5b8] ss:$52 sps:$4 sm:$0xff]   ;;  %v18578_v14 = vld [vmem:[%s25494_s3 + $0x688] ss:$52 sps:$4 sm:$0xff]  }
 0x2a3   : > { %7119 = vmatpush1.bf16.msra.mxu1 %v3955_v51  ;;  %v2938_v18 = vsel %vm2731_vm3, %v2935_v15, %v2937_v19  ;;  %v2939_v50 = vrot.slane %v20514_v39, 1  ;;  %16919 = vmatmul.mubr.msk.bf16.gmra.mrb[128].mxu0 %vm1200_vm2, %v18625_v32  ;;  %v3813_v41 = vmax.f32 %v3618_v17, 0.0  ;;  %v18628_v15 = vld [vmem:[%s19514_s30 + $0x210] sm:$0xff]   ;;  %v18600_v22 = vld [vmem:[%s25494_s3 + $0x8f8] ss:$52 sps:$4 sm:$0xff]  }
 0x2a4   : > { %7368 = vmatprep.subr.bf16.mxu1 %v25518_v35  ;;  %v20530_v28 = vsel %vm2731_vm3, %v2941_v27, %v2943_v63  ;;  %v3418_v36 = vmax.f32 %v20474_v44, %v2938_v18  ;;  %v3619_v55 = vadd.f32 %v20172_v26, %v3417_v30  ;;  %16922 = vmatprep.mubr.msk.bf16.mxu0 %vm1200_vm2, %v18628_v15  ;;  %v18581_v51 = vld [vmem:[%s25494_s3 + $0x6f0] ss:$52 sps:$4 sm:$0xff]   ;;  %v18607_v18 = vld [vmem:[%s25494_s3 + $0xa34] ss:$52 sps:$4 sm:$0xff]  }
 0x2a5   : > { %v2940_v40 = vsel %vm2731_vm3, %v2937_v19, %v2939_v50  ;;  %v20537_v45 = vsel %vm2731_vm3, %v2939_v50, %v2941_v27  ;;  %v18584_v24 = vld [vmem:[%s25494_s3 + $0x75c] ss:$52 sps:$4 sm:$0xff]  }
 0x2a6   : > { %6929 = vmatmul.mubr.bf16.gmra.mrb[44].mxu1 %v18561_v25  ;;  %v3809_v25 = vmax.f32 %v3614_v0, 0.0  ;;  %v3420_v47 = vmax.f32 %v20514_v39, %v20537_v45  ;;  %v3419_v37 = vmax.f32 %v2444_v56, %v2940_v40  ;;  %v3620_v49 = vadd.f32 %v20172_v26, %v3418_v36  ;;  %v18579_v0 = vld [vmem:[%s25494_s3 + $0x6f4] ss:$52 sps:$4 sm:$0xff]   ;;  %v18595_v19 = vld [vmem:[%s25494_s3 + $0x890] ss:$52 sps:$4 sm:$0xff]  }
 0x2a7   : > { %6936 = vmatprep.mubr.bf16.mxu1 %v18562_v42  ;;  %v3811_v42 = vmax.f32 %v3616_v34, 0.0  ;;  %v3814_v44 = vmax.f32 %v3619_v55, 0.0  ;;  %v18589_v56 = vld [vmem:[%s25494_s3 + $0x7c0] ss:$52 sps:$4 sm:$0xff]   ;;  %v18592_v27 = vld [vmem:[%s25494_s3 + $0x828] ss:$52 sps:$4 sm:$0xff]  }
 0x2a8   : > { %v20532_v62 = vpack.c.bf16 %v3810_v3, %v3809_v25  ;;  %v3621_v54 = vadd.f32 %v20172_v26, %v3419_v37  ;;  %v3815_v5 = vmax.f32 %v3620_v49, 0.0  ;;  %v18598_v34 = vld [vmem:[%s25494_s3 + $0x8fc] ss:$52 sps:$4 sm:$0xff]   ;;  %v18603_v25 = vld [vmem:[%s25494_s3 + $0x960] ss:$52 sps:$4 sm:$0xff]  }
 0x2a9   : > { %v20539_v2 = vpack.c.bf16 %v3812_v43, %v3811_v42  ;;  %v20558_v53 = vpack.c.bf16 %v3814_v44, %v3813_v41  ;;  %v18604_v3 = vld [vmem:[%s25494_s3 + $0x9cc] ss:$52 sps:$4 sm:$0xff]   ;;  %v18609_v36 = vld [vmem:[%s25494_s3 + $0xa30] ss:$52 sps:$4 sm:$0xff]  }
 0x2aa   : > { %v3816_v57 = vmax.f32 %v3621_v54, 0.0  ;;  %v3622_v54 = vadd.f32 %v20172_v26, %v3420_v47  ;;  %v18614_v39 = vld [vmem:[%s25494_s3 + $0xa98] ss:$52 sps:$4 sm:$0xff]  }
 0x2ab   : > { %16923 = vmatmul.mubr.msk.bf16.gmra.mrb[132].mxu0 %vm1200_vm2, %v18629_v46  ;;  %v18615_v45 = vld [vmem:[%s25494_s3 + $0xb04] ss:$52 sps:$4 sm:$0xff]  }
 0x2ac   : > { %16926 = vmatprep.mubr.msk.bf16.mxu0 %vm1200_vm2, %v18633_v59 }
 0x2ae   : > { %6937 = vmatmul.mubr.bf16.gmra.mrb[48].mxu1 %v18564_v58  ;;  %v20560_v58 = vpack.c.bf16 %v3816_v57, %v3815_v5  ;;  %v3421_v5 = vmax.f32 %v20495_v16, %v20530_v28  ;;  %v3817_v57 = vmax.f32 %v3622_v54, 0.0 }
 0x2af   : > { %6944 = vmatprep.mubr.bf16.mxu1 %v18565_v9  ;;  %v18575_v9 = vld [vmem:[%s25494_s3 + $0x620] ss:$52 sps:$4 sm:$0xff]  }
 0x2b2   : > { %v16904_v50 = vpop.f32.mrb[112].mxu0 }
 0x2b3   : > { %16927 = vmatmul.mubr.msk.bf16.gmra.mrb[136].mxu0 %vm1200_vm2, %v18634_v11  ;;  %v20635_v42 = vmax.f32 %v20509_v20, %v16904_v50  ;;  %v1990_v43 = vpop.f32.mrb[113].mxu0  ;;  %v18618_v11 = vld [vmem:[%s25494_s3 + $0xb6c] ss:$52 sps:$4 sm:$0xff]  }
 0x2b4   : > { %16930 = vmatprep.mubr.msk.bf16.mxu0 %vm1200_vm2, %v18638_v6  ;;  %v2448_v17 = vmax.f32 %v20470_v60, %v1990_v43  ;;  %v20638_v40 = vpop.f32.mrb[114].mxu0  ;;  %v18612_v60 = vld [vmem:[%s25494_s3 + $0xa9c] ss:$52 sps:$4 sm:$0xff]  }
 0x2b5   : > { %v2949_v31 = vrot.slane %v20635_v42, 1  ;;  %v20643_v32 = vmax.f32 %v20492_v21, %v20638_v40  ;;  %v1993_v30 = vpop.f32.mrb[115].mxu0 }
 0x2b6   : > { %6945 = vmatmul.mubr.bf16.gmra.mrb[52].mxu1 %v18567_v4  ;;  %v18601_v4 = vld [vmem:[%s25494_s3 + $0x964] ss:$52 sps:$4 sm:$0xff]   ;;  %v2945_v37 = vrot.slane %v2448_v17, 1  ;;  %v2449_v20 = vmax.f32 %v20497_v52, %v1993_v30 }
 0x2b7   : > { %6952 = vmatprep.mubr.bf16.mxu1 %v18570_v61  ;;  %v18606_v61 = vld [vmem:[%s25494_s3 + $0x9c8] ss:$52 sps:$4 sm:$0xff]   ;;  %v2951_v55 = vrot.slane %v20643_v32, 1 }
 0x2b8   : > { %v2946_v49 = vsel %vm2731_vm3, %v2943_v63, %v2945_v37  ;;  %v2947_v21 = vrot.slane %v2449_v20, 1  ;;  %v3623_v63 = vadd.f32 %v20172_v26, %v3421_v5  ;;  %v18635_v5 = vld [vmem:[%s25494_s3 + $0x7c] ss:$52 sps:$4 sm:$0xff]  }
 0x2b9   : > { %v3422_v15 = vmax.f32 %v20507_v38, %v2946_v49  ;;  %v18620_v38 = vld [vmem:[%s25494_s3 + $0xb68] ss:$52 sps:$4 sm:$0xff]  }
 0x2ba   : > { %v2948_v52 = vsel %vm2731_vm3, %v2945_v37, %v2947_v21  ;;  %v2950_v41 = vsel %vm2731_vm3, %v2947_v21, %v2949_v31  ;;  %v3818_v47 = vmax.f32 %v3623_v63, 0.0 }
 0x2bb   : > { %16931 = vmatmul.mubr.msk.bf16.gmra.mrb[140].mxu0 %vm1200_vm2, %v18639_v8  ;;  %v3424_v44 = vmax.f32 %v2449_v20, %v2950_v41  ;;  %v3423_v46 = vmax.f32 %v2448_v17, %v2948_v52  ;;  %v3624_v16 = vadd.f32 %v20172_v26, %v3422_v15  ;;  %v18676_v8 = vld [vmem:[%s19514_s30 + $0x240] sm:$0xff]  }
 0x2bc   : > { %16934 = vmatprep.mubr.msk.bf16.mxu0 %vm1200_vm2, %v18676_v8  ;;  %v18630_v52 = vld [vmem:[%s25494_s3 + $0x10] ss:$52 sps:$4 sm:$0xff]  }
 0x2bd   : > { %v3625_v28 = vadd.f32 %v20172_v26, %v3423_v46 }
 0x2be   : > { %6953 = vmatmul.mubr.bf16.gmra.mrb[56].mxu1 %v18572_v13  ;;  %v2952_v13 = vsel %vm2731_vm3, %v2949_v31, %v2951_v55 }
 0x2bf   : > { %6960 = vmatprep.mubr.bf16.mxu1 %v18573_v48  ;;  %v20672_v48 = vpack.c.bf16 %v3818_v47, %v3817_v57  ;;  %v3820_v59 = vmax.f32 %v3625_v28, 0.0  ;;  %v18691_v47 = vld [vmem:[%s19514_s30 + $0x258] sm:$0xff]  }
 0x2c6   : > { %6961 = vmatmul.mubr.bf16.gmra.mrb[60].mxu1 %v18575_v9  ;;  %v18617_v9 = vld [vmem:[%s25494_s3 + $0xb00] ss:$52 sps:$4 sm:$0xff]  }
 0x2c7   : > { %6968 = vmatprep.mubr.bf16.mxu1 %v18576_v10  ;;  %v3819_v10 = vmax.f32 %v3624_v16, 0.0 }
 0x2ce   : > { %6969 = vmatmul.mubr.bf16.gmra.mrb[64].mxu1 %v18578_v14  ;;  %v20683_v14 = vpack.c.bf16 %v3820_v59, %v3819_v10  ;;  %v18643_v59 = vld [vmem:[%s25494_s3 + $0x14c] ss:$52 sps:$4 sm:$0xff]  }
 0x2cf   : > { %6976 = vmatprep.mubr.bf16.mxu1 %v18579_v0  ;;  %v18621_v0 = vld [vmem:[%s25494_s3 + $0xbd4] ss:$52 sps:$4 sm:$0xff]  }
 0x2d6   : > { %6977 = vmatmul.mubr.bf16.gmra.mrb[68].mxu1 %v18581_v51  ;;  %v18677_v51 = vld [vmem:[%s19514_s30 + $0x248] sm:$0xff]  }
 0x2d7   : > { %6984 = vmatprep.mubr.bf16.mxu1 %v18584_v24  ;;  %16935 = vmatmul.mubr.msk.bf16.gmra.mrb[144].mxu0 %vm1200_vm2, %v18677_v51 }
 0x2de   : > { %6985 = vmatmul.mubr.bf16.gmra.mrb[72].mxu1 %v18586_v12 }
 0x2df   : > { %6992 = vmatprep.mubr.bf16.mxu1 %v18587_v29  ;;  %v4427_v29 = vld [vmem:[%s25494_s3 + $0xc38] sm:$0x77] }
 0x2e0   : > { %v16010_v20 = vcombine.low %v4427_v29, %v4427_v29 }
 0x2e5   : > { %v20691_v6 = vpop.f32.mrb[116].mxu0 }
 0x2e6   : > { %6993 = vmatmul.mubr.bf16.gmra.mrb[76].mxu1 %v18589_v56  ;;  %v20696_v24 = vmax.f32 %v1993_v30, %v20691_v6  ;;  %v20698_v12 = vpop.f32.mrb[117].mxu0 }
 0x2e7   : > { %7000 = vmatprep.mubr.bf16.mxu1 %v18590_v7  ;;  %v2452_v56 = vmax.f32 %v20503_v33, %v20698_v12  ;;  %v20705_v7 = vpop.f32.mrb[118].mxu0  ;;  %v16011_v33 = vcombine.high %v4427_v29, %v4427_v29 }
 0x2ee   : > { %7001 = vmatmul.mubr.bf16.gmra.mrb[80].mxu1 %v18592_v27  ;;  %v2957_v27 = vrot.slane %v20696_v24, 1 }
 0x2ef   : > { %7008 = vmatprep.mubr.bf16.mxu1 %v18593_v23  ;;  %v20710_v23 = vmax.f32 %v16904_v50, %v20705_v7 }
 0x2f6   : > { %7009 = vmatmul.mubr.bf16.gmra.mrb[84].mxu1 %v18595_v19  ;;  %v2009_v19 = vpop.f32.mrb[119].mxu0 }
 0x2f7   : > { %7016 = vmatprep.mubr.bf16.mxu1 %v18598_v34  ;;  %v18623_v34 = vld [vmem:[%s25494_s3 + $0xbd0] ss:$52 sps:$4 sm:$0xff]  }
 0x2fe   : > { %7017 = vmatmul.mubr.bf16.gmra.mrb[88].mxu1 %v18600_v22  ;;  %v2953_v22 = vrot.slane %v2452_v56, 1 }
 0x2ff   : > { %7024 = vmatprep.mubr.bf16.mxu1 %v18601_v4  ;;  %v20716_v4 = vmax.f32 %v1990_v43, %v2009_v19  ;;  %v3425_v43 = vmax.f32 %v20635_v42, %v2952_v13 }
 0x306   : > { %7025 = vmatmul.mubr.bf16.gmra.mrb[92].mxu1 %v18603_v25  ;;  %v2959_v25 = vrot.slane %v20710_v23, 1 }
 0x307   : > { %7032 = vmatprep.mubr.bf16.mxu1 %v18604_v3  ;;  %v3626_v3 = vadd.f32 %v20172_v26, %v3424_v44 }
 0x308   : > { %v20723_v50 = vsel %vm2731_vm3, %v2957_v27, %v2959_v25 }
 0x309   : > { %v3821_v37 = vmax.f32 %v3626_v3, 0.0  ;;  %v3429_v29 = vmax.f32 %v20696_v24, %v20723_v50  ;;  %v18651_v50 = vld [vmem:[%s25494_s3 + $0x218] ss:$52 sps:$4 sm:$0xff]  }
 0x30e   : > { %7033 = vmatmul.mubr.bf16.gmra.mrb[96].mxu1 %v18606_v61  ;;  %v2954_v61 = vsel %vm2731_vm3, %v2951_v55, %v2953_v22  ;;  %v18632_v55 = vld [vmem:[%s25494_s3 + $0x14] ss:$52 sps:$4 sm:$0xff]  }
 0x30f   : > { %7040 = vmatprep.mubr.bf16.mxu1 %v18607_v18  ;;  %v2955_v18 = vrot.slane %v20716_v4, 1  ;;  %v3426_v21 = vmax.f32 %v20643_v32, %v2954_v61  ;;  %v18640_v32 = vld [vmem:[%s25494_s3 + $0xe4] ss:$52 sps:$4 sm:$0xff]  }
 0x311   : > { %v2956_v17 = vsel %vm2731_vm3, %v2953_v22, %v2955_v18  ;;  %v2958_v31 = vsel %vm2731_vm3, %v2955_v18, %v2957_v27  ;;  %v3628_v42 = vadd.f32 %v20172_v26, %v3426_v21  ;;  %v18646_v22 = vld [vmem:[%s25494_s3 + $0x1b4] ss:$52 sps:$4 sm:$0xff]  }
 0x312   : > { %v3428_v30 = vmax.f32 %v20716_v4, %v2958_v31  ;;  %v3427_v54 = vmax.f32 %v2452_v56, %v2956_v17  ;;  %v18652_v17 = vld [vmem:[%s25494_s3 + $0x284] ss:$52 sps:$4 sm:$0xff]  }
 0x313   : > { %v3823_v41 = vmax.f32 %v3628_v42, 0.0 }
 0x314   : > { %v3629_v13 = vadd.f32 %v20172_v26, %v3427_v54 }
 0x316   : > { %7041 = vmatmul.mubr.bf16.gmra.mrb[100].mxu1 %v18609_v36  ;;  %v3627_v36 = vadd.f32 %v20172_v26, %v3425_v43  ;;  %v3824_v44 = vmax.f32 %v3629_v13, 0.0  ;;  %v18637_v26 = vld [vmem:[%s25494_s3 + $0x78] ss:$52 sps:$4 sm:$0xff]  }
 0x317   : > { %7048 = vmatprep.mubr.bf16.mxu1 %v18612_v60 }
 0x318   : > { %v3822_v60 = vmax.f32 %v3627_v36, 0.0  ;;  %v20744_v63 = vpack.c.bf16 %v3824_v44, %v3823_v41  ;;  %v18655_v44 = vld [vmem:[%s25494_s3 + $0x2ec] ss:$52 sps:$4 sm:$0xff]  }
 0x31a   : > { %v20733_v49 = vpack.c.bf16 %v3822_v60, %v3821_v37  ;;  %v18705_v60 = vld [vmem:[%s19514_s30 + $0x268] sm:$0xff]  }
 0x31b   : > { %v20756_v57 = vpop.f32.mrb[120].mxu0 }
 0x31e   : > { %7049 = vmatmul.mubr.bf16.gmra.mrb[104].mxu1 %v18614_v39  ;;  %v20759_v39 = vmax.f32 %v2009_v19, %v20756_v57  ;;  %v18645_v19 = vld [vmem:[%s25494_s3 + $0x148] ss:$52 sps:$4 sm:$0xff]  }
 0x31f   : > { %7056 = vmatprep.mubr.bf16.mxu1 %v18615_v45  ;;  %v18690_v45 = vld [vmem:[%s19514_s30 + $0x250] sm:$0xff]  }
 0x320   : > { %v2965_v46 = vrot.slane %v20759_v39, 1  ;;  %16938 = vmatprep.mubr.msk.bf16.mxu0 %vm1200_vm2, %v18690_v45 }
 0x321   : > { %16939 = vmatmul.mubr.msk.bf16.gmra.mrb[148].mxu0 %vm1200_vm2, %v18691_v47 }
 0x326   : > { %7057 = vmatmul.mubr.bf16.gmra.mrb[108].mxu1 %v18617_v9 }
 0x327   : > { %7064 = vmatprep.mubr.bf16.mxu1 %v18618_v11 }
 0x32e   : > { %7065 = vmatmul.mubr.bf16.gmra.mrb[112].mxu1 %v18620_v38 }
 0x32f   : > { %7072 = vmatprep.mubr.bf16.mxu1 %v18621_v0  ;;  %v20795_v0 = vld [vmem:[%s25493_s2] ss:$0 sm:$0xff] }
 0x330   : > { %v3631_v56 = vadd.f32 %v20795_v0, %v3429_v29 }
 0x336   : > { %7073 = vmatmul.mubr.bf16.gmra.mrb[116].mxu1 %v18623_v34  ;;  %v3826_v34 = vmax.f32 %v3631_v56, 0.0 }
 0x337   : > { %7080 = vmatprep.mubr.bf16.mxu1 %v16011_v33 }
 0x33e   : > { %7081 = vmatmul.mubr.bf16.gmra.mrb[120].mxu1 %v16010_v20  ;;  %v18704_v20 = vld [vmem:[%s19514_s30 + $0x260] sm:$0xff]  }
 0x33f   : > { %7120 = vmatprep.mubr.bf16.mxu1 %v18632_v55  ;;  %16942 = vmatprep.mubr.msk.bf16.mxu0 %vm1200_vm2, %v18704_v20 }
 0x340   : > { %16943 = vmatmul.mubr.msk.bf16.gmra.mrb[152].mxu0 %vm1200_vm2, %v18705_v60 }
 0x346   : > { %7121 = vmatmul.mubr.bf16.vlgmr.msra.gmra.mrb[0].mxu1 %v18630_v52 }
 0x347   : > { %7369 = vmatpush1.bf16.msra.mxu1 %v20532_v62  ;;  %7128 = vmatprep.mubr.bf16.mxu1 %v18635_v5  ;;  %v20761_v62 = vpop.f32.mrb[121].mxu0 }
 0x348   : > { %7370 = vmatprep.subr.bf16.mxu1 %v25518_v35  ;;  %v20768_v15 = vpop.f32.mrb[122].mxu0 }
 0x349   : > { %v20774_v16 = vmax.f32 %v20691_v6, %v20768_v15  ;;  %v2025_v28 = vpop.f32.mrb[123].mxu0  ;;  %v3630_v6 = vadd.f32 %v20795_v0, %v3428_v30 }
 0x34a   : > { %v20839_v31 = vpop.f32.mrb[124].mxu0 }
 0x34b   : > { %7371 = vmatpush1.bf16.msra.mxu1 %v20539_v2  ;;  %v2456_v2 = vmax.f32 %v20638_v40, %v20761_v62  ;;  %v18642_v40 = vld [vmem:[%s25494_s3 + $0xe0] ss:$52 sps:$4 sm:$0xff]   ;;  %v2967_v10 = vrot.slane %v20774_v16, 1  ;;  %v3825_v27 = vmax.f32 %v3630_v6, 0.0  ;;  %v20843_v43 = vmax.f32 %v2025_v28, %v20839_v31  ;;  %v20845_v30 = vpop.f32.mrb[125].mxu0 }
 0x34c   : > { %7372 = vmatprep.subr.bf16.mxu1 %v25518_v35  ;;  %v2460_v36 = vmax.f32 %v20705_v7, %v20845_v30  ;;  %v20849_v37 = vpop.f32.mrb[126].mxu0  ;;  %v18654_v7 = vld [vmem:[%s25494_s3 + $0x280] ss:$52 sps:$4 sm:$0xff]  }
 0x34d   : > { %v2961_v9 = vrot.slane %v2456_v2, 1  ;;  %v3964_v24 = vpack.c.bf16 %v3826_v34, %v3825_v27  ;;  %v2973_v55 = vrot.slane %v20843_v43, 1  ;;  %v2041_v21 = vpop.f32.mrb[127].mxu0  ;;  %v18719_v34 = vld [vmem:[%s19514_s30 + $0x278] sm:$0xff]  }
 0x34e   : > { %7129 = vmatmul.mubr.bf16.gmra.mrb[4].mxu1 %v18637_v26  ;;  %v2969_v54 = vrot.slane %v2460_v36, 1  ;;  %v2461_v42 = vmax.f32 %v20761_v62, %v2041_v21 }
 0x34f   : > { %7373 = vmatpush1.bf16.msra.mxu1 %v20558_v53  ;;  %7136 = vmatprep.mubr.bf16.mxu1 %v18640_v32  ;;  %v20778_v53 = vmax.f32 %v20698_v12, %v2025_v28  ;;  %v2962_v11 = vsel %vm2731_vm3, %v2959_v25, %v2961_v9  ;;  %v18658_v28 = vld [vmem:[%s25494_s3 + $0x354] ss:$52 sps:$4 sm:$0xff]  }
 0x350   : > { %7374 = vmatprep.subr.bf16.mxu1 %v25518_v35  ;;  %v2970_v52 = vsel %vm2731_vm3, %v2967_v10, %v2969_v54  ;;  %v2971_v41 = vrot.slane %v2461_v42, 1 }
 0x351   : > { %v2963_v38 = vrot.slane %v20778_v53, 1 }
 0x352   : > { %v2972_v26 = vsel %vm2731_vm3, %v2969_v54, %v2971_v41  ;;  %v2974_v32 = vsel %vm2731_vm3, %v2971_v41, %v2973_v55 }
 0x353   : > { %7375 = vmatpush1.bf16.msra.mxu1 %v20560_v58  ;;  %v20801_v58 = vsel %vm2731_vm3, %v2965_v46, %v2967_v10  ;;  %v2964_v8 = vsel %vm2731_vm3, %v2961_v9, %v2963_v38  ;;  %v2966_v51 = vsel %vm2731_vm3, %v2963_v38, %v2965_v46 }
 0x354   : > { %7376 = vmatprep.subr.bf16.mxu1 %v25518_v35  ;;  %v3432_v12 = vmax.f32 %v20778_v53, %v2966_v51  ;;  %v3431_v4 = vmax.f32 %v2456_v2, %v2964_v8  ;;  %v3433_v62 = vmax.f32 %v20759_v39, %v20801_v58  ;;  %v18657_v2 = vld [vmem:[%s25494_s3 + $0x2e8] ss:$52 sps:$4 sm:$0xff]   ;;  %v3434_v53 = vmax.f32 %v20774_v16, %v2970_v52  ;;  %v18663_v58 = vld [vmem:[%s25494_s3 + $0x3b8] ss:$52 sps:$4 sm:$0xff]  }
 0x355   : > { %v18661_v16 = vld [vmem:[%s25494_s3 + $0x3bc] ss:$52 sps:$4 sm:$0xff]   ;;  %v18664_v8 = vld [vmem:[%s25494_s3 + $0x424] ss:$52 sps:$4 sm:$0xff]  }
 0x356   : > { %7137 = vmatmul.mubr.bf16.gmra.mrb[8].mxu1 %v18642_v40  ;;  %v3633_v25 = vadd.f32 %v20795_v0, %v3431_v4  ;;  %v3635_v45 = vadd.f32 %v20795_v0, %v3433_v62  ;;  %v3435_v40 = vmax.f32 %v2460_v36, %v2972_v26  ;;  %v3636_v39 = vadd.f32 %v20795_v0, %v3434_v53 }
 0x357   : > { %7144 = vmatprep.mubr.bf16.mxu1 %v18643_v59  ;;  %7377 = vmatpush1.bf16.msra.mxu1 %v20672_v48  ;;  %v3430_v48 = vmax.f32 %v20710_v23, %v2962_v11  ;;  %v18649_v23 = vld [vmem:[%s25494_s3 + $0x21c] ss:$52 sps:$4 sm:$0xff]  }
 0x358   : > { %7378 = vmatprep.subr.bf16.mxu1 %v25518_v35  ;;  %v3828_v61 = vmax.f32 %v3633_v25, 0.0  ;;  %v3830_v46 = vmax.f32 %v3635_v45, 0.0  ;;  %v3637_v10 = vadd.f32 %v20795_v0, %v3435_v40  ;;  %v18660_v59 = vld [vmem:[%s25494_s3 + $0x350] ss:$52 sps:$4 sm:$0xff]   ;;  %v3831_v11 = vmax.f32 %v3636_v39, 0.0 }
 0x359   : > { %v3632_v33 = vadd.f32 %v20795_v0, %v3430_v48 }
 0x35a   : > { %v3832_v38 = vmax.f32 %v3637_v10, 0.0 }
 0x35b   : > { %7379 = vmatpush1.bf16.msra.mxu1 %v20683_v14  ;;  %v18648_v14 = vld [vmem:[%s25494_s3 + $0x1b0] ss:$52 sps:$4 sm:$0xff]   ;;  %v3827_v3 = vmax.f32 %v3632_v33, 0.0 }
 0x35c   : > { %7380 = vmatprep.subr.bf16.mxu1 %v25518_v35  ;;  %v3967_v6 = vpack.c.bf16 %v3832_v38, %v3831_v11 }
 0x35d   : > { %v3965_v18 = vpack.c.bf16 %v3828_v61, %v3827_v3 }
 0x35e   : > { %7145 = vmatmul.mubr.bf16.gmra.mrb[12].mxu1 %v18645_v19  ;;  %v18718_v19 = vld [vmem:[%s19514_s30 + $0x270] sm:$0xff]  }
 0x35f   : > { %7152 = vmatprep.mubr.bf16.mxu1 %v18646_v22  ;;  %7381 = vmatpush1.bf16.msra.mxu1 %v20733_v49  ;;  %v20856_v49 = vmax.f32 %v20756_v57, %v20849_v37  ;;  %v3436_v57 = vmax.f32 %v2461_v42, %v2974_v32 }
 0x360   : > { %7382 = vmatprep.subr.bf16.mxu1 %v25518_v35  ;;  %16946 = vmatprep.mubr.msk.bf16.mxu0 %vm1200_vm2, %v18718_v19 }
 0x361   : > { %v2975_v13 = vrot.slane %v20856_v49, 1  ;;  %16947 = vmatmul.mubr.msk.bf16.gmra.mrb[156].mxu0 %vm1200_vm2, %v18719_v34 }
 0x363   : > { %7383 = vmatpush1.bf16.msra.mxu1 %v20744_v63  ;;  %v2976_v5 = vsel %vm2731_vm3, %v2973_v55, %v2975_v13  ;;  %v3634_v63 = vadd.f32 %v20795_v0, %v3432_v12 }
 0x364   : > { %7384 = vmatprep.subr.bf16.mxu1 %v25518_v35 }
 0x365   : > { %v3829_v47 = vmax.f32 %v3634_v63, 0.0 }
 0x366   : > { %7153 = vmatmul.mubr.bf16.gmra.mrb[16].mxu1 %v18648_v14  ;;  %v3638_v14 = vadd.f32 %v20795_v0, %v3436_v57 }
 0x367   : > { %7160 = vmatprep.mubr.bf16.mxu1 %v18649_v23  ;;  %7385 = vmatpush1.bf16.msra.mxu1 %v3964_v24  ;;  %v3966_v9 = vpack.c.bf16 %v3830_v46, %v3829_v47  ;;  %v3437_v23 = vmax.f32 %v20843_v43, %v2976_v5 }
 0x368   : > { %7386 = vmatprep.subr.bf16.mxu1 %v25518_v35  ;;  %v3833_v54 = vmax.f32 %v3638_v14, 0.0 }
 0x369   : > { %v3639_v36 = vadd.f32 %v20795_v0, %v3437_v23 }
 0x36b   : > { %7387 = vmatpush1.bf16.msra.mxu1 %v3965_v18  ;;  %v18667_v18 = vld [vmem:[%s25494_s3 + $0x48c] ss:$52 sps:$4 sm:$0xff]   ;;  %v3834_v42 = vmax.f32 %v3639_v36, 0.0 }
 0x36c   : > { %7388 = vmatprep.subr.bf16.mxu1 %v25518_v35 }
 0x36d   : > { %v3968_v26 = vpack.c.bf16 %v3834_v42, %v3833_v54 }
 0x36e   : > { %7161 = vmatmul.mubr.bf16.gmra.mrb[20].mxu1 %v18651_v50 }
 0x36f   : > { %7168 = vmatprep.mubr.bf16.mxu1 %v18652_v17  ;;  %7389 = vmatpush1.bf16.msra.mxu1 %v3966_v9 }
 0x370   : > { %7390 = vmatprep.subr.bf16.mxu1 %v25518_v35 }
 0x373   : > { %7391 = vmatpush1.bf16.msra.mxu1 %v3967_v6 }
 0x374   : > { %7392 = vmatprep.subr.bf16.mxu1 %v25518_v35 }
 0x376   : > { %7169 = vmatmul.mubr.bf16.gmra.mrb[24].mxu1 %v18654_v7  ;;  %v16920_v51 = vpop.f32.mrb[128].mxu0 }
 0x377   : > { %7176 = vmatprep.mubr.bf16.mxu1 %v18655_v44  ;;  %v2466_v12 = vmax.f32 %v2041_v21, %v16920_v51  ;;  %v2054_v29 = vpop.f32.mrb[129].mxu0  ;;  %7393 = vmatpush1.bf16.msra.mxu1 %v3968_v26 }
 0x378   : > { %v2464_v56 = vmax.f32 %v20768_v15, %v2054_v29  ;;  %v20902_v27 = vpop.f32.mrb[130].mxu0  ;;  %v18666_v15 = vld [vmem:[%s25494_s3 + $0x420] ss:$52 sps:$4 sm:$0xff]   ;;  %7394 = vmatprep.subr.bf16.mxu1 %v25518_v35 }
 0x379   : > { %v2981_v22 = vrot.slane %v2466_v12, 1  ;;  %v20908_v24 = vmax.f32 %v20839_v31, %v20902_v27  ;;  %v2057_v48 = vpop.f32.mrb[131].mxu0 }
 0x37a   : > { %v2977_v4 = vrot.slane %v2464_v56, 1  ;;  %v2465_v33 = vmax.f32 %v20845_v30, %v2057_v48 }
 0x37b   : > { %v2983_v25 = vrot.slane %v20908_v24, 1 }
 0x37c   : > { %v2978_v3 = vsel %vm2731_vm3, %v2975_v13, %v2977_v4  ;;  %v2979_v61 = vrot.slane %v2465_v33, 1 }
 0x37d   : > { %v2984_v50 = vsel %vm2731_vm3, %v2981_v22, %v2983_v25  ;;  %v3438_v13 = vmax.f32 %v20856_v49, %v2978_v3  ;;  %v18669_v49 = vld [vmem:[%s25494_s3 + $0x488] ss:$52 sps:$4 sm:$0xff]  }
 0x37e   : > { %7177 = vmatmul.mubr.bf16.gmra.mrb[28].mxu1 %v18657_v2  ;;  %v2980_v17 = vsel %vm2731_vm3, %v2977_v4, %v2979_v61  ;;  %v2982_v31 = vsel %vm2731_vm3, %v2979_v61, %v2981_v22  ;;  %v16924_v30 = vpop.f32.mrb[132].mxu0  ;;  %v3441_v46 = vmax.f32 %v2466_v12, %v2984_v50  ;;  %v18673_v3 = vld [vmem:[%s25494_s3 + $0x55c] ss:$52 sps:$4 sm:$0xff]  }
 0x37f   : > { %7184 = vmatprep.mubr.bf16.mxu1 %v18658_v28  ;;  %v3440_v20 = vmax.f32 %v2465_v33, %v2982_v31  ;;  %v20927_v60 = vmax.f32 %v2057_v48, %v16924_v30  ;;  %v2070_v55 = vpop.f32.mrb[133].mxu0  ;;  %v3439_v44 = vmax.f32 %v2464_v56, %v2980_v17  ;;  %v3640_v32 = vadd.f32 %v20795_v0, %v3438_v13  ;;  %v18670_v28 = vld [vmem:[%s25494_s3 + $0x4f4] ss:$52 sps:$4 sm:$0xff]  }
 0x380   : > { %v2468_v43 = vmax.f32 %v20849_v37, %v2070_v55  ;;  %v20930_v21 = vpop.f32.mrb[134].mxu0  ;;  %v3643_v10 = vadd.f32 %v20795_v0, %v3441_v46 }
 0x381   : > { %v2989_v7 = vrot.slane %v20927_v60, 1  ;;  %v20935_v52 = vmax.f32 %v16920_v51, %v20930_v21  ;;  %v2073_v41 = vpop.f32.mrb[135].mxu0  ;;  %v3642_v37 = vadd.f32 %v20795_v0, %v3440_v20  ;;  %v3641_v62 = vadd.f32 %v20795_v0, %v3439_v44 }
 0x382   : > { %v2985_v5 = vrot.slane %v2468_v43, 1  ;;  %v2469_v63 = vmax.f32 %v2054_v29, %v2073_v41  ;;  %v3835_v2 = vmax.f32 %v3640_v32, 0.0 }
 0x383   : > { %v2991_v57 = vrot.slane %v20935_v52, 1  ;;  %v3836_v53 = vmax.f32 %v3641_v62, 0.0 }
 0x384   : > { %v2986_v45 = vsel %vm2731_vm3, %v2983_v25, %v2985_v5  ;;  %v2987_v47 = vrot.slane %v2469_v63, 1 }
 0x385   : > { %v2992_v9 = vsel %vm2731_vm3, %v2989_v7, %v2991_v57  ;;  %v3969_v38 = vpack.c.bf16 %v3836_v53, %v3835_v2  ;;  %v3442_v51 = vmax.f32 %v20908_v24, %v2986_v45 }
 0x386   : > { %7185 = vmatmul.mubr.bf16.gmra.mrb[32].mxu1 %v18660_v59  ;;  %v2988_v40 = vsel %vm2731_vm3, %v2985_v5, %v2987_v47  ;;  %v2990_v39 = vsel %vm2731_vm3, %v2987_v47, %v2989_v7  ;;  %v16928_v11 = vpop.f32.mrb[136].mxu0  ;;  %v3445_v42 = vmax.f32 %v20927_v60, %v2992_v9  ;;  %v18678_v47 = vld [vmem:[%s25494_s3 + $0x5c4] ss:$52 sps:$4 sm:$0xff]  }
 0x387   : > { %7192 = vmatprep.mubr.bf16.mxu1 %v18661_v16  ;;  %v3444_v59 = vmax.f32 %v2469_v63, %v2990_v39  ;;  %v20953_v16 = vmax.f32 %v2073_v41, %v16928_v11  ;;  %v2086_v6 = vpop.f32.mrb[137].mxu0  ;;  %7395 = vmatpush1.bf16.msra.mxu1 %v3969_v38  ;;  %v3443_v56 = vmax.f32 %v2468_v43, %v2988_v40 }
 0x388   : > { %v2472_v12 = vmax.f32 %v20902_v27, %v2086_v6  ;;  %v20957_v29 = vpop.f32.mrb[138].mxu0  ;;  %7396 = vmatprep.subr.bf16.mxu1 %v25518_v35  ;;  %v3644_v4 = vadd.f32 %v20795_v0, %v3442_v51  ;;  %v18672_v27 = vld [vmem:[%s25494_s3 + $0x4f0] ss:$52 sps:$4 sm:$0xff]   ;;  %v3647_v60 = vadd.f32 %v20795_v0, %v3445_v42  ;;  %v18694_v42 = vld [vmem:[%s25494_s3 + $0x760] ss:$52 sps:$4 sm:$0xff]  }
 0x389   : > { %v2997_v19 = vrot.slane %v20953_v16, 1  ;;  %v20961_v34 = vmax.f32 %v16924_v30, %v20957_v29  ;;  %v2089_v22 = vpop.f32.mrb[139].mxu0  ;;  %v3645_v25 = vadd.f32 %v20795_v0, %v3443_v56  ;;  %v3646_v17 = vadd.f32 %v20795_v0, %v3444_v59 }
 0x38a   : > { %v2993_v33 = vrot.slane %v2472_v12, 1  ;;  %v2473_v24 = vmax.f32 %v2070_v55, %v2089_v22  ;;  %v3839_v14 = vmax.f32 %v3644_v4, 0.0  ;;  %v3842_v45 = vmax.f32 %v3647_v60, 0.0  ;;  %v18701_v60 = vld [vmem:[%s25494_s3 + $0x89c] ss:$52 sps:$4 sm:$0xff]  }
 0x38c   : > { %v2994_v61 = vsel %vm2731_vm3, %v2991_v57, %v2993_v33  ;;  %v2995_v23 = vrot.slane %v2473_v24, 1  ;;  %v18675_v57 = vld [vmem:[%s25494_s3 + $0x558] ss:$52 sps:$4 sm:$0xff]  }
 0x38d   : > { %v3446_v13 = vmax.f32 %v20935_v52, %v2994_v61  ;;  %v18684_v61 = vld [vmem:[%s25494_s3 + $0x694] ss:$52 sps:$4 sm:$0xff]  }
 0x38e   : > { %7193 = vmatmul.mubr.bf16.gmra.mrb[36].mxu1 %v18663_v58  ;;  %v3837_v58 = vmax.f32 %v3642_v37, 0.0  ;;  %v2996_v31 = vsel %vm2731_vm3, %v2993_v33, %v2995_v23  ;;  %v2998_v30 = vsel %vm2731_vm3, %v2995_v23, %v2997_v19  ;;  %v20979_v36 = vpop.f32.mrb[140].mxu0  ;;  %v18741_v23 = vld [vmem:[%s19514_s30 + $0x2a0] sm:$0xff]  }
 0x38f   : > { %7200 = vmatprep.mubr.bf16.mxu1 %v18664_v8  ;;  %v3838_v8 = vmax.f32 %v3643_v10, 0.0  ;;  %v3448_v55 = vmax.f32 %v2473_v24, %v2998_v30  ;;  %v20982_v43 = vmax.f32 %v2089_v22, %v20979_v36  ;;  %v20984_v54 = vpop.f32.mrb[141].mxu0  ;;  %v3447_v44 = vmax.f32 %v2472_v12, %v2996_v31  ;;  %v18681_v24 = vld [vmem:[%s25494_s3 + $0x62c] ss:$52 sps:$4 sm:$0xff]   ;;  %v18746_v31 = vld [vmem:[%s19514_s30 + $0x2b0] sm:$0xff]   ;;  %v18747_v30 = vld [vmem:[%s19514_s30 + $0x2b8] sm:$0xff]  }
 0x390   : > { %v2476_v7 = vmax.f32 %v20930_v21, %v20984_v54  ;;  %v20990_v41 = vpop.f32.mrb[142].mxu0  ;;  %v3648_v21 = vadd.f32 %v20795_v0, %v3446_v13  ;;  %v18695_v13 = vld [vmem:[%s25494_s3 + $0x7cc] ss:$52 sps:$4 sm:$0xff]  }
 0x391   : > { %v3970_v48 = vpack.c.bf16 %v3838_v8, %v3837_v58  ;;  %v3005_v5 = vrot.slane %v20982_v43, 1  ;;  %v20994_v63 = vmax.f32 %v16928_v11, %v20990_v41  ;;  %v20996_v26 = vpop.f32.mrb[143].mxu0  ;;  %v3649_v37 = vadd.f32 %v20795_v0, %v3447_v44  ;;  %v18733_v58 = vld [vmem:[%s19514_s30 + $0x288] sm:$0xff]  }
 0x392   : > { %v3001_v52 = vrot.slane %v2476_v7, 1  ;;  %v21001_v32 = vmax.f32 %v2086_v6, %v20996_v26  ;;  %v3650_v39 = vadd.f32 %v20795_v0, %v3448_v55  ;;  %v18732_v6 = vld [vmem:[%s19514_s30 + $0x280] sm:$0xff]   ;;  %v18698_v44 = vld [vmem:[%s25494_s3 + $0x834] ss:$52 sps:$4 sm:$0xff]  }
 0x393   : > { %7397 = vmatpush1.bf16.msra.mxu1 %v3970_v48  ;;  %v3007_v62 = vrot.slane %v20994_v63, 1  ;;  %v3844_v9 = vmax.f32 %v3649_v37, 0.0  ;;  %16950 = vmatprep.mubr.msk.bf16.mxu0 %vm1200_vm2, %v18732_v6  ;;  %v18692_v55 = vld [vmem:[%s25494_s3 + $0x764] ss:$52 sps:$4 sm:$0xff]   ;;  %v18708_v37 = vld [vmem:[%s25494_s3 + $0x900] ss:$52 sps:$4 sm:$0xff]  }
 0x394   : > { %7398 = vmatprep.subr.bf16.mxu1 %v25518_v35  ;;  %v3003_v46 = vrot.slane %v21001_v32, 1  ;;  %16951 = vmatmul.mubr.msk.bf16.gmra.mrb[160].mxu0 %vm1200_vm2, %v18733_v58  ;;  %v3845_v48 = vmax.f32 %v3650_v39, 0.0 }
 0x395   : > { %v21017_v53 = vsel %vm2731_vm3, %v3005_v5, %v3007_v62 }
 0x396   : > { %7201 = vmatmul.mubr.bf16.gmra.mrb[40].mxu1 %v18666_v15  ;;  %v2999_v15 = vrot.slane %v20961_v34, 1  ;;  %v3004_v10 = vsel %vm2731_vm3, %v3001_v52, %v3003_v46  ;;  %v21024_v59 = vsel %vm2731_vm3, %v3003_v46, %v3005_v5  ;;  %v18700_v5 = vld [vmem:[%s25494_s3 + $0x830] ss:$52 sps:$4 sm:$0xff]  }
 0x397   : > { %7208 = vmatprep.mubr.bf16.mxu1 %v18667_v18  ;;  %v3840_v18 = vmax.f32 %v3645_v25, 0.0  ;;  %v3452_v38 = vmax.f32 %v21001_v32, %v21024_v59  ;;  %v3451_v12 = vmax.f32 %v2476_v7, %v3004_v10  ;;  %v18697_v7 = vld [vmem:[%s25494_s3 + $0x7c8] ss:$52 sps:$4 sm:$0xff]   ;;  %v18722_v32 = vld [vmem:[%s25494_s3 + $0xaa0] ss:$52 sps:$4 sm:$0xff]  }
 0x398   : > { %v3000_v50 = vsel %vm2731_vm3, %v2997_v19, %v2999_v15  ;;  %v3002_v2 = vsel %vm2731_vm3, %v2999_v15, %v3001_v52  ;;  %v18736_v15 = vld [vmem:[%s19514_s30 + $0x290] sm:$0xff]   ;;  %v18703_v52 = vld [vmem:[%s25494_s3 + $0x898] ss:$52 sps:$4 sm:$0xff]  }
 0x399   : > { %v3971_v20 = vpack.c.bf16 %v3840_v18, %v3839_v14  ;;  %v3449_v8 = vmax.f32 %v20953_v16, %v3000_v50  ;;  %v3450_v51 = vmax.f32 %v20961_v34, %v3002_v2  ;;  %v3653_v22 = vadd.f32 %v20795_v0, %v3451_v12  ;;  %v18680_v16 = vld [vmem:[%s25494_s3 + $0x5c0] ss:$52 sps:$4 sm:$0xff]   ;;  %v18737_v14 = vld [vmem:[%s19514_s30 + $0x298] sm:$0xff]   ;;  %16954 = vmatprep.mubr.msk.bf16.mxu0 %vm1200_vm2, %v18736_v15  ;;  %v18742_v18 = vld [vmem:[%s19514_s30 + $0x2a8] sm:$0xff]  }
 0x39a   : > { %v18686_v50 = vld [vmem:[%s25494_s3 + $0x690] ss:$52 sps:$4 sm:$0xff]   ;;  %v18723_v59 = vld [vmem:[%s25494_s3 + $0xb0c] ss:$52 sps:$4 sm:$0xff]  }
 0x39b   : > { %7399 = vmatpush1.bf16.msra.mxu1 %v3971_v20  ;;  %v3651_v56 = vadd.f32 %v20795_v0, %v3449_v8  ;;  %v3652_v19 = vadd.f32 %v20795_v0, %v3450_v51  ;;  %v3848_v33 = vmax.f32 %v3653_v22, 0.0  ;;  %v18689_v20 = vld [vmem:[%s25494_s3 + $0x6f8] ss:$52 sps:$4 sm:$0xff]   ;;  %v18715_v2 = vld [vmem:[%s25494_s3 + $0xa3c] ss:$52 sps:$4 sm:$0xff]   ;;  %v3654_v22 = vadd.f32 %v20795_v0, %v3452_v38 }
 0x39c   : > { %7648 = vmatprep.subr.bf16.mxu1 %v25518_v35  ;;  %16955 = vmatmul.mubr.msk.bf16.gmra.mrb[164].mxu0 %vm1200_vm2, %v18737_v14  ;;  %v18717_v51 = vld [vmem:[%s25494_s3 + $0xa38] ss:$52 sps:$4 sm:$0xff]  }
 0x39d   : > { %v3846_v34 = vmax.f32 %v3651_v56, 0.0  ;;  %v3847_v4 = vmax.f32 %v3652_v19, 0.0  ;;  %16958 = vmatprep.mubr.msk.bf16.mxu0 %vm1200_vm2, %v18741_v23 }
 0x39e   : > { %7209 = vmatmul.mubr.bf16.gmra.mrb[44].mxu1 %v18669_v49  ;;  %v3841_v49 = vmax.f32 %v3646_v17, 0.0  ;;  %v18687_v17 = vld [vmem:[%s25494_s3 + $0x6fc] ss:$52 sps:$4 sm:$0xff]  }
 0x39f   : > { %7216 = vmatprep.mubr.bf16.mxu1 %v18670_v28  ;;  %v3843_v28 = vmax.f32 %v3648_v21, 0.0  ;;  %v21045_v25 = vpack.c.bf16 %v3846_v34, %v3845_v48  ;;  %v18706_v21 = vld [vmem:[%s25494_s3 + $0x904] ss:$52 sps:$4 sm:$0xff]  }
 0x3a0   : > { %v21019_v40 = vpack.c.bf16 %v3842_v45, %v3841_v49  ;;  %v18711_v49 = vld [vmem:[%s25494_s3 + $0x968] ss:$52 sps:$4 sm:$0xff]  }
 0x3a1   : > { %v21026_v11 = vpack.c.bf16 %v3844_v9, %v3843_v28  ;;  %v18712_v45 = vld [vmem:[%s25494_s3 + $0x9d4] ss:$52 sps:$4 sm:$0xff]  }
 0x3a4   : > { %16959 = vmatmul.mubr.msk.bf16.gmra.mrb[168].mxu0 %vm1200_vm2, %v18742_v18  ;;  %v18726_v18 = vld [vmem:[%s25494_s3 + $0xb74] ss:$52 sps:$4 sm:$0xff]  }
 0x3a5   : > { %16962 = vmatprep.mubr.msk.bf16.mxu0 %vm1200_vm2, %v18746_v31 }
 0x3a6   : > { %7217 = vmatmul.mubr.bf16.gmra.mrb[48].mxu1 %v18672_v27  ;;  %v21047_v27 = vpack.c.bf16 %v3848_v33, %v3847_v4  ;;  %v3453_v4 = vmax.f32 %v20982_v43, %v21017_v53  ;;  %v3849_v33 = vmax.f32 %v3654_v22, 0.0 }
 0x3a7   : > { %7224 = vmatprep.mubr.bf16.mxu1 %v18673_v3  ;;  %v18683_v3 = vld [vmem:[%s25494_s3 + $0x628] ss:$52 sps:$4 sm:$0xff]  }
 0x3aa   : > { %v16936_v46 = vpop.f32.mrb[144].mxu0 }
 0x3ab   : > { %v21122_v28 = vmax.f32 %v20996_v26, %v16936_v46  ;;  %v2118_v9 = vpop.f32.mrb[145].mxu0 }
 0x3ac   : > { %16963 = vmatmul.mubr.msk.bf16.gmra.mrb[172].mxu0 %vm1200_vm2, %v18747_v30  ;;  %v2480_v39 = vmax.f32 %v20957_v29, %v2118_v9  ;;  %v21125_v10 = vpop.f32.mrb[146].mxu0  ;;  %v18720_v29 = vld [vmem:[%s25494_s3 + $0xaa4] ss:$52 sps:$4 sm:$0xff]  }
 0x3ad   : > { %v3013_v6 = vrot.slane %v21122_v28, 1  ;;  %v21130_v58 = vmax.f32 %v20979_v36, %v21125_v10  ;;  %v2121_v8 = vpop.f32.mrb[147].mxu0  ;;  %v18784_v30 = vld [vmem:[%s19514_s30 + $0x2c0] sm:$0xff]  }
 0x3ae   : > { %7225 = vmatmul.mubr.bf16.gmra.mrb[52].mxu1 %v18675_v57  ;;  %v18709_v57 = vld [vmem:[%s25494_s3 + $0x96c] ss:$52 sps:$4 sm:$0xff]   ;;  %v3009_v12 = vrot.slane %v2480_v39, 1  ;;  %v2481_v26 = vmax.f32 %v20984_v54, %v2121_v8  ;;  %16966 = vmatprep.mubr.msk.bf16.mxu0 %vm1200_vm2, %v18784_v30 }
 0x3af   : > { %7232 = vmatprep.mubr.bf16.mxu1 %v18678_v47  ;;  %v18714_v47 = vld [vmem:[%s25494_s3 + $0x9d0] ss:$52 sps:$4 sm:$0xff]   ;;  %v3015_v56 = vrot.slane %v21130_v58, 1 }
 0x3b0   : > { %v3010_v19 = vsel %vm2731_vm3, %v3007_v62, %v3009_v12  ;;  %v3011_v36 = vrot.slane %v2481_v26, 1  ;;  %v3655_v62 = vadd.f32 %v20795_v0, %v3453_v4  ;;  %v18743_v4 = vld [vmem:[%s25494_s3 + $0x84] ss:$52 sps:$4 sm:$0xff]  }
 0x3b1   : > { %v3454_v15 = vmax.f32 %v20994_v63, %v3010_v19  ;;  %v18728_v63 = vld [vmem:[%s25494_s3 + $0xb70] ss:$52 sps:$4 sm:$0xff]  }
 0x3b2   : > { %v3012_v54 = vsel %vm2731_vm3, %v3009_v12, %v3011_v36  ;;  %v3014_v48 = vsel %vm2731_vm3, %v3011_v36, %v3013_v6  ;;  %v3850_v38 = vmax.f32 %v3655_v62, 0.0 }
 0x3b3   : > { %v3456_v34 = vmax.f32 %v2481_v26, %v3014_v48  ;;  %v3455_v14 = vmax.f32 %v2480_v39, %v3012_v54  ;;  %v3656_v43 = vadd.f32 %v20795_v0, %v3454_v15  ;;  %v18738_v54 = vld [vmem:[%s25494_s3 + $0x18] ss:$52 sps:$4 sm:$0xff]  }
 0x3b4   : > { %v18799_v15 = vld [vmem:[%s19514_s30 + $0x2d8] sm:$0xff]  }
 0x3b5   : > { %v3657_v53 = vadd.f32 %v20795_v0, %v3455_v14 }
 0x3b6   : > { %7233 = vmatmul.mubr.bf16.gmra.mrb[56].mxu1 %v18680_v16  ;;  %v3016_v16 = vsel %vm2731_vm3, %v3013_v6, %v3015_v56 }
 0x3b7   : > { %7240 = vmatprep.mubr.bf16.mxu1 %v18681_v24  ;;  %v21159_v24 = vpack.c.bf16 %v3850_v38, %v3849_v33  ;;  %v3852_v23 = vmax.f32 %v3657_v53, 0.0  ;;  %v18748_v33 = vld [vmem:[%s25494_s3 + $0xec] ss:$52 sps:$4 sm:$0xff]   ;;  %v18798_v38 = vld [vmem:[%s19514_s30 + $0x2d0] sm:$0xff]  }
 0x3be   : > { %7241 = vmatmul.mubr.bf16.gmra.mrb[60].mxu1 %v18683_v3  ;;  %v18725_v3 = vld [vmem:[%s25494_s3 + $0xb08] ss:$52 sps:$4 sm:$0xff]  }
 0x3bf   : > { %7248 = vmatprep.mubr.bf16.mxu1 %v18684_v61  ;;  %v3851_v61 = vmax.f32 %v3656_v43, 0.0 }
 0x3c6   : > { %7249 = vmatmul.mubr.bf16.gmra.mrb[64].mxu1 %v18686_v50  ;;  %v21170_v50 = vpack.c.bf16 %v3852_v23, %v3851_v61 }
 0x3c7   : > { %7256 = vmatprep.mubr.bf16.mxu1 %v18687_v17  ;;  %v18729_v17 = vld [vmem:[%s25494_s3 + $0xbdc] ss:$52 sps:$4 sm:$0xff]  }
 0x3ce   : > { %7257 = vmatmul.mubr.bf16.gmra.mrb[68].mxu1 %v18689_v20  ;;  %v18785_v20 = vld [vmem:[%s19514_s30 + $0x2c8] sm:$0xff]  }
 0x3cf   : > { %7264 = vmatprep.mubr.bf16.mxu1 %v18692_v55  ;;  %16967 = vmatmul.mubr.msk.bf16.gmra.mrb[176].mxu0 %vm1200_vm2, %v18785_v20 }
 0x3d0   : > { %16970 = vmatprep.mubr.msk.bf16.mxu0 %vm1200_vm2, %v18798_v38 }
 0x3d6   : > { %7265 = vmatmul.mubr.bf16.gmra.mrb[72].mxu1 %v18694_v42 }
 0x3d7   : > { %7272 = vmatprep.mubr.bf16.mxu1 %v18695_v13  ;;  %v4428_v13 = vld [vmem:[%s25494_s3 + $0xc40] sm:$0x77]  ;;  %16971 = vmatmul.mubr.msk.bf16.gmra.mrb[180].mxu0 %vm1200_vm2, %v18799_v15 }
 0x3d8   : > { %v16012_v26 = vcombine.low %v4428_v13, %v4428_v13 }
 0x3de   : > { %7273 = vmatmul.mubr.bf16.gmra.mrb[76].mxu1 %v18697_v7 }
 0x3df   : > { %7280 = vmatprep.mubr.bf16.mxu1 %v18698_v44 }
 0x3e6   : > { %7281 = vmatmul.mubr.bf16.gmra.mrb[80].mxu1 %v18700_v5 }
 0x3e7   : > { %7288 = vmatprep.mubr.bf16.mxu1 %v18701_v60 }
 0x3ee   : > { %7289 = vmatmul.mubr.bf16.gmra.mrb[84].mxu1 %v18703_v52 }
 0x3ef   : > { %7296 = vmatprep.mubr.bf16.mxu1 %v18706_v21  ;;  %v18731_v21 = vld [vmem:[%s25494_s3 + $0xbd8] ss:$52 sps:$4 sm:$0xff]  }
 0x3f4   : > { %v21178_v31 = vpop.f32.mrb[148].mxu0 }
 0x3f5   : > { %v21183_v55 = vmax.f32 %v2121_v8, %v21178_v31  ;;  %v21185_v42 = vpop.f32.mrb[149].mxu0 }
 0x3f6   : > { %7297 = vmatmul.mubr.bf16.gmra.mrb[88].mxu1 %v18708_v37  ;;  %v2484_v7 = vmax.f32 %v20990_v41, %v21185_v42  ;;  %v21192_v44 = vpop.f32.mrb[150].mxu0  ;;  %v16013_v41 = vcombine.high %v4428_v13, %v4428_v13 }
 0x3f7   : > { %7304 = vmatprep.mubr.bf16.mxu1 %v18709_v57  ;;  %v3021_v5 = vrot.slane %v21183_v55, 1  ;;  %v21197_v60 = vmax.f32 %v16936_v46, %v21192_v44  ;;  %v2137_v52 = vpop.f32.mrb[151].mxu0 }
 0x3f8   : > { %v3017_v37 = vrot.slane %v2484_v7, 1  ;;  %v21203_v57 = vmax.f32 %v2118_v9, %v2137_v52  ;;  %v3457_v9 = vmax.f32 %v21122_v28, %v3016_v16 }
 0x3fe   : > { %7305 = vmatmul.mubr.bf16.gmra.mrb[92].mxu1 %v18711_v49  ;;  %v3023_v49 = vrot.slane %v21197_v60, 1 }
 0x3ff   : > { %7312 = vmatprep.mubr.bf16.mxu1 %v18712_v45  ;;  %v3658_v45 = vadd.f32 %v20795_v0, %v3456_v34 }
 0x400   : > { %v21210_v46 = vsel %vm2731_vm3, %v3021_v5, %v3023_v49 }
 0x401   : > { %v3853_v12 = vmax.f32 %v3658_v45, 0.0  ;;  %v3461_v13 = vmax.f32 %v21183_v55, %v21210_v46  ;;  %v18759_v46 = vld [vmem:[%s25494_s3 + $0x220] ss:$52 sps:$4 sm:$0xff]  }
 0x406   : > { %7313 = vmatmul.mubr.bf16.gmra.mrb[96].mxu1 %v18714_v47  ;;  %v3018_v47 = vsel %vm2731_vm3, %v3015_v56, %v3017_v37  ;;  %v18740_v56 = vld [vmem:[%s25494_s3 + $0x1c] ss:$52 sps:$4 sm:$0xff]  }
 0x407   : > { %7320 = vmatprep.mubr.bf16.mxu1 %v18715_v2  ;;  %v3019_v2 = vrot.slane %v21203_v57, 1  ;;  %v3458_v36 = vmax.f32 %v21130_v58, %v3018_v47  ;;  %v18745_v58 = vld [vmem:[%s25494_s3 + $0x80] ss:$52 sps:$4 sm:$0xff]  }
 0x409   : > { %v3020_v39 = vsel %vm2731_vm3, %v3017_v37, %v3019_v2  ;;  %v3022_v6 = vsel %vm2731_vm3, %v3019_v2, %v3021_v5  ;;  %v3660_v28 = vadd.f32 %v20795_v0, %v3458_v36  ;;  %v18754_v37 = vld [vmem:[%s25494_s3 + $0x1bc] ss:$52 sps:$4 sm:$0xff]  }
 0x40a   : > { %v3460_v8 = vmax.f32 %v21203_v57, %v3022_v6  ;;  %v3459_v22 = vmax.f32 %v2484_v7, %v3020_v39  ;;  %v3663_v7 = vadd.f32 %v20795_v0, %v3461_v13  ;;  %v18760_v39 = vld [vmem:[%s25494_s3 + $0x28c] ss:$52 sps:$4 sm:$0xff]  }
 0x40b   : > { %v3855_v48 = vmax.f32 %v3660_v28, 0.0 }
 0x40c   : > { %v3661_v16 = vadd.f32 %v20795_v0, %v3459_v22 }
 0x40e   : > { %7321 = vmatmul.mubr.bf16.gmra.mrb[100].mxu1 %v18717_v51  ;;  %v3659_v51 = vadd.f32 %v20795_v0, %v3457_v9  ;;  %v3856_v34 = vmax.f32 %v3661_v16, 0.0 }
 0x40f   : > { %7328 = vmatprep.mubr.bf16.mxu1 %v18720_v29 }
 0x410   : > { %v3854_v29 = vmax.f32 %v3659_v51, 0.0  ;;  %v21231_v62 = vpack.c.bf16 %v3856_v34, %v3855_v48  ;;  %v18763_v34 = vld [vmem:[%s25494_s3 + $0x2f4] ss:$52 sps:$4 sm:$0xff]  }
 0x412   : > { %v21220_v19 = vpack.c.bf16 %v3854_v29, %v3853_v12  ;;  %v18813_v29 = vld [vmem:[%s19514_s30 + $0x2e8] sm:$0xff]  }
 0x416   : > { %7329 = vmatmul.mubr.bf16.gmra.mrb[104].mxu1 %v18722_v32  ;;  %v21243_v32 = vpop.f32.mrb[152].mxu0 }
 0x417   : > { %7336 = vmatprep.mubr.bf16.mxu1 %v18723_v59  ;;  %v21246_v59 = vmax.f32 %v2137_v52, %v21243_v32  ;;  %v18753_v52 = vld [vmem:[%s25494_s3 + $0x150] ss:$52 sps:$4 sm:$0xff]  }
 0x419   : > { %v3029_v43 = vrot.slane %v21246_v59, 1 }
 0x41e   : > { %7337 = vmatmul.mubr.bf16.gmra.mrb[108].mxu1 %v18725_v3 }
 0x41f   : > { %7344 = vmatprep.mubr.bf16.mxu1 %v18726_v18  ;;  %v18751_v18 = vld [vmem:[%s25494_s3 + $0x154] ss:$52 sps:$4 sm:$0xff]  }
 0x426   : > { %7345 = vmatmul.mubr.bf16.gmra.mrb[112].mxu1 %v18728_v63 }
 0x427   : > { %7352 = vmatprep.mubr.bf16.mxu1 %v18729_v17 }
 0x42e   : > { %7353 = vmatmul.mubr.bf16.gmra.mrb[116].mxu1 %v18731_v21  ;;  %v3858_v21 = vmax.f32 %v3663_v7, 0.0 }
 0x42f   : > { %7360 = vmatprep.mubr.bf16.mxu1 %v16013_v41 }
 0x436   : > { %7361 = vmatmul.mubr.bf16.gmra.mrb[120].mxu1 %v16012_v26  ;;  %v18812_v26 = vld [vmem:[%s19514_s30 + $0x2e0] sm:$0xff]  }
 0x437   : > { %7400 = vmatprep.mubr.bf16.mxu1 %v18740_v56  ;;  %16974 = vmatprep.mubr.msk.bf16.mxu0 %vm1200_vm2, %v18812_v26 }
 0x438   : > { %16975 = vmatmul.mubr.msk.bf16.gmra.mrb[184].mxu0 %vm1200_vm2, %v18813_v29 }
 0x43e   : > { %7401 = vmatmul.mubr.bf16.vlgmr.msra.gmra.mrb[0].mxu1 %v18738_v54 }
 0x43f   : > { %7649 = vmatpush1.bf16.msra.mxu1 %v21019_v40  ;;  %7408 = vmatprep.mubr.bf16.mxu1 %v18743_v4  ;;  %v21248_v40 = vpop.f32.mrb[153].mxu0 }
 0x440   : > { %7650 = vmatprep.subr.bf16.mxu1 %v25518_v35  ;;  %v21255_v14 = vpop.f32.mrb[154].mxu0 }
 0x441   : > { %v21261_v53 = vmax.f32 %v21178_v31, %v21255_v14  ;;  %v2153_v3 = vpop.f32.mrb[155].mxu0  ;;  %v3662_v31 = vadd.f32 %v20795_v0, %v3460_v8 }
 0x442   : > { %v21321_v6 = vpop.f32.mrb[156].mxu0 }
 0x443   : > { %7651 = vmatpush1.bf16.msra.mxu1 %v21026_v11  ;;  %v2488_v11 = vmax.f32 %v21125_v10, %v21248_v40  ;;  %v18750_v10 = vld [vmem:[%s25494_s3 + $0xe8] ss:$52 sps:$4 sm:$0xff]   ;;  %v3031_v23 = vrot.slane %v21261_v53, 1  ;;  %v3857_v5 = vmax.f32 %v3662_v31, 0.0  ;;  %v21325_v9 = vmax.f32 %v2153_v3, %v21321_v6  ;;  %v21327_v8 = vpop.f32.mrb[157].mxu0 }
 0x444   : > { %7652 = vmatprep.subr.bf16.mxu1 %v25518_v35  ;;  %v2492_v51 = vmax.f32 %v21192_v44, %v21327_v8  ;;  %v21331_v12 = vpop.f32.mrb[158].mxu0  ;;  %v18762_v44 = vld [vmem:[%s25494_s3 + $0x288] ss:$52 sps:$4 sm:$0xff]   ;;  %v18769_v31 = vld [vmem:[%s25494_s3 + $0x3c4] ss:$52 sps:$4 sm:$0xff]  }
 0x445   : > { %v3025_v61 = vrot.slane %v2488_v11, 1  ;;  %v21283_v30 = vsel %vm2731_vm3, %v3029_v43, %v3031_v23  ;;  %v3980_v55 = vpack.c.bf16 %v3858_v21, %v3857_v5  ;;  %v3037_v56 = vrot.slane %v21325_v9, 1  ;;  %v2169_v36 = vpop.f32.mrb[159].mxu0  ;;  %v18827_v21 = vld [vmem:[%s19514_s30 + $0x2f8] sm:$0xff]  }
 0x446   : > { %7409 = vmatmul.mubr.bf16.gmra.mrb[4].mxu1 %v18745_v58  ;;  %v3033_v22 = vrot.slane %v2492_v51, 1  ;;  %v2493_v28 = vmax.f32 %v21248_v40, %v2169_v36  ;;  %v3465_v40 = vmax.f32 %v21246_v59, %v21283_v30  ;;  %v18771_v30 = vld [vmem:[%s25494_s3 + $0x3c0] ss:$52 sps:$4 sm:$0xff]  }
 0x447   : > { %7653 = vmatpush1.bf16.msra.mxu1 %v21045_v25  ;;  %7416 = vmatprep.mubr.bf16.mxu1 %v18748_v33  ;;  %v21265_v25 = vmax.f32 %v21185_v42, %v2153_v3  ;;  %v3026_v63 = vsel %vm2731_vm3, %v3023_v49, %v3025_v61  ;;  %v18766_v3 = vld [vmem:[%s25494_s3 + $0x35c] ss:$52 sps:$4 sm:$0xff]  }
 0x448   : > { %7654 = vmatprep.subr.bf16.mxu1 %v25518_v35  ;;  %v3034_v54 = vsel %vm2731_vm3, %v3031_v23, %v3033_v22  ;;  %v3035_v48 = vrot.slane %v2493_v28, 1  ;;  %v3667_v38 = vadd.f32 %v20795_v0, %v3465_v40  ;;  %v21372_v23 = vld [vmem:[%s25493_s2] ss:$0 sm:$0xff] }
 0x449   : > { %v3027_v17 = vrot.slane %v21265_v25, 1 }
 0x44a   : > { %v3036_v58 = vsel %vm2731_vm3, %v3033_v22, %v3035_v48  ;;  %v3038_v33 = vsel %vm2731_vm3, %v3035_v48, %v3037_v56 }
 0x44b   : > { %7655 = vmatpush1.bf16.msra.mxu1 %v21047_v27  ;;  %v3028_v20 = vsel %vm2731_vm3, %v3025_v61, %v3027_v17  ;;  %v3030_v27 = vsel %vm2731_vm3, %v3027_v17, %v3029_v43  ;;  %v3862_v43 = vmax.f32 %v3667_v38, 0.0 }
 0x44c   : > { %7656 = vmatprep.subr.bf16.mxu1 %v25518_v35  ;;  %v3464_v42 = vmax.f32 %v21265_v25, %v3030_v27  ;;  %v3463_v57 = vmax.f32 %v2488_v11, %v3028_v20  ;;  %v18765_v11 = vld [vmem:[%s25494_s3 + $0x2f0] ss:$52 sps:$4 sm:$0xff]   ;;  %v3466_v25 = vmax.f32 %v21261_v53, %v3034_v54  ;;  %v18772_v20 = vld [vmem:[%s25494_s3 + $0x42c] ss:$52 sps:$4 sm:$0xff]  }
 0x44e   : > { %7417 = vmatmul.mubr.bf16.gmra.mrb[8].mxu1 %v18750_v10  ;;  %v3665_v49 = vadd.f32 %v20795_v0, %v3463_v57  ;;  %v3467_v10 = vmax.f32 %v2492_v51, %v3036_v58  ;;  %v3668_v59 = vadd.f32 %v20795_v0, %v3466_v25 }
 0x44f   : > { %7424 = vmatprep.mubr.bf16.mxu1 %v18751_v18  ;;  %7657 = vmatpush1.bf16.msra.mxu1 %v21159_v24  ;;  %v3462_v24 = vmax.f32 %v21197_v60, %v3026_v63  ;;  %v18757_v60 = vld [vmem:[%s25494_s3 + $0x224] ss:$52 sps:$4 sm:$0xff]  }
 0x450   : > { %7658 = vmatprep.subr.bf16.mxu1 %v25518_v35  ;;  %v3860_v47 = vmax.f32 %v3665_v49, 0.0  ;;  %v3669_v18 = vadd.f32 %v21372_v23, %v3467_v10  ;;  %v18768_v63 = vld [vmem:[%s25494_s3 + $0x358] ss:$52 sps:$4 sm:$0xff]   ;;  %v3863_v17 = vmax.f32 %v3668_v59, 0.0 }
 0x451   : > { %v3664_v41 = vadd.f32 %v20795_v0, %v3462_v24 }
 0x452   : > { %v3864_v53 = vmax.f32 %v3669_v18, 0.0 }
 0x453   : > { %7659 = vmatpush1.bf16.msra.mxu1 %v21170_v50  ;;  %v18756_v50 = vld [vmem:[%s25494_s3 + $0x1b8] ss:$52 sps:$4 sm:$0xff]   ;;  %v3859_v45 = vmax.f32 %v3664_v41, 0.0 }
 0x454   : > { %7660 = vmatprep.subr.bf16.mxu1 %v25518_v35 }
 0x455   : > { %v3981_v2 = vpack.c.bf16 %v3860_v47, %v3859_v45 }
 0x456   : > { %7425 = vmatmul.mubr.bf16.gmra.mrb[12].mxu1 %v18753_v52  ;;  %v18826_v52 = vld [vmem:[%s19514_s30 + $0x2f0] sm:$0xff]  }
 0x457   : > { %7432 = vmatprep.mubr.bf16.mxu1 %v18754_v37  ;;  %7661 = vmatpush1.bf16.msra.mxu1 %v21220_v19  ;;  %v21338_v19 = vmax.f32 %v21243_v32, %v21331_v12  ;;  %v3468_v32 = vmax.f32 %v2493_v28, %v3038_v33 }
 0x458   : > { %7662 = vmatprep.subr.bf16.mxu1 %v25518_v35  ;;  %16978 = vmatprep.mubr.msk.bf16.mxu0 %vm1200_vm2, %v18826_v52 }
 0x459   : > { %v3039_v16 = vrot.slane %v21338_v19, 1  ;;  %16979 = vmatmul.mubr.msk.bf16.gmra.mrb[188].mxu0 %vm1200_vm2, %v18827_v21 }
 0x45b   : > { %7663 = vmatpush1.bf16.msra.mxu1 %v21231_v62  ;;  %v3040_v4 = vsel %vm2731_vm3, %v3037_v56, %v3039_v16  ;;  %v3666_v62 = vadd.f32 %v20795_v0, %v3464_v42  ;;  %v3983_v0 = vpack.c.bf16 %v3864_v53, %v3863_v17 }
 0x45c   : > { %7664 = vmatprep.subr.bf16.mxu1 %v25518_v35 }
 0x45d   : > { %v3861_v15 = vmax.f32 %v3666_v62, 0.0 }
 0x45e   : > { %7433 = vmatmul.mubr.bf16.gmra.mrb[16].mxu1 %v18756_v50  ;;  %v3670_v50 = vadd.f32 %v21372_v23, %v3468_v32 }
 0x45f   : > { %7440 = vmatprep.mubr.bf16.mxu1 %v18757_v60  ;;  %7665 = vmatpush1.bf16.msra.mxu1 %v3980_v55  ;;  %v3982_v61 = vpack.c.bf16 %v3862_v43, %v3861_v15  ;;  %v3469_v60 = vmax.f32 %v21325_v9, %v3040_v4 }
 0x460   : > { %7666 = vmatprep.subr.bf16.mxu1 %v25518_v35  ;;  %v3865_v22 = vmax.f32 %v3670_v50, 0.0 }
 0x461   : > { %v3671_v51 = vadd.f32 %v21372_v23, %v3469_v60 }
 0x463   : > { %7667 = vmatpush1.bf16.msra.mxu1 %v3981_v2  ;;  %v18775_v2 = vld [vmem:[%s25494_s3 + $0x494] ss:$52 sps:$4 sm:$0xff]   ;;  %v3866_v28 = vmax.f32 %v3671_v51, 0.0 }
 0x464   : > { %7668 = vmatprep.subr.bf16.mxu1 %v25518_v35 }
 0x465   : > { %v3984_v58 = vpack.c.bf16 %v3866_v28, %v3865_v22 }
 0x466   : > { %7441 = vmatmul.mubr.bf16.gmra.mrb[20].mxu1 %v18759_v46 }
 0x467   : > { %7448 = vmatprep.mubr.bf16.mxu1 %v18760_v39  ;;  %7669 = vmatpush1.bf16.msra.mxu1 %v3982_v61  ;;  %v16952_v27 = vpop.f32.mrb[160].mxu0 }
 0x468   : > { %7670 = vmatprep.subr.bf16.mxu1 %v25518_v35  ;;  %v2498_v42 = vmax.f32 %v2169_v36, %v16952_v27  ;;  %v2182_v13 = vpop.f32.mrb[161].mxu0 }
 0x469   : > { %v2496_v7 = vmax.f32 %v21255_v14, %v2182_v13  ;;  %v21389_v5 = vpop.f32.mrb[162].mxu0  ;;  %v18774_v14 = vld [vmem:[%s25494_s3 + $0x428] ss:$52 sps:$4 sm:$0xff]  }
 0x46a   : > { %v3045_v37 = vrot.slane %v2498_v42, 1  ;;  %v21395_v55 = vmax.f32 %v21321_v6, %v21389_v5  ;;  %v2185_v24 = vpop.f32.mrb[163].mxu0 }
 0x46b   : > { %7671 = vmatpush1.bf16.msra.mxu1 %v3983_v0  ;;  %v3041_v57 = vrot.slane %v2496_v7, 1  ;;  %v2497_v41 = vmax.f32 %v21327_v8, %v2185_v24 }
 0x46c   : > { %7672 = vmatprep.subr.bf16.mxu1 %v25518_v35  ;;  %v3047_v49 = vrot.slane %v21395_v55, 1 }
 0x46d   : > { %v3042_v45 = vsel %vm2731_vm3, %v3039_v16, %v3041_v57  ;;  %v3043_v47 = vrot.slane %v2497_v41, 1 }
 0x46e   : > { %7449 = vmatmul.mubr.bf16.gmra.mrb[24].mxu1 %v18762_v44  ;;  %v3048_v46 = vsel %vm2731_vm3, %v3045_v37, %v3047_v49  ;;  %v3470_v16 = vmax.f32 %v21338_v19, %v3042_v45  ;;  %v18777_v19 = vld [vmem:[%s25494_s3 + $0x490] ss:$52 sps:$4 sm:$0xff]  }
 0x46f   : > { %7456 = vmatprep.mubr.bf16.mxu1 %v18763_v34  ;;  %v3044_v39 = vsel %vm2731_vm3, %v3041_v57, %v3043_v47  ;;  %v3046_v6 = vsel %vm2731_vm3, %v3043_v47, %v3045_v37  ;;  %v16956_v8 = vpop.f32.mrb[164].mxu0  ;;  %7673 = vmatpush1.bf16.msra.mxu1 %v3984_v58  ;;  %v3473_v43 = vmax.f32 %v2498_v42, %v3048_v46  ;;  %v18781_v45 = vld [vmem:[%s25494_s3 + $0x564] ss:$52 sps:$4 sm:$0xff]  }
 0x470   : > { %v3472_v26 = vmax.f32 %v2497_v41, %v3046_v6  ;;  %v21414_v29 = vmax.f32 %v2185_v24, %v16956_v8  ;;  %v2198_v56 = vpop.f32.mrb[165].mxu0  ;;  %v3471_v34 = vmax.f32 %v2496_v7, %v3044_v39  ;;  %v3672_v33 = vadd.f32 %v21372_v23, %v3470_v16  ;;  %7674 = vmatprep.subr.bf16.mxu1 %v25518_v35 }
 0x471   : > { %v2500_v9 = vmax.f32 %v21331_v12, %v2198_v56  ;;  %v21417_v36 = vpop.f32.mrb[166].mxu0  ;;  %v3675_v18 = vadd.f32 %v21372_v23, %v3473_v43 }
 0x472   : > { %v3053_v44 = vrot.slane %v21414_v29, 1  ;;  %v21422_v54 = vmax.f32 %v16952_v27, %v21417_v36  ;;  %v2201_v48 = vpop.f32.mrb[167].mxu0  ;;  %v3674_v12 = vadd.f32 %v21372_v23, %v3472_v26  ;;  %v3673_v40 = vadd.f32 %v21372_v23, %v3471_v34 }
 0x473   : > { %v3049_v4 = vrot.slane %v2500_v9, 1  ;;  %v2501_v62 = vmax.f32 %v2182_v13, %v2201_v48 }
 0x474   : > { %v3055_v32 = vrot.slane %v21422_v54, 1  ;;  %v3868_v25 = vmax.f32 %v3673_v40, 0.0 }
 0x475   : > { %v3050_v38 = vsel %vm2731_vm3, %v3047_v49, %v3049_v4  ;;  %v3051_v15 = vrot.slane %v2501_v62, 1 }
 0x476   : > { %7457 = vmatmul.mubr.bf16.gmra.mrb[28].mxu1 %v18765_v11  ;;  %v3867_v11 = vmax.f32 %v3672_v33, 0.0  ;;  %v3056_v61 = vsel %vm2731_vm3, %v3053_v44, %v3055_v32  ;;  %v3474_v27 = vmax.f32 %v21395_v55, %v3050_v38 }
 0x477   : > { %7464 = vmatprep.mubr.bf16.mxu1 %v18766_v3  ;;  %v18778_v3 = vld [vmem:[%s25494_s3 + $0x4fc] ss:$52 sps:$4 sm:$0xff]   ;;  %v3052_v10 = vsel %vm2731_vm3, %v3049_v4, %v3051_v15  ;;  %v3054_v59 = vsel %vm2731_vm3, %v3051_v15, %v3053_v44  ;;  %v16960_v17 = vpop.f32.mrb[168].mxu0  ;;  %v3477_v28 = vmax.f32 %v21414_v29, %v3056_v61  ;;  %v18786_v15 = vld [vmem:[%s25494_s3 + $0x5cc] ss:$52 sps:$4 sm:$0xff]  }
 0x478   : > { %v3985_v53 = vpack.c.bf16 %v3868_v25, %v3867_v11  ;;  %v2214_v0 = vpop.f32.mrb[169].mxu0  ;;  %v3475_v7 = vmax.f32 %v2500_v9, %v3052_v10  ;;  %v3676_v57 = vadd.f32 %v21372_v23, %v3474_v27 }
 0x479   : > { %v2504_v42 = vmax.f32 %v21389_v5, %v2214_v0  ;;  %v21444_v13 = vpop.f32.mrb[170].mxu0  ;;  %v18780_v5 = vld [vmem:[%s25494_s3 + $0x4f8] ss:$52 sps:$4 sm:$0xff]   ;;  %v3679_v29 = vadd.f32 %v21372_v23, %v3477_v28 }
 0x47a   : > { %7675 = vmatpush1.bf16.msra.mxu1 %v3985_v53  ;;  %v21448_v21 = vmax.f32 %v16956_v8, %v21444_v13  ;;  %v2217_v37 = vpop.f32.mrb[171].mxu0  ;;  %v3677_v49 = vadd.f32 %v21372_v23, %v3475_v7  ;;  %v3871_v50 = vmax.f32 %v3676_v57, 0.0  ;;  %v18808_v28 = vld [vmem:[%s25494_s3 + $0x838] ss:$52 sps:$4 sm:$0xff]  }
 0x47b   : > { %7676 = vmatprep.subr.bf16.mxu1 %v25518_v35  ;;  %v3057_v41 = vrot.slane %v2504_v42, 1  ;;  %v2505_v55 = vmax.f32 %v2198_v56, %v2217_v37  ;;  %v3874_v38 = vmax.f32 %v3679_v29, 0.0  ;;  %v18817_v29 = vld [vmem:[%s25494_s3 + $0x974] ss:$52 sps:$4 sm:$0xff]  }
 0x47d   : > { %v3058_v47 = vsel %vm2731_vm3, %v3055_v32, %v3057_v41  ;;  %v3059_v60 = vrot.slane %v2505_v55, 1  ;;  %v18783_v32 = vld [vmem:[%s25494_s3 + $0x560] ss:$52 sps:$4 sm:$0xff]  }
 0x47e   : > { %7465 = vmatmul.mubr.bf16.gmra.mrb[32].mxu1 %v18768_v63  ;;  %v3476_v63 = vmax.f32 %v2501_v62, %v3054_v59  ;;  %v3478_v16 = vmax.f32 %v21422_v54, %v3058_v47  ;;  %v18792_v47 = vld [vmem:[%s25494_s3 + $0x69c] ss:$52 sps:$4 sm:$0xff]  }
 0x47f   : > { %7472 = vmatprep.mubr.bf16.mxu1 %v18769_v31  ;;  %v21440_v31 = vmax.f32 %v2201_v48, %v16960_v17  ;;  %v3060_v6 = vsel %vm2731_vm3, %v3057_v41, %v3059_v60  ;;  %v21466_v51 = vpop.f32.mrb[172].mxu0 }
 0x480   : > { %v3678_v39 = vadd.f32 %v21372_v23, %v3476_v63  ;;  %v21469_v9 = vmax.f32 %v2217_v37, %v21466_v51  ;;  %v21471_v22 = vpop.f32.mrb[173].mxu0  ;;  %v3479_v34 = vmax.f32 %v2504_v42, %v3060_v6  ;;  %v18802_v6 = vld [vmem:[%s25494_s3 + $0x768] ss:$52 sps:$4 sm:$0xff]  }
 0x481   : > { %v3061_v52 = vrot.slane %v21440_v31, 1  ;;  %v2508_v44 = vmax.f32 %v21417_v36, %v21471_v22  ;;  %v21477_v48 = vpop.f32.mrb[174].mxu0  ;;  %v3680_v36 = vadd.f32 %v21372_v23, %v3478_v16  ;;  %v18809_v16 = vld [vmem:[%s25494_s3 + $0x8a4] ss:$52 sps:$4 sm:$0xff]  }
 0x482   : > { %v3069_v4 = vrot.slane %v21469_v9, 1  ;;  %v21481_v62 = vmax.f32 %v16960_v17, %v21477_v48  ;;  %v21483_v58 = vpop.f32.mrb[175].mxu0 }
 0x483   : > { %v3062_v8 = vsel %vm2731_vm3, %v3059_v60, %v3061_v52  ;;  %v3065_v54 = vrot.slane %v2508_v44, 1  ;;  %v21488_v33 = vmax.f32 %v2214_v0, %v21483_v58  ;;  %v18840_v0 = vld [vmem:[%s19514_s30 + $0x300] sm:$0xff]   ;;  %v18794_v60 = vld [vmem:[%s25494_s3 + $0x698] ss:$52 sps:$4 sm:$0xff]  }
 0x484   : > { %v3480_v56 = vmax.f32 %v2505_v55, %v3062_v8  ;;  %v3071_v40 = vrot.slane %v21481_v62, 1  ;;  %16982 = vmatprep.mubr.msk.bf16.mxu0 %vm1200_vm2, %v18840_v0  ;;  %v18789_v55 = vld [vmem:[%s25494_s3 + $0x634] ss:$52 sps:$4 sm:$0xff]  }
 0x485   : > { %v3067_v43 = vrot.slane %v21488_v33, 1  ;;  %v18803_v8 = vld [vmem:[%s25494_s3 + $0x7d4] ss:$52 sps:$4 sm:$0xff]  }
 0x486   : > { %7473 = vmatmul.mubr.bf16.gmra.mrb[36].mxu1 %v18771_v30  ;;  %v3869_v30 = vmax.f32 %v3674_v12, 0.0  ;;  %v3681_v12 = vadd.f32 %v21372_v23, %v3479_v34  ;;  %v21504_v25 = vsel %vm2731_vm3, %v3069_v4, %v3071_v40  ;;  %v3682_v59 = vadd.f32 %v21372_v23, %v3480_v56  ;;  %v18806_v56 = vld [vmem:[%s25494_s3 + $0x83c] ss:$52 sps:$4 sm:$0xff]   ;;  %v18814_v34 = vld [vmem:[%s25494_s3 + $0x90c] ss:$52 sps:$4 sm:$0xff]  }
 0x487   : > { %7480 = vmatprep.mubr.bf16.mxu1 %v18772_v20  ;;  %v3870_v20 = vmax.f32 %v3675_v18, 0.0  ;;  %v3068_v18 = vsel %vm2731_vm3, %v3065_v54, %v3067_v43  ;;  %v21511_v63 = vsel %vm2731_vm3, %v3067_v43, %v3069_v4  ;;  %v18816_v4 = vld [vmem:[%s25494_s3 + $0x908] ss:$52 sps:$4 sm:$0xff]  }
 0x488   : > { %v3876_v61 = vmax.f32 %v3681_v12, 0.0  ;;  %v3484_v53 = vmax.f32 %v21488_v33, %v21511_v63  ;;  %v3483_v42 = vmax.f32 %v2508_v44, %v3068_v18  ;;  %v18811_v44 = vld [vmem:[%s25494_s3 + $0x8a0] ss:$52 sps:$4 sm:$0xff]   ;;  %v18822_v12 = vld [vmem:[%s25494_s3 + $0x9d8] ss:$52 sps:$4 sm:$0xff]  }
 0x489   : > { %v3986_v24 = vpack.c.bf16 %v3870_v20, %v3869_v30  ;;  %v18841_v30 = vld [vmem:[%s19514_s30 + $0x308] sm:$0xff]   ;;  %v18825_v18 = vld [vmem:[%s25494_s3 + $0xa40] ss:$52 sps:$4 sm:$0xff]  }
 0x48a   : > { %v3685_v37 = vadd.f32 %v21372_v23, %v3483_v42  ;;  %16983 = vmatmul.mubr.msk.bf16.gmra.mrb[192].mxu0 %vm1200_vm2, %v18841_v30  ;;  %v18830_v33 = vld [vmem:[%s25494_s3 + $0xaa8] ss:$52 sps:$4 sm:$0xff]  }
 0x48b   : > { %7677 = vmatpush1.bf16.msra.mxu1 %v3986_v24  ;;  %v3877_v24 = vmax.f32 %v3682_v59, 0.0  ;;  %v18831_v63 = vld [vmem:[%s25494_s3 + $0xb14] ss:$52 sps:$4 sm:$0xff]  }
 0x48c   : > { %7678 = vmatprep.subr.bf16.mxu1 %v25518_v35  ;;  %v3880_v41 = vmax.f32 %v3685_v37, 0.0  ;;  %v3485_v37 = vmax.f32 %v21469_v9, %v21504_v25 }
 0x48e   : > { %7481 = vmatmul.mubr.bf16.gmra.mrb[40].mxu1 %v18774_v14  ;;  %v3063_v14 = vrot.slane %v21448_v21, 1 }
 0x48f   : > { %7488 = vmatprep.mubr.bf16.mxu1 %v18775_v2  ;;  %v3872_v2 = vmax.f32 %v3677_v49, 0.0 }
 0x490   : > { %v3064_v46 = vsel %vm2731_vm3, %v3061_v52, %v3063_v14  ;;  %v3066_v11 = vsel %vm2731_vm3, %v3063_v14, %v3065_v54  ;;  %v18844_v14 = vld [vmem:[%s19514_s30 + $0x310] sm:$0xff]  }
 0x491   : > { %v3987_v26 = vpack.c.bf16 %v3872_v2, %v3871_v50  ;;  %v3481_v20 = vmax.f32 %v21440_v31, %v3064_v46  ;;  %v3482_v27 = vmax.f32 %v21448_v21, %v3066_v11  ;;  %v18788_v31 = vld [vmem:[%s25494_s3 + $0x5c8] ss:$52 sps:$4 sm:$0xff]   ;;  %16986 = vmatprep.mubr.msk.bf16.mxu0 %vm1200_vm2, %v18844_v14  ;;  %v18795_v2 = vld [vmem:[%s25494_s3 + $0x704] ss:$52 sps:$4 sm:$0xff]   ;;  %v18797_v46 = vld [vmem:[%s25494_s3 + $0x700] ss:$52 sps:$4 sm:$0xff]  }
 0x492   : > { %v18845_v50 = vld [vmem:[%s19514_s30 + $0x318] sm:$0xff]   ;;  %v18819_v54 = vld [vmem:[%s25494_s3 + $0x970] ss:$52 sps:$4 sm:$0xff]   ;;  %s19373_s30 = smov 64  }
 0x493   : > { %7679 = vmatpush1.bf16.msra.mxu1 %v3987_v26  ;;  %v3683_v7 = vadd.f32 %v21372_v23, %v3481_v20  ;;  %v3684_v52 = vadd.f32 %v21372_v23, %v3482_v27  ;;  %16987 = vmatmul.mubr.msk.bf16.gmra.mrb[196].mxu0 %vm1200_vm2, %v18845_v50  ;;  %v18805_v26 = vld [vmem:[%s25494_s3 + $0x7d0] ss:$52 sps:$4 sm:$0xff]   ;;  %v3686_v27 = vadd.f32 %v21372_v23, %v3484_v53  ;;  %vm15341_vm2 = vcmask 8192  }
 0x494   : > { %7928 = vmatprep.subr.bf16.mxu1 %v25518_v35  ;;  %v18834_v50 = vld [vmem:[%s25494_s3 + $0xb7c] ss:$52 sps:$4 sm:$0xff]  }
 0x495   : > { %v3878_v21 = vmax.f32 %v3683_v7, 0.0  ;;  %v3879_v57 = vmax.f32 %v3684_v52, 0.0 }
 0x496   : > { %7489 = vmatmul.mubr.bf16.gmra.mrb[44].mxu1 %v18777_v19  ;;  %v3873_v19 = vmax.f32 %v3678_v39, 0.0  ;;  %v18800_v39 = vld [vmem:[%s25494_s3 + $0x76c] ss:$52 sps:$4 sm:$0xff]  }
 0x497   : > { %7496 = vmatprep.mubr.bf16.mxu1 %v18778_v3  ;;  %v3875_v3 = vmax.f32 %v3680_v36, 0.0  ;;  %v21532_v49 = vpack.c.bf16 %v3878_v21, %v3877_v24  ;;  %v18820_v36 = vld [vmem:[%s25494_s3 + $0x9dc] ss:$52 sps:$4 sm:$0xff]  }
 0x498   : > { %v21506_v10 = vpack.c.bf16 %v3874_v38, %v3873_v19 }
 0x499   : > { %v21513_v17 = vpack.c.bf16 %v3876_v61, %v3875_v3 }
 0x49e   : > { %7497 = vmatmul.mubr.bf16.gmra.mrb[48].mxu1 %v18780_v5  ;;  %v21534_v5 = vpack.c.bf16 %v3880_v41, %v3879_v57  ;;  %v18833_v41 = vld [vmem:[%s25494_s3 + $0xb10] ss:$52 sps:$4 sm:$0xff]  }
 0x49f   : > { %7504 = vmatprep.mubr.bf16.mxu1 %v18781_v45  ;;  %v18791_v45 = vld [vmem:[%s25494_s3 + $0x630] ss:$52 sps:$4 sm:$0xff]  }
 0x4a2   : > { %v16968_v19 = vpop.f32.mrb[176].mxu0 }
 0x4a3   : > { %v21601_v38 = vmax.f32 %v21483_v58, %v16968_v19 }
 0x4a5   : > { %v3077_v3 = vrot.slane %v21601_v38, 1 }
 0x4a6   : > { %7505 = vmatmul.mubr.bf16.gmra.mrb[52].mxu1 %v18783_v32  ;;  %v18823_v32 = vld [vmem:[%s25494_s3 + $0xa44] ss:$52 sps:$4 sm:$0xff]  }
 0x4a7   : > { %7512 = vmatprep.mubr.bf16.mxu1 %v18786_v15  ;;  %v2246_v15 = vpop.f32.mrb[177].mxu0 }
 0x4a8   : > { %v2512_v11 = vmax.f32 %v21444_v13, %v2246_v15  ;;  %v21604_v43 = vpop.f32.mrb[178].mxu0  ;;  %v18828_v13 = vld [vmem:[%s25494_s3 + $0xaac] ss:$52 sps:$4 sm:$0xff]  }
 0x4a9   : > { %v21609_v61 = vmax.f32 %v21466_v51, %v21604_v43  ;;  %v2249_v59 = vpop.f32.mrb[179].mxu0 }
 0x4aa   : > { %v3073_v0 = vrot.slane %v2512_v11, 1  ;;  %v2513_v58 = vmax.f32 %v21471_v22, %v2249_v59 }
 0x4ab   : > { %v3079_v30 = vrot.slane %v21609_v61, 1 }
 0x4ac   : > { %v3074_v20 = vsel %vm2731_vm3, %v3071_v40, %v3073_v0  ;;  %v3075_v51 = vrot.slane %v2513_v58, 1  ;;  %v3687_v40 = vadd.f32 %v21372_v23, %v3485_v37  ;;  %v18852_v37 = vld [vmem:[%s25494_s3 + $0xf4] ss:$52 sps:$4 sm:$0xff]  }
 0x4ad   : > { %v3080_v42 = vsel %vm2731_vm3, %v3077_v3, %v3079_v30  ;;  %v3486_v21 = vmax.f32 %v21481_v62, %v3074_v20  ;;  %v18836_v62 = vld [vmem:[%s25494_s3 + $0xb78] ss:$52 sps:$4 sm:$0xff]  }
 0x4ae   : > { %7513 = vmatmul.mubr.bf16.gmra.mrb[56].mxu1 %v18788_v31  ;;  %v3076_v22 = vsel %vm2731_vm3, %v3073_v0, %v3075_v51  ;;  %v3078_v7 = vsel %vm2731_vm3, %v3075_v51, %v3077_v3  ;;  %v3881_v31 = vmax.f32 %v3686_v27, 0.0  ;;  %v3882_v53 = vmax.f32 %v3687_v40, 0.0  ;;  %v18846_v27 = vld [vmem:[%s25494_s3 + $0x20] ss:$52 sps:$4 sm:$0xff]  }
 0x4af   : > { %7520 = vmatprep.mubr.bf16.mxu1 %v18789_v55  ;;  %v3488_v52 = vmax.f32 %v2513_v58, %v3078_v7  ;;  %v3487_v57 = vmax.f32 %v2512_v11, %v3076_v22  ;;  %v3688_v9 = vadd.f32 %v21372_v23, %v3486_v21  ;;  %v3489_v11 = vmax.f32 %v21601_v38, %v3080_v42  ;;  %v18848_v58 = vld [vmem:[%s25494_s3 + $0x24] ss:$52 sps:$4 sm:$0xff]   ;;  %v18849_v7 = vld [vmem:[%s25494_s3 + $0x8c] ss:$52 sps:$4 sm:$0xff]  }
 0x4b0   : > { %v21638_v24 = vpack.c.bf16 %v3882_v53, %v3881_v31 }
 0x4b1   : > { %v3689_v25 = vadd.f32 %v21372_v23, %v3487_v57  ;;  %v3883_v55 = vmax.f32 %v3688_v9, 0.0  ;;  %v3691_v3 = vadd.f32 %v21372_v23, %v3489_v11 }
 0x4b3   : > { %v3884_v14 = vmax.f32 %v3689_v25, 0.0  ;;  %v3886_v0 = vmax.f32 %v3691_v3, 0.0 }
 0x4b6   : > { %7521 = vmatmul.mubr.bf16.gmra.mrb[60].mxu1 %v18791_v45  ;;  %v21649_v45 = vpack.c.bf16 %v3884_v14, %v3883_v55 }
 0x4b7   : > { %7528 = vmatprep.mubr.bf16.mxu1 %v18792_v47  ;;  %v18837_v47 = vld [vmem:[%s25494_s3 + $0xbe4] ss:$52 sps:$4 sm:$0xff]  }
 0x4be   : > { %7529 = vmatmul.mubr.bf16.gmra.mrb[64].mxu1 %v18794_v60  ;;  %v16972_v60 = vpop.f32.mrb[180].mxu0 }
 0x4bf   : > { %7536 = vmatprep.mubr.bf16.mxu1 %v18795_v2  ;;  %v21657_v2 = vmax.f32 %v2249_v59, %v16972_v60 }
 0x4c6   : > { %7537 = vmatmul.mubr.bf16.gmra.mrb[68].mxu1 %v18797_v46  ;;  %v2262_v46 = vpop.f32.mrb[181].mxu0 }
 0x4c7   : > { %7544 = vmatprep.mubr.bf16.mxu1 %v18800_v39  ;;  %v4429_v39 = vld [vmem:[%s25494_s3 + $0xc48] sm:$0x77] }
 0x4ce   : > { %7545 = vmatmul.mubr.bf16.gmra.mrb[72].mxu1 %v18802_v6  ;;  %v2516_v6 = vmax.f32 %v21477_v48, %v2262_v46 }
 0x4cf   : > { %7552 = vmatprep.mubr.bf16.mxu1 %v18803_v8  ;;  %v21663_v8 = vpop.f32.mrb[182].mxu0 }
 0x4d6   : > { %7553 = vmatmul.mubr.bf16.gmra.mrb[76].mxu1 %v18805_v26  ;;  %v3085_v26 = vrot.slane %v21657_v2, 1 }
 0x4d7   : > { %7560 = vmatprep.mubr.bf16.mxu1 %v18806_v56  ;;  %v21667_v56 = vmax.f32 %v16968_v19, %v21663_v8 }
 0x4de   : > { %7561 = vmatmul.mubr.bf16.gmra.mrb[80].mxu1 %v18808_v28  ;;  %v2265_v28 = vpop.f32.mrb[183].mxu0 }
 0x4df   : > { %7568 = vmatprep.mubr.bf16.mxu1 %v18809_v16  ;;  %v18839_v16 = vld [vmem:[%s25494_s3 + $0xbe0] ss:$52 sps:$4 sm:$0xff]  }
 0x4e6   : > { %7569 = vmatmul.mubr.bf16.gmra.mrb[84].mxu1 %v18811_v44  ;;  %v3081_v44 = vrot.slane %v2516_v6, 1 }
 0x4e7   : > { %7576 = vmatprep.mubr.bf16.mxu1 %v18814_v34  ;;  %v2517_v34 = vmax.f32 %v2246_v15, %v2265_v28 }
 0x4e8   : > { %v3082_v48 = vsel %vm2731_vm3, %v3079_v30, %v3081_v44 }
 0x4e9   : > { %v3490_v30 = vmax.f32 %v21609_v61, %v3082_v48  ;;  %v18851_v61 = vld [vmem:[%s25494_s3 + $0x88] ss:$52 sps:$4 sm:$0xff]  }
 0x4ea   : > { %v18863_v48 = vld [vmem:[%s25494_s3 + $0x228] ss:$52 sps:$4 sm:$0xff]  }
 0x4eb   : > { %v3692_v51 = vadd.f32 %v21372_v23, %v3490_v30  ;;  %v18866_v30 = vld [vmem:[%s25494_s3 + $0x290] ss:$52 sps:$4 sm:$0xff]  }
 0x4ed   : > { %v3887_v42 = vmax.f32 %v3692_v51, 0.0  ;;  %v18867_v51 = vld [vmem:[%s25494_s3 + $0x2fc] ss:$52 sps:$4 sm:$0xff]  }
 0x4ee   : > { %7577 = vmatmul.mubr.bf16.gmra.mrb[88].mxu1 %v18816_v4  ;;  %v16015_v4 = vcombine.high %v4429_v39, %v4429_v39 }
 0x4ef   : > { %7584 = vmatprep.mubr.bf16.mxu1 %v18817_v29  ;;  %v3087_v29 = vrot.slane %v21667_v56, 1 }
 0x4f6   : > { %7585 = vmatmul.mubr.bf16.gmra.mrb[92].mxu1 %v18819_v54  ;;  %v3690_v54 = vadd.f32 %v21372_v23, %v3488_v52 }
 0x4f7   : > { %7592 = vmatprep.mubr.bf16.mxu1 %v18820_v36  ;;  %v3083_v36 = vrot.slane %v2517_v34, 1 }
 0x4f8   : > { %v3885_v59 = vmax.f32 %v3690_v54, 0.0  ;;  %v18861_v54 = vld [vmem:[%s25494_s3 + $0x22c] ss:$52 sps:$4 sm:$0xff]  }
 0x4f9   : > { %v3086_v19 = vsel %vm2731_vm3, %v3083_v36, %v3085_v26 }
 0x4fa   : > { %v3492_v15 = vmax.f32 %v2517_v34, %v3086_v19 }
 0x4fc   : > { %v3694_v14 = vadd.f32 %v21372_v23, %v3492_v15 }
 0x4fe   : > { %7593 = vmatmul.mubr.bf16.gmra.mrb[96].mxu1 %v18822_v12  ;;  %v21676_v12 = vsel %vm2731_vm3, %v3085_v26, %v3087_v29 }
 0x4ff   : > { %7600 = vmatprep.mubr.bf16.mxu1 %v18823_v32  ;;  %v3084_v32 = vsel %vm2731_vm3, %v3081_v44, %v3083_v36  ;;  %v18864_v36 = vld [vmem:[%s25494_s3 + $0x294] ss:$52 sps:$4 sm:$0xff]  }
 0x500   : > { %v3491_v20 = vmax.f32 %v2516_v6, %v3084_v32  ;;  %v18857_v6 = vld [vmem:[%s25494_s3 + $0x158] ss:$52 sps:$4 sm:$0xff]  }
 0x502   : > { %v3693_v38 = vadd.f32 %v21372_v23, %v3491_v20 }
 0x504   : > { %v3888_v22 = vmax.f32 %v3693_v38, 0.0 }
 0x506   : > { %7601 = vmatmul.mubr.bf16.gmra.mrb[100].mxu1 %v18825_v18  ;;  %v16014_v18 = vcombine.low %v4429_v39, %v4429_v39  ;;  %v3995_v52 = vpack.c.bf16 %v3888_v22, %v3887_v42  ;;  %v3889_v39 = vmax.f32 %v3694_v14, 0.0  ;;  %v18876_v14 = vld [vmem:[%s25494_s3 + $0x434] ss:$52 sps:$4 sm:$0xff]  }
 0x507   : > { %7608 = vmatprep.mubr.bf16.mxu1 %v18828_v13  ;;  %v3994_v13 = vpack.c.bf16 %v3886_v0, %v3885_v59 }
 0x50b   : > { %v21704_v40 = vpop.f32.mrb[184].mxu0 }
 0x50c   : > { %v21707_v31 = vmax.f32 %v2265_v28, %v21704_v40  ;;  %v18858_v28 = vld [vmem:[%s25494_s3 + $0x1c4] ss:$52 sps:$4 sm:$0xff]  }
 0x50e   : > { %7609 = vmatmul.mubr.bf16.gmra.mrb[104].mxu1 %v18830_v33 }
 0x50f   : > { %7616 = vmatprep.mubr.bf16.mxu1 %v18831_v63  ;;  %v3093_v63 = vrot.slane %v21707_v31, 1 }
 0x516   : > { %7617 = vmatmul.mubr.bf16.gmra.mrb[108].mxu1 %v18833_v41 }
 0x517   : > { %7624 = vmatprep.mubr.bf16.mxu1 %v18834_v50 }
 0x51e   : > { %7625 = vmatmul.mubr.bf16.gmra.mrb[112].mxu1 %v18836_v62 }
 0x51f   : > { %7632 = vmatprep.mubr.bf16.mxu1 %v18837_v47 }
 0x526   : > { %7633 = vmatmul.mubr.bf16.gmra.mrb[116].mxu1 %v18839_v16 }
 0x527   : > { %7640 = vmatprep.mubr.bf16.mxu1 %v16015_v4  ;;  %v18860_v4 = vld [vmem:[%s25494_s3 + $0x1c0] ss:$52 sps:$4 sm:$0xff]  }
 0x52e   : > { %7641 = vmatmul.mubr.bf16.gmra.mrb[120].mxu1 %v16014_v18 }
 0x52f   : > { %7680 = vmatprep.mubr.bf16.mxu1 %v18848_v58 }
 0x536   : > { %7681 = vmatmul.mubr.bf16.vlgmr.msra.gmra.mrb[0].mxu1 %v18846_v27 }
 0x537   : > { %7929 = vmatpush1.bf16.msra.mxu1 %v21506_v10  ;;  %7688 = vmatprep.mubr.bf16.mxu1 %v18849_v7  ;;  %v21709_v10 = vpop.f32.mrb[185].mxu0 }
 0x538   : > { %7930 = vmatprep.subr.bf16.mxu1 %v25518_v35  ;;  %v21714_v33 = vpop.f32.mrb[186].mxu0 }
 0x539   : > { %v21719_v53 = vmax.f32 %v16972_v60, %v21714_v33  ;;  %v2281_v21 = vpop.f32.mrb[187].mxu0  ;;  %v3493_v60 = vmax.f32 %v21657_v2, %v21676_v12 }
 0x53a   : > { %v21721_v9 = vmax.f32 %v2262_v46, %v2281_v21  ;;  %v16980_v12 = vpop.f32.mrb[188].mxu0 }
 0x53b   : > { %7931 = vmatpush1.bf16.msra.mxu1 %v21513_v17  ;;  %v2520_v17 = vmax.f32 %v21604_v43, %v21709_v10  ;;  %v3095_v25 = vrot.slane %v21719_v53, 1  ;;  %v18855_v43 = vld [vmem:[%s25494_s3 + $0x15c] ss:$52 sps:$4 sm:$0xff]   ;;  %v3695_v46 = vadd.f32 %v21372_v23, %v3493_v60  ;;  %v21773_v32 = vmax.f32 %v2281_v21, %v16980_v12  ;;  %v2294_v19 = vpop.f32.mrb[189].mxu0 }
 0x53c   : > { %7932 = vmatprep.subr.bf16.mxu1 %v25518_v35  ;;  %v3091_v55 = vrot.slane %v21721_v9, 1  ;;  %v2524_v11 = vmax.f32 %v21663_v8, %v2294_v19  ;;  %v21776_v15 = vpop.f32.mrb[190].mxu0 }
 0x53d   : > { %v3089_v57 = vrot.slane %v2520_v17, 1  ;;  %v21736_v50 = vsel %vm2731_vm3, %v3093_v63, %v3095_v25  ;;  %v3890_v26 = vmax.f32 %v3695_v46, 0.0  ;;  %v3101_v3 = vrot.slane %v21773_v32, 1  ;;  %v2297_v18 = vpop.f32.mrb[191].mxu0 }
 0x53e   : > { %7689 = vmatmul.mubr.bf16.gmra.mrb[4].mxu1 %v18851_v61  ;;  %v3094_v47 = vsel %vm2731_vm3, %v3091_v55, %v3093_v63  ;;  %v21781_v59 = vmax.f32 %v21704_v40, %v21776_v15  ;;  %v3097_v0 = vrot.slane %v2524_v11, 1  ;;  %v2525_v58 = vmax.f32 %v21709_v10, %v2297_v18  ;;  %v18869_v40 = vld [vmem:[%s25494_s3 + $0x2f8] ss:$52 sps:$4 sm:$0xff]  }
 0x53f   : > { %7933 = vmatpush1.bf16.msra.mxu1 %v21532_v49  ;;  %7696 = vmatprep.mubr.bf16.mxu1 %v18852_v37  ;;  %v18854_v49 = vld [vmem:[%s25494_s3 + $0xf0] ss:$52 sps:$4 sm:$0xff]   ;;  %v3090_v41 = vsel %vm2731_vm3, %v3087_v29, %v3089_v57  ;;  %v3092_v62 = vsel %vm2731_vm3, %v3089_v57, %v3091_v55  ;;  %v3996_v2 = vpack.c.bf16 %v3890_v26, %v3889_v39  ;;  %v18875_v55 = vld [vmem:[%s25494_s3 + $0x3c8] ss:$52 sps:$4 sm:$0xff]  }
 0x540   : > { %7934 = vmatprep.subr.bf16.mxu1 %v25518_v35  ;;  %v3495_v16 = vmax.f32 %v2520_v17, %v3092_v62  ;;  %v3098_v8 = vsel %vm2731_vm3, %v3095_v25, %v3097_v0  ;;  %v3099_v20 = vrot.slane %v2525_v58, 1  ;;  %v18870_v17 = vld [vmem:[%s25494_s3 + $0x364] ss:$52 sps:$4 sm:$0xff]  }
 0x541   : > { %v3498_v21 = vmax.f32 %v21719_v53, %v3098_v8 }
 0x542   : > { %v3697_v34 = vadd.f32 %v21372_v23, %v3495_v16  ;;  %v3100_v42 = vsel %vm2731_vm3, %v3097_v0, %v3099_v20  ;;  %v3102_v22 = vsel %vm2731_vm3, %v3099_v20, %v3101_v3 }
 0x543   : > { %7935 = vmatpush1.bf16.msra.mxu1 %v21534_v5  ;;  %v3496_v5 = vmax.f32 %v21721_v9, %v3094_v47  ;;  %v3500_v7 = vmax.f32 %v2525_v58, %v3102_v22  ;;  %v3499_v57 = vmax.f32 %v2524_v11, %v3100_v42 }
 0x544   : > { %7936 = vmatprep.subr.bf16.mxu1 %v25518_v35  ;;  %v3892_v29 = vmax.f32 %v3697_v34, 0.0 }
 0x545   : > { %v3698_v27 = vadd.f32 %v21372_v23, %v3496_v5  ;;  %v3701_v9 = vadd.f32 %v21372_v23, %v3499_v57  ;;  %v3702_v16 = vadd.f32 %v21372_v23, %v3500_v7 }
 0x546   : > { %7697 = vmatmul.mubr.bf16.gmra.mrb[8].mxu1 %v18854_v49  ;;  %v18872_v49 = vld [vmem:[%s25494_s3 + $0x360] ss:$52 sps:$4 sm:$0xff]  }
 0x547   : > { %7704 = vmatprep.mubr.bf16.mxu1 %v18855_v43  ;;  %7937 = vmatpush1.bf16.msra.mxu1 %v21638_v24  ;;  %v3494_v24 = vmax.f32 %v21667_v56, %v3090_v41  ;;  %v3893_v37 = vmax.f32 %v3698_v27, 0.0  ;;  %v3896_v43 = vmax.f32 %v3701_v9, 0.0  ;;  %v18873_v41 = vld [vmem:[%s25494_s3 + $0x3cc] ss:$52 sps:$4 sm:$0xff]  }
 0x548   : > { %7938 = vmatprep.subr.bf16.mxu1 %v25518_v35 }
 0x549   : > { %v3696_v44 = vadd.f32 %v21372_v23, %v3494_v24  ;;  %v18878_v24 = vld [vmem:[%s25494_s3 + $0x430] ss:$52 sps:$4 sm:$0xff]  }
 0x54b   : > { %7939 = vmatpush1.bf16.msra.mxu1 %v21649_v45  ;;  %v3891_v45 = vmax.f32 %v3696_v44, 0.0 }
 0x54c   : > { %7940 = vmatprep.subr.bf16.mxu1 %v25518_v35 }
 0x54d   : > { %v3997_v56 = vpack.c.bf16 %v3892_v29, %v3891_v45 }
 0x54e   : > { %7705 = vmatmul.mubr.bf16.gmra.mrb[12].mxu1 %v18857_v6 }
 0x54f   : > { %7712 = vmatprep.mubr.bf16.mxu1 %v18858_v28  ;;  %7941 = vmatpush1.bf16.msra.mxu1 %v3994_v13  ;;  %v3103_v13 = vrot.slane %v21781_v59, 1 }
 0x550   : > { %7942 = vmatprep.subr.bf16.mxu1 %v25518_v35 }
 0x551   : > { %v3104_v38 = vsel %vm2731_vm3, %v3101_v3, %v3103_v13 }
 0x553   : > { %7943 = vmatpush1.bf16.msra.mxu1 %v3995_v52  ;;  %v3497_v52 = vmax.f32 %v21707_v31, %v21736_v50  ;;  %v3700_v31 = vadd.f32 %v21372_v23, %v3498_v21 }
 0x554   : > { %7944 = vmatprep.subr.bf16.mxu1 %v25518_v35 }
 0x555   : > { %v3699_v61 = vadd.f32 %v21372_v23, %v3497_v52  ;;  %v3895_v25 = vmax.f32 %v3700_v31, 0.0 }
 0x556   : > { %7713 = vmatmul.mubr.bf16.gmra.mrb[16].mxu1 %v18860_v4  ;;  %v3501_v4 = vmax.f32 %v21773_v32, %v3104_v38 }
 0x557   : > { %7720 = vmatprep.mubr.bf16.mxu1 %v18861_v54  ;;  %7945 = vmatpush1.bf16.msra.mxu1 %v3996_v2  ;;  %v3894_v10 = vmax.f32 %v3699_v61, 0.0  ;;  %v3999_v53 = vpack.c.bf16 %v3896_v43, %v3895_v25 }
 0x558   : > { %7946 = vmatprep.subr.bf16.mxu1 %v25518_v35 }
 0x559   : > { %v3998_v63 = vpack.c.bf16 %v3894_v10, %v3893_v37 }
 0x55b   : > { %7947 = vmatpush1.bf16.msra.mxu1 %v3997_v56 }
 0x55c   : > { %7948 = vmatprep.subr.bf16.mxu1 %v25518_v35 }
 0x55d   : > { %v16984_v50 = vpop.f32.mrb[192].mxu0 }
 0x55e   : > { %7721 = vmatmul.mubr.bf16.gmra.mrb[20].mxu1 %v18863_v48  ;;  %v2530_v62 = vmax.f32 %v2297_v18, %v16984_v50  ;;  %v2310_v47 = vpop.f32.mrb[193].mxu0  ;;  %v3897_v18 = vmax.f32 %v3702_v16, 0.0 }
 0x55f   : > { %7728 = vmatprep.mubr.bf16.mxu1 %v18864_v36  ;;  %7949 = vmatpush1.bf16.msra.mxu1 %v3998_v63  ;;  %v2528_v5 = vmax.f32 %v21714_v33, %v2310_v47  ;;  %v16985_v60 = vpop.f32.mrb[194].mxu0  ;;  %v18879_v33 = vld [vmem:[%s25494_s3 + $0x49c] ss:$52 sps:$4 sm:$0xff]   ;;  %v3703_v36 = vadd.f32 %v21372_v23, %v3501_v4 }
 0x560   : > { %7950 = vmatprep.subr.bf16.mxu1 %v25518_v35  ;;  %v3109_v46 = vrot.slane %v2530_v62, 1  ;;  %v2531_v39 = vmax.f32 %v16980_v12, %v16985_v60  ;;  %v2313_v6 = vpop.f32.mrb[195].mxu0  ;;  %v18884_v60 = vld [vmem:[%s25494_s3 + $0x500] ss:$52 sps:$4 sm:$0xff]  }
 0x561   : > { %v3105_v26 = vrot.slane %v2528_v5, 1  ;;  %v2529_v28 = vmax.f32 %v2294_v19, %v2313_v6  ;;  %v3898_v0 = vmax.f32 %v3703_v36, 0.0  ;;  %v18894_v36 = vld [vmem:[%s25494_s3 + $0x6a4] ss:$52 sps:$4 sm:$0xff]  }
 0x562   : > { %v3111_v2 = vrot.slane %v2531_v39, 1 }
 0x563   : > { %7951 = vmatpush1.bf16.msra.mxu1 %v3999_v53  ;;  %v3106_v44 = vsel %vm2731_vm3, %v3103_v13, %v3105_v26  ;;  %v3107_v34 = vrot.slane %v2529_v28, 1  ;;  %v4000_v27 = vpack.c.bf16 %v3898_v0, %v3897_v18  ;;  %v18903_v18 = vld [vmem:[%s25494_s3 + $0x7dc] ss:$52 sps:$4 sm:$0xff]   ;;  %v18905_v0 = vld [vmem:[%s25494_s3 + $0x7d8] ss:$52 sps:$4 sm:$0xff]  }
 0x564   : > { %7952 = vmatprep.subr.bf16.mxu1 %v25518_v35  ;;  %v3112_v45 = vsel %vm2731_vm3, %v3109_v46, %v3111_v2  ;;  %v3502_v58 = vmax.f32 %v21781_v59, %v3106_v44  ;;  %v18887_v44 = vld [vmem:[%s25494_s3 + $0x568] ss:$52 sps:$4 sm:$0xff]  }
 0x565   : > { %v3505_v29 = vmax.f32 %v2530_v62, %v3112_v45  ;;  %v3108_v54 = vsel %vm2731_vm3, %v3105_v26, %v3107_v34  ;;  %v3110_v56 = vsel %vm2731_vm3, %v3107_v34, %v3109_v46  ;;  %v18888_v45 = vld [vmem:[%s25494_s3 + $0x5d4] ss:$52 sps:$4 sm:$0xff]  }
 0x566   : > { %7729 = vmatmul.mubr.bf16.gmra.mrb[24].mxu1 %v18866_v30  ;;  %v16988_v48 = vpop.f32.mrb[196].mxu0  ;;  %v3504_v12 = vmax.f32 %v2529_v28, %v3110_v56  ;;  %v3503_v20 = vmax.f32 %v2528_v5, %v3108_v54  ;;  %v3704_v42 = vadd.f32 %v21372_v23, %v3502_v58  ;;  %v18891_v54 = vld [vmem:[%s25494_s3 + $0x63c] ss:$52 sps:$4 sm:$0xff]   ;;  %v25510_v56 = vmov 0.0   ;;  %v18906_v58 = vld [vmem:[%s25494_s3 + $0x844] ss:$52 sps:$4 sm:$0xff]  }
 0x567   : > { %7736 = vmatprep.mubr.bf16.mxu1 %v18867_v51  ;;  %v21836_v19 = vmax.f32 %v2313_v6, %v16988_v48  ;;  %v2326_v11 = vpop.f32.mrb[197].mxu0  ;;  %7953 = vmatpush1.bf16.msra.mxu1 %v4000_v27  ;;  %v3707_v9 = vadd.f32 %v21372_v23, %v3505_v29  ;;  %v18893_v48 = vld [vmem:[%s25494_s3 + $0x638] ss:$52 sps:$4 sm:$0xff]  }
 0x568   : > { %v2532_v32 = vmax.f32 %v21776_v15, %v2326_v11  ;;  %v16989_v3 = vpop.f32.mrb[198].mxu0  ;;  %v3705_v7 = vadd.f32 %v21372_v23, %v3503_v20  ;;  %v18881_v15 = vld [vmem:[%s25494_s3 + $0x498] ss:$52 sps:$4 sm:$0xff]   ;;  %v3706_v59 = vadd.f32 %v21372_v23, %v3504_v12  ;;  %v3899_v37 = vmax.f32 %v3704_v42, 0.0  ;;  %7954 = vmatprep.subr.bf16.mxu1 %v25518_v35  ;;  %v18896_v12 = vld [vmem:[%s25494_s3 + $0x6a0] ss:$52 sps:$4 sm:$0xff]  }
 0x569   : > { %v3117_v13 = vrot.slane %v21836_v19, 1  ;;  %v2535_v30 = vmax.f32 %v16984_v50, %v16989_v3  ;;  %v2329_v8 = vpop.f32.mrb[199].mxu0  ;;  %v18899_v11 = vld [vmem:[%s25494_s3 + $0x708] ss:$52 sps:$4 sm:$0xff]   ;;  %v18902_v3 = vld [vmem:[%s25494_s3 + $0x770] ss:$52 sps:$4 sm:$0xff]  }
 0x56a   : > { %v3113_v51 = vrot.slane %v2532_v32, 1  ;;  %v2533_v38 = vmax.f32 %v2310_v47, %v2329_v8  ;;  %v3900_v63 = vmax.f32 %v3705_v7, 0.0  ;;  %v3901_v53 = vmax.f32 %v3706_v59, 0.0  ;;  %v18911_v8 = vld [vmem:[%s25494_s3 + $0x8a8] ss:$52 sps:$4 sm:$0xff]  }
 0x56b   : > { %v3119_v22 = vrot.slane %v2535_v30, 1  ;;  %v18912_v20 = vld [vmem:[%s25494_s3 + $0x914] ss:$52 sps:$4 sm:$0xff]   ;;  %v18917_v27 = vld [vmem:[%s25494_s3 + $0x978] ss:$52 sps:$4 sm:$0xff]  }
 0x56c   : > { %v3114_v52 = vsel %vm2731_vm3, %v3111_v2, %v3113_v51  ;;  %v3115_v61 = vrot.slane %v2533_v38, 1  ;;  %v4001_v43 = vpack.c.bf16 %v3900_v63, %v3899_v37  ;;  %v6523_v2 = vsel %vm6522_vm4, 4294967295, %v19369_v1  ;;  %v18918_v42 = vld [vmem:[%s25494_s3 + $0x9e4] ss:$52 sps:$4 sm:$0xff]   ;;  %v18921_v7 = vld [vmem:[%s25494_s3 + $0xa4c] ss:$52 sps:$4 sm:$0xff]  }
 0x56d   : > { %v3506_v10 = vmax.f32 %v2531_v39, %v3114_v52  ;;  %v18885_v39 = vld [vmem:[%s25494_s3 + $0x56c] ss:$52 sps:$4 sm:$0xff]   ;;  %v18924_v59 = vld [vmem:[%s25494_s3 + $0xab4] ss:$52 sps:$4 sm:$0xff]   ;;  %v18926_v52 = vld [vmem:[%s25494_s3 + $0xab0] ss:$52 sps:$4 sm:$0xff]  }
 0x56e   : > { %7737 = vmatmul.mubr.bf16.gmra.mrb[28].mxu1 %v18869_v40  ;;  %v18882_v40 = vld [vmem:[%s25494_s3 + $0x504] ss:$52 sps:$4 sm:$0xff]   ;;  %v3116_v57 = vsel %vm2731_vm3, %v3113_v51, %v3115_v61  ;;  %v3118_v31 = vsel %vm2731_vm3, %v3115_v61, %v3117_v13  ;;  %v18927_v61 = vld [vmem:[%s25494_s3 + $0xb1c] ss:$52 sps:$4 sm:$0xff]  }
 0x56f   : > { %7744 = vmatprep.mubr.bf16.mxu1 %v18870_v17  ;;  %v3120_v17 = vsel %vm2731_vm3, %v3117_v13, %v3119_v22  ;;  %v3508_v25 = vmax.f32 %v2533_v38, %v3118_v31  ;;  %7955 = vmatpush1.bf16.msra.mxu1 %v4001_v43  ;;  %v18908_v13 = vld [vmem:[%s25494_s3 + $0x840] ss:$52 sps:$4 sm:$0xff]   ;;  %v18914_v51 = vld [vmem:[%s25494_s3 + $0x910] ss:$52 sps:$4 sm:$0xff]   ;;  %v18929_v37 = vld [vmem:[%s25494_s3 + $0xb18] ss:$52 sps:$4 sm:$0xff]  }
 0x570   : > { %v3509_v21 = vmax.f32 %v21836_v19, %v3120_v17  ;;  %7956 = vmatprep.subr.bf16.mxu1 %v25518_v35  ;;  %v18897_v19 = vld [vmem:[%s25494_s3 + $0x70c] ss:$52 sps:$4 sm:$0xff]   ;;  %v18915_v38 = vld [vmem:[%s25494_s3 + $0x97c] ss:$52 sps:$4 sm:$0xff]  }
 0x571   : > { %v3710_v26 = vadd.f32 %v21372_v23, %v3508_v25  ;;  %v18933_v17 = vld [vmem:[%s25494_s3 + $0xbec] ss:$52 sps:$4 sm:$0xff]   ;;  %v4430_v63 = vld [vmem:[%s25494_s3 + $0xc50] sm:$0x77] }
 0x572   : > { %v3711_v16 = vadd.f32 %v21372_v23, %v3509_v21  ;;  %v18935_v21 = vld [vmem:[%s25494_s3 + $0xbe8] ss:$52 sps:$4 sm:$0xff]   ;;  %v16016_v31 = vcombine.low %v4430_v63, %v4430_v63  ;;  %v18943_v43 = vld [vmem:[%s25494_s3 + $0x90] ss:$52 sps:$4 sm:$0xff]  }
 0x573   : > { %v18941_v25 = vld [vmem:[%s25494_s3 + $0x94] ss:$52 sps:$4 sm:$0xff]  }
 0x574   : > { %v3906_v4 = vmax.f32 %v3711_v16, 0.0  ;;  %v18965_v16 = vld [vmem:[%s25494_s3 + $0x3d4] ss:$52 sps:$4 sm:$0xff]  }
 0x576   : > { %7745 = vmatmul.mubr.bf16.gmra.mrb[32].mxu1 %v18872_v49  ;;  %v3507_v49 = vmax.f32 %v2532_v32, %v3116_v57  ;;  %v18900_v32 = vld [vmem:[%s25494_s3 + $0x774] ss:$52 sps:$4 sm:$0xff]   ;;  %v16017_v57 = vcombine.high %v4430_v63, %v4430_v63  ;;  %v19017_v63 = vld [vmem:[%s25494_s3 + $0xa50] ss:$52 sps:$4 sm:$0xff]  }
 0x577   : > { %7752 = vmatprep.mubr.bf16.mxu1 %v18873_v41  ;;  %v3510_v41 = vmax.f32 %v2535_v30, %v3119_v22  ;;  %v18909_v30 = vld [vmem:[%s25494_s3 + $0x8ac] ss:$52 sps:$4 sm:$0xff]  }
 0x578   : > { %v3709_v50 = vadd.f32 %v21372_v23, %v3507_v49  ;;  %v18920_v22 = vld [vmem:[%s25494_s3 + $0x9e0] ss:$52 sps:$4 sm:$0xff]   ;;  %v18938_v49 = vld [vmem:[%s25494_s3 + $0x28] ss:$52 sps:$4 sm:$0xff]  }
 0x579   : > { %v3712_v46 = vadd.f32 %v21372_v23, %v3510_v41  ;;  %v18944_v41 = vld [vmem:[%s25494_s3 + $0xfc] ss:$52 sps:$4 sm:$0xff]  }
 0x57a   : > { %v3904_v5 = vmax.f32 %v3709_v50, 0.0  ;;  %v18950_v50 = vld [vmem:[%s25494_s3 + $0x1cc] ss:$52 sps:$4 sm:$0xff]  }
 0x57b   : > { %v3907_v28 = vmax.f32 %v3712_v46, 0.0  ;;  %v18956_v46 = vld [vmem:[%s25494_s3 + $0x29c] ss:$52 sps:$4 sm:$0xff]  }
 0x57d   : > { %v21875_v34 = vpack.c.bf16 %v3907_v28, %v3907_v28  ;;  %v18962_v28 = vld [vmem:[%s25494_s3 + $0x36c] ss:$52 sps:$4 sm:$0xff]  }
 0x57e   : > { %7753 = vmatmul.mubr.bf16.gmra.mrb[36].mxu1 %v18875_v55  ;;  %v3902_v55 = vmax.f32 %v3707_v9, 0.0  ;;  %v18940_v9 = vld [vmem:[%s25494_s3 + $0x2c] ss:$52 sps:$4 sm:$0xff]  }
 0x57f   : > { %7760 = vmatprep.mubr.bf16.mxu1 %v18876_v14  ;;  %v3708_v14 = vadd.f32 %v21372_v23, %v3506_v10  ;;  %v18890_v23 = vld [vmem:[%s25494_s3 + $0x5d0] ss:$52 sps:$4 sm:$0xff]   ;;  %v18932_v10 = vld [vmem:[%s25494_s3 + $0xb80] ss:$52 sps:$4 sm:$0xff]  }
 0x580   : > { %v4002_v62 = vpack.c.bf16 %v3902_v55, %v3901_v53  ;;  %v18946_v53 = vld [vmem:[%s25494_s3 + $0xf8] ss:$52 sps:$4 sm:$0xff]  }
 0x581   : > { %v3903_v47 = vmax.f32 %v3708_v14, 0.0  ;;  %v18947_v55 = vld [vmem:[%s25494_s3 + $0x164] ss:$52 sps:$4 sm:$0xff]   ;;  %v18949_v14 = vld [vmem:[%s25494_s3 + $0x160] ss:$52 sps:$4 sm:$0xff]  }
 0x582   : > { %7957 = vmatpush1.bf16.msra.mxu1 %v4002_v62  ;;  %v19000_v62 = vld [vmem:[%s25495_s4] sm:$0xff]  }
 0x583   : > { %v4003_v6 = vpack.c.bf16 %v3904_v5, %v3903_v47  ;;  %7958 = vmatprep.subr.bf16.mxu1 %v25518_v35  ;;  %10194 = vmatpush1.bf16.msra.mxu0 %v19000_v62  ;;  %v18952_v47 = vld [vmem:[%s25494_s3 + $0x1c8] ss:$52 sps:$4 sm:$0xff]  }
 0x584   : > { %10195 = vmatprep.subr.bf16.mxu0 %v25518_v35  ;;  %v18953_v5 = vld [vmem:[%s25494_s3 + $0x234] ss:$52 sps:$4 sm:$0xff]  }
 0x586   : > { %7761 = vmatmul.mubr.bf16.gmra.mrb[40].mxu1 %v18878_v24  ;;  %v3905_v24 = vmax.f32 %v3710_v26, 0.0  ;;  %v18961_v26 = vld [vmem:[%s25494_s3 + $0x300] ss:$52 sps:$4 sm:$0xff]  }
 0x587   : > { %7768 = vmatprep.mubr.bf16.mxu1 %v18879_v33  ;;  %7959 = vmatpush1.bf16.msra.mxu1 %v4003_v6  ;;  %v21878_v33 = vsel %vm1501_vm0, %v6523_v2, 0  ;;  %v18959_v6 = vld [vmem:[%s25494_s3 + $0x304] ss:$52 sps:$4 sm:$0xff]   ;;  %v19011_v2 = vld [vmem:[%s25495_s4 + $0x8] sm:$0xff]  }
 0x588   : > { %v21883_v29 = vpack.c.bf16 %v3906_v4, %v3905_v24  ;;  %v6526_v1 = vand.u32 %v21878_v33, %v21875_v34  ;;  %16990 = vmatprep.subr.bf16.mxu1 %v25510_v56  ;;  %10196 = vmatpush1.bf16.msra.mxu0 %v19011_v2  ;;  %v18964_v24 = vld [vmem:[%s25494_s3 + $0x368] ss:$52 sps:$4 sm:$0xff]   ;;  %v18970_v4 = vld [vmem:[%s25494_s3 + $0x438] ss:$52 sps:$4 sm:$0xff]   ;;  %v19042_v2 = vld [vmem:[%s25494_s3 + $0x2a0] ss:$52 sps:$4 sm:$0xff]  }
 0x589   : > { %10197 = vmatprep.subr.bf16.mxu0 %v25518_v35  ;;  %v18968_v34 = vld [vmem:[%s25494_s3 + $0x43c] ss:$52 sps:$4 sm:$0xff]   ;;  %v18971_v33 = vld [vmem:[%s25494_s3 + $0x4a4] ss:$52 sps:$4 sm:$0xff]  }
 0x58e   : > { %7769 = vmatmul.mubr.bf16.gmra.mrb[44].mxu1 %v18881_v15  ;;  %v18923_v15 = vld [vmem:[%s25494_s3 + $0xa48] ss:$52 sps:$4 sm:$0xff]  }
 0x58f   : > { %7776 = vmatprep.mubr.bf16.mxu1 %v18882_v40  ;;  %v18930_v40 = vld [vmem:[%s25494_s3 + $0xb84] ss:$52 sps:$4 sm:$0xff]  }
 0x596   : > { %7777 = vmatmul.mubr.bf16.gmra.mrb[48].mxu1 %v18884_v60  ;;  %v18955_v60 = vld [vmem:[%s25494_s3 + $0x230] ss:$52 sps:$4 sm:$0xff]  }
 0x597   : > { %7784 = vmatprep.mubr.bf16.mxu1 %v18885_v39  ;;  %v18958_v39 = vld [vmem:[%s25494_s3 + $0x298] ss:$52 sps:$4 sm:$0xff]  }
 0x59e   : > { %7785 = vmatmul.mubr.bf16.gmra.mrb[52].mxu1 %v18887_v44  ;;  %v18967_v44 = vld [vmem:[%s25494_s3 + $0x3d0] ss:$52 sps:$4 sm:$0xff]  }
 0x59f   : > { %7792 = vmatprep.mubr.bf16.mxu1 %v18888_v45  ;;  %v19021_v45 = vld [vmem:[%s25495_s4 + $0x10] sm:$0xff]  }
 0x5a0   : > { %10198 = vmatpush1.bf16.msra.mxu0 %v19021_v45  ;;  %v19049_v45 = vld [vmem:[%s25494_s3 + $0x4a8] ss:$52 sps:$4 sm:$0xff]  }
 0x5a1   : > { %10199 = vmatprep.subr.bf16.mxu0 %v25518_v35 }
 0x5a6   : > { %7793 = vmatmul.mubr.bf16.gmra.mrb[56].mxu1 %v18890_v23  ;;  %v18976_v23 = vld [vmem:[%s25494_s3 + $0x508] ss:$52 sps:$4 sm:$0xff]  }
 0x5a7   : > { %7800 = vmatprep.mubr.bf16.mxu1 %v18891_v54  ;;  %v18977_v54 = vld [vmem:[%s25494_s3 + $0x574] ss:$52 sps:$4 sm:$0xff]  }
 0x5ae   : > { %7801 = vmatmul.mubr.bf16.gmra.mrb[60].mxu1 %v18893_v48  ;;  %v18979_v48 = vld [vmem:[%s25494_s3 + $0x570] ss:$52 sps:$4 sm:$0xff]  }
 0x5af   : > { %7808 = vmatprep.mubr.bf16.mxu1 %v18894_v36  ;;  %v18980_v36 = vld [vmem:[%s25494_s3 + $0x5dc] ss:$52 sps:$4 sm:$0xff]  }
 0x5b6   : > { %7809 = vmatmul.mubr.bf16.gmra.mrb[64].mxu1 %v18896_v12  ;;  %v19031_v12 = vld [vmem:[%s25495_s4 + $0x18] sm:$0xff]  }
 0x5b7   : > { %7816 = vmatprep.mubr.bf16.mxu1 %v18897_v19  ;;  %10200 = vmatpush1.bf16.msra.mxu0 %v19031_v12  ;;  %v18982_v19 = vld [vmem:[%s25494_s3 + $0x5d8] ss:$52 sps:$4 sm:$0xff]   ;;  %v19054_v12 = vld [vmem:[%s25494_s3 + $0x648] ss:$52 sps:$4 sm:$0xff]  }
 0x5b8   : > { %10201 = vmatprep.subr.bf16.mxu0 %v25518_v35 }
 0x5be   : > { %7817 = vmatmul.mubr.bf16.gmra.mrb[68].mxu1 %v18899_v11  ;;  %v18983_v11 = vld [vmem:[%s25494_s3 + $0x644] ss:$52 sps:$4 sm:$0xff]  }
 0x5bf   : > { %7824 = vmatprep.mubr.bf16.mxu1 %v18900_v32  ;;  %v18985_v32 = vld [vmem:[%s25494_s3 + $0x640] ss:$52 sps:$4 sm:$0xff]  }
 0x5c6   : > { %7825 = vmatmul.mubr.bf16.gmra.mrb[72].mxu1 %v18902_v3  ;;  %v18986_v3 = vld [vmem:[%s25494_s3 + $0x6ac] ss:$52 sps:$4 sm:$0xff]  }
 0x5c7   : > { %7832 = vmatprep.mubr.bf16.mxu1 %v18903_v18  ;;  %v18988_v18 = vld [vmem:[%s25494_s3 + $0x6a8] ss:$52 sps:$4 sm:$0xff]  }
 0x5ce   : > { %7833 = vmatmul.mubr.bf16.gmra.mrb[76].mxu1 %v18905_v0  ;;  %v18989_v0 = vld [vmem:[%s25494_s3 + $0x714] ss:$52 sps:$4 sm:$0xff]  }
 0x5cf   : > { %7840 = vmatprep.mubr.bf16.mxu1 %v18906_v58  ;;  %v19036_v58 = vld [vmem:[%s25495_s4 + $0x20] sm:$0xff]  }
 0x5d0   : > { %10202 = vmatpush1.bf16.msra.mxu0 %v19036_v58  ;;  %v19063_v58 = vld [vmem:[%s25494_s3 + $0x920] ss:$52 sps:$4 sm:$0xff]  }
 0x5d1   : > { %10203 = vmatprep.subr.bf16.mxu0 %v25518_v35 }
 0x5d6   : > { %7841 = vmatmul.mubr.bf16.gmra.mrb[80].mxu1 %v18908_v13  ;;  %v18991_v13 = vld [vmem:[%s25494_s3 + $0x710] ss:$52 sps:$4 sm:$0xff]  }
 0x5d7   : > { %7848 = vmatprep.mubr.bf16.mxu1 %v18909_v30  ;;  %v18992_v30 = vld [vmem:[%s25494_s3 + $0x77c] ss:$52 sps:$4 sm:$0xff]  }
 0x5de   : > { %7849 = vmatmul.mubr.bf16.gmra.mrb[84].mxu1 %v18911_v8  ;;  %v18994_v8 = vld [vmem:[%s25494_s3 + $0x778] ss:$52 sps:$4 sm:$0xff]  }
 0x5df   : > { %7856 = vmatprep.mubr.bf16.mxu1 %v18912_v20  ;;  %v18995_v20 = vld [vmem:[%s25494_s3 + $0x7e4] ss:$52 sps:$4 sm:$0xff]  }
 0x5e6   : > { %7857 = vmatmul.mubr.bf16.gmra.mrb[88].mxu1 %v18914_v51  ;;  %v18997_v51 = vld [vmem:[%s25494_s3 + $0x7e0] ss:$52 sps:$4 sm:$0xff]  }
 0x5e7   : > { %7864 = vmatprep.mubr.bf16.mxu1 %v18915_v38  ;;  %v18998_v38 = vld [vmem:[%s25494_s3 + $0x84c] ss:$52 sps:$4 sm:$0xff]  }
 0x5ee   : > { %7865 = vmatmul.mubr.bf16.gmra.mrb[92].mxu1 %v18917_v27  ;;  %v19040_v27 = vld [vmem:[%s25495_s4 + $0x28] sm:$0xff]  }
 0x5ef   : > { %7872 = vmatprep.mubr.bf16.mxu1 %v18918_v42  ;;  %10204 = vmatpush1.bf16.msra.mxu0 %v19040_v27  ;;  %v19001_v42 = vld [vmem:[%s25494_s3 + $0x848] ss:$52 sps:$4 sm:$0xff]  }
 0x5f0   : > { %10205 = vmatprep.subr.bf16.mxu0 %v25518_v35  ;;  %v19070_v27 = vld [vmem:[%s25494_s3 + $0xb28] ss:$52 sps:$4 sm:$0xff]  }
 0x5f6   : > { %7873 = vmatmul.mubr.bf16.gmra.mrb[96].mxu1 %v18920_v22  ;;  %v19002_v22 = vld [vmem:[%s25494_s3 + $0x8b4] ss:$52 sps:$4 sm:$0xff]  }
 0x5f7   : > { %7880 = vmatprep.mubr.bf16.mxu1 %v18921_v7  ;;  %v19004_v7 = vld [vmem:[%s25494_s3 + $0x8b0] ss:$52 sps:$4 sm:$0xff]  }
 0x5fe   : > { %7881 = vmatmul.mubr.bf16.gmra.mrb[100].mxu1 %v18923_v15  ;;  %v19005_v15 = vld [vmem:[%s25494_s3 + $0x91c] ss:$52 sps:$4 sm:$0xff]  }
 0x5ff   : > { %7888 = vmatprep.mubr.bf16.mxu1 %v18924_v59  ;;  %v19007_v59 = vld [vmem:[%s25494_s3 + $0x918] ss:$52 sps:$4 sm:$0xff]  }
 0x606   : > { %7889 = vmatmul.mubr.bf16.gmra.mrb[104].mxu1 %v18926_v52  ;;  %v19008_v52 = vld [vmem:[%s25494_s3 + $0x984] ss:$52 sps:$4 sm:$0xff]  }
 0x607   : > { %7896 = vmatprep.mubr.bf16.mxu1 %v18927_v61  ;;  %v19044_v61 = vld [vmem:[%s25495_s4 + $0x30] sm:$0xff]  }
 0x608   : > { %10206 = vmatpush1.bf16.msra.mxu0 %v19044_v61  ;;  %v19073_v61 = vld [vmem:[%s25494_s3 + $0xb90] ss:$52 sps:$4 sm:$0xff]  }
 0x609   : > { %10207 = vmatprep.subr.bf16.mxu0 %v25518_v35 }
 0x60e   : > { %7897 = vmatmul.mubr.bf16.gmra.mrb[108].mxu1 %v18929_v37  ;;  %v19010_v37 = vld [vmem:[%s25494_s3 + $0x980] ss:$52 sps:$4 sm:$0xff]  }
 0x60f   : > { %7904 = vmatprep.mubr.bf16.mxu1 %v18930_v40  ;;  %v19012_v40 = vld [vmem:[%s25494_s3 + $0x9ec] ss:$52 sps:$4 sm:$0xff]  }
 0x616   : > { %7905 = vmatmul.mubr.bf16.gmra.mrb[112].mxu1 %v18932_v10  ;;  %v19014_v10 = vld [vmem:[%s25494_s3 + $0x9e8] ss:$52 sps:$4 sm:$0xff]  }
 0x617   : > { %7912 = vmatprep.mubr.bf16.mxu1 %v18933_v17  ;;  %v19015_v17 = vld [vmem:[%s25494_s3 + $0xa54] ss:$52 sps:$4 sm:$0xff]  }
 0x61e   : > { %7913 = vmatmul.mubr.bf16.gmra.mrb[116].mxu1 %v18935_v21  ;;  %v19018_v21 = vld [vmem:[%s25494_s3 + $0xabc] ss:$52 sps:$4 sm:$0xff]  }
 0x61f   : > { %7920 = vmatprep.mubr.bf16.mxu1 %v16017_v57  ;;  %v19048_v57 = vld [vmem:[%s25495_s4 + $0x38] sm:$0xff]  }
 0x620   : > { %10208 = vmatpush1.bf16.msra.mxu0 %v19048_v57 }
 0x621   : > { %10209 = vmatprep.subr.bf16.mxu0 %v25518_v35 }
 0x626   : > { %7921 = vmatmul.mubr.bf16.gmra.mrb[120].mxu1 %v16016_v31  ;;  %v19020_v31 = vld [vmem:[%s25494_s3 + $0xab8] ss:$52 sps:$4 sm:$0xff]  }
 0x627   : > { %7960 = vmatprep.mubr.bf16.mxu1 %v18940_v9  ;;  %v19022_v9 = vld [vmem:[%s25494_s3 + $0xb24] ss:$52 sps:$4 sm:$0xff]  }
 0x62e   : > { %7961 = vmatmul.mubr.bf16.vlgmr.msra.gmra.mrb[0].mxu1 %v18938_v49  ;;  %v19024_v49 = vld [vmem:[%s25494_s3 + $0xb20] ss:$52 sps:$4 sm:$0xff]  }
 0x62f   : > { %16991 = vmatpush3.bf16.msra.mxu1 %v21883_v29  ;;  %7968 = vmatprep.mubr.bf16.mxu1 %v18941_v25  ;;  %v18973_v29 = vld [vmem:[%s25494_s3 + $0x4a0] ss:$52 sps:$4 sm:$0xff]  }
 0x630   : > { %16992 = vmatprep.subr.bf16.mxu1 %v25510_v56  ;;  %v19025_v25 = vld [vmem:[%s25494_s3 + $0xb8c] ss:$52 sps:$4 sm:$0xff]  }
 0x633   : > { %16993 = vmatpush3.bf16.msra.mxu1 %v6526_v1  ;;  %v18974_v1 = vld [vmem:[%s25494_s3 + $0x50c] ss:$52 sps:$4 sm:$0xff]  }
 0x636   : > { %7969 = vmatmul.mubr.bf16.gmra.mrb[4].mxu1 %v18943_v43  ;;  %v19027_v43 = vld [vmem:[%s25494_s3 + $0xb88] ss:$52 sps:$4 sm:$0xff]  }
 0x637   : > { %7976 = vmatprep.mubr.bf16.mxu1 %v18944_v41  ;;  %v19028_v41 = vld [vmem:[%s25494_s3 + $0xbf4] ss:$52 sps:$4 sm:$0xff]  }
 0x63e   : > { %7977 = vmatmul.mubr.bf16.gmra.mrb[8].mxu1 %v18946_v53  ;;  %v19052_v53 = vld [vmem:[%s25495_s4 + $0x40] sm:$0xff]  }
 0x63f   : > { %7984 = vmatprep.mubr.bf16.mxu1 %v18947_v55  ;;  %v4431_v55 = vld [vmem:[%s25494_s3 + $0xc58] sm:$0x77]  ;;  %10210 = vmatpush1.bf16.msra.mxu0 %v19052_v53 }
 0x640   : > { %10211 = vmatprep.subr.bf16.mxu0 %v25518_v35  ;;  %v16018_v62 = vcombine.low %v4431_v55, %v4431_v55 }
 0x646   : > { %7985 = vmatmul.mubr.bf16.gmra.mrb[12].mxu1 %v18949_v14  ;;  %v19030_v14 = vld [vmem:[%s25494_s3 + $0xbf0] ss:$52 sps:$4 sm:$0xff]  }
 0x647   : > { %7992 = vmatprep.mubr.bf16.mxu1 %v18950_v50  ;;  %v16019_v50 = vcombine.high %v4431_v55, %v4431_v55 }
 0x64e   : > { %7993 = vmatmul.mubr.bf16.gmra.mrb[16].mxu1 %v18952_v47  ;;  %v19034_v47 = vld [vmem:[%s25494_s3 + $0x30] ss:$52 sps:$4 sm:$0xff]  }
 0x64f   : > { %8000 = vmatprep.mubr.bf16.mxu1 %v18953_v5  ;;  %v19035_v5 = vld [vmem:[%s25494_s3 + $0x98] ss:$52 sps:$4 sm:$0xff]  }
 0x656   : > { %8001 = vmatmul.mubr.bf16.gmra.mrb[20].mxu1 %v18955_v60  ;;  %v19057_v60 = vld [vmem:[%s25495_s4 + $0x48] sm:$0xff]  }
 0x657   : > { %8008 = vmatprep.mubr.bf16.mxu1 %v18956_v46  ;;  %10212 = vmatpush1.bf16.msra.mxu0 %v19057_v60  ;;  %v19037_v46 = vld [vmem:[%s25494_s3 + $0x100] ss:$52 sps:$4 sm:$0xff]  }
 0x658   : > { %10213 = vmatprep.subr.bf16.mxu0 %v25518_v35 }
 0x65e   : > { %8009 = vmatmul.mubr.bf16.gmra.mrb[24].mxu1 %v18958_v39  ;;  %v19038_v39 = vld [vmem:[%s25494_s3 + $0x168] ss:$52 sps:$4 sm:$0xff]  }
 0x65f   : > { %8016 = vmatprep.mubr.bf16.mxu1 %v18959_v6  ;;  %v19039_v6 = vld [vmem:[%s25494_s3 + $0x1d0] ss:$52 sps:$4 sm:$0xff]  }
 0x666   : > { %8017 = vmatmul.mubr.bf16.gmra.mrb[28].mxu1 %v18961_v26  ;;  %v19061_v26 = vld [vmem:[%s25495_s4 + $0x50] sm:$0xff]  }
 0x667   : > { %8024 = vmatprep.mubr.bf16.mxu1 %v18962_v28  ;;  %10214 = vmatpush1.bf16.msra.mxu0 %v19061_v26  ;;  %v19041_v28 = vld [vmem:[%s25494_s3 + $0x238] ss:$52 sps:$4 sm:$0xff]  }
 0x668   : > { %10215 = vmatprep.subr.bf16.mxu0 %v25518_v35  ;;  %v19078_v26 = vld [vmem:[%s25495_s4 + $0x88] sm:$0xff]  }
 0x66e   : > { %8025 = vmatmul.mubr.bf16.gmra.mrb[32].mxu1 %v18964_v24  ;;  %v19043_v24 = vld [vmem:[%s25494_s3 + $0x308] ss:$52 sps:$4 sm:$0xff]  }
 0x66f   : > { %8032 = vmatprep.mubr.bf16.mxu1 %v18965_v16  ;;  %v19065_v16 = vld [vmem:[%s25495_s4 + $0x58] sm:$0xff]  }
 0x670   : > { %10216 = vmatpush1.bf16.msra.mxu0 %v19065_v16 }
 0x671   : > { %10217 = vmatprep.subr.bf16.mxu0 %v25518_v35 }
 0x676   : > { %8033 = vmatmul.mubr.bf16.gmra.mrb[36].mxu1 %v18967_v44  ;;  %v19045_v44 = vld [vmem:[%s25494_s3 + $0x370] ss:$52 sps:$4 sm:$0xff]  }
 0x677   : > { %8040 = vmatprep.mubr.bf16.mxu1 %v18968_v34  ;;  %v19046_v34 = vld [vmem:[%s25494_s3 + $0x3d8] ss:$52 sps:$4 sm:$0xff]  }
 0x67e   : > { %8041 = vmatmul.mubr.bf16.gmra.mrb[40].mxu1 %v18970_v4  ;;  %v19047_v4 = vld [vmem:[%s25494_s3 + $0x440] ss:$52 sps:$4 sm:$0xff]  }
 0x67f   : > { %8048 = vmatprep.mubr.bf16.mxu1 %v18971_v33  ;;  %v19069_v33 = vld [vmem:[%s25495_s4 + $0x60] sm:$0xff]  }
 0x680   : > { %10218 = vmatpush1.bf16.msra.mxu0 %v19069_v33 }
 0x681   : > { %10219 = vmatprep.subr.bf16.mxu0 %v25518_v35 }
 0x686   : > { %8049 = vmatmul.mubr.bf16.gmra.mrb[44].mxu1 %v18973_v29  ;;  %v19071_v29 = vld [vmem:[%s25495_s4 + $0x68] sm:$0xff]  }
 0x687   : > { %8056 = vmatprep.mubr.bf16.mxu1 %v18974_v1  ;;  %v19050_v1 = vld [vmem:[%s25494_s3 + $0x510] ss:$52 sps:$4 sm:$0xff]   ;;  %10220 = vmatpush1.bf16.msra.mxu0 %v19071_v29 }
 0x688   : > { %10221 = vmatprep.subr.bf16.mxu0 %v25518_v35 }
 0x68e   : > { %8057 = vmatmul.mubr.bf16.gmra.mrb[48].mxu1 %v18976_v23  ;;  %v19072_v23 = vld [vmem:[%s25495_s4 + $0x70] sm:$0xff]  }
 0x68f   : > { %8064 = vmatprep.mubr.bf16.mxu1 %v18977_v54  ;;  %10222 = vmatpush1.bf16.msra.mxu0 %v19072_v23  ;;  %v19074_v54 = vld [vmem:[%s25495_s4 + $0x78] sm:$0xff]   ;;  %v19079_v23 = vld [vmem:[%s25495_s4 + $0x90] sm:$0xff]  }
 0x690   : > { %10223 = vmatprep.subr.bf16.mxu0 %v25518_v35 }
 0x693   : > { %10224 = vmatpush1.bf16.msra.mxu0 %v19074_v54 }
 0x694   : > { %10449 = vmatprep.subr.bf16.mxu0 %v25518_v35 }
 0x696   : > { %8065 = vmatmul.mubr.bf16.gmra.mrb[52].mxu1 %v18979_v48  ;;  %v19051_v48 = vld [vmem:[%s25494_s3 + $0x578] ss:$52 sps:$4 sm:$0xff]  }
 0x697   : > { %8072 = vmatprep.mubr.bf16.mxu1 %v18980_v36  ;;  %v19053_v36 = vld [vmem:[%s25494_s3 + $0x5e0] ss:$52 sps:$4 sm:$0xff]  }
 0x69e   : > { %8073 = vmatmul.mubr.bf16.gmra.mrb[56].mxu1 %v18982_v19  ;;  %v19055_v19 = vld [vmem:[%s25494_s3 + $0x6b0] ss:$52 sps:$4 sm:$0xff]  }
 0x69f   : > { %8080 = vmatprep.mubr.bf16.mxu1 %v18983_v11  ;;  %v19056_v11 = vld [vmem:[%s25494_s3 + $0x718] ss:$52 sps:$4 sm:$0xff]  }
 0x6a6   : > { %8081 = vmatmul.mubr.bf16.gmra.mrb[60].mxu1 %v18985_v32  ;;  %v19058_v32 = vld [vmem:[%s25494_s3 + $0x780] ss:$52 sps:$4 sm:$0xff]  }
 0x6a7   : > { %8088 = vmatprep.mubr.bf16.mxu1 %v18986_v3  ;;  %v19059_v3 = vld [vmem:[%s25494_s3 + $0x7e8] ss:$52 sps:$4 sm:$0xff]  }
 0x6ae   : > { %8089 = vmatmul.mubr.bf16.gmra.mrb[64].mxu1 %v18988_v18  ;;  %v19060_v18 = vld [vmem:[%s25494_s3 + $0x850] ss:$52 sps:$4 sm:$0xff]  }
 0x6af   : > { %8096 = vmatprep.mubr.bf16.mxu1 %v18989_v0  ;;  %v19062_v0 = vld [vmem:[%s25494_s3 + $0x8b8] ss:$52 sps:$4 sm:$0xff]  }
 0x6b6   : > { %8097 = vmatmul.mubr.bf16.gmra.mrb[68].mxu1 %v18991_v13  ;;  %v19064_v13 = vld [vmem:[%s25494_s3 + $0x988] ss:$52 sps:$4 sm:$0xff]  }
 0x6b7   : > { %8104 = vmatprep.mubr.bf16.mxu1 %v18992_v30  ;;  %v19066_v30 = vld [vmem:[%s25494_s3 + $0x9f0] ss:$52 sps:$4 sm:$0xff]  }
 0x6be   : > { %8105 = vmatmul.mubr.bf16.gmra.mrb[72].mxu1 %v18994_v8  ;;  %v19067_v8 = vld [vmem:[%s25494_s3 + $0xa58] ss:$52 sps:$4 sm:$0xff]  }
 0x6bf   : > { %8112 = vmatprep.mubr.bf16.mxu1 %v18995_v20  ;;  %v19068_v20 = vld [vmem:[%s25494_s3 + $0xac0] ss:$52 sps:$4 sm:$0xff]  }
 0x6c6   : > { %8113 = vmatmul.mubr.bf16.gmra.mrb[76].mxu1 %v18997_v51 }
 0x6c7   : > { %8120 = vmatprep.mubr.bf16.mxu1 %v18998_v38 }
 0x6ce   : > { %8121 = vmatmul.mubr.bf16.gmra.mrb[80].mxu1 %v19001_v42 }
 0x6cf   : > { %8128 = vmatprep.mubr.bf16.mxu1 %v19002_v22 }
 0x6d6   : > { %8129 = vmatmul.mubr.bf16.gmra.mrb[84].mxu1 %v19004_v7 }
 0x6d7   : > { %8136 = vmatprep.mubr.bf16.mxu1 %v19005_v15 }
 0x6de   : > { %8137 = vmatmul.mubr.bf16.gmra.mrb[88].mxu1 %v19007_v59 }
 0x6df   : > { %8144 = vmatprep.mubr.bf16.mxu1 %v19008_v52 }
 0x6e6   : > { %8145 = vmatmul.mubr.bf16.gmra.mrb[92].mxu1 %v19010_v37 }
 0x6e7   : > { %8152 = vmatprep.mubr.bf16.mxu1 %v19012_v40 }
 0x6ee   : > { %8153 = vmatmul.mubr.bf16.gmra.mrb[96].mxu1 %v19014_v10 }
 0x6ef   : > { %8160 = vmatprep.mubr.bf16.mxu1 %v19015_v17 }
 0x6f6   : > { %8161 = vmatmul.mubr.bf16.gmra.mrb[100].mxu1 %v19017_v63 }
 0x6f7   : > { %8168 = vmatprep.mubr.bf16.mxu1 %v19018_v21 }
 0x6fe   : > { %8169 = vmatmul.mubr.bf16.gmra.mrb[104].mxu1 %v19020_v31 }
 0x6ff   : > { %8176 = vmatprep.mubr.bf16.mxu1 %v19022_v9 }
 0x706   : > { %8177 = vmatmul.mubr.bf16.gmra.mrb[108].mxu1 %v19024_v49 }
 0x707   : > { %8184 = vmatprep.mubr.bf16.mxu1 %v19025_v25 }
 0x70e   : > { %8185 = vmatmul.mubr.bf16.gmra.mrb[112].mxu1 %v19027_v43 }
 0x70f   : > { %8192 = vmatprep.mubr.bf16.mxu1 %v19028_v41 }
 0x716   : > { %8193 = vmatmul.mubr.bf16.gmra.mrb[116].mxu1 %v19030_v14  ;;  %v19077_v14 = vld [vmem:[%s25495_s4 + $0x80] sm:$0xff]  }
 0x717   : > { %8200 = vmatprep.mubr.bf16.mxu1 %v16019_v50 }
 0x71e   : > { %8201 = vmatmul.mubr.bf16.gmra.mrb[120].mxu1 %v16018_v62 }
 0x71f   : > { %16994 = vmatprep.mubr.msk.bf16.mxu1 %vm19372_vm5, %v25510_v56 }
 0x726   : > { %16995 = vmatmul.mubr.msk.bf16.vlgmr.msra.gmra.mrb[0].mxu1 %vm6428_vm6, %v19034_v47 }
 0x727   : > { %16998 = vmatprep.mubr.msk.bf16.mxu1 %vm19372_vm5, %v25510_v56 }
 0x72e   : > { %16999 = vmatmul.mubr.msk.bf16.gmra.mrb[4].mxu1 %vm6428_vm6, %v19035_v5  ;;  %v19075_v5 = vld [vmem:[%s25494_s3 + $0xbf8] ss:$52 sps:$4 sm:$0xff]  }
 0x72f   : > { %17002 = vmatprep.mubr.msk.bf16.mxu1 %vm19372_vm5, %v25510_v56 }
 0x736   : > { %17003 = vmatmul.mubr.msk.bf16.gmra.mrb[8].mxu1 %vm6428_vm6, %v19037_v46 }
 0x737   : > { %17006 = vmatprep.mubr.msk.bf16.mxu1 %vm19372_vm5, %v25510_v56 }
 0x73e   : > { %17007 = vmatmul.mubr.msk.bf16.gmra.mrb[12].mxu1 %vm6428_vm6, %v19038_v39 }
 0x73f   : > { %17010 = vmatprep.mubr.msk.bf16.mxu1 %vm19372_vm5, %v25510_v56 }
 0x746   : > { %17011 = vmatmul.mubr.msk.bf16.gmra.mrb[16].mxu1 %vm6428_vm6, %v19039_v6 }
 0x747   : > { %17014 = vmatprep.mubr.msk.bf16.mxu1 %vm19372_vm5, %v25510_v56 }
 0x74e   : > { %17015 = vmatmul.mubr.msk.bf16.gmra.mrb[20].mxu1 %vm6428_vm6, %v19041_v28 }
 0x74f   : > { %17018 = vmatprep.mubr.msk.bf16.mxu1 %vm19372_vm5, %v25510_v56 }
 0x756   : > { %17019 = vmatmul.mubr.msk.bf16.gmra.mrb[24].mxu1 %vm6428_vm6, %v19042_v2 }
 0x757   : > { %17022 = vmatprep.mubr.msk.bf16.mxu1 %vm19372_vm5, %v25510_v56 }
 0x75e   : > { %17023 = vmatmul.mubr.msk.bf16.gmra.mrb[28].mxu1 %vm6428_vm6, %v19043_v24 }
 0x75f   : > { %17026 = vmatprep.mubr.msk.bf16.mxu1 %vm19372_vm5, %v25510_v56 }
 0x766   : > { %17027 = vmatmul.mubr.msk.bf16.gmra.mrb[32].mxu1 %vm6428_vm6, %v19045_v44 }
 0x767   : > { %17030 = vmatprep.mubr.msk.bf16.mxu1 %vm19372_vm5, %v25510_v56 }
 0x76e   : > { %17031 = vmatmul.mubr.msk.bf16.gmra.mrb[36].mxu1 %vm6428_vm6, %v19046_v34 }
 0x76f   : > { %17034 = vmatprep.mubr.msk.bf16.mxu1 %vm19372_vm5, %v25510_v56 }
 0x776   : > { %17035 = vmatmul.mubr.msk.bf16.gmra.mrb[40].mxu1 %vm6428_vm6, %v19047_v4 }
 0x777   : > { %17038 = vmatprep.mubr.msk.bf16.mxu1 %vm19372_vm5, %v25510_v56 }
 0x77e   : > { %17039 = vmatmul.mubr.msk.bf16.gmra.mrb[44].mxu1 %vm6428_vm6, %v19049_v45 }
 0x77f   : > { %17042 = vmatprep.mubr.msk.bf16.mxu1 %vm19372_vm5, %v25510_v56 }
 0x786   : > { %17043 = vmatmul.mubr.msk.bf16.gmra.mrb[48].mxu1 %vm6428_vm6, %v19050_v1 }
 0x787   : > { %17046 = vmatprep.mubr.msk.bf16.mxu1 %vm19372_vm5, %v25510_v56 }
 0x78e   : > { %17047 = vmatmul.mubr.msk.bf16.gmra.mrb[52].mxu1 %vm6428_vm6, %v19051_v48 }
 0x78f   : > { %17050 = vmatprep.mubr.msk.bf16.mxu1 %vm19372_vm5, %v25510_v56 }
 0x796   : > { %17051 = vmatmul.mubr.msk.bf16.gmra.mrb[56].mxu1 %vm6428_vm6, %v19053_v36 }
 0x797   : > { %17054 = vmatprep.mubr.msk.bf16.mxu1 %vm19372_vm5, %v25510_v56 }
 0x79e   : > { %17055 = vmatmul.mubr.msk.bf16.gmra.mrb[60].mxu1 %vm6428_vm6, %v19054_v12 }
 0x79f   : > { %17058 = vmatprep.mubr.msk.bf16.mxu1 %vm19372_vm5, %v25510_v56 }
 0x7a6   : > { %17059 = vmatmul.mubr.msk.bf16.gmra.mrb[64].mxu1 %vm6428_vm6, %v19055_v19  ;;  %v19076_v19 = vld [vmem:[%s25494_s3 + $0xc60] ss:$0 sps:$4 sm:$0x77]  }
 0x7a7   : > { %17062 = vmatprep.mubr.msk.bf16.mxu1 %vm19372_vm5, %v25510_v56 }
 0x7ae   : > { %17063 = vmatmul.mubr.msk.bf16.gmra.mrb[68].mxu1 %vm6428_vm6, %v19056_v11 }
 0x7af   : > { %17066 = vmatprep.mubr.msk.bf16.mxu1 %vm19372_vm5, %v25510_v56 }
 0x7b6   : > { %17067 = vmatmul.mubr.msk.bf16.gmra.mrb[72].mxu1 %vm6428_vm6, %v19058_v32 }
 0x7b7   : > { %17070 = vmatprep.mubr.msk.bf16.mxu1 %vm19372_vm5, %v25510_v56 }
 0x7be   : > { %17071 = vmatmul.mubr.msk.bf16.gmra.mrb[76].mxu1 %vm6428_vm6, %v19059_v3 }
 0x7bf   : > { %17074 = vmatprep.mubr.msk.bf16.mxu1 %vm19372_vm5, %v25510_v56 }
 0x7c6   : > { %17075 = vmatmul.mubr.msk.bf16.gmra.mrb[80].mxu1 %vm6428_vm6, %v19060_v18 }
 0x7c7   : > { %17078 = vmatprep.mubr.msk.bf16.mxu1 %vm19372_vm5, %v25510_v56 }
 0x7ce   : > { %17079 = vmatmul.mubr.msk.bf16.gmra.mrb[84].mxu1 %vm6428_vm6, %v19062_v0 }
 0x7cf   : > { %17082 = vmatprep.mubr.msk.bf16.mxu1 %vm19372_vm5, %v25510_v56 }
 0x7d6   : > { %17083 = vmatmul.mubr.msk.bf16.gmra.mrb[88].mxu1 %vm6428_vm6, %v19063_v58  ;;  %v19080_v58 = vld [vmem:[%s25495_s4 + $0x98] sm:$0xff]  }
 0x7d7   : > { %17086 = vmatprep.mubr.msk.bf16.mxu1 %vm19372_vm5, %v25510_v56 }
 0x7de   : > { %17087 = vmatmul.mubr.msk.bf16.gmra.mrb[92].mxu1 %vm6428_vm6, %v19064_v13 }
 0x7df   : > { %17090 = vmatprep.mubr.msk.bf16.mxu1 %vm19372_vm5, %v25510_v56 }
 0x7e6   : > { %17091 = vmatmul.mubr.msk.bf16.gmra.mrb[96].mxu1 %vm6428_vm6, %v19066_v30 }
 0x7e7   : > { %17094 = vmatprep.mubr.msk.bf16.mxu1 %vm19372_vm5, %v25510_v56 }
 0x7ee   : > { %17095 = vmatmul.mubr.msk.bf16.gmra.mrb[100].mxu1 %vm6428_vm6, %v19067_v8 }
 0x7ef   : > { %17098 = vmatprep.mubr.msk.bf16.mxu1 %vm19372_vm5, %v25510_v56 }
 0x7f6   : > { %17099 = vmatmul.mubr.msk.bf16.gmra.mrb[104].mxu1 %vm6428_vm6, %v19068_v20 }
 0x7f7   : > { %17102 = vmatprep.mubr.msk.bf16.mxu1 %vm19372_vm5, %v25510_v56 }
 0x7f9   : > { %v8242_v51 = vpop.f32.mrb[0].mxu1 }
 0x7fa   : > { %v16996_v38 = vpop.f32.mrb[1].mxu1 }
 0x7fb   : > { %v8245_v42 = vpop.f32.mrb[2].mxu1 }
 0x7fc   : > { %v8488_v22 = vpack.c.bf16 %v8245_v42, %v8242_v51  ;;  %v16997_v7 = vpop.f32.mrb[3].mxu1 }
 0x7fe   : > { %17103 = vmatmul.mubr.msk.bf16.gmra.mrb[108].mxu1 %vm6428_vm6, %v19070_v27  ;;  %v8552_v15 = vshll.u32 %v8488_v22, 16  ;;  %v8550_v63 = vshrl.u32 %v8488_v22, 16  ;;  %v8829_v21 = vrot.slane %v8488_v22, 1 }
 0x7ff   : > { %17106 = vmatprep.mubr.msk.bf16.mxu1 %vm19372_vm5, %v25510_v56 }
 0x800   : > { %v8554_v40 = vrot.slane %v8552_v15, 1  ;;  %v19081_v15 = vld [vmem:[%s25495_s4 + $0xa0] sm:$0xff]  }
 0x801   : > { %v8250_v59 = vpop.f32.mrb[4].mxu1 }
 0x802   : > { %v17000_v52 = vpop.f32.mrb[5].mxu1  ;;  %v8555_v49 = vor.u32 %v8554_v40, %v8550_v63 }
 0x803   : > { %v22409_v37 = vpop.f32.mrb[6].mxu1 }
 0x804   : > { %25555 = vst [vmem:[#allocation8_spill] sm:$0xff] %v22409_v37  ;;  %v8489_v10 = vpack.c.bf16 %v22409_v37, %v8250_v59  ;;  %v17001_v17 = vpop.f32.mrb[7].mxu1 }
 0x806   : > { %17107 = vmatmul.mubr.msk.bf16.gmra.mrb[112].mxu1 %vm6428_vm6, %v19073_v61  ;;  %v8557_v57 = vshll.u32 %v8489_v10, 16  ;;  %v8561_v31 = vshrl.u32 %v8489_v10, 16  ;;  %v8830_v9 = vrot.slane %v8489_v10, 1  ;;  %v8914_v28 = vrot.slane %v8489_v10, 3 }
 0x807   : > { %17110 = vmatprep.mubr.msk.bf16.mxu1 %vm19372_vm5, %v25510_v56 }
 0x808   : > { %v8559_v25 = vrot.slane %v8557_v57, 1  ;;  %v8999_v43 = vrot.slane %v8557_v57, 4  ;;  %v8998_v41 = vrot.slane %v8561_v31, 3  ;;  %v22416_v53 = vsel %vm2731_vm3, %v8829_v21, %v8830_v9 }
 0x809   : > { %v22418_v55 = vpop.f32.mrb[8].mxu1 }
 0x80a   : > { %25556 = vst [vmem:[#allocation9_spill] sm:$0xff] %v22418_v55  ;;  %v17004_v62 = vpop.f32.mrb[9].mxu1  ;;  %v8560_v47 = vsel %vm8548_vm7, %v8555_v49, %v8559_v25  ;;  %v9000_v60 = vor.u32 %v8999_v43, %v8998_v41  ;;  %v8563_v34 = vor.u32 %v8561_v31, %v8559_v25 }
 0x80b   : > { %v8261_v46 = vpop.f32.mrb[10].mxu1  ;;  %10225 = vmatprep.mubr.bf16.mxu0 %v8560_v47 }
 0x80c   : > { %v8490_v39 = vpack.c.bf16 %v8261_v46, %v22418_v55  ;;  %v17005_v6 = vpop.f32.mrb[11].mxu1  ;;  %10226 = vmatmul.mubr.bf16.vlgmr.msra.gmra.mrb[200].mxu0 %v8488_v22 }
 0x80d   : > { %10450 = vmatpush1.bf16.msra.mxu0 %v19077_v14 }
 0x80e   : > { %17111 = vmatmul.mubr.msk.bf16.gmra.mrb[116].mxu1 %vm6428_vm6, %v19075_v5  ;;  %v8565_v2 = vshll.u32 %v8490_v39, 16  ;;  %v8569_v24 = vshrl.u32 %v8490_v39, 16  ;;  %10451 = vmatprep.subr.bf16.mxu0 %v25518_v35  ;;  %v8915_v16 = vrot.slane %v8490_v39, 3  ;;  %v8832_v44 = vrot.slane %v8490_v39, 1 }
 0x80f   : > { %17114 = vmatprep.mubr.msk.bf16.mxu1 %vm19372_vm5, %v25510_v56 }
 0x810   : > { %v8567_v4 = vrot.slane %v8565_v2, 1  ;;  %v9002_v33 = vrot.slane %v8565_v2, 4  ;;  %v9001_v45 = vrot.slane %v8569_v24, 3  ;;  %v22438_v29 = vsel %vm1502_vm1, %v8914_v28, %v8915_v16 }
 0x811   : > { %v8266_v1 = vpop.f32.mrb[12].mxu1  ;;  %10452 = vmatpush1.bf16.msra.mxu0 %v19078_v26  ;;  %v22444_v54 = vsel %vm2731_vm3, %v8830_v9, %v8832_v44 }
 0x812   : > { %v22446_v48 = vpack.c.bf16 %v8266_v1, %v8261_v46  ;;  %v17008_v36 = vpop.f32.mrb[13].mxu1  ;;  %v8568_v12 = vsel %vm8548_vm7, %v8563_v34, %v8567_v4  ;;  %10453 = vmatprep.subr.bf16.mxu0 %v25518_v35  ;;  %v9003_v11 = vor.u32 %v9002_v33, %v9001_v45  ;;  %v8571_v51 = vor.u32 %v8569_v24, %v8567_v4  ;;  %v19082_v4 = vld [vmem:[%s25495_s4 + $0xa8] sm:$0xff]  }
 0x813   : > { %v8269_v32 = vpop.f32.mrb[14].mxu1  ;;  %10233 = vmatprep.mubr.bf16.mxu0 %v8568_v12 }
 0x814   : > { %25557 = vst [vmem:[#allocation10_spill] sm:$0xff] %v22446_v48  ;;  %v8491_v3 = vpack.c.bf16 %v8269_v32, %v8266_v1  ;;  %v17009_v18 = vpop.f32.mrb[15].mxu1  ;;  %10234 = vmatmul.mubr.bf16.gmra.mrb[204].mxu0 %v8489_v10  ;;  %v22454_v0 = vsel %vm8997_vm8, %v9000_v60, %v9003_v11 }
 0x815   : > { %25558 = vst [vmem:[#allocation11_spill] sm:$0xff] %v22454_v0  ;;  %10454 = vmatpush1.bf16.msra.mxu0 %v19079_v23 }
 0x816   : > { %17115 = vmatmul.mubr.msk.bf16.gmra.mrb[120].mxu1 %vm6428_vm6, %v19076_v19  ;;  %v8573_v13 = vshll.u32 %v8491_v3, 16  ;;  %v8577_v30 = vshrl.u32 %v8491_v3, 16  ;;  %10455 = vmatprep.subr.bf16.mxu0 %v25518_v35  ;;  %v8917_v8 = vrot.slane %v8491_v3, 3  ;;  %v8834_v20 = vrot.slane %v8491_v3, 1 }
 0x817   : > { %14190 = vmatprep.mubr.bf16.mxu1 %v25518_v35 }
 0x818   : > { %v8575_v38 = vrot.slane %v8573_v13, 1  ;;  %v22463_v27 = vsel %vm1502_vm1, %v8915_v16, %v8917_v8  ;;  %v22466_v42 = vsel %vm2731_vm3, %v8832_v44, %v8834_v20  ;;  %v9005_v22 = vrot.slane %v8577_v30, 3 }
 0x819   : > { %v8274_v7 = vpop.f32.mrb[16].mxu1  ;;  %10456 = vmatpush1.bf16.msra.mxu0 %v19080_v58  ;;  %v9006_v59 = vrot.slane %v8573_v13, 4 }
 0x81a   : > { %v22471_v52 = vpack.c.bf16 %v8274_v7, %v8269_v32  ;;  %v17012_v61 = vpop.f32.mrb[17].mxu1  ;;  %v8576_v40 = vsel %vm8548_vm7, %v8571_v51, %v8575_v38  ;;  %10457 = vmatprep.subr.bf16.mxu0 %v25518_v35  ;;  %v8579_v43 = vor.u32 %v8577_v30, %v8575_v38 }
 0x81b   : > { %v8277_v10 = vpop.f32.mrb[18].mxu1  ;;  %10241 = vmatprep.mubr.bf16.mxu0 %v8576_v40  ;;  %v9007_v17 = vor.u32 %v9006_v59, %v9005_v22 }
 0x81c   : > { %25559 = vst [vmem:[#allocation12_spill] sm:$0xff] %v22471_v52  ;;  %v8492_v63 = vpack.c.bf16 %v8277_v10, %v8274_v7  ;;  %v17013_v21 = vpop.f32.mrb[19].mxu1  ;;  %10242 = vmatmul.mubr.bf16.gmra.mrb[208].mxu0 %v8490_v39 }
 0x81d   : > { %10458 = vmatpush1.bf16.msra.mxu0 %v19081_v15  ;;  %v22476_v57 = vsel %vm8997_vm8, %v9003_v11, %v9007_v17 }
 0x81e   : > { %25560 = vst [vmem:[#allocation13_spill] sm:$0xff] %v22476_v57  ;;  %v8581_v31 = vshll.u32 %v8492_v63, 16  ;;  %v8585_v9 = vshrl.u32 %v8492_v63, 16  ;;  %10459 = vmatprep.subr.bf16.mxu0 %v25518_v35  ;;  %v8919_v49 = vrot.slane %v8492_v63, 3  ;;  %v8836_v25 = vrot.slane %v8492_v63, 1 }
 0x820   : > { %v8583_v41 = vrot.slane %v8581_v31, 1  ;;  %v22480_v14 = vsel %vm1502_vm1, %v8917_v8, %v8919_v49  ;;  %v22483_v62 = vsel %vm2731_vm3, %v8834_v20, %v8836_v25  ;;  %v9009_v47 = vrot.slane %v8585_v9, 3 }
 0x821   : > { %v8282_v5 = vpop.f32.mrb[20].mxu1  ;;  %v9010_v60 = vrot.slane %v8581_v31, 4  ;;  %10460 = vmatpush1.bf16.msra.mxu0 %v19082_v4 }
 0x822   : > { %v22485_v46 = vpack.c.bf16 %v8282_v5, %v8277_v10  ;;  %v17016_v39 = vpop.f32.mrb[21].mxu1  ;;  %v8584_v6 = vsel %vm8548_vm7, %v8579_v43, %v8583_v41  ;;  %v8587_v1 = vor.u32 %v8585_v9, %v8583_v41  ;;  %10461 = vmatprep.subr.bf16.mxu0 %v25518_v35 }
 0x823   : > { %v8285_v26 = vpop.f32.mrb[22].mxu1  ;;  %10249 = vmatprep.mubr.bf16.mxu0 %v8584_v6  ;;  %v9011_v28 = vor.u32 %v9010_v60, %v9009_v47 }
 0x824   : > { %25561 = vst [vmem:[#allocation14_spill] sm:$0xff] %v22485_v46  ;;  %v8493_v2 = vpack.c.bf16 %v8285_v26, %v8282_v5  ;;  %v17017_v24 = vpop.f32.mrb[23].mxu1  ;;  %10250 = vmatmul.mubr.bf16.gmra.mrb[212].mxu0 %v8491_v3  ;;  %v19083_v5 = vld [vmem:[%s25495_s4 + $0xb0] sm:$0xff]  }
 0x825   : > { %v22489_v16 = vsel %vm8997_vm8, %v9007_v17, %v9011_v28  ;;  %10462 = vmatpush1.bf16.msra.mxu0 %v19083_v5 }
 0x826   : > { %25562 = vst [vmem:[#allocation15_spill] sm:$0xff] %v22489_v16  ;;  %v8589_v44 = vshll.u32 %v8493_v2, 16  ;;  %v8593_v34 = vshrl.u32 %v8493_v2, 16  ;;  %v8921_v33 = vrot.slane %v8493_v2, 3  ;;  %v8838_v45 = vrot.slane %v8493_v2, 1  ;;  %10463 = vmatprep.subr.bf16.mxu0 %v25518_v35 }
 0x828   : > { %v8591_v23 = vrot.slane %v8589_v44, 1  ;;  %v22495_v36 = vsel %vm1502_vm1, %v8919_v49, %v8921_v33  ;;  %v22498_v12 = vsel %vm2731_vm3, %v8836_v25, %v8838_v45  ;;  %v9013_v19 = vrot.slane %v8593_v34, 3 }
 0x829   : > { %v8290_v11 = vpop.f32.mrb[24].mxu1  ;;  %v9014_v32 = vrot.slane %v8589_v44, 4 }
 0x82a   : > { %v22501_v3 = vpack.c.bf16 %v8290_v11, %v8285_v26  ;;  %v17020_v18 = vpop.f32.mrb[25].mxu1  ;;  %v8592_v58 = vsel %vm8548_vm7, %v8587_v1, %v8591_v23  ;;  %v8595_v59 = vor.u32 %v8593_v34, %v8591_v23 }
 0x82b   : > { %v8293_v13 = vpop.f32.mrb[26].mxu1  ;;  %10257 = vmatprep.mubr.bf16.mxu0 %v8592_v58  ;;  %v9015_v30 = vor.u32 %v9014_v32, %v9013_v19 }
 0x82c   : > { %25563 = vst [vmem:[#allocation16_spill] sm:$0xff] %v22501_v3  ;;  %v8494_v8 = vpack.c.bf16 %v8293_v13, %v8290_v11  ;;  %v17021_v20 = vpop.f32.mrb[27].mxu1  ;;  %10258 = vmatmul.mubr.bf16.gmra.mrb[216].mxu0 %v8492_v63 }
 0x82d   : > { %v22505_v51 = vsel %vm8997_vm8, %v9011_v28, %v9015_v30 }
 0x82e   : > { %25564 = vst [vmem:[#allocation17_spill] sm:$0xff] %v22505_v51  ;;  %v8597_v38 = vshll.u32 %v8494_v8, 16  ;;  %v8601_v22 = vshrl.u32 %v8494_v8, 16  ;;  %v8923_v7 = vrot.slane %v8494_v8, 3  ;;  %v8840_v15 = vrot.slane %v8494_v8, 1 }
 0x830   : > { %v8599_v61 = vrot.slane %v8597_v38, 1  ;;  %v22508_v40 = vsel %vm1502_vm1, %v8921_v33, %v8923_v7  ;;  %v22511_v10 = vsel %vm2731_vm3, %v8838_v45, %v8840_v15  ;;  %v9017_v17 = vrot.slane %v8601_v22, 3 }
 0x831   : > { %v8298_v21 = vpop.f32.mrb[28].mxu1  ;;  %v9018_v31 = vrot.slane %v8597_v38, 4  ;;  %v19084_v38 = vld [vmem:[%s25495_s4 + $0xb8] sm:$0xff]  }
 0x832   : > { %v22513_v9 = vpack.c.bf16 %v8298_v21, %v8293_v13  ;;  %v17024_v63 = vpop.f32.mrb[29].mxu1  ;;  %v8600_v49 = vsel %vm8548_vm7, %v8595_v59, %v8599_v61  ;;  %v8603_v24 = vor.u32 %v8601_v22, %v8599_v61  ;;  %10464 = vmatpush1.bf16.msra.mxu0 %v19084_v38 }
 0x833   : > { %v8301_v25 = vpop.f32.mrb[30].mxu1  ;;  %10265 = vmatprep.mubr.bf16.mxu0 %v8600_v49  ;;  %v9019_v43 = vor.u32 %v9018_v31, %v9017_v17  ;;  %10465 = vmatprep.subr.bf16.mxu0 %v25518_v35 }
 0x834   : > { %25565 = vst [vmem:[#allocation18_spill] sm:$0xff] %v22513_v9  ;;  %v8495_v41 = vpack.c.bf16 %v8301_v25, %v8298_v21  ;;  %v17025_v47 = vpop.f32.mrb[31].mxu1  ;;  %10266 = vmatmul.mubr.bf16.gmra.mrb[220].mxu0 %v8493_v2 }
 0x835   : > { %v22520_v60 = vsel %vm8997_vm8, %v9015_v30, %v9019_v43 }
 0x836   : > { %25566 = vst [vmem:[#allocation19_spill] sm:$0xff] %v22520_v60  ;;  %v8605_v39 = vshll.u32 %v8495_v41, 16  ;;  %v8609_v6 = vshrl.u32 %v8495_v41, 16  ;;  %v8925_v26 = vrot.slane %v8495_v41, 3  ;;  %v8842_v28 = vrot.slane %v8495_v41, 1 }
 0x838   : > { %v8607_v44 = vrot.slane %v8605_v39, 1  ;;  %v22524_v34 = vsel %vm1502_vm1, %v8923_v7, %v8925_v26  ;;  %v22527_v2 = vsel %vm2731_vm3, %v8840_v15, %v8842_v28  ;;  %v9021_v4 = vrot.slane %v8609_v6, 3 }
 0x839   : > { %v8306_v33 = vpop.f32.mrb[32].mxu1  ;;  %v9022_v45 = vrot.slane %v8605_v39, 4 }
 0x83a   : > { %v22529_v1 = vpack.c.bf16 %v8306_v33, %v8301_v25  ;;  %v17028_v23 = vpop.f32.mrb[33].mxu1  ;;  %v8608_v19 = vsel %vm8548_vm7, %v8603_v24, %v8607_v44  ;;  %v8611_v15 = vor.u32 %v8609_v6, %v8607_v44 }
 0x83b   : > { %v8309_v11 = vpop.f32.mrb[34].mxu1  ;;  %10273 = vmatprep.mubr.bf16.mxu0 %v8608_v19  ;;  %v9023_v32 = vor.u32 %v9022_v45, %v9021_v4 }
 0x83c   : > { %25567 = vst [vmem:[#allocation20_spill] sm:$0xff] %v22529_v1  ;;  %v8496_v18 = vpack.c.bf16 %v8309_v11, %v8306_v33  ;;  %v17029_v58 = vpop.f32.mrb[35].mxu1  ;;  %10274 = vmatmul.mubr.bf16.gmra.mrb[224].mxu0 %v8494_v8 }
 0x83d   : > { %v22533_v13 = vsel %vm8997_vm8, %v9019_v43, %v9023_v32 }
 0x83e   : > { %25568 = vst [vmem:[#allocation21_spill] sm:$0xff] %v22533_v13  ;;  %v8613_v30 = vshll.u32 %v8496_v18, 16  ;;  %v8617_v20 = vshrl.u32 %v8496_v18, 16  ;;  %v8927_v22 = vrot.slane %v8496_v18, 3  ;;  %v8844_v7 = vrot.slane %v8496_v18, 1 }
 0x840   : > { %v8615_v59 = vrot.slane %v8613_v30, 1  ;;  %v22539_v61 = vsel %vm1502_vm1, %v8925_v26, %v8927_v22  ;;  %v22542_v17 = vsel %vm2731_vm3, %v8842_v28, %v8844_v7  ;;  %v9025_v8 = vrot.slane %v8617_v20, 3 }
 0x841   : > { %v8314_v21 = vpop.f32.mrb[36].mxu1  ;;  %v9026_v31 = vrot.slane %v8613_v30, 4 }
 0x842   : > { %v22545_v63 = vpack.c.bf16 %v8314_v21, %v8309_v11  ;;  %v17032_v49 = vpop.f32.mrb[37].mxu1  ;;  %v8616_v25 = vsel %vm8548_vm7, %v8611_v15, %v8615_v59  ;;  %v8619_v4 = vor.u32 %v8617_v20, %v8615_v59 }
 0x843   : > { %v8317_v43 = vpop.f32.mrb[38].mxu1  ;;  %10281 = vmatprep.mubr.bf16.mxu0 %v8616_v25  ;;  %v9027_v47 = vor.u32 %v9026_v31, %v9025_v8 }
 0x844   : > { %25569 = vst [vmem:[#allocation22_spill] sm:$0xff] %v22545_v63  ;;  %v8497_v5 = vpack.c.bf16 %v8317_v43, %v8314_v21  ;;  %v17033_v39 = vpop.f32.mrb[39].mxu1  ;;  %10282 = vmatmul.mubr.bf16.gmra.mrb[228].mxu0 %v8495_v41 }
 0x845   : > { %v22549_v6 = vsel %vm8997_vm8, %v9023_v32, %v9027_v47 }
 0x846   : > { %25570 = vst [vmem:[#allocation23_spill] sm:$0xff] %v22549_v6  ;;  %v8621_v26 = vshll.u32 %v8497_v5, 16  ;;  %v8625_v28 = vshrl.u32 %v8497_v5, 16  ;;  %v8929_v24 = vrot.slane %v8497_v5, 3  ;;  %v8846_v44 = vrot.slane %v8497_v5, 1 }
 0x848   : > { %v8623_v33 = vrot.slane %v8621_v26, 1  ;;  %v22552_v45 = vsel %vm1502_vm1, %v8927_v22, %v8929_v24  ;;  %v22555_v23 = vsel %vm2731_vm3, %v8844_v7, %v8846_v44  ;;  %v9029_v19 = vrot.slane %v8625_v28, 3  ;;  %v19085_v22 = vld [vmem:[%s25495_s4 + $0xc0] sm:$0xff]  }
 0x849   : > { %v8322_v11 = vpop.f32.mrb[40].mxu1  ;;  %v9030_v58 = vrot.slane %v8621_v26, 4  ;;  %10466 = vmatpush1.bf16.msra.mxu0 %v19085_v22 }
 0x84a   : > { %v22557_v30 = vpack.c.bf16 %v8322_v11, %v8317_v43  ;;  %v17036_v41 = vpop.f32.mrb[41].mxu1  ;;  %v8624_v32 = vsel %vm8548_vm7, %v8619_v4, %v8623_v33  ;;  %v8627_v25 = vor.u32 %v8625_v28, %v8623_v33  ;;  %10467 = vmatprep.subr.bf16.mxu0 %v25518_v35 }
 0x84b   : > { %v8325_v38 = vpop.f32.mrb[42].mxu1  ;;  %10289 = vmatprep.mubr.bf16.mxu0 %v8624_v32  ;;  %v9031_v15 = vor.u32 %v9030_v58, %v9029_v19 }
 0x84c   : > { %25571 = vst [vmem:[#allocation24_spill] sm:$0xff] %v22557_v30  ;;  %v8498_v8 = vpack.c.bf16 %v8325_v38, %v8322_v11  ;;  %v17037_v20 = vpop.f32.mrb[43].mxu1  ;;  %10290 = vmatmul.mubr.bf16.gmra.mrb[232].mxu0 %v8496_v18  ;;  %v19086_v18 = vld [vmem:[%s25495_s4 + $0xc8] sm:$0xff]  }
 0x84d   : > { %v22564_v7 = vsel %vm8997_vm8, %v9027_v47, %v9031_v15  ;;  %10468 = vmatpush1.bf16.msra.mxu0 %v19086_v18 }
 0x84e   : > { %25572 = vst [vmem:[#allocation25_spill] sm:$0xff] %v22564_v7  ;;  %v8629_v59 = vshll.u32 %v8498_v8, 16  ;;  %v8633_v21 = vshrl.u32 %v8498_v8, 16  ;;  %v8931_v31 = vrot.slane %v8498_v8, 3  ;;  %v8848_v49 = vrot.slane %v8498_v8, 1  ;;  %10469 = vmatprep.subr.bf16.mxu0 %v25518_v35 }
 0x850   : > { %v8631_v43 = vrot.slane %v8629_v59, 1  ;;  %v22571_v39 = vsel %vm1502_vm1, %v8929_v24, %v8931_v31  ;;  %v22574_v26 = vsel %vm2731_vm3, %v8846_v44, %v8848_v49  ;;  %v9033_v47 = vrot.slane %v8633_v21, 3  ;;  %v19087_v44 = vld [vmem:[%s25495_s4 + $0xd0] sm:$0xff]  }
 0x851   : > { %v8330_v4 = vpop.f32.mrb[44].mxu1  ;;  %v9034_v19 = vrot.slane %v8629_v59, 4  ;;  %10470 = vmatpush1.bf16.msra.mxu0 %v19087_v44 }
 0x852   : > { %v22576_v11 = vpack.c.bf16 %v8330_v4, %v8325_v38  ;;  %v17040_v58 = vpop.f32.mrb[45].mxu1  ;;  %v8632_v28 = vsel %vm8548_vm7, %v8627_v25, %v8631_v43  ;;  %v8635_v18 = vor.u32 %v8633_v21, %v8631_v43  ;;  %10471 = vmatprep.subr.bf16.mxu0 %v25518_v35 }
 0x853   : > { %v8333_v33 = vpop.f32.mrb[46].mxu1  ;;  %10297 = vmatprep.mubr.bf16.mxu0 %v8632_v28  ;;  %v9035_v41 = vor.u32 %v9034_v19, %v9033_v47 }
 0x854   : > { %25573 = vst [vmem:[#allocation26_spill] sm:$0xff] %v22576_v11  ;;  %v8499_v32 = vpack.c.bf16 %v8333_v33, %v8330_v4  ;;  %v17041_v24 = vpop.f32.mrb[47].mxu1  ;;  %10298 = vmatmul.mubr.bf16.gmra.mrb[236].mxu0 %v8497_v5  ;;  %v19088_v5 = vld [vmem:[%s25495_s4 + $0xd8] sm:$0xff]  }
 0x855   : > { %v22584_v20 = vsel %vm8997_vm8, %v9031_v15, %v9035_v41  ;;  %10472 = vmatpush1.bf16.msra.mxu0 %v19088_v5 }
 0x856   : > { %25574 = vst [vmem:[#allocation27_spill] sm:$0xff] %v22584_v20  ;;  %v8637_v38 = vshll.u32 %v8499_v32, 16  ;;  %v8641_v22 = vshrl.u32 %v8499_v32, 16  ;;  %v8933_v59 = vrot.slane %v8499_v32, 3  ;;  %v8850_v25 = vrot.slane %v8499_v32, 1  ;;  %10473 = vmatprep.subr.bf16.mxu0 %v25518_v35 }
 0x858   : > { %v8639_v58 = vrot.slane %v8637_v38, 1  ;;  %v22591_v47 = vsel %vm1502_vm1, %v8931_v31, %v8933_v59  ;;  %v22594_v4 = vsel %vm2731_vm3, %v8848_v49, %v8850_v25  ;;  %v9037_v15 = vrot.slane %v8641_v22, 3  ;;  %v19089_v49 = vld [vmem:[%s25495_s4 + $0xe0] sm:$0xff]  }
 0x859   : > { %v8338_v19 = vpop.f32.mrb[48].mxu1  ;;  %v9038_v28 = vrot.slane %v8637_v38, 4  ;;  %10474 = vmatpush1.bf16.msra.mxu0 %v19089_v49 }
 0x85a   : > { %v22596_v24 = vpack.c.bf16 %v8338_v19, %v8333_v33  ;;  %v17044_v44 = vpop.f32.mrb[49].mxu1  ;;  %v8640_v21 = vsel %vm8548_vm7, %v8635_v18, %v8639_v58  ;;  %10475 = vmatprep.subr.bf16.mxu0 %v25518_v35 }
 0x85b   : > { %v8341_v43 = vpop.f32.mrb[50].mxu1  ;;  %10305 = vmatprep.mubr.bf16.mxu0 %v8640_v21  ;;  %v9039_v56 = vor.u32 %v9038_v28, %v9037_v15 }
 0x85c   : > { %25575 = vst [vmem:[#allocation28_spill] sm:$0xff] %v22596_v24  ;;  %v8500_v50 = vpack.c.bf16 %v8341_v43, %v8338_v19  ;;  %v17045_v31 = vpop.f32.mrb[51].mxu1  ;;  %10306 = vmatmul.mubr.bf16.gmra.mrb[240].mxu0 %v8498_v8  ;;  %v8643_v24 = vor.u32 %v8641_v22, %v8639_v58  ;;  %v19090_v8 = vld [vmem:[%s25495_s4 + $0xe8] sm:$0xff]  }
 0x85d   : > { %v22604_v38 = vsel %vm8997_vm8, %v9035_v41, %v9039_v56  ;;  %10476 = vmatpush1.bf16.msra.mxu0 %v19090_v8 }
 0x85e   : > { %25576 = vst [vmem:[#allocation29_spill] sm:$0xff] %v22604_v38  ;;  %v8645_v33 = vshll.u32 %v8500_v50, 16  ;;  %v8649_v44 = vshrl.u32 %v8500_v50, 16  ;;  %v8935_v18 = vrot.slane %v8500_v50, 3  ;;  %v8852_v5 = vrot.slane %v8500_v50, 1  ;;  %10477 = vmatprep.subr.bf16.mxu0 %v25518_v35 }
 0x860   : > { %v8647_v21 = vrot.slane %v8645_v33, 1  ;;  %v22611_v15 = vsel %vm1502_vm1, %v8933_v59, %v8935_v18  ;;  %v22614_v19 = vsel %vm2731_vm3, %v8850_v25, %v8852_v5  ;;  %v9041_v41 = vrot.slane %v8649_v44, 3  ;;  %v19091_v25 = vld [vmem:[%s25495_s4 + $0xf0] sm:$0xff]  }
 0x861   : > { %v8346_v28 = vpop.f32.mrb[52].mxu1  ;;  %v9042_v31 = vrot.slane %v8645_v33, 4  ;;  %10478 = vmatpush1.bf16.msra.mxu0 %v19091_v25 }
 0x862   : > { %v22616_v49 = vpack.c.bf16 %v8346_v28, %v8341_v43  ;;  %v17048_v38 = vpop.f32.mrb[53].mxu1  ;;  %v8648_v22 = vsel %vm8548_vm7, %v8643_v24, %v8647_v21  ;;  %10479 = vmatprep.subr.bf16.mxu0 %v25518_v35 }
 0x863   : > { %v8349_v58 = vpop.f32.mrb[54].mxu1  ;;  %10313 = vmatprep.mubr.bf16.mxu0 %v8648_v22  ;;  %v9043_v11 = vor.u32 %v9042_v31, %v9041_v41 }
 0x864   : > { %25577 = vst [vmem:[#allocation30_spill] sm:$0xff] %v22616_v49  ;;  %v8501_v20 = vpack.c.bf16 %v8349_v58, %v8346_v28  ;;  %v17049_v59 = vpop.f32.mrb[55].mxu1  ;;  %10314 = vmatmul.mubr.bf16.gmra.mrb[244].mxu0 %v8499_v32  ;;  %v8651_v49 = vor.u32 %v8649_v44, %v8647_v21  ;;  %v19092_v32 = vld [vmem:[%s25495_s4 + $0xf8] sm:$0xff]  }
 0x865   : > { %v22624_v33 = vsel %vm8997_vm8, %v9039_v56, %v9043_v11  ;;  %10480 = vmatpush1.bf16.msra.mxu0 %v19092_v32 }
 0x866   : > { %25578 = vst [vmem:[#allocation31_spill] sm:$0xff] %v22624_v33  ;;  %v8653_v43 = vshll.u32 %v8501_v20, 16  ;;  %v8657_v38 = vshrl.u32 %v8501_v20, 16  ;;  %v8937_v24 = vrot.slane %v8501_v20, 3  ;;  %v8854_v8 = vrot.slane %v8501_v20, 1  ;;  %10705 = vmatprep.subr.bf16.mxu0 %v25518_v35 }
 0x868   : > { %v8655_v22 = vrot.slane %v8653_v43, 1  ;;  %v22631_v41 = vsel %vm1502_vm1, %v8935_v18, %v8937_v24  ;;  %v22634_v28 = vsel %vm2731_vm3, %v8852_v5, %v8854_v8  ;;  %v9045_v56 = vrot.slane %v8657_v38, 3 }
 0x869   : > { %v8354_v31 = vpop.f32.mrb[56].mxu1  ;;  %v9046_v59 = vrot.slane %v8653_v43, 4 }
 0x86a   : > { %v22636_v25 = vpack.c.bf16 %v8354_v31, %v8349_v58  ;;  %v17052_v33 = vpop.f32.mrb[57].mxu1  ;;  %v8656_v44 = vsel %vm8548_vm7, %v8651_v49, %v8655_v22 }
 0x86b   : > { %v8357_v21 = vpop.f32.mrb[58].mxu1  ;;  %10321 = vmatprep.mubr.bf16.mxu0 %v8656_v44  ;;  %v9047_v30 = vor.u32 %v9046_v59, %v9045_v56 }
 0x86c   : > { %25579 = vst [vmem:[#allocation32_spill] sm:$0xff] %v22636_v25  ;;  %v8502_v7 = vpack.c.bf16 %v8357_v21, %v8354_v31  ;;  %v17053_v18 = vpop.f32.mrb[59].mxu1  ;;  %10322 = vmatmul.mubr.bf16.gmra.mrb[248].mxu0 %v8500_v50  ;;  %v8659_v25 = vor.u32 %v8657_v38, %v8655_v22 }
 0x86d   : > { %v22641_v5 = vsel %vm8997_vm8, %v9043_v11, %v9047_v30 }
 0x86e   : > { %25580 = vst [vmem:[#allocation33_spill] sm:$0xff] %v22641_v5  ;;  %v8661_v63 = vshll.u32 %v8502_v7, 16  ;;  %v8665_v6 = vshrl.u32 %v8502_v7, 16  ;;  %v8939_v43 = vrot.slane %v8502_v7, 3  ;;  %v8856_v58 = vrot.slane %v8502_v7, 1 }
 0x870   : > { %v8663_v33 = vrot.slane %v8661_v63, 1  ;;  %v22644_v49 = vsel %vm1502_vm1, %v8937_v24, %v8939_v43  ;;  %v22647_v32 = vsel %vm2731_vm3, %v8854_v8, %v8856_v58  ;;  %v9049_v44 = vrot.slane %v8665_v6, 3 }
 0x871   : > { %v8362_v56 = vpop.f32.mrb[60].mxu1  ;;  %v9050_v31 = vrot.slane %v8661_v63, 4 }
 0x872   : > { %v22649_v59 = vpack.c.bf16 %v8362_v56, %v8357_v21  ;;  %v17056_v50 = vpop.f32.mrb[61].mxu1  ;;  %v8664_v11 = vsel %vm8548_vm7, %v8659_v25, %v8663_v33  ;;  %v8667_v9 = vor.u32 %v8665_v6, %v8663_v33 }
 0x873   : > { %v8365_v18 = vpop.f32.mrb[62].mxu1  ;;  %10329 = vmatprep.mubr.bf16.mxu0 %v8664_v11  ;;  %v9051_v35 = vor.u32 %v9050_v31, %v9049_v44 }
 0x874   : > { %25581 = vst [vmem:[#allocation34_spill] sm:$0xff] %v22649_v59  ;;  %v8503_v5 = vpack.c.bf16 %v8365_v18, %v8362_v56  ;;  %v17057_v38 = vpop.f32.mrb[63].mxu1  ;;  %10330 = vmatmul.mubr.bf16.gmra.mrb[252].mxu0 %v8501_v20 }
 0x875   : > { %v22653_v24 = vsel %vm8997_vm8, %v9047_v30, %v9051_v35 }
 0x876   : > { %25582 = vst [vmem:[#allocation35_spill] sm:$0xff] %v22653_v24  ;;  %v8858_v22 = vrot.slane %v8503_v5, 1  ;;  %v8669_v8 = vshll.u32 %v8503_v5, 16  ;;  %v8673_v1 = vshrl.u32 %v8503_v5, 16  ;;  %v8941_v13 = vrot.slane %v8503_v5, 3 }
 0x878   : > { %v8671_v63 = vrot.slane %v8669_v8, 1  ;;  %v22656_v21 = vsel %vm1502_vm1, %v8939_v43, %v8941_v13  ;;  %v22659_v25 = vsel %vm2731_vm3, %v8856_v58, %v8858_v22  ;;  %v9053_v50 = vrot.slane %v8673_v1, 3 }
 0x879   : > { %v8370_v44 = vpop.f32.mrb[64].mxu1  ;;  %v9054_v56 = vrot.slane %v8669_v8, 4 }
 0x87a   : > { %v22661_v31 = vpack.c.bf16 %v8370_v44, %v8365_v18  ;;  %v17060_v20 = vpop.f32.mrb[65].mxu1  ;;  %v8672_v30 = vsel %vm8548_vm7, %v8667_v9, %v8671_v63  ;;  %v8675_v3 = vor.u32 %v8673_v1, %v8671_v63 }
 0x87b   : > { %v8373_v11 = vpop.f32.mrb[66].mxu1  ;;  %10337 = vmatprep.mubr.bf16.mxu0 %v8672_v30  ;;  %v9055_v38 = vor.u32 %v9054_v56, %v9053_v50 }
 0x87c   : > { %25583 = vst [vmem:[#allocation36_spill] sm:$0xff] %v22661_v31  ;;  %v8504_v59 = vpack.c.bf16 %v8373_v11, %v8370_v44  ;;  %v17061_v6 = vpop.f32.mrb[67].mxu1  ;;  %10338 = vmatmul.mubr.bf16.gmra.mrb[0].mxu0 %v8502_v7 }
 0x87d   : > { %v22665_v43 = vsel %vm8997_vm8, %v9051_v35, %v9055_v38 }
 0x87e   : > { %25584 = vst [vmem:[#allocation37_spill] sm:$0xff] %v22665_v43  ;;  %v8860_v33 = vrot.slane %v8504_v59, 1  ;;  %v8677_v58 = vshll.u32 %v8504_v59, 16  ;;  %v8681_v24 = vshrl.u32 %v8504_v59, 16  ;;  %v8943_v60 = vrot.slane %v8504_v59, 3 }
 0x880   : > { %v8679_v8 = vrot.slane %v8677_v58, 1  ;;  %v9058_v18 = vrot.slane %v8677_v58, 4  ;;  %v9057_v31 = vrot.slane %v8681_v24, 3  ;;  %v22668_v20 = vsel %vm1502_vm1, %v8941_v13, %v8943_v60 }
 0x881   : > { %v8378_v9 = vpop.f32.mrb[68].mxu1  ;;  %v22671_v50 = vsel %vm2731_vm3, %v8858_v22, %v8860_v33 }
 0x882   : > { %v22673_v44 = vpack.c.bf16 %v8378_v9, %v8373_v11  ;;  %v17064_v7 = vpop.f32.mrb[69].mxu1  ;;  %v8680_v35 = vsel %vm8548_vm7, %v8675_v3, %v8679_v8  ;;  %v9059_v56 = vor.u32 %v9058_v18, %v9057_v31  ;;  %v8683_v22 = vor.u32 %v8681_v24, %v8679_v8 }
 0x883   : > { %v8381_v30 = vpop.f32.mrb[70].mxu1  ;;  %10345 = vmatprep.mubr.bf16.mxu0 %v8680_v35 }
 0x884   : > { %25585 = vst [vmem:[#allocation38_spill] sm:$0xff] %v22673_v44  ;;  %v8505_v6 = vpack.c.bf16 %v8381_v30, %v8378_v9  ;;  %v17065_v1 = vpop.f32.mrb[71].mxu1  ;;  %10346 = vmatmul.mubr.bf16.gmra.mrb[4].mxu0 %v8503_v5  ;;  %v22677_v63 = vsel %vm8997_vm8, %v9055_v38, %v9059_v56 }
 0x885   : > { %25586 = vst [vmem:[#allocation39_spill] sm:$0xff] %v22677_v63 }
 0x886   : > { %v8862_v13 = vrot.slane %v8505_v6, 1  ;;  %v8685_v58 = vshll.u32 %v8505_v6, 16  ;;  %v8689_v43 = vshrl.u32 %v8505_v6, 16  ;;  %v8945_v51 = vrot.slane %v8505_v6, 3 }
 0x888   : > { %v8687_v46 = vrot.slane %v8685_v58, 1  ;;  %v9062_v11 = vrot.slane %v8685_v58, 4  ;;  %v9061_v44 = vrot.slane %v8689_v43, 3  ;;  %v22680_v7 = vsel %vm1502_vm1, %v8943_v60, %v8945_v51 }
 0x889   : > { %v8386_v3 = vpop.f32.mrb[72].mxu1  ;;  %v22683_v31 = vsel %vm2731_vm3, %v8860_v33, %v8862_v13 }
 0x88a   : > { %v22685_v18 = vpack.c.bf16 %v8386_v3, %v8381_v30  ;;  %v17068_v5 = vpop.f32.mrb[73].mxu1  ;;  %v8688_v38 = vsel %vm8548_vm7, %v8683_v22, %v8687_v46  ;;  %v9063_v9 = vor.u32 %v9062_v11, %v9061_v44  ;;  %v8691_v33 = vor.u32 %v8689_v43, %v8687_v46 }
 0x88b   : > { %v8389_v35 = vpop.f32.mrb[74].mxu1  ;;  %10353 = vmatprep.mubr.bf16.mxu0 %v8688_v38 }
 0x88c   : > { %25587 = vst [vmem:[#allocation40_spill] sm:$0xff] %v22685_v18  ;;  %v8506_v1 = vpack.c.bf16 %v8389_v35, %v8386_v3  ;;  %v17069_v24 = vpop.f32.mrb[75].mxu1  ;;  %10354 = vmatmul.mubr.bf16.gmra.mrb[8].mxu0 %v8504_v59  ;;  %v22689_v8 = vsel %vm8997_vm8, %v9059_v56, %v9063_v9 }
 0x88d   : > { %25588 = vst [vmem:[#allocation41_spill] sm:$0xff] %v22689_v8 }
 0x88e   : > { %v8864_v60 = vrot.slane %v8506_v1, 1  ;;  %v8693_v58 = vshll.u32 %v8506_v1, 16  ;;  %v8697_v63 = vshrl.u32 %v8506_v1, 16  ;;  %v8947_v16 = vrot.slane %v8506_v1, 3 }
 0x890   : > { %v8695_v52 = vrot.slane %v8693_v58, 1  ;;  %v9066_v30 = vrot.slane %v8693_v58, 4  ;;  %v9065_v18 = vrot.slane %v8697_v63, 3  ;;  %v22692_v5 = vsel %vm1502_vm1, %v8945_v51, %v8947_v16 }
 0x891   : > { %v8394_v44 = vpop.f32.mrb[76].mxu1  ;;  %v22695_v22 = vsel %vm2731_vm3, %v8862_v13, %v8864_v60 }
 0x892   : > { %v22697_v11 = vpack.c.bf16 %v8394_v44, %v8389_v35  ;;  %v17072_v59 = vpop.f32.mrb[77].mxu1  ;;  %v8696_v56 = vsel %vm8548_vm7, %v8691_v33, %v8695_v52  ;;  %v9067_v3 = vor.u32 %v9066_v30, %v9065_v18  ;;  %v8699_v13 = vor.u32 %v8697_v63, %v8695_v52 }
 0x893   : > { %v8397_v38 = vpop.f32.mrb[78].mxu1  ;;  %10361 = vmatprep.mubr.bf16.mxu0 %v8696_v56 }
 0x894   : > { %25589 = vst [vmem:[#allocation42_spill] sm:$0xff] %v22697_v11  ;;  %v8507_v24 = vpack.c.bf16 %v8397_v38, %v8394_v44  ;;  %v17073_v46 = vpop.f32.mrb[79].mxu1  ;;  %10362 = vmatmul.mubr.bf16.gmra.mrb[12].mxu0 %v8505_v6  ;;  %v22701_v43 = vsel %vm8997_vm8, %v9063_v9, %v9067_v3 }
 0x895   : > { %25590 = vst [vmem:[#allocation43_spill] sm:$0xff] %v22701_v43 }
 0x896   : > { %v8866_v51 = vrot.slane %v8507_v24, 1  ;;  %v8701_v58 = vshll.u32 %v8507_v24, 16  ;;  %v8705_v8 = vshrl.u32 %v8507_v24, 16  ;;  %v8949_v57 = vrot.slane %v8507_v24, 3 }
 0x898   : > { %v8703_v48 = vrot.slane %v8701_v58, 1  ;;  %v9070_v35 = vrot.slane %v8701_v58, 4  ;;  %v9069_v11 = vrot.slane %v8705_v8, 3  ;;  %v22704_v59 = vsel %vm1502_vm1, %v8947_v16, %v8949_v57 }
 0x899   : > { %v8402_v18 = vpop.f32.mrb[80].mxu1  ;;  %v22707_v33 = vsel %vm2731_vm3, %v8864_v60, %v8866_v51 }
 0x89a   : > { %v22709_v30 = vpack.c.bf16 %v8402_v18, %v8397_v38  ;;  %v17076_v6 = vpop.f32.mrb[81].mxu1  ;;  %v8704_v9 = vsel %vm8548_vm7, %v8699_v13, %v8703_v48  ;;  %v9071_v44 = vor.u32 %v9070_v35, %v9069_v11  ;;  %v8707_v60 = vor.u32 %v8705_v8, %v8703_v48 }
 0x89b   : > { %v8405_v56 = vpop.f32.mrb[82].mxu1  ;;  %10369 = vmatprep.mubr.bf16.mxu0 %v8704_v9 }
 0x89c   : > { %25591 = vst [vmem:[#allocation44_spill] sm:$0xff] %v22709_v30  ;;  %v8508_v46 = vpack.c.bf16 %v8405_v56, %v8402_v18  ;;  %v17077_v52 = vpop.f32.mrb[83].mxu1  ;;  %10370 = vmatmul.mubr.bf16.gmra.mrb[16].mxu0 %v8506_v1  ;;  %v22713_v63 = vsel %vm8997_vm8, %v9067_v3, %v9071_v44 }
 0x89d   : > { %25592 = vst [vmem:[#allocation45_spill] sm:$0xff] %v22713_v63 }
 0x89e   : > { %v8868_v16 = vrot.slane %v8508_v46, 1  ;;  %v8709_v58 = vshll.u32 %v8508_v46, 16  ;;  %v8713_v43 = vshrl.u32 %v8508_v46, 16  ;;  %v8951_v0 = vrot.slane %v8508_v46, 3 }
 0x8a0   : > { %v8711_v37 = vrot.slane %v8709_v58, 1  ;;  %v9074_v38 = vrot.slane %v8709_v58, 4  ;;  %v9073_v30 = vrot.slane %v8713_v43, 3  ;;  %v22716_v6 = vsel %vm1502_vm1, %v8949_v57, %v8951_v0 }
 0x8a1   : > { %v8410_v11 = vpop.f32.mrb[84].mxu1  ;;  %v22719_v13 = vsel %vm2731_vm3, %v8866_v51, %v8868_v16 }
 0x8a2   : > { %25593 = vst [vmem:[#allocation46_spill] sm:$0xff] %v22719_v13  ;;  %v22721_v35 = vpack.c.bf16 %v8410_v11, %v8405_v56  ;;  %v17080_v1 = vpop.f32.mrb[85].mxu1  ;;  %v8712_v3 = vsel %vm8548_vm7, %v8707_v60, %v8711_v37  ;;  %v9075_v18 = vor.u32 %v9074_v38, %v9073_v30  ;;  %v8715_v51 = vor.u32 %v8713_v43, %v8711_v37 }
 0x8a3   : > { %v8413_v9 = vpop.f32.mrb[86].mxu1  ;;  %10377 = vmatprep.mubr.bf16.mxu0 %v8712_v3 }
 0x8a4   : > { %25594 = vst [vmem:[#allocation47_spill] sm:$0xff] %v22721_v35  ;;  %v8509_v52 = vpack.c.bf16 %v8413_v9, %v8410_v11  ;;  %v17081_v48 = vpop.f32.mrb[87].mxu1  ;;  %10378 = vmatmul.mubr.bf16.gmra.mrb[20].mxu0 %v8507_v24  ;;  %v22725_v8 = vsel %vm8997_vm8, %v9071_v44, %v9075_v18 }
 0x8a5   : > { %25595 = vst [vmem:[#allocation48_spill] sm:$0xff] %v22725_v8 }
 0x8a6   : > { %v8870_v57 = vrot.slane %v8509_v52, 1  ;;  %v8717_v58 = vshll.u32 %v8509_v52, 16  ;;  %v8721_v63 = vshrl.u32 %v8509_v52, 16  ;;  %v8953_v55 = vrot.slane %v8509_v52, 3 }
 0x8a8   : > { %v8719_v13 = vrot.slane %v8717_v58, 1  ;;  %v9078_v56 = vrot.slane %v8717_v58, 4  ;;  %v9077_v35 = vrot.slane %v8721_v63, 3  ;;  %v22728_v1 = vsel %vm1502_vm1, %v8951_v0, %v8953_v55 }
 0x8a9   : > { %25596 = vst [vmem:[#allocation49_spill] sm:$0xff] %v22728_v1  ;;  %v8418_v30 = vpop.f32.mrb[88].mxu1  ;;  %v22731_v60 = vsel %vm2731_vm3, %v8868_v16, %v8870_v57 }
 0x8aa   : > { %25597 = vst [vmem:[#allocation50_spill] sm:$0xff] %v22731_v60  ;;  %v22733_v38 = vpack.c.bf16 %v8418_v30, %v8413_v9  ;;  %v17084_v24 = vpop.f32.mrb[89].mxu1  ;;  %v8720_v44 = vsel %vm8548_vm7, %v8715_v51, %v8719_v13  ;;  %v9079_v11 = vor.u32 %v9078_v56, %v9077_v35  ;;  %v8723_v16 = vor.u32 %v8721_v63, %v8719_v13 }
 0x8ab   : > { %v8421_v3 = vpop.f32.mrb[90].mxu1  ;;  %10385 = vmatprep.mubr.bf16.mxu0 %v8720_v44 }
 0x8ac   : > { %25598 = vst [vmem:[#allocation51_spill] sm:$0xff] %v22733_v38  ;;  %v8510_v48 = vpack.c.bf16 %v8421_v3, %v8418_v30  ;;  %v17085_v37 = vpop.f32.mrb[91].mxu1  ;;  %10386 = vmatmul.mubr.bf16.gmra.mrb[24].mxu0 %v8508_v46  ;;  %v22737_v43 = vsel %vm8997_vm8, %v9075_v18, %v9079_v11 }
 0x8ad   : > { %25599 = vst [vmem:[#allocation52_spill] sm:$0xff] %v22737_v43 }
 0x8ae   : > { %v8872_v0 = vrot.slane %v8510_v48, 1  ;;  %v8725_v58 = vshll.u32 %v8510_v48, 16  ;;  %v8729_v8 = vshrl.u32 %v8510_v48, 16  ;;  %v8955_v1 = vrot.slane %v8510_v48, 3 }
 0x8b0   : > { %v8727_v60 = vrot.slane %v8725_v58, 1  ;;  %v9082_v9 = vrot.slane %v8725_v58, 4  ;;  %v9081_v38 = vrot.slane %v8729_v8, 3  ;;  %v22740_v24 = vsel %vm1502_vm1, %v8953_v55, %v8955_v1 }
 0x8b1   : > { %25600 = vst [vmem:[#allocation53_spill] sm:$0xff] %v22740_v24  ;;  %v8426_v35 = vpop.f32.mrb[92].mxu1  ;;  %v22743_v51 = vsel %vm2731_vm3, %v8870_v57, %v8872_v0 }
 0x8b2   : > { %25601 = vst [vmem:[#allocation54_spill] sm:$0xff] %v22743_v51  ;;  %v22745_v56 = vpack.c.bf16 %v8426_v35, %v8421_v3  ;;  %v17088_v46 = vpop.f32.mrb[93].mxu1  ;;  %v8728_v18 = vsel %vm8548_vm7, %v8723_v16, %v8727_v60  ;;  %v9083_v30 = vor.u32 %v9082_v9, %v9081_v38  ;;  %v8731_v57 = vor.u32 %v8729_v8, %v8727_v60 }
 0x8b3   : > { %v8429_v44 = vpop.f32.mrb[94].mxu1  ;;  %10393 = vmatprep.mubr.bf16.mxu0 %v8728_v18 }
 0x8b4   : > { %25602 = vst [vmem:[#allocation55_spill] sm:$0xff] %v22745_v56  ;;  %v8511_v37 = vpack.c.bf16 %v8429_v44, %v8426_v35  ;;  %v17089_v63 = vpop.f32.mrb[95].mxu1  ;;  %10394 = vmatmul.mubr.bf16.gmra.mrb[28].mxu0 %v8509_v52  ;;  %v22749_v13 = vsel %vm8997_vm8, %v9079_v11, %v9083_v30 }
 0x8b5   : > { %25603 = vst [vmem:[#allocation56_spill] sm:$0xff] %v22749_v13 }
 0x8b6   : > { %v8874_v55 = vrot.slane %v8511_v37, 1  ;;  %v8733_v58 = vshll.u32 %v8511_v37, 16  ;;  %v8737_v43 = vshrl.u32 %v8511_v37, 16  ;;  %v8957_v24 = vrot.slane %v8511_v37, 3 }
 0x8b8   : > { %v8735_v51 = vrot.slane %v8733_v58, 1  ;;  %v9086_v3 = vrot.slane %v8733_v58, 4  ;;  %v9085_v56 = vrot.slane %v8737_v43, 3  ;;  %v22752_v46 = vsel %vm1502_vm1, %v8955_v1, %v8957_v24 }
 0x8b9   : > { %25604 = vst [vmem:[#allocation57_spill] sm:$0xff] %v22752_v46  ;;  %v8434_v38 = vpop.f32.mrb[96].mxu1  ;;  %v22755_v16 = vsel %vm2731_vm3, %v8872_v0, %v8874_v55 }
 0x8ba   : > { %25605 = vst [vmem:[#allocation58_spill] sm:$0xff] %v22755_v16  ;;  %v22757_v9 = vpack.c.bf16 %v8434_v38, %v8429_v44  ;;  %v17092_v52 = vpop.f32.mrb[97].mxu1  ;;  %v8736_v11 = vsel %vm8548_vm7, %v8731_v57, %v8735_v51  ;;  %v9087_v35 = vor.u32 %v9086_v3, %v9085_v56  ;;  %v8739_v0 = vor.u32 %v8737_v43, %v8735_v51 }
 0x8bb   : > { %v8437_v18 = vpop.f32.mrb[98].mxu1  ;;  %10401 = vmatprep.mubr.bf16.mxu0 %v8736_v11 }
 0x8bc   : > { %25606 = vst [vmem:[#allocation59_spill] sm:$0xff] %v22757_v9  ;;  %v8512_v63 = vpack.c.bf16 %v8437_v18, %v8434_v38  ;;  %v17093_v8 = vpop.f32.mrb[99].mxu1  ;;  %10402 = vmatmul.mubr.bf16.gmra.mrb[32].mxu0 %v8510_v48  ;;  %v22761_v60 = vsel %vm8997_vm8, %v9083_v30, %v9087_v35 }
 0x8bd   : > { %25607 = vst [vmem:[#allocation60_spill] sm:$0xff] %v22761_v60 }
 0x8be   : > { %v8876_v1 = vrot.slane %v8512_v63, 1  ;;  %v8741_v58 = vshll.u32 %v8512_v63, 16  ;;  %v8745_v13 = vshrl.u32 %v8512_v63, 16  ;;  %v8959_v46 = vrot.slane %v8512_v63, 3 }
 0x8c0   : > { %v8743_v16 = vrot.slane %v8741_v58, 1  ;;  %v9090_v44 = vrot.slane %v8741_v58, 4  ;;  %v9089_v9 = vrot.slane %v8745_v13, 3  ;;  %v22764_v52 = vsel %vm1502_vm1, %v8957_v24, %v8959_v46 }
 0x8c1   : > { %25608 = vst [vmem:[#allocation61_spill] sm:$0xff] %v22764_v52  ;;  %v8442_v56 = vpop.f32.mrb[100].mxu1  ;;  %v22767_v57 = vsel %vm2731_vm3, %v8874_v55, %v8876_v1 }
 0x8c2   : > { %25609 = vst [vmem:[#allocation62_spill] sm:$0xff] %v22767_v57  ;;  %v22769_v3 = vpack.c.bf16 %v8442_v56, %v8437_v18  ;;  %v17096_v48 = vpop.f32.mrb[101].mxu1  ;;  %v8744_v30 = vsel %vm8548_vm7, %v8739_v0, %v8743_v16  ;;  %v9091_v38 = vor.u32 %v9090_v44, %v9089_v9  ;;  %v8747_v55 = vor.u32 %v8745_v13, %v8743_v16 }
 0x8c3   : > { %v8445_v11 = vpop.f32.mrb[102].mxu1  ;;  %10409 = vmatprep.mubr.bf16.mxu0 %v8744_v30 }
 0x8c4   : > { %25610 = vst [vmem:[#allocation63_spill] sm:$0xff] %v22769_v3  ;;  %v8513_v8 = vpack.c.bf16 %v8445_v11, %v8442_v56  ;;  %v17097_v43 = vpop.f32.mrb[103].mxu1  ;;  %10410 = vmatmul.mubr.bf16.gmra.mrb[36].mxu0 %v8511_v37  ;;  %v22773_v51 = vsel %vm8997_vm8, %v9087_v35, %v9091_v38 }
 0x8c5   : > { %25611 = vst [vmem:[#allocation64_spill] sm:$0xff] %v22773_v51 }
 0x8c6   : > { %v8878_v24 = vrot.slane %v8513_v8, 1  ;;  %v8749_v58 = vshll.u32 %v8513_v8, 16  ;;  %v8753_v60 = vshrl.u32 %v8513_v8, 16  ;;  %v8961_v52 = vrot.slane %v8513_v8, 3 }
 0x8c8   : > { %v8751_v57 = vrot.slane %v8749_v58, 1  ;;  %v9094_v18 = vrot.slane %v8749_v58, 4  ;;  %v9093_v3 = vrot.slane %v8753_v60, 3  ;;  %v22776_v48 = vsel %vm1502_vm1, %v8959_v46, %v8961_v52 }
 0x8c9   : > { %25612 = vst [vmem:[#allocation65_spill] sm:$0xff] %v22776_v48  ;;  %v8450_v9 = vpop.f32.mrb[104].mxu1  ;;  %v22779_v0 = vsel %vm2731_vm3, %v8876_v1, %v8878_v24 }
 0x8ca   : > { %25613 = vst [vmem:[#allocation66_spill] sm:$0xff] %v22779_v0  ;;  %v22781_v44 = vpack.c.bf16 %v8450_v9, %v8445_v11  ;;  %v17100_v37 = vpop.f32.mrb[105].mxu1  ;;  %v8752_v35 = vsel %vm8548_vm7, %v8747_v55, %v8751_v57  ;;  %v9095_v56 = vor.u32 %v9094_v18, %v9093_v3  ;;  %v8755_v1 = vor.u32 %v8753_v60, %v8751_v57 }
 0x8cb   : > { %v8453_v30 = vpop.f32.mrb[106].mxu1  ;;  %10417 = vmatprep.mubr.bf16.mxu0 %v8752_v35 }
 0x8cc   : > { %25614 = vst [vmem:[#allocation67_spill] sm:$0xff] %v22781_v44  ;;  %v8514_v43 = vpack.c.bf16 %v8453_v30, %v8450_v9  ;;  %v17101_v13 = vpop.f32.mrb[107].mxu1  ;;  %10418 = vmatmul.mubr.bf16.gmra.mrb[40].mxu0 %v8512_v63  ;;  %v22785_v16 = vsel %vm8997_vm8, %v9091_v38, %v9095_v56 }
 0x8cd   : > { %25615 = vst [vmem:[#allocation68_spill] sm:$0xff] %v22785_v16 }
 0x8ce   : > { %v8880_v46 = vrot.slane %v8514_v43, 1  ;;  %v8757_v58 = vshll.u32 %v8514_v43, 16  ;;  %v8761_v51 = vshrl.u32 %v8514_v43, 16  ;;  %v8963_v48 = vrot.slane %v8514_v43, 3 }
 0x8d0   : > { %v8759_v0 = vrot.slane %v8757_v58, 1  ;;  %v9098_v11 = vrot.slane %v8757_v58, 4  ;;  %v9097_v44 = vrot.slane %v8761_v51, 3  ;;  %v22788_v37 = vsel %vm1502_vm1, %v8961_v52, %v8963_v48 }
 0x8d1   : > { %v8458_v3 = vpop.f32.mrb[108].mxu1  ;;  %v22791_v55 = vsel %vm2731_vm3, %v8878_v24, %v8880_v46 }
 0x8d2   : > { %25616 = vst [vmem:[#allocation69_spill] sm:$0xff] %v22791_v55  ;;  %v22793_v18 = vpack.c.bf16 %v8458_v3, %v8453_v30  ;;  %v17104_v63 = vpop.f32.mrb[109].mxu1  ;;  %v8760_v38 = vsel %vm8548_vm7, %v8755_v1, %v8759_v0  ;;  %v9099_v35 = vor.u32 %v9098_v11, %v9097_v44 }
 0x8d3   : > { %v8461_v9 = vpop.f32.mrb[110].mxu1  ;;  %10425 = vmatprep.mubr.bf16.mxu0 %v8760_v38  ;;  %v8763_v63 = vor.u32 %v8761_v51, %v8759_v0 }
 0x8d4   : > { %25617 = vst [vmem:[#allocation70_spill] sm:$0xff] %v22793_v18  ;;  %v22796_v13 = vpack.c.bf16 %v8461_v9, %v8458_v3  ;;  %v17105_v60 = vpop.f32.mrb[111].mxu1  ;;  %10426 = vmatmul.mubr.bf16.gmra.mrb[44].mxu0 %v8513_v8  ;;  %v22799_v57 = vsel %vm8997_vm8, %v9095_v56, %v9099_v35 }
 0x8d5   : > { %25618 = vst [vmem:[#allocation71_spill] sm:$0xff] %v22799_v57 }
 0x8d6   : > { %v25541_v52 = vrot.slane %v22796_v13, 1  ;;  %v8765_v24 = vshll.u32 %v22796_v13, 16  ;;  %v8769_v30 = vshrl.u32 %v22796_v13, 16  ;;  %v8965_v58 = vrot.slane %v22796_v13, 3 }
 0x8d8   : > { %v8767_v1 = vrot.slane %v8765_v24, 1  ;;  %v9102_v18 = vrot.slane %v8765_v24, 4  ;;  %v9101_v38 = vrot.slane %v8769_v30, 3  ;;  %v22806_v44 = vsel %vm1502_vm1, %v8963_v48, %v8965_v58 }
 0x8d9   : > { %v8466_v11 = vpop.f32.mrb[112].mxu1  ;;  %v22811_v8 = vsel %vm2731_vm3, %v8880_v46, %v25541_v52 }
 0x8da   : > { %v22813_v56 = vpack.c.bf16 %v8466_v11, %v8461_v9  ;;  %v17108_v60 = vpop.f32.mrb[113].mxu1  ;;  %v8768_v57 = vsel %vm8548_vm7, %v8763_v63, %v8767_v1  ;;  %v8771_v16 = vor.u32 %v8769_v30, %v8767_v1  ;;  %v9103_v55 = vor.u32 %v9102_v18, %v9101_v38 }
 0x8db   : > { %v22816_v51 = vpop.f32.mrb[114].mxu1  ;;  %10433 = vmatprep.mubr.bf16.mxu0 %v8768_v57  ;;  %v8515_v38 = vpack.c.bf16 %v8458_v3, %v8458_v3 }
 0x8dc   : > { %v22819_v0 = vpack.c.bf16 %v22816_v51, %v8466_v11  ;;  %v17109_v48 = vpop.f32.mrb[115].mxu1  ;;  %10434 = vmatmul.mubr.bf16.gmra.mrb[48].mxu0 %v8514_v43  ;;  %v22822_v24 = vsel %vm8997_vm8, %v9099_v35, %v9103_v55 }
 0x8dd   : > { %10441 = vmatprep.mubr.bf16.mxu0 %v8771_v16 }
 0x8de   : > { %v9106_v46 = vshrl.u32 %v22819_v0, 16  ;;  %v9109_v9 = vshll.u32 %v22819_v0, 16  ;;  %v25542_v63 = vrot.slane %v22819_v0, 3 }
 0x8e0   : > { %v9108_v30 = vrot.slane %v9106_v46, 3  ;;  %v9111_v18 = vrot.slane %v9109_v9, 4  ;;  %v22830_v57 = vsel %vm1502_vm1, %v8965_v58, %v25542_v63  ;;  %v19093_v9 = vld [vmem:[%s25495_s4 + $0x100] sm:$0xff]  }
 0x8e1   : > { %v8474_v1 = vpop.f32.mrb[116].mxu1 }
 0x8e2   : > { %v22832_v43 = vor.u32 %v9111_v18, %v9108_v30  ;;  %v22835_v35 = vpack.c.bf16 %v8474_v1, %v22816_v51  ;;  %v17112_v16 = vpop.f32.mrb[117].mxu1 }
 0x8e3   : > { %v8477_v11 = vpop.f32.mrb[118].mxu1 }
 0x8e4   : > { %25619 = vst [vmem:[#allocation72_spill] sm:$0xff] %v22832_v43  ;;  %v17113_v60 = vpop.f32.mrb[119].mxu1  ;;  %10442 = vmatmul.mubr.bf16.gmra.mrb[52].mxu0 %v8515_v38  ;;  %v22840_v48 = vsel %vm8997_vm8, %v9103_v55, %v22832_v43  ;;  %v9489_v58 = vshrl.u32 %v22835_v35, 16  ;;  %v9492_v46 = vshll.u32 %v22835_v35, 16  ;;  %v9222_v1 = vrot.slane %v22835_v35, 2 }
 0x8e5   : > { %10481 = vmatprep.mubr.bf16.mxu0 %v22438_v29  ;;  %v9585_v29 = vrot.slane %v22835_v35, 3 }
 0x8e6   : > { %v9491_v16 = vrot.slane %v9489_v58, 2  ;;  %v9494_v55 = vrot.slane %v9492_v46, 3  ;;  %v25620_v58 = vmov 0  }
 0x8e9   : > { %v8482_v3 = vpop.f32.mrb[120].mxu1 }
 0x8ea   : > { %v22847_v30 = vpack.c.bf16 %v8482_v3, %v8477_v11  ;;  %v17116_v18 = vpop.f32.mrb[121].mxu1  ;;  %v19094_v3 = vld [vmem:[%s25495_s4 + $0x108] sm:$0xff]  }
 0x8eb   : > { %v8485_v38 = vpop.f32.mrb[122].mxu1 }
 0x8ec   : > { %v9224_v60 = vrot.slane %v22847_v30, 2  ;;  %v9498_v52 = vshrl.u32 %v22847_v30, 16  ;;  %v9501_v63 = vshll.u32 %v22847_v30, 16  ;;  %v17117_v43 = vpop.f32.mrb[123].mxu1  ;;  %10482 = vmatmul.mubr.bf16.vlgmr.msra.gmra.mrb[200].mxu0 %v22416_v53  ;;  %v9587_v11 = vrot.slane %v22847_v30, 3  ;;  %v19096_v38 = vld [vmem:[%s25495_s4 + $0x118] sm:$0xff]  }
 0x8ed   : > { %10489 = vmatprep.mubr.bf16.mxu0 %v22463_v27  ;;  %10706 = vmatpush1.bf16.msra.mxu0 %v19093_v9  ;;  %v22875_v43 = vor.u32 %v9494_v55, %v9491_v16  ;;  %v19097_v16 = vld [vmem:[%s25495_s4 + $0x120] sm:$0xff]  }
 0x8ee   : > { %10707 = vmatprep.subr.bf16.mxu0 %v25620_v58  ;;  %v9500_v46 = vrot.slane %v9498_v52, 2  ;;  %v9503_v18 = vrot.slane %v9501_v63, 3  ;;  %v22866_v53 = vsel %vm9170_vm9, %v9222_v1, %v9224_v60  ;;  %v22873_v27 = vsel %vm1502_vm1, %v9585_v29, %v9587_v11  ;;  %v19095_v52 = vld [vmem:[%s25495_s4 + $0x110] sm:$0xff]   ;;  %v25642_v55 = vld [vmem:[#allocation15_spill] sm:$0xff] }
 0x8f0   : > { %v22877_v9 = vor.u32 %v9503_v18, %v9500_v46  ;;  %v19114_v46 = vld [vmem:[%s25495_s4 + $0x1a8] sm:$0xff]  }
 0x8f1   : > { %10708 = vmatpush1.bf16.msra.mxu0 %v19094_v3  ;;  %v25643_v3 = vld [vmem:[#allocation14_spill] sm:$0xff]  ;;  %v25644_v18 = vld [vmem:[#allocation17_spill] sm:$0xff] }
 0x8f2   : > { %10709 = vmatprep.subr.bf16.mxu0 %v25620_v58  ;;  %v22886_v63 = vsel %vm9254_vm10, %v22875_v43, %v22877_v9 }
 0x8f4   : > { %10490 = vmatmul.mubr.bf16.gmra.mrb[204].mxu0 %v22444_v54  ;;  %v19098_v54 = vld [vmem:[%s25495_s4 + $0x128] sm:$0xff]  }
 0x8f5   : > { %10497 = vmatprep.mubr.bf16.mxu0 %v22480_v14  ;;  %10710 = vmatpush1.bf16.msra.mxu0 %v19095_v52  ;;  %v19100_v14 = vld [vmem:[%s25495_s4 + $0x138] sm:$0xff]   ;;  %v25645_v52 = vld [vmem:[#allocation16_spill] sm:$0xff] }
 0x8f6   : > { %10711 = vmatprep.subr.bf16.mxu0 %v25620_v58 }
 0x8f9   : > { %10712 = vmatpush1.bf16.msra.mxu0 %v19096_v38  ;;  %v25646_v38 = vld [vmem:[#allocation19_spill] sm:$0xff] }
 0x8fa   : > { %10713 = vmatprep.subr.bf16.mxu0 %v25620_v58 }
 0x8fc   : > { %10498 = vmatmul.mubr.bf16.gmra.mrb[208].mxu0 %v22466_v42  ;;  %v19099_v42 = vld [vmem:[%s25495_s4 + $0x130] sm:$0xff]  }
 0x8fd   : > { %10505 = vmatprep.mubr.bf16.mxu0 %v22495_v36  ;;  %10714 = vmatpush1.bf16.msra.mxu0 %v19097_v16  ;;  %v19102_v36 = vld [vmem:[%s25495_s4 + $0x148] sm:$0xff]   ;;  %v25647_v16 = vld [vmem:[#allocation18_spill] sm:$0xff] }
 0x8fe   : > { %10715 = vmatprep.subr.bf16.mxu0 %v25620_v58 }
 0x901   : > { %10716 = vmatpush1.bf16.msra.mxu0 %v19098_v54  ;;  %v19115_v54 = vld [vmem:[%s25495_s4 + $0x1b0] sm:$0xff]  }
 0x902   : > { %10717 = vmatprep.subr.bf16.mxu0 %v25620_v58 }
 0x904   : > { %10506 = vmatmul.mubr.bf16.gmra.mrb[212].mxu0 %v22483_v62  ;;  %v19101_v62 = vld [vmem:[%s25495_s4 + $0x140] sm:$0xff]  }
 0x905   : > { %10513 = vmatprep.mubr.bf16.mxu0 %v22508_v40  ;;  %10718 = vmatpush1.bf16.msra.mxu0 %v19099_v42  ;;  %v19104_v40 = vld [vmem:[%s25495_s4 + $0x158] sm:$0xff]   ;;  %v25648_v42 = vld [vmem:[#allocation21_spill] sm:$0xff] }
 0x906   : > { %10719 = vmatprep.subr.bf16.mxu0 %v25620_v58 }
 0x909   : > { %10720 = vmatpush1.bf16.msra.mxu0 %v19100_v14  ;;  %v25649_v14 = vld [vmem:[#allocation20_spill] sm:$0xff] }
 0x90a   : > { %10721 = vmatprep.subr.bf16.mxu0 %v25620_v58 }
 0x90c   : > { %10514 = vmatmul.mubr.bf16.gmra.mrb[216].mxu0 %v22498_v12  ;;  %v19103_v12 = vld [vmem:[%s25495_s4 + $0x150] sm:$0xff]  }
 0x90d   : > { %10521 = vmatprep.mubr.bf16.mxu0 %v22524_v34  ;;  %10722 = vmatpush1.bf16.msra.mxu0 %v19101_v62  ;;  %v19106_v34 = vld [vmem:[%s25495_s4 + $0x168] sm:$0xff]   ;;  %v25650_v62 = vld [vmem:[#allocation23_spill] sm:$0xff] }
 0x90e   : > { %10723 = vmatprep.subr.bf16.mxu0 %v25620_v58 }
 0x911   : > { %10724 = vmatpush1.bf16.msra.mxu0 %v19102_v36  ;;  %v25651_v36 = vld [vmem:[#allocation22_spill] sm:$0xff] }
 0x912   : > { %10725 = vmatprep.subr.bf16.mxu0 %v25620_v58 }
 0x914   : > { %10522 = vmatmul.mubr.bf16.gmra.mrb[220].mxu0 %v22511_v10  ;;  %v19105_v10 = vld [vmem:[%s25495_s4 + $0x160] sm:$0xff]  }
 0x915   : > { %10529 = vmatprep.mubr.bf16.mxu0 %v22539_v61  ;;  %10726 = vmatpush1.bf16.msra.mxu0 %v19103_v12  ;;  %v19108_v61 = vld [vmem:[%s25495_s4 + $0x178] sm:$0xff]  }
 0x916   : > { %10727 = vmatprep.subr.bf16.mxu0 %v25620_v58  ;;  %v19116_v12 = vld [vmem:[%s25495_s4 + $0x1b8] sm:$0xff]  }
 0x919   : > { %10728 = vmatpush1.bf16.msra.mxu0 %v19104_v40  ;;  %v25652_v40 = vld [vmem:[#allocation25_spill] sm:$0xff] }
 0x91a   : > { %10729 = vmatprep.subr.bf16.mxu0 %v25620_v58 }
 0x91c   : > { %10530 = vmatmul.mubr.bf16.gmra.mrb[224].mxu0 %v22527_v2  ;;  %v19107_v2 = vld [vmem:[%s25495_s4 + $0x170] sm:$0xff]  }
 0x91d   : > { %10537 = vmatprep.mubr.bf16.mxu0 %v22552_v45  ;;  %10730 = vmatpush1.bf16.msra.mxu0 %v19105_v10  ;;  %v25622_v45 = vld [vmem:[#allocation46_spill] sm:$0xff]  ;;  %v25653_v10 = vld [vmem:[#allocation24_spill] sm:$0xff] }
 0x91e   : > { %10731 = vmatprep.subr.bf16.mxu0 %v25620_v58 }
 0x921   : > { %10732 = vmatpush1.bf16.msra.mxu0 %v19106_v34  ;;  %v25654_v34 = vld [vmem:[#allocation27_spill] sm:$0xff] }
 0x922   : > { %10733 = vmatprep.subr.bf16.mxu0 %v25620_v58 }
 0x924   : > { %10538 = vmatmul.mubr.bf16.gmra.mrb[228].mxu0 %v22542_v17  ;;  %v25621_v17 = vld [vmem:[#allocation49_spill] sm:$0xff] }
 0x925   : > { %10545 = vmatprep.mubr.bf16.mxu0 %v22571_v39  ;;  %10734 = vmatpush1.bf16.msra.mxu0 %v19107_v2  ;;  %v25624_v39 = vld [vmem:[#allocation50_spill] sm:$0xff]  ;;  %v19117_v2 = vld [vmem:[%s25495_s4 + $0x1c0] sm:$0xff]  }
 0x926   : > { %10735 = vmatprep.subr.bf16.mxu0 %v25620_v58 }
 0x929   : > { %10736 = vmatpush1.bf16.msra.mxu0 %v19108_v61  ;;  %v25655_v61 = vld [vmem:[#allocation26_spill] sm:$0xff] }
 0x92a   : > { %10961 = vmatprep.subr.bf16.mxu0 %v25620_v58 }
 0x92c   : > { %10546 = vmatmul.mubr.bf16.gmra.mrb[232].mxu0 %v22555_v23  ;;  %v25623_v23 = vld [vmem:[#allocation53_spill] sm:$0xff] }
 0x92d   : > { %10553 = vmatprep.mubr.bf16.mxu0 %v22591_v47  ;;  %v25626_v47 = vld [vmem:[#allocation54_spill] sm:$0xff] }
 0x934   : > { %10554 = vmatmul.mubr.bf16.gmra.mrb[236].mxu0 %v22574_v26  ;;  %v25625_v26 = vld [vmem:[#allocation57_spill] sm:$0xff] }
 0x935   : > { %10561 = vmatprep.mubr.bf16.mxu0 %v22611_v15  ;;  %v25628_v15 = vld [vmem:[#allocation58_spill] sm:$0xff] }
 0x93c   : > { %10562 = vmatmul.mubr.bf16.gmra.mrb[240].mxu0 %v22594_v4  ;;  %v25627_v4 = vld [vmem:[#allocation61_spill] sm:$0xff] }
 0x93d   : > { %10569 = vmatprep.mubr.bf16.mxu0 %v22631_v41  ;;  %v25630_v41 = vld [vmem:[#allocation62_spill] sm:$0xff] }
 0x944   : > { %10570 = vmatmul.mubr.bf16.gmra.mrb[244].mxu0 %v22614_v19  ;;  %v25629_v19 = vld [vmem:[#allocation65_spill] sm:$0xff] }
 0x945   : > { %10577 = vmatprep.mubr.bf16.mxu0 %v22644_v49  ;;  %v25632_v49 = vld [vmem:[#allocation69_spill] sm:$0xff] }
 0x94c   : > { %10578 = vmatmul.mubr.bf16.gmra.mrb[248].mxu0 %v22634_v28  ;;  %v25631_v28 = vld [vmem:[#allocation66_spill] sm:$0xff] }
 0x94d   : > { %10585 = vmatprep.mubr.bf16.mxu0 %v22656_v21 }
 0x954   : > { %10586 = vmatmul.mubr.bf16.gmra.mrb[252].mxu0 %v22647_v32 }
 0x955   : > { %10593 = vmatprep.mubr.bf16.mxu0 %v22668_v20 }
 0x95c   : > { %10594 = vmatmul.mubr.bf16.gmra.mrb[0].mxu0 %v22659_v25 }
 0x95d   : > { %10601 = vmatprep.mubr.bf16.mxu0 %v22680_v7  ;;  %v25634_v7 = vrot.slane %v22796_v13, 1  ;;  %v19111_v13 = vld [vmem:[%s25495_s4 + $0x190] sm:$0xff]  }
 0x964   : > { %10602 = vmatmul.mubr.bf16.gmra.mrb[4].mxu0 %v22671_v50  ;;  %v25633_v50 = vrot.slane %v22819_v0, 3  ;;  %v19112_v0 = vld [vmem:[%s25495_s4 + $0x198] sm:$0xff]  }
 0x965   : > { %10609 = vmatprep.mubr.bf16.mxu0 %v22692_v5  ;;  %v25636_v5 = vld [vmem:[#allocation8_spill] sm:$0xff] }
 0x96c   : > { %10610 = vmatmul.mubr.bf16.gmra.mrb[8].mxu0 %v22683_v31  ;;  %v25635_v31 = vld [vmem:[#allocation9_spill] sm:$0xff] }
 0x96d   : > { %10617 = vmatprep.mubr.bf16.mxu0 %v22704_v59  ;;  %v19109_v59 = vld [vmem:[%s25495_s4 + $0x180] sm:$0xff]  }
 0x974   : > { %10618 = vmatmul.mubr.bf16.gmra.mrb[12].mxu0 %v22695_v22  ;;  %v25637_v22 = vpack.c.bf16 %v25635_v31, %v25636_v5  ;;  %v25666_v31 = vld [vmem:[#allocation39_spill] sm:$0xff]  ;;  %v25667_v5 = vld [vmem:[#allocation38_spill] sm:$0xff] }
 0x975   : > { %10625 = vmatprep.mubr.bf16.mxu0 %v22716_v6  ;;  %v25639_v6 = vld [vmem:[#allocation10_spill] sm:$0xff] }
 0x97c   : > { %10626 = vmatmul.mubr.bf16.gmra.mrb[16].mxu0 %v22707_v33  ;;  %v25638_v33 = vld [vmem:[#allocation11_spill] sm:$0xff] }
 0x97d   : > { %10633 = vmatprep.mubr.bf16.mxu0 %v25621_v17  ;;  %v19118_v17 = vld [vmem:[%s25495_s4 + $0x1c8] sm:$0xff]  }
 0x984   : > { %10634 = vmatmul.mubr.bf16.gmra.mrb[20].mxu0 %v25622_v45  ;;  %v25656_v45 = vld [vmem:[#allocation29_spill] sm:$0xff] }
 0x985   : > { %10641 = vmatprep.mubr.bf16.mxu0 %v25623_v23  ;;  %v19119_v23 = vld [vmem:[%s25495_s4 + $0x1d0] sm:$0xff]  }
 0x98c   : > { %10642 = vmatmul.mubr.bf16.gmra.mrb[24].mxu0 %v25624_v39  ;;  %v25657_v39 = vld [vmem:[#allocation28_spill] sm:$0xff] }
 0x98d   : > { %10649 = vmatprep.mubr.bf16.mxu0 %v25625_v26  ;;  %v19120_v26 = vld [vmem:[%s25495_s4 + $0x1d8] sm:$0xff]  }
 0x994   : > { %10650 = vmatmul.mubr.bf16.gmra.mrb[28].mxu0 %v25626_v47  ;;  %v25658_v47 = vld [vmem:[#allocation31_spill] sm:$0xff] }
 0x995   : > { %10657 = vmatprep.mubr.bf16.mxu0 %v25627_v4  ;;  %v19121_v4 = vld [vmem:[%s25495_s4 + $0x1e0] sm:$0xff]  }
 0x99c   : > { %10658 = vmatmul.mubr.bf16.gmra.mrb[32].mxu0 %v25628_v15  ;;  %v25659_v15 = vld [vmem:[#allocation30_spill] sm:$0xff] }
 0x99d   : > { %10665 = vmatprep.mubr.bf16.mxu0 %v25629_v19  ;;  %v19122_v19 = vld [vmem:[%s25495_s4 + $0x1e8] sm:$0xff]  }
 0x9a4   : > { %10666 = vmatmul.mubr.bf16.gmra.mrb[36].mxu0 %v25630_v41  ;;  %v25660_v41 = vld [vmem:[#allocation33_spill] sm:$0xff] }
 0x9a5   : > { %10673 = vmatprep.mubr.bf16.mxu0 %v22788_v37  ;;  %v19110_v37 = vld [vmem:[%s25495_s4 + $0x188] sm:$0xff]  }
 0x9ac   : > { %10674 = vmatmul.mubr.bf16.gmra.mrb[40].mxu0 %v25631_v28  ;;  %v19123_v28 = vld [vmem:[%s25495_s4 + $0x1f0] sm:$0xff]  }
 0x9ad   : > { %10681 = vmatprep.mubr.bf16.mxu0 %v22806_v44  ;;  %v25640_v44 = vld [vmem:[#allocation13_spill] sm:$0xff] }
 0x9b4   : > { %10682 = vmatmul.mubr.bf16.gmra.mrb[44].mxu0 %v25632_v49  ;;  %v25661_v49 = vld [vmem:[#allocation32_spill] sm:$0xff] }
 0x9b5   : > { %10689 = vmatprep.mubr.bf16.mxu0 %v22830_v57  ;;  %v19113_v57 = vld [vmem:[%s25495_s4 + $0x1a0] sm:$0xff]  }
 0x9b7   : > { %v22991_v32 = vpop.f32.mrb[52].mxu0 }
 0x9b8   : > { %v10445_v21 = vpop.f32.mrb[53].mxu0 }
 0x9b9   : > { %v10446_v25 = vpop.f32.mrb[54].mxu0  ;;  %v19124_v21 = vld [vmem:[%s25495_s4 + $0x1f8] sm:$0xff]  }
 0x9ba   : > { %v10447_v20 = vpop.f32.mrb[55].mxu0  ;;  %v25662_v25 = vld [vmem:[#allocation35_spill] sm:$0xff] }
 0x9bb   : > { %v25663_v20 = vld [vmem:[#allocation34_spill] sm:$0xff] }
 0x9bc   : > { %10690 = vmatmul.mubr.bf16.gmra.mrb[48].mxu0 %v22811_v8  ;;  %v25641_v8 = vld [vmem:[#allocation12_spill] sm:$0xff] }
 0x9bd   : > { %10697 = vmatprep.mubr.bf16.mxu0 %v25633_v50  ;;  %v25664_v50 = vld [vmem:[#allocation37_spill] sm:$0xff] }
 0x9c4   : > { %10698 = vmatmul.mubr.bf16.gmra.mrb[56].mxu0 %v25634_v7  ;;  %v25665_v7 = vld [vmem:[#allocation36_spill] sm:$0xff] }
 0x9c5   : > { %10737 = vmatprep.mubr.bf16.mxu0 %v25637_v22  ;;  %v25668_v22 = vld [vmem:[#allocation41_spill] sm:$0xff] }
 0x9cc   : > { %10738 = vmatmul.mubr.bf16.vlgmr.msra.gmra.mrb[200].mxu0 %v25638_v33  ;;  %v25670_v33 = vld [vmem:[#allocation43_spill] sm:$0xff] }
 0x9cd   : > { %10745 = vmatprep.mubr.bf16.mxu0 %v25639_v6  ;;  %10962 = vmatpush1.bf16.msra.mxu0 %v19109_v59  ;;  %v25669_v59 = vld [vmem:[#allocation40_spill] sm:$0xff] }
 0x9ce   : > { %10963 = vmatprep.subr.bf16.mxu0 %v25620_v58 }
 0x9d1   : > { %10964 = vmatpush1.bf16.msra.mxu0 %v19110_v37  ;;  %v25671_v37 = vld [vmem:[#allocation42_spill] sm:$0xff] }
 0x9d2   : > { %10965 = vmatprep.subr.bf16.mxu0 %v25620_v58 }
 0x9d4   : > { %10746 = vmatmul.mubr.bf16.gmra.mrb[204].mxu0 %v25640_v44  ;;  %v25673_v44 = vld [vmem:[#allocation44_spill] sm:$0xff] }
 0x9d5   : > { %10753 = vmatprep.mubr.bf16.mxu0 %v25641_v8  ;;  %10966 = vmatpush1.bf16.msra.mxu0 %v19111_v13  ;;  %v25672_v13 = vld [vmem:[#allocation45_spill] sm:$0xff] }
 0x9d6   : > { %10967 = vmatprep.subr.bf16.mxu0 %v25620_v58 }
 0x9d9   : > { %10968 = vmatpush1.bf16.msra.mxu0 %v19112_v0  ;;  %v25674_v0 = vld [vmem:[#allocation48_spill] sm:$0xff] }
 0x9da   : > { %10969 = vmatprep.subr.bf16.mxu0 %v25620_v58 }
 0x9dc   : > { %10754 = vmatmul.mubr.bf16.gmra.mrb[208].mxu0 %v25642_v55  ;;  %v25676_v55 = vld [vmem:[#allocation52_spill] sm:$0xff] }
 0x9dd   : > { %10761 = vmatprep.mubr.bf16.mxu0 %v25643_v3  ;;  %10970 = vmatpush1.bf16.msra.mxu0 %v19113_v57  ;;  %v25675_v57 = vld [vmem:[#allocation47_spill] sm:$0xff] }
 0x9de   : > { %10971 = vmatprep.subr.bf16.mxu0 %v25620_v58 }
 0x9e1   : > { %10972 = vmatpush1.bf16.msra.mxu0 %v19114_v46  ;;  %v25677_v46 = vld [vmem:[#allocation51_spill] sm:$0xff] }
 0x9e2   : > { %10973 = vmatprep.subr.bf16.mxu0 %v25620_v58 }
 0x9e4   : > { %10762 = vmatmul.mubr.bf16.gmra.mrb[212].mxu0 %v25644_v18  ;;  %v25678_v18 = vld [vmem:[#allocation56_spill] sm:$0xff] }
 0x9e5   : > { %10769 = vmatprep.mubr.bf16.mxu0 %v25645_v52  ;;  %10974 = vmatpush1.bf16.msra.mxu0 %v19115_v54  ;;  %v25680_v54 = vld [vmem:[#allocation60_spill] sm:$0xff] }
 0x9e6   : > { %10975 = vmatprep.subr.bf16.mxu0 %v25620_v58 }
 0x9e9   : > { %10976 = vmatpush1.bf16.msra.mxu0 %v19116_v12  ;;  %v19125_v12 = vld [vmem:[%s25495_s4 + $0x200] sm:$0xff]  }
 0x9ea   : > { %10977 = vmatprep.subr.bf16.mxu0 %v25620_v58 }
 0x9ec   : > { %10770 = vmatmul.mubr.bf16.gmra.mrb[216].mxu0 %v25646_v38  ;;  %v25679_v38 = vld [vmem:[#allocation55_spill] sm:$0xff] }
 0x9ed   : > { %10777 = vmatprep.mubr.bf16.mxu0 %v25647_v16  ;;  %10978 = vmatpush1.bf16.msra.mxu0 %v19117_v2  ;;  %v25685_v2 = vld [vmem:[#allocation67_spill] sm:$0xff] }
 0x9ee   : > { %10979 = vmatprep.subr.bf16.mxu0 %v25620_v58 }
 0x9f1   : > { %10980 = vmatpush1.bf16.msra.mxu0 %v19118_v17  ;;  %v25686_v17 = vld [vmem:[#allocation71_spill] sm:$0xff] }
 0x9f2   : > { %10981 = vmatprep.subr.bf16.mxu0 %v25620_v58 }
 0x9f4   : > { %10778 = vmatmul.mubr.bf16.gmra.mrb[220].mxu0 %v25648_v42  ;;  %v25681_v42 = vld [vmem:[#allocation59_spill] sm:$0xff] }
 0x9f5   : > { %10785 = vmatprep.mubr.bf16.mxu0 %v25649_v14  ;;  %10982 = vmatpush1.bf16.msra.mxu0 %v19119_v23 }
 0x9f6   : > { %10983 = vmatprep.subr.bf16.mxu0 %v25620_v58 }
 0x9f9   : > { %10984 = vmatpush1.bf16.msra.mxu0 %v19120_v26 }
 0x9fa   : > { %10985 = vmatprep.subr.bf16.mxu0 %v25620_v58 }
 0x9fc   : > { %10786 = vmatmul.mubr.bf16.gmra.mrb[224].mxu0 %v25650_v62  ;;  %v25682_v62 = vld [vmem:[#allocation64_spill] sm:$0xff] }
 0x9fd   : > { %10793 = vmatprep.mubr.bf16.mxu0 %v25651_v36  ;;  %10986 = vmatpush1.bf16.msra.mxu0 %v19121_v4  ;;  %v9264_v4 = vshrl.u32 %v25641_v8, 16 }
 0x9fe   : > { %10987 = vmatprep.subr.bf16.mxu0 %v25620_v58 }
 0xa01   : > { %10988 = vmatpush1.bf16.msra.mxu0 %v19122_v19  ;;  %v9267_v19 = vshll.u32 %v25641_v8, 16 }
 0xa02   : > { %10989 = vmatprep.subr.bf16.mxu0 %v25620_v58 }
 0xa04   : > { %10794 = vmatmul.mubr.bf16.gmra.mrb[228].mxu0 %v25652_v40  ;;  %v25683_v40 = vld [vmem:[#allocation63_spill] sm:$0xff] }
 0xa05   : > { %10801 = vmatprep.mubr.bf16.mxu0 %v25653_v10  ;;  %10990 = vmatpush1.bf16.msra.mxu0 %v19123_v28 }
 0xa06   : > { %10991 = vmatprep.subr.bf16.mxu0 %v25620_v58 }
 0xa09   : > { %10992 = vmatpush1.bf16.msra.mxu0 %v19124_v21  ;;  %v9256_v21 = vshrl.u32 %v25639_v6, 16 }
 0xa0a   : > { %17118 = vmatprep.subr.bf16.mxu0 %v19125_v12 }
 0xa0c   : > { %10802 = vmatmul.mubr.bf16.gmra.mrb[232].mxu0 %v25654_v34  ;;  %v25684_v34 = vld [vmem:[#allocation68_spill] sm:$0xff] }
 0xa0d   : > { %10809 = vmatprep.mubr.bf16.mxu0 %v25655_v61 }
 0xa14   : > { %10810 = vmatmul.mubr.bf16.gmra.mrb[236].mxu0 %v25656_v45  ;;  %v25687_v45 = vld [vmem:[#allocation70_spill] sm:$0xff] }
 0xa15   : > { %10817 = vmatprep.mubr.bf16.mxu0 %v25657_v39 }
 0xa1c   : > { %10818 = vmatmul.mubr.bf16.gmra.mrb[240].mxu0 %v25658_v47 }
 0xa1d   : > { %10825 = vmatprep.mubr.bf16.mxu0 %v25659_v15 }
 0xa24   : > { %10826 = vmatmul.mubr.bf16.gmra.mrb[244].mxu0 %v25660_v41 }
 0xa25   : > { %10833 = vmatprep.mubr.bf16.mxu0 %v25661_v49 }
 0xa2c   : > { %10834 = vmatmul.mubr.bf16.gmra.mrb[248].mxu0 %v25662_v25  ;;  %v9259_v25 = vshll.u32 %v25639_v6, 16 }
 0xa2d   : > { %10841 = vmatprep.mubr.bf16.mxu0 %v25663_v20 }
 0xa34   : > { %10842 = vmatmul.mubr.bf16.gmra.mrb[252].mxu0 %v25664_v50  ;;  %v9266_v50 = vrot.slane %v9264_v4, 2  ;;  %v19126_v4 = vld [vmem:[%s25495_s4 + $0x208] sm:$0xff]  }
 0xa35   : > { %10849 = vmatprep.mubr.bf16.mxu0 %v25665_v7 }
 0xa3c   : > { %10850 = vmatmul.mubr.bf16.gmra.mrb[0].mxu0 %v25666_v31  ;;  %v9269_v31 = vrot.slane %v9267_v19, 3 }
 0xa3d   : > { %10857 = vmatprep.mubr.bf16.mxu0 %v25667_v5 }
 0xa44   : > { %10858 = vmatmul.mubr.bf16.gmra.mrb[4].mxu0 %v25668_v22  ;;  %v9261_v22 = vrot.slane %v9259_v25, 3  ;;  %v9174_v25 = vrot.slane %v25643_v3, 2 }
 0xa45   : > { %10865 = vmatprep.mubr.bf16.mxu0 %v25669_v59 }
 0xa4c   : > { %10866 = vmatmul.mubr.bf16.gmra.mrb[8].mxu0 %v25670_v33  ;;  %v9270_v33 = vor.u32 %v9269_v31, %v9266_v50  ;;  %v9291_v50 = vshrl.u32 %v25647_v16, 16  ;;  %v9294_v31 = vshll.u32 %v25647_v16, 16 }
 0xa4d   : > { %10873 = vmatprep.mubr.bf16.mxu0 %v25671_v37 }
 0xa54   : > { %10874 = vmatmul.mubr.bf16.gmra.mrb[12].mxu0 %v25672_v13  ;;  %v9273_v13 = vshrl.u32 %v25643_v3, 16 }
 0xa55   : > { %10881 = vmatprep.mubr.bf16.mxu0 %v25673_v44 }
 0xa5c   : > { %10882 = vmatmul.mubr.bf16.gmra.mrb[16].mxu0 %v25674_v0  ;;  %v9276_v0 = vshll.u32 %v25643_v3, 16 }
 0xa5d   : > { %10889 = vmatprep.mubr.bf16.mxu0 %v25675_v57 }
 0xa64   : > { %10890 = vmatmul.mubr.bf16.gmra.mrb[20].mxu0 %v25676_v55 }
 0xa65   : > { %10897 = vmatprep.mubr.bf16.mxu0 %v25677_v46 }
 0xa6c   : > { %10898 = vmatmul.mubr.bf16.gmra.mrb[24].mxu0 %v25678_v18  ;;  %v25688_v18 = vld [vmem:[#allocation72_spill] sm:$0xff] }
 0xa6d   : > { %10905 = vmatprep.mubr.bf16.mxu0 %v25679_v38 }
 0xa74   : > { %10906 = vmatmul.mubr.bf16.gmra.mrb[28].mxu0 %v25680_v54 }
 0xa75   : > { %10913 = vmatprep.mubr.bf16.mxu0 %v25681_v42 }
 0xa7c   : > { %10914 = vmatmul.mubr.bf16.gmra.mrb[32].mxu0 %v25682_v62  ;;  %v9275_v62 = vrot.slane %v9273_v13, 2  ;;  %v9293_v13 = vrot.slane %v9291_v50, 2  ;;  %v9318_v50 = vshrl.u32 %v25653_v10, 16 }
 0xa7d   : > { %10921 = vmatprep.mubr.bf16.mxu0 %v25683_v40 }
 0xa84   : > { %10922 = vmatmul.mubr.bf16.gmra.mrb[36].mxu0 %v25684_v34  ;;  %v9278_v34 = vrot.slane %v9276_v0, 3  ;;  %v9176_v0 = vrot.slane %v25645_v52, 2 }
 0xa85   : > { %10929 = vmatprep.mubr.bf16.mxu0 %v25685_v2 }
 0xa8c   : > { %10930 = vmatmul.mubr.bf16.gmra.mrb[40].mxu0 %v25686_v17  ;;  %v9282_v17 = vshrl.u32 %v25645_v52, 16 }
 0xa8d   : > { %10937 = vmatprep.mubr.bf16.mxu0 %v25687_v45 }
 0xa94   : > { %10938 = vmatmul.mubr.bf16.gmra.mrb[44].mxu0 %v22822_v24  ;;  %v8545_v24 = vpack.c.bf16 %v22816_v51, %v22816_v51  ;;  %v9172_v51 = vrot.slane %v25641_v8, 2 }
 0xa95   : > { %10945 = vmatprep.mubr.bf16.mxu0 %v22813_v56 }
 0xa97   : > { %v10699_v23 = vpop.f32.mrb[56].mxu0 }
 0xa98   : > { %v23120_v26 = vadd.f32 %v10699_v23, %v22991_v32  ;;  %v10701_v47 = vpop.f32.mrb[57].mxu0  ;;  %v9258_v32 = vrot.slane %v9256_v21, 2  ;;  %v9285_v23 = vshll.u32 %v25645_v52, 16 }
 0xa99   : > { %v10702_v41 = vpop.f32.mrb[58].mxu0  ;;  %v9171_v47 = vrot.slane %v25639_v6, 2 }
 0xa9a   : > { %v10703_v28 = vpop.f32.mrb[59].mxu0  ;;  %v9262_v55 = vor.u32 %v9261_v22, %v9258_v32  ;;  %v9287_v21 = vrot.slane %v9285_v23, 3  ;;  %v9175_v32 = vsel %vm9170_vm9, %v9172_v51, %v9174_v25 }
 0xa9b   : > { %v9173_v19 = vsel %vm9170_vm9, %v9171_v47, %v9172_v51  ;;  %v9284_v28 = vrot.slane %v9282_v17, 2  ;;  %v9178_v17 = vrot.slane %v25647_v16, 2  ;;  %v9309_v47 = vshrl.u32 %v25651_v36, 16 }
 0xa9c   : > { %10946 = vmatmul.mubr.bf16.gmra.mrb[48].mxu0 %v22840_v48  ;;  %v9271_v54 = vsel %vm9254_vm10, %v9262_v55, %v9270_v33  ;;  %v9279_v48 = vor.u32 %v9278_v34, %v9275_v62  ;;  %v9177_v62 = vsel %vm9170_vm9, %v9174_v25, %v9176_v0  ;;  %v9180_v25 = vrot.slane %v25649_v14, 2 }
 0xa9d   : > { %10953 = vmatprep.mubr.bf16.mxu0 %v8545_v24  ;;  %v9288_v24 = vor.u32 %v9287_v21, %v9284_v28  ;;  %v9311_v28 = vrot.slane %v9309_v47, 2  ;;  %v9336_v47 = vshrl.u32 %v25657_v39, 16 }
 0xa9e   : > { %v9280_v41 = vsel %vm9254_vm10, %v9270_v33, %v9279_v48  ;;  %v9296_v33 = vrot.slane %v9294_v31, 3  ;;  %v9321_v31 = vshll.u32 %v25653_v10, 16 }
 0xa9f   : > { %v9289_v22 = vsel %vm9254_vm10, %v9279_v48, %v9288_v24 }
 0xaa0   : > { %v9297_v55 = vor.u32 %v9296_v33, %v9293_v13  ;;  %v9320_v13 = vrot.slane %v9318_v50, 2  ;;  %v9323_v33 = vrot.slane %v9321_v31, 3  ;;  %v9345_v50 = vshrl.u32 %v25659_v15, 16 }
 0xaa1   : > { %v9348_v31 = vshll.u32 %v25659_v15, 16 }
 0xaa2   : > { %v9298_v34 = vsel %vm9254_vm10, %v9288_v24, %v9297_v55 }
 0xaa4   : > { %10954 = vmatmul.mubr.bf16.gmra.mrb[60].mxu0 %v25688_v18  ;;  %v9300_v18 = vshrl.u32 %v25649_v14, 16 }
 0xaa5   : > { %10993 = vmatprep.mubr.bf16.mxu0 %v9271_v54  ;;  %v9303_v54 = vshll.u32 %v25649_v14, 16 }
 0xaa6   : > { %v9302_v51 = vrot.slane %v9300_v18, 2  ;;  %v9327_v18 = vshrl.u32 %v25655_v61, 16 }
 0xaa7   : > { %v9305_v48 = vrot.slane %v9303_v54, 3  ;;  %v9330_v54 = vshll.u32 %v25655_v61, 16 }
 0xaa9   : > { %v9306_v23 = vor.u32 %v9305_v48, %v9302_v51  ;;  %v9329_v51 = vrot.slane %v9327_v18, 2  ;;  %v9332_v48 = vrot.slane %v9330_v54, 3  ;;  %v9357_v18 = vshll.u32 %v25661_v49, 16 }
 0xaac   : > { %10994 = vmatmul.mubr.bf16.vlgmr.msra.gmra.mrb[200].mxu0 %v9173_v19  ;;  %v9179_v19 = vsel %vm9170_vm9, %v9176_v0, %v9178_v17  ;;  %v9182_v0 = vrot.slane %v25651_v36, 2 }
 0xaad   : > { %11001 = vmatprep.mubr.bf16.mxu0 %v9280_v41  ;;  %17119 = vmatpush3.bf16.msra.mxu0 %v19125_v12  ;;  %v19127_v12 = vld [vmem:[%s25495_s4 + $0x210] sm:$0xff]   ;;  %v9307_v41 = vsel %vm9254_vm10, %v9297_v55, %v9306_v23  ;;  %v9324_v55 = vor.u32 %v9323_v33, %v9320_v13  ;;  %v9347_v13 = vrot.slane %v9345_v50, 2  ;;  %v9350_v33 = vrot.slane %v9348_v31, 3 }
 0xaae   : > { %17120 = vmatprep.subr.bf16.mxu0 %v19126_v4  ;;  %v9372_v50 = vshrl.u32 %v25665_v7, 16  ;;  %v9375_v31 = vshll.u32 %v25665_v7, 16 }
 0xab1   : > { %17121 = vmatpush3.bf16.msra.mxu0 %v19126_v4  ;;  %v9312_v4 = vshll.u32 %v25651_v36, 16 }
 0xab2   : > { %17122 = vmatprep.subr.bf16.mxu0 %v19127_v12 }
 0xab3   : > { %v9314_v21 = vrot.slane %v9312_v4, 3  ;;  %v9339_v4 = vshll.u32 %v25657_v39, 16 }
 0xab4   : > { %11002 = vmatmul.mubr.bf16.gmra.mrb[204].mxu0 %v9175_v32  ;;  %v9181_v32 = vsel %vm9170_vm9, %v9178_v17, %v9180_v25  ;;  %v9184_v17 = vrot.slane %v25653_v10, 2 }
 0xab5   : > { %11009 = vmatprep.mubr.bf16.mxu0 %v9289_v22  ;;  %17123 = vmatpush3.bf16.msra.mxu0 %v19127_v12  ;;  %v9315_v24 = vor.u32 %v9314_v21, %v9311_v28  ;;  %v19128_v12 = vld [vmem:[%s25495_s4 + $0x218] sm:$0xff]   ;;  %v9338_v28 = vrot.slane %v9336_v47, 2  ;;  %v9341_v21 = vrot.slane %v9339_v4, 3  ;;  %v9363_v47 = vshrl.u32 %v25663_v20, 16 }
 0xab6   : > { %17124 = vmatprep.subr.bf16.mxu0 %v19128_v12  ;;  %v9366_v4 = vshll.u32 %v25663_v20, 16 }
 0xab7   : > { %v9316_v22 = vsel %vm9254_vm10, %v9306_v23, %v9315_v24  ;;  %v9333_v23 = vor.u32 %v9332_v48, %v9329_v51  ;;  %v9359_v51 = vrot.slane %v9357_v18, 3  ;;  %v19129_v48 = vld [vmem:[%s25495_s4 + $0x220] sm:$0xff]   ;;  %v9381_v18 = vshrl.u32 %v25667_v5, 16 }
 0xab9   : > { %17125 = vmatpush3.bf16.msra.mxu0 %v19128_v12  ;;  %v9188_v12 = vrot.slane %v25657_v39, 2 }
 0xaba   : > { %17126 = vmatprep.subr.bf16.mxu0 %v19129_v48 }
 0xabc   : > { %11010 = vmatmul.mubr.bf16.gmra.mrb[208].mxu0 %v9177_v62  ;;  %v9183_v62 = vsel %vm9170_vm9, %v9180_v25, %v9182_v0  ;;  %v9186_v25 = vrot.slane %v25655_v61, 2 }
 0xabd   : > { %11017 = vmatprep.mubr.bf16.mxu0 %v9298_v34  ;;  %v9325_v34 = vsel %vm9254_vm10, %v9315_v24, %v9324_v55  ;;  %v9342_v24 = vor.u32 %v9341_v21, %v9338_v28  ;;  %17127 = vmatpush3.bf16.msra.mxu0 %v19129_v48  ;;  %v9365_v28 = vrot.slane %v9363_v47, 2  ;;  %v9368_v21 = vrot.slane %v9366_v4, 3  ;;  %v19132_v47 = vld [vmem:[%s25495_s4 + $0x238] sm:$0xff]  }
 0xabe   : > { %v9189_v54 = vsel %vm9170_vm9, %v9186_v25, %v9188_v12  ;;  %v9383_v48 = vrot.slane %v9381_v18, 2 }
 0xac4   : > { %11018 = vmatmul.mubr.bf16.gmra.mrb[212].mxu0 %v9179_v19  ;;  %v9185_v19 = vsel %vm9170_vm9, %v9182_v0, %v9184_v17  ;;  %v9351_v0 = vor.u32 %v9350_v33, %v9347_v13  ;;  %v9374_v13 = vrot.slane %v9372_v50, 2  ;;  %v9377_v33 = vrot.slane %v9375_v31, 3 }
 0xac5   : > { %11025 = vmatprep.mubr.bf16.mxu0 %v9307_v41  ;;  %v9334_v41 = vsel %vm9254_vm10, %v9324_v55, %v9333_v23  ;;  %v9354_v55 = vshrl.u32 %v25661_v49, 16  ;;  %v9198_v50 = vrot.slane %v25667_v5, 2 }
 0xacc   : > { %11026 = vmatmul.mubr.bf16.gmra.mrb[216].mxu0 %v9181_v32  ;;  %v9187_v32 = vsel %vm9170_vm9, %v9184_v17, %v9186_v25  ;;  %v9190_v17 = vrot.slane %v25659_v15, 2  ;;  %v9192_v25 = vrot.slane %v25661_v49, 2 }
 0xacd   : > { %11033 = vmatprep.mubr.bf16.mxu0 %v9316_v22  ;;  %v9343_v22 = vsel %vm9254_vm10, %v9333_v23, %v9342_v24 }
 0xad4   : > { %11034 = vmatmul.mubr.bf16.gmra.mrb[220].mxu0 %v9183_v62  ;;  %v9352_v62 = vsel %vm9254_vm10, %v9342_v24, %v9351_v0  ;;  %v9369_v24 = vor.u32 %v9368_v21, %v9365_v28 }
 0xad5   : > { %11041 = vmatprep.mubr.bf16.mxu0 %v9325_v34  ;;  %v9356_v34 = vrot.slane %v9354_v55, 2  ;;  %v9378_v55 = vor.u32 %v9377_v33, %v9374_v13 }
 0xad7   : > { %v9360_v23 = vor.u32 %v9359_v51, %v9356_v34  ;;  %v19131_v34 = vld [vmem:[%s25495_s4 + $0x230] sm:$0xff]   ;;  %v9379_v51 = vsel %vm9254_vm10, %v9369_v24, %v9378_v55 }
 0xadc   : > { %11042 = vmatmul.mubr.bf16.gmra.mrb[224].mxu0 %v9185_v19  ;;  %v9191_v19 = vsel %vm9170_vm9, %v9188_v12, %v9190_v17  ;;  %v9194_v12 = vrot.slane %v25663_v20, 2 }
 0xadd   : > { %11049 = vmatprep.mubr.bf16.mxu0 %v9334_v41  ;;  %v9361_v41 = vsel %vm9254_vm10, %v9351_v0, %v9360_v23  ;;  %v19130_v0 = vld [vmem:[%s25495_s4 + $0x228] sm:$0xff]  }
 0xade   : > { %17128 = vmatprep.subr.bf16.mxu0 %v19130_v0 }
 0xadf   : > { %17129 = vmatpush3.bf16.msra.mxu0 %v19130_v0 }
 0xae0   : > { %17130 = vmatprep.subr.bf16.mxu0 %v19131_v34 }
 0xae3   : > { %17131 = vmatpush3.bf16.msra.mxu0 %v19131_v34 }
 0xae4   : > { %11050 = vmatmul.mubr.bf16.gmra.mrb[228].mxu0 %v9187_v32  ;;  %v9193_v32 = vsel %vm9170_vm9, %v9190_v17, %v9192_v25  ;;  %17132 = vmatprep.subr.bf16.mxu0 %v19132_v47 }
 0xae5   : > { %11057 = vmatprep.mubr.bf16.mxu0 %v9343_v22  ;;  %v9370_v22 = vsel %vm9254_vm10, %v9360_v23, %v9369_v24  ;;  %v9196_v23 = vrot.slane %v25665_v7, 2 }
 0xae7   : > { %17133 = vmatpush3.bf16.msra.mxu0 %v19132_v47  ;;  %v9197_v28 = vsel %vm9170_vm9, %v9194_v12, %v9196_v23  ;;  %v9199_v13 = vsel %vm9170_vm9, %v9196_v23, %v9198_v50  ;;  %v9202_v23 = vrot.slane %v25671_v37, 2 }
 0xaec   : > { %11058 = vmatmul.mubr.bf16.gmra.mrb[232].mxu0 %v9189_v54  ;;  %v9384_v54 = vshll.u32 %v25667_v5, 16 }
 0xaed   : > { %11065 = vmatprep.mubr.bf16.mxu0 %v9352_v62  ;;  %v9195_v62 = vsel %vm9170_vm9, %v9192_v25, %v9194_v12 }
 0xaee   : > { %v9386_v17 = vrot.slane %v9384_v54, 3  ;;  %v9408_v54 = vshrl.u32 %v25673_v44, 16 }
 0xaf0   : > { %v9387_v4 = vor.u32 %v9386_v17, %v9383_v48  ;;  %v9410_v48 = vrot.slane %v9408_v54, 2  ;;  %v9438_v54 = vshll.u32 %v25679_v38, 16 }
 0xaf2   : > { %v9388_v21 = vsel %vm9254_vm10, %v9378_v55, %v9387_v4  ;;  %v9200_v55 = vrot.slane %v25669_v59, 2 }
 0xaf4   : > { %11066 = vmatmul.mubr.bf16.gmra.mrb[236].mxu0 %v9191_v19  ;;  %v9390_v19 = vshrl.u32 %v25669_v59, 16  ;;  %v9201_v34 = vsel %vm9170_vm9, %v9198_v50, %v9200_v55 }
 0xaf5   : > { %11073 = vmatprep.mubr.bf16.mxu0 %v9361_v41  ;;  %v9393_v41 = vshll.u32 %v25669_v59, 16 }
 0xaf6   : > { %v9392_v25 = vrot.slane %v9390_v19, 2  ;;  %v9420_v19 = vshll.u32 %v25675_v57, 16 }
 0xaf7   : > { %v9395_v24 = vrot.slane %v9393_v41, 3  ;;  %v9203_v41 = vsel %vm9170_vm9, %v9200_v55, %v9202_v23 }
 0xaf9   : > { %v9396_v31 = vor.u32 %v9395_v24, %v9392_v25  ;;  %v9422_v25 = vrot.slane %v9420_v19, 3  ;;  %v9204_v24 = vrot.slane %v25673_v44, 2 }
 0xafb   : > { %v9397_v33 = vsel %vm9254_vm10, %v9387_v4, %v9396_v31  ;;  %v9417_v4 = vshrl.u32 %v25675_v57, 16 }
 0xafc   : > { %11074 = vmatmul.mubr.bf16.gmra.mrb[240].mxu0 %v9193_v32  ;;  %v9399_v32 = vshrl.u32 %v25671_v37, 16 }
 0xafd   : > { %11081 = vmatprep.mubr.bf16.mxu0 %v9370_v22  ;;  %v9402_v22 = vshll.u32 %v25671_v37, 16 }
 0xafe   : > { %v9401_v0 = vrot.slane %v9399_v32, 2  ;;  %v9429_v32 = vshll.u32 %v25677_v46, 16 }
 0xaff   : > { %v9404_v12 = vrot.slane %v9402_v22, 3  ;;  %v9205_v22 = vsel %vm9170_vm9, %v9202_v23, %v9204_v24 }
 0xb01   : > { %v9405_v18 = vor.u32 %v9404_v12, %v9401_v0  ;;  %v9431_v0 = vrot.slane %v9429_v32, 3  ;;  %v9206_v12 = vrot.slane %v25675_v57, 2 }
 0xb04   : > { %11082 = vmatmul.mubr.bf16.gmra.mrb[244].mxu0 %v9195_v62  ;;  %v9411_v62 = vshll.u32 %v25673_v44, 16 }
 0xb05   : > { %11089 = vmatprep.mubr.bf16.mxu0 %v9379_v51  ;;  %v9406_v51 = vsel %vm9254_vm10, %v9396_v31, %v9405_v18  ;;  %v9426_v31 = vshrl.u32 %v25677_v46, 16 }
 0xb06   : > { %v9413_v17 = vrot.slane %v9411_v62, 3  ;;  %v9207_v62 = vsel %vm9170_vm9, %v9204_v24, %v9206_v12 }
 0xb08   : > { %v9414_v47 = vor.u32 %v9413_v17, %v9410_v48  ;;  %v9440_v48 = vrot.slane %v9438_v54, 3  ;;  %v9208_v17 = vrot.slane %v25677_v46, 2 }
 0xb0a   : > { %v9209_v19 = vsel %vm9170_vm9, %v9206_v12, %v9208_v17 }
 0xb0c   : > { %11090 = vmatmul.mubr.bf16.gmra.mrb[248].mxu0 %v9197_v28  ;;  %v9415_v28 = vsel %vm9254_vm10, %v9405_v18, %v9414_v47  ;;  %v9435_v18 = vshrl.u32 %v25679_v38, 16 }
 0xb0d   : > { %11097 = vmatprep.mubr.bf16.mxu0 %v9388_v21  ;;  %v9419_v21 = vrot.slane %v9417_v4, 2  ;;  %v9447_v4 = vshll.u32 %v25681_v42, 16 }
 0xb0f   : > { %v9423_v50 = vor.u32 %v9422_v25, %v9419_v21  ;;  %v9449_v21 = vrot.slane %v9447_v4, 3  ;;  %v9210_v25 = vrot.slane %v25679_v38, 2 }
 0xb11   : > { %v9211_v32 = vsel %vm9170_vm9, %v9208_v17, %v9210_v25 }
 0xb14   : > { %11098 = vmatmul.mubr.bf16.gmra.mrb[252].mxu0 %v9199_v13  ;;  %v9424_v13 = vsel %vm9254_vm10, %v9414_v47, %v9423_v50  ;;  %v9444_v47 = vshrl.u32 %v25681_v42, 16 }
 0xb15   : > { %11105 = vmatprep.mubr.bf16.mxu0 %v9397_v33  ;;  %v9428_v33 = vrot.slane %v9426_v31, 2  ;;  %v9456_v31 = vshll.u32 %v25683_v40, 16 }
 0xb17   : > { %v9432_v55 = vor.u32 %v9431_v0, %v9428_v33  ;;  %v9458_v33 = vrot.slane %v9456_v31, 3  ;;  %v9212_v0 = vrot.slane %v25681_v42, 2 }
 0xb19   : > { %v9213_v54 = vsel %vm9170_vm9, %v9210_v25, %v9212_v0 }
 0xb1c   : > { %11106 = vmatmul.mubr.bf16.gmra.mrb[0].mxu0 %v9201_v34  ;;  %v9433_v34 = vsel %vm9254_vm10, %v9423_v50, %v9432_v55  ;;  %v9453_v50 = vshrl.u32 %v25683_v40, 16 }
 0xb1d   : > { %11113 = vmatprep.mubr.bf16.mxu0 %v9406_v51  ;;  %v9437_v51 = vrot.slane %v9435_v18, 2  ;;  %v9465_v18 = vshll.u32 %v25685_v2, 16 }
 0xb1f   : > { %v9441_v23 = vor.u32 %v9440_v48, %v9437_v51  ;;  %v9467_v51 = vrot.slane %v9465_v18, 3  ;;  %v9214_v48 = vrot.slane %v25683_v40, 2  ;;  %v9220_v18 = vrot.slane %v22813_v56, 2 }
 0xb21   : > { %v9215_v4 = vsel %vm9170_vm9, %v9212_v0, %v9214_v48 }
 0xb24   : > { %11114 = vmatmul.mubr.bf16.gmra.mrb[4].mxu0 %v9203_v41  ;;  %v9442_v41 = vsel %vm9254_vm10, %v9432_v55, %v9441_v23  ;;  %v9462_v55 = vshrl.u32 %v25685_v2, 16 }
 0xb25   : > { %11121 = vmatprep.mubr.bf16.mxu0 %v9415_v28  ;;  %v9446_v28 = vrot.slane %v9444_v47, 2  ;;  %v9474_v47 = vshll.u32 %v25687_v45, 16 }
 0xb27   : > { %v9450_v24 = vor.u32 %v9449_v21, %v9446_v28  ;;  %v9476_v28 = vrot.slane %v9474_v47, 3  ;;  %v9216_v21 = vrot.slane %v25685_v2, 2 }
 0xb29   : > { %v9217_v31 = vsel %vm9170_vm9, %v9214_v48, %v9216_v21 }
 0xb2c   : > { %11122 = vmatmul.mubr.bf16.gmra.mrb[8].mxu0 %v9205_v22  ;;  %v9451_v22 = vsel %vm9254_vm10, %v9441_v23, %v9450_v24  ;;  %v9471_v23 = vshrl.u32 %v25687_v45, 16 }
 0xb2d   : > { %11129 = vmatprep.mubr.bf16.mxu0 %v9424_v13  ;;  %v9455_v13 = vrot.slane %v9453_v50, 2  ;;  %v9483_v50 = vshll.u32 %v22813_v56, 16 }
 0xb2f   : > { %v9459_v12 = vor.u32 %v9458_v33, %v9455_v13  ;;  %v9485_v13 = vrot.slane %v9483_v50, 3  ;;  %v9218_v33 = vrot.slane %v25687_v45, 2 }
 0xb34   : > { %11130 = vmatmul.mubr.bf16.gmra.mrb[12].mxu0 %v9207_v62  ;;  %v9460_v62 = vsel %vm9254_vm10, %v9450_v24, %v9459_v12  ;;  %v9480_v24 = vshrl.u32 %v22813_v56, 16 }
 0xb35   : > { %11137 = vmatprep.mubr.bf16.mxu0 %v9433_v34  ;;  %v9464_v34 = vrot.slane %v9462_v55, 2 }
 0xb37   : > { %v9468_v17 = vor.u32 %v9467_v51, %v9464_v34  ;;  %v9223_v34 = vsel %vm9170_vm9, %v9220_v18, %v9222_v1 }
 0xb3c   : > { %11138 = vmatmul.mubr.bf16.gmra.mrb[16].mxu0 %v9209_v19  ;;  %v9469_v19 = vsel %vm9254_vm10, %v9459_v12, %v9468_v17  ;;  %v9219_v12 = vsel %vm9170_vm9, %v9216_v21, %v9218_v33  ;;  %v9539_v21 = vrot.slane %v25645_v52, 3 }
 0xb3d   : > { %11145 = vmatprep.mubr.bf16.mxu0 %v9442_v41  ;;  %v9473_v41 = vrot.slane %v9471_v23, 2 }
 0xb3f   : > { %v9477_v25 = vor.u32 %v9476_v28, %v9473_v41 }
 0xb44   : > { %11146 = vmatmul.mubr.bf16.gmra.mrb[20].mxu0 %v9211_v32  ;;  %v9478_v32 = vsel %vm9254_vm10, %v9468_v17, %v9477_v25 }
 0xb45   : > { %11153 = vmatprep.mubr.bf16.mxu0 %v9451_v22  ;;  %v9482_v22 = vrot.slane %v9480_v24, 2 }
 0xb47   : > { %v9486_v0 = vor.u32 %v9485_v13, %v9482_v22 }
 0xb49   : > { %v9487_v55 = vsel %vm9254_vm10, %v9477_v25, %v9486_v0 }
 0xb4c   : > { %11154 = vmatmul.mubr.bf16.gmra.mrb[24].mxu0 %v9213_v54  ;;  %v9221_v54 = vsel %vm9170_vm9, %v9218_v33, %v9220_v18  ;;  %v9545_v33 = vrot.slane %v25651_v36, 3  ;;  %v9551_v36 = vrot.slane %v25657_v39, 3 }
 0xb4d   : > { %11161 = vmatprep.mubr.bf16.mxu0 %v9460_v62  ;;  %v9496_v62 = vsel %vm9254_vm10, %v9486_v0, %v22875_v43 }
 0xb54   : > { %11162 = vmatmul.mubr.bf16.gmra.mrb[28].mxu0 %v9215_v4 }
 0xb55   : > { %11169 = vmatprep.mubr.bf16.mxu0 %v9469_v19  ;;  %v9535_v19 = vrot.slane %v25641_v8, 3 }
 0xb5c   : > { %11170 = vmatmul.mubr.bf16.gmra.mrb[32].mxu0 %v9217_v31 }
 0xb5d   : > { %11177 = vmatprep.mubr.bf16.mxu0 %v9478_v32 }
 0xb64   : > { %11178 = vmatmul.mubr.bf16.gmra.mrb[36].mxu0 %v9219_v12 }
 0xb65   : > { %11185 = vmatprep.mubr.bf16.mxu0 %v9487_v55 }
 0xb6c   : > { %11186 = vmatmul.mubr.bf16.gmra.mrb[40].mxu0 %v9221_v54 }
 0xb6d   : > { %11193 = vmatprep.mubr.bf16.mxu0 %v9496_v62  ;;  %v9549_v62 = vrot.slane %v25655_v61, 3  ;;  %v9555_v61 = vrot.slane %v25661_v49, 3 }
 0xb74   : > { %11194 = vmatmul.mubr.bf16.gmra.mrb[44].mxu0 %v9223_v34 }
 0xb75   : > { %11201 = vmatprep.mubr.bf16.mxu0 %v22886_v63  ;;  %v9534_v63 = vrot.slane %v25639_v6, 3 }
 0xb77   : > { %v10955_v51 = vpop.f32.mrb[60].mxu0 }
 0xb78   : > { %v23282_v48 = vadd.f32 %v10955_v51, %v23120_v26  ;;  %v10957_v17 = vpop.f32.mrb[61].mxu0  ;;  %v9536_v26 = vsel %vm1502_vm1, %v9534_v63, %v9535_v19 }
 0xb79   : > { %v10958_v23 = vpop.f32.mrb[62].mxu0 }
 0xb7a   : > { %v10959_v47 = vpop.f32.mrb[63].mxu0 }
 0xb7b   : > { %v9552_v47 = vsel %vm1502_vm1, %v9549_v62, %v9551_v36 }
 0xb7c   : > { %11202 = vmatmul.mubr.bf16.gmra.mrb[48].mxu0 %v22866_v53  ;;  %v9537_v53 = vrot.slane %v25643_v3, 3  ;;  %v9543_v3 = vrot.slane %v25649_v14, 3 }
 0xb7d   : > { %11209 = vmatprep.mubr.bf16.mxu0 %v22877_v9 }
 0xb7e   : > { %v9538_v24 = vsel %vm1502_vm1, %v9535_v19, %v9537_v53  ;;  %v9540_v6 = vsel %vm1502_vm1, %v9537_v53, %v9539_v21  ;;  %v9546_v14 = vsel %vm1502_vm1, %v9543_v3, %v9545_v33 }
 0xb7f   : > { %v23286_v43 = vpop.f32.mrb[200].mxu0 }
 0xb80   : > { %v10997_v4 = vpop.f32.mrb[201].mxu0 }
 0xb81   : > { %v23289_v1 = vpop.f32.mrb[202].mxu0  ;;  %v9553_v4 = vrot.slane %v25659_v15, 3  ;;  %v9559_v15 = vrot.slane %v25665_v7, 3 }
 0xb82   : > { %v11000_v41 = vpop.f32.mrb[203].mxu0 }
 0xb83   : > { %v9554_v39 = vsel %vm1502_vm1, %v9551_v36, %v9553_v4  ;;  %v9556_v53 = vsel %vm1502_vm1, %v9553_v4, %v9555_v61 }
 0xb84   : > { %11210 = vmatmul.mubr.bf16.gmra.mrb[64].mxu0 %v9224_v60  ;;  %v9541_v60 = vrot.slane %v25647_v16, 3  ;;  %v9547_v16 = vrot.slane %v25653_v10, 3 }
 0xb85   : > { %17134 = vmatprep.mubr.bf16.mxu0 %v9536_v26 }
 0xb86   : > { %v9542_v52 = vsel %vm1502_vm1, %v9539_v21, %v9541_v60  ;;  %v9544_v13 = vsel %vm1502_vm1, %v9541_v60, %v9543_v3  ;;  %v9548_v54 = vsel %vm1502_vm1, %v9545_v33, %v9547_v16  ;;  %v9550_v10 = vsel %vm1502_vm1, %v9547_v16, %v9549_v62 }
 0xb87   : > { %v23296_v28 = vpop.f32.mrb[204].mxu0 }
 0xb88   : > { %v11005_v9 = vpop.f32.mrb[205].mxu0 }
 0xb89   : > { %v23299_v25 = vpop.f32.mrb[206].mxu0  ;;  %v9557_v9 = vrot.slane %v25663_v20, 3  ;;  %v9563_v20 = vrot.slane %v25669_v59, 3 }
 0xb8a   : > { %v11008_v8 = vpop.f32.mrb[207].mxu0 }
 0xb8b   : > { %v9558_v49 = vsel %vm1502_vm1, %v9555_v61, %v9557_v9  ;;  %v9560_v60 = vsel %vm1502_vm1, %v9557_v9, %v9559_v15 }
 0xb8c   : > { %17135 = vmatmul.mubr.bf16.vlgmr.msra.gmra.mrb[68].mxu0 %v9538_v24 }
 0xb8d   : > { %17138 = vmatprep.mubr.bf16.mxu0 %v9540_v6 }
 0xb8f   : > { %v23304_v50 = vpop.f32.mrb[208].mxu0 }
 0xb90   : > { %v11013_v31 = vpop.f32.mrb[209].mxu0 }
 0xb91   : > { %v23307_v32 = vpop.f32.mrb[210].mxu0  ;;  %v9561_v31 = vrot.slane %v25667_v5, 3  ;;  %v9567_v5 = vrot.slane %v25673_v44, 3 }
 0xb92   : > { %v11016_v22 = vpop.f32.mrb[211].mxu0 }
 0xb93   : > { %v9562_v7 = vsel %vm1502_vm1, %v9559_v15, %v9561_v31  ;;  %v9564_v33 = vsel %vm1502_vm1, %v9561_v31, %v9563_v20 }
 0xb94   : > { %17139 = vmatmul.mubr.bf16.gmra.mrb[72].mxu0 %v9542_v52 }
 0xb95   : > { %17142 = vmatprep.mubr.bf16.mxu0 %v9544_v13 }
 0xb97   : > { %v23312_v0 = vpop.f32.mrb[212].mxu0 }
 0xb98   : > { %v11021_v12 = vpop.f32.mrb[213].mxu0 }
 0xb99   : > { %v23315_v55 = vpop.f32.mrb[214].mxu0  ;;  %v9565_v12 = vrot.slane %v25671_v37, 3  ;;  %v9571_v37 = vrot.slane %v25677_v46, 3 }
 0xb9a   : > { %v11024_v18 = vpop.f32.mrb[215].mxu0 }
 0xb9b   : > { %v9566_v59 = vsel %vm1502_vm1, %v9563_v20, %v9565_v12  ;;  %v9568_v62 = vsel %vm1502_vm1, %v9565_v12, %v9567_v5 }
 0xb9c   : > { %17143 = vmatmul.mubr.bf16.gmra.mrb[76].mxu0 %v9546_v14 }
 0xb9d   : > { %17146 = vmatprep.mubr.bf16.mxu0 %v9548_v54 }
 0xb9f   : > { %v23320_v34 = vpop.f32.mrb[216].mxu0 }
 0xba0   : > { %v11029_v51 = vpop.f32.mrb[217].mxu0 }
 0xba1   : > { %v23323_v17 = vpop.f32.mrb[218].mxu0  ;;  %v9569_v51 = vrot.slane %v25675_v57, 3  ;;  %v9575_v57 = vrot.slane %v25681_v42, 3 }
 0xba2   : > { %v11032_v23 = vpop.f32.mrb[219].mxu0 }
 0xba3   : > { %v9570_v44 = vsel %vm1502_vm1, %v9567_v5, %v9569_v51  ;;  %v9572_v4 = vsel %vm1502_vm1, %v9569_v51, %v9571_v37 }
 0xba4   : > { %17147 = vmatmul.mubr.bf16.gmra.mrb[80].mxu0 %v9550_v10 }
 0xba5   : > { %17150 = vmatprep.mubr.bf16.mxu0 %v9552_v47 }
 0xba7   : > { %v23328_v19 = vpop.f32.mrb[220].mxu0 }
 0xba8   : > { %v11037_v41 = vpop.f32.mrb[221].mxu0 }
 0xba9   : > { %v23331_v63 = vpop.f32.mrb[222].mxu0  ;;  %v9573_v41 = vrot.slane %v25679_v38, 3  ;;  %v9579_v38 = vrot.slane %v25685_v2, 3 }
 0xbaa   : > { %v11040_v26 = vpop.f32.mrb[223].mxu0 }
 0xbab   : > { %v9574_v46 = vsel %vm1502_vm1, %v9571_v37, %v9573_v41  ;;  %v9576_v9 = vsel %vm1502_vm1, %v9573_v41, %v9575_v57 }
 0xbac   : > { %17151 = vmatmul.mubr.bf16.gmra.mrb[84].mxu0 %v9554_v39 }
 0xbad   : > { %17154 = vmatprep.mubr.bf16.mxu0 %v9556_v53 }
 0xbaf   : > { %v23336_v21 = vpop.f32.mrb[224].mxu0 }
 0xbb0   : > { %v11045_v8 = vpop.f32.mrb[225].mxu0 }
 0xbb1   : > { %v23339_v24 = vpop.f32.mrb[226].mxu0  ;;  %v9577_v8 = vrot.slane %v25683_v40, 3  ;;  %v9583_v40 = vrot.slane %v22813_v56, 3 }
 0xbb2   : > { %v11048_v6 = vpop.f32.mrb[227].mxu0 }
 0xbb3   : > { %v9578_v42 = vsel %vm1502_vm1, %v9575_v57, %v9577_v8  ;;  %v9580_v31 = vsel %vm1502_vm1, %v9577_v8, %v9579_v38 }
 0xbb4   : > { %17155 = vmatmul.mubr.bf16.gmra.mrb[88].mxu0 %v9558_v49 }
 0xbb5   : > { %17158 = vmatprep.mubr.bf16.mxu0 %v9560_v60 }
 0xbb7   : > { %v23344_v3 = vpop.f32.mrb[228].mxu0 }
 0xbb8   : > { %v11053_v22 = vpop.f32.mrb[229].mxu0 }
 0xbb9   : > { %v23347_v52 = vpop.f32.mrb[230].mxu0  ;;  %v9581_v22 = vrot.slane %v25687_v45, 3 }
 0xbba   : > { %v11056_v13 = vpop.f32.mrb[231].mxu0 }
 0xbbb   : > { %v9582_v2 = vsel %vm1502_vm1, %v9579_v38, %v9581_v22  ;;  %v9584_v12 = vsel %vm1502_vm1, %v9581_v22, %v9583_v40 }
 0xbbc   : > { %17159 = vmatmul.mubr.bf16.gmra.mrb[92].mxu0 %v9562_v7 }
 0xbbd   : > { %17162 = vmatprep.mubr.bf16.mxu0 %v9564_v33 }
 0xbbf   : > { %v23352_v16 = vpop.f32.mrb[232].mxu0 }
 0xbc0   : > { %v11061_v18 = vpop.f32.mrb[233].mxu0 }
 0xbc1   : > { %v23355_v14 = vpop.f32.mrb[234].mxu0 }
 0xbc2   : > { %v11064_v54 = vpop.f32.mrb[235].mxu0 }
 0xbc4   : > { %17163 = vmatmul.mubr.bf16.gmra.mrb[96].mxu0 %v9566_v59  ;;  %v9586_v59 = vsel %vm1502_vm1, %v9583_v40, %v9585_v29 }
 0xbc5   : > { %17166 = vmatprep.mubr.bf16.mxu0 %v9568_v62 }
 0xbc7   : > { %v23360_v36 = vpop.f32.mrb[236].mxu0 }
 0xbc8   : > { %v11069_v23 = vpop.f32.mrb[237].mxu0 }
 0xbc9   : > { %v23363_v10 = vpop.f32.mrb[238].mxu0 }
 0xbca   : > { %v11072_v47 = vpop.f32.mrb[239].mxu0 }
 0xbcc   : > { %17167 = vmatmul.mubr.bf16.gmra.mrb[100].mxu0 %v9570_v44 }
 0xbcd   : > { %17170 = vmatprep.mubr.bf16.mxu0 %v9572_v4 }
 0xbcf   : > { %v23368_v61 = vpop.f32.mrb[240].mxu0 }
 0xbd0   : > { %v11077_v26 = vpop.f32.mrb[241].mxu0 }
 0xbd1   : > { %v23371_v39 = vpop.f32.mrb[242].mxu0 }
 0xbd2   : > { %v11080_v53 = vpop.f32.mrb[243].mxu0 }
 0xbd4   : > { %17171 = vmatmul.mubr.bf16.gmra.mrb[104].mxu0 %v9574_v46 }
 0xbd5   : > { %17174 = vmatprep.mubr.bf16.mxu0 %v9576_v9 }
 0xbd7   : > { %v23376_v15 = vpop.f32.mrb[244].mxu0 }
 0xbd8   : > { %v11085_v6 = vpop.f32.mrb[245].mxu0 }
 0xbd9   : > { %v23379_v49 = vpop.f32.mrb[246].mxu0 }
 0xbda   : > { %v11088_v60 = vpop.f32.mrb[247].mxu0 }
 0xbdc   : > { %17175 = vmatmul.mubr.bf16.gmra.mrb[108].mxu0 %v9578_v42 }
 0xbdd   : > { %17178 = vmatprep.mubr.bf16.mxu0 %v9580_v31 }
 0xbdf   : > { %v23384_v20 = vpop.f32.mrb[248].mxu0 }
 0xbe0   : > { %v11093_v13 = vpop.f32.mrb[249].mxu0 }
 0xbe1   : > { %v23387_v7 = vpop.f32.mrb[250].mxu0 }
 0xbe2   : > { %v11096_v33 = vpop.f32.mrb[251].mxu0 }
 0xbe4   : > { %17179 = vmatmul.mubr.bf16.gmra.mrb[112].mxu0 %v9582_v2 }
 0xbe5   : > { %17182 = vmatprep.mubr.bf16.mxu0 %v9584_v12 }
 0xbe7   : > { %v23391_v18 = vpop.f32.mrb[252].mxu0 }
 0xbe8   : > { %v11101_v5 = vpop.f32.mrb[253].mxu0 }
 0xbe9   : > { %v23393_v54 = vpop.f32.mrb[254].mxu0 }
 0xbea   : > { %v11104_v45 = vpop.f32.mrb[255].mxu0 }
 0xbec   : > { %17183 = vmatmul.mubr.bf16.gmra.mrb[116].mxu0 %v9586_v59 }
 0xbed   : > { %17186 = vmatprep.mubr.bf16.mxu0 %v22873_v27 }
 0xbef   : > { %v23399_v56 = vpop.f32.mrb[0].mxu0 }
 0xbf0   : > { %v11109_v62 = vpop.f32.mrb[1].mxu0 }
 0xbf1   : > { %v23401_v51 = vpop.f32.mrb[2].mxu0 }
 0xbf2   : > { %v11112_v23 = vpop.f32.mrb[3].mxu0 }
 0xbf4   : > { %17187 = vmatmul.mubr.bf16.gmra.mrb[120].mxu0 %v9587_v11 }
 0xbf7   : > { %v23405_v37 = vpop.f32.mrb[4].mxu0 }
 0xbf8   : > { %v11117_v47 = vpop.f32.mrb[5].mxu0 }
 0xbf9   : > { %v23407_v44 = vpop.f32.mrb[6].mxu0 }
 0xbfa   : > { %v11120_v35 = vpop.f32.mrb[7].mxu0 }
 0xbff   : > { %v23409_v4 = vpop.f32.mrb[8].mxu0 }
 0xc00   : > { %v11125_v29 = vpop.f32.mrb[9].mxu0 }
 0xc01   : > { %v23411_v41 = vpop.f32.mrb[10].mxu0 }
 0xc02   : > { %v11128_v27 = vpop.f32.mrb[11].mxu0 }
 0xc07   : > { %v23413_v26 = vpop.f32.mrb[12].mxu0 }
 0xc08   : > { %v11133_v57 = vpop.f32.mrb[13].mxu0 }
 0xc09   : > { %v23415_v53 = vpop.f32.mrb[14].mxu0 }
 0xc0a   : > { %v11136_v46 = vpop.f32.mrb[15].mxu0 }
 0xc0f   : > { %v23417_v30 = vpop.f32.mrb[16].mxu0 }
 0xc10   : > { %v11141_v11 = vpop.f32.mrb[17].mxu0 }
 0xc11   : > { %v23419_v9 = vpop.f32.mrb[18].mxu0 }
 0xc12   : > { %v11144_v8 = vpop.f32.mrb[19].mxu0 }
 0xc17   : > { %v23421_v6 = vpop.f32.mrb[20].mxu0 }
 0xc18   : > { %v11149_v38 = vpop.f32.mrb[21].mxu0 }
 0xc19   : > { %v23423_v60 = vpop.f32.mrb[22].mxu0 }
 0xc1a   : > { %v11152_v42 = vpop.f32.mrb[23].mxu0 }
 0xc1f   : > { %v23425_v31 = vpop.f32.mrb[24].mxu0 }
 0xc20   : > { %25689 = vst [vmem:[#allocation49_spill] sm:$0xff] %v23425_v31  ;;  %v11157_v22 = vpop.f32.mrb[25].mxu0 }
 0xc21   : > { %v23427_v13 = vpop.f32.mrb[26].mxu0 }
 0xc22   : > { %25690 = vst [vmem:[#allocation46_spill] sm:$0xff] %v23427_v13  ;;  %v11160_v40 = vpop.f32.mrb[27].mxu0 }
 0xc27   : > { %v23429_v33 = vpop.f32.mrb[28].mxu0 }
 0xc28   : > { %v11165_v2 = vpop.f32.mrb[29].mxu0 }
 0xc29   : > { %v23431_v12 = vpop.f32.mrb[30].mxu0  ;;  %v19135_v2 = vld [vmem:[%s25497_s6 + $0x4] ss:$16 sps:$4 sm:$0xff]  }
 0xc2a   : > { %25691 = vst [vmem:[#allocation53_spill] sm:$0xff] %v23431_v12  ;;  %v11168_v5 = vpop.f32.mrb[31].mxu0  ;;  %12433 = vmatprep.mubr.bf16.mxu0 %v19135_v2 }
 0xc2f   : > { %v23433_v45 = vpop.f32.mrb[32].mxu0 }
 0xc30   : > { %25692 = vst [vmem:[#allocation50_spill] sm:$0xff] %v23433_v45  ;;  %v11173_v59 = vpop.f32.mrb[33].mxu0 }
 0xc31   : > { %v23435_v62 = vpop.f32.mrb[34].mxu0 }
 0xc32   : > { %25693 = vst [vmem:[#allocation57_spill] sm:$0xff] %v23435_v62  ;;  %v11176_v23 = vpop.f32.mrb[35].mxu0 }
 0xc37   : > { %v23437_v47 = vpop.f32.mrb[36].mxu0 }
 0xc38   : > { %25694 = vst [vmem:[#allocation54_spill] sm:$0xff] %v23437_v47  ;;  %v11181_v35 = vpop.f32.mrb[37].mxu0 }
 0xc39   : > { %v23439_v29 = vpop.f32.mrb[38].mxu0 }
 0xc3a   : > { %25695 = vst [vmem:[#allocation61_spill] sm:$0xff] %v23439_v29  ;;  %v11184_v27 = vpop.f32.mrb[39].mxu0 }
 0xc3f   : > { %v23441_v57 = vpop.f32.mrb[40].mxu0 }
 0xc40   : > { %25696 = vst [vmem:[#allocation58_spill] sm:$0xff] %v23441_v57  ;;  %v11189_v46 = vpop.f32.mrb[41].mxu0 }
 0xc41   : > { %v23443_v11 = vpop.f32.mrb[42].mxu0 }
 0xc42   : > { %25697 = vst [vmem:[#allocation65_spill] sm:$0xff] %v23443_v11  ;;  %v11192_v8 = vpop.f32.mrb[43].mxu0 }
 0xc47   : > { %v23445_v38 = vpop.f32.mrb[44].mxu0 }
 0xc48   : > { %25698 = vst [vmem:[#allocation62_spill] sm:$0xff] %v23445_v38  ;;  %v11197_v42 = vpop.f32.mrb[45].mxu0 }
 0xc49   : > { %v23447_v22 = vpop.f32.mrb[46].mxu0 }
 0xc4a   : > { %25699 = vst [vmem:[#allocation66_spill] sm:$0xff] %v23447_v22  ;;  %v11200_v40 = vpop.f32.mrb[47].mxu0 }
 0xc4f   : > { %v23452_v5 = vpop.f32.mrb[48].mxu0 }
 0xc50   : > { %25700 = vst [vmem:[#allocation69_spill] sm:$0xff] %v23452_v5  ;;  %v11205_v59 = vpop.f32.mrb[49].mxu0 }
 0xc51   : > { %v23454_v23 = vpop.f32.mrb[50].mxu0 }
 0xc52   : > { %25701 = vst [vmem:[#allocation9_spill] sm:$0xff] %v23454_v23  ;;  %v11208_v35 = vpop.f32.mrb[51].mxu0 }
 0xc57   : > { %v11211_v27 = vpop.f32.mrb[64].mxu0 }
 0xc58   : > { %v11213_v46 = vpop.f32.mrb[65].mxu0  ;;  %v23457_v8 = vadd.f32 %v11211_v27, %v23282_v48 }
 0xc59   : > { %v11214_v42 = vpop.f32.mrb[66].mxu0 }
 0xc5a   : > { %25702 = vst [vmem:[#allocation8_spill] sm:$0xff] %v23457_v8  ;;  %v11215_v58 = vpop.f32.mrb[67].mxu0 }
 0xc5f   : > { %v17136_v11 = vpop.f32.mrb[68].mxu0 }
 0xc60   : > { %v11260_v40 = vadd.f32 %v17136_v11, %v23296_v28  ;;  %v11251_v22 = vpop.f32.mrb[69].mxu0 }
 0xc61   : > { %v11252_v57 = vadd.f32 %v11251_v22, %v23286_v43  ;;  %v17137_v2 = vpop.f32.mrb[70].mxu0 }
 0xc62   : > { %v11263_v5 = vadd.f32 %v17137_v2, %v23299_v25  ;;  %v11254_v59 = vpop.f32.mrb[71].mxu0  ;;  %v11527_v23 = vrot.slane %v11260_v40, 6 }
 0xc63   : > { %v11255_v35 = vadd.f32 %v11254_v59, %v23289_v1 }
 0xc64   : > { %v11528_v46 = vrot.slane %v11263_v5, 6 }
 0xc66   : > { %v11529_v48 = vsel %vm11526_vm11, %v11527_v23, %v11528_v46 }
 0xc67   : > { %v11685_v27 = vmax.f32 %v11252_v57, %v11529_v48  ;;  %v17140_v42 = vpop.f32.mrb[72].mxu0 }
 0xc68   : > { %v11276_v58 = vadd.f32 %v17140_v42, %v23312_v0  ;;  %v11267_v8 = vpop.f32.mrb[73].mxu0 }
 0xc69   : > { %v11268_v28 = vadd.f32 %v11267_v8, %v23304_v50  ;;  %v17141_v11 = vpop.f32.mrb[74].mxu0  ;;  %v11791_v29 = vrot.slane %v11685_v27, 1 }
 0xc6a   : > { %v11279_v43 = vadd.f32 %v17141_v11, %v23315_v55  ;;  %v11270_v22 = vpop.f32.mrb[75].mxu0  ;;  %v11534_v38 = vrot.slane %v11276_v58, 6 }
 0xc6b   : > { %v11530_v25 = vrot.slane %v11268_v28, 6  ;;  %v11271_v2 = vadd.f32 %v11270_v22, %v23307_v32 }
 0xc6c   : > { %v11536_v1 = vrot.slane %v11279_v43, 6 }
 0xc6d   : > { %v11531_v59 = vsel %vm11526_vm11, %v11528_v46, %v11530_v25  ;;  %v11532_v62 = vrot.slane %v11271_v2, 6 }
 0xc6e   : > { %v11686_v23 = vmax.f32 %v11255_v35, %v11531_v59  ;;  %v11537_v57 = vsel %vm11526_vm11, %v11534_v38, %v11536_v1 }
 0xc6f   : > { %v23470_v48 = vmax.f32 %v11268_v28, %v11537_v57  ;;  %v11533_v0 = vsel %vm11526_vm11, %v11530_v25, %v11532_v62  ;;  %v11535_v50 = vsel %vm11526_vm11, %v11532_v62, %v11534_v38  ;;  %v17144_v8 = vpop.f32.mrb[76].mxu0 }
 0xc70   : > { %v11792_v55 = vrot.slane %v11686_v23, 1  ;;  %v11687_v42 = vmax.f32 %v11260_v40, %v11533_v0  ;;  %v11688_v11 = vmax.f32 %v11263_v5, %v11535_v50  ;;  %v23475_v32 = vadd.f32 %v17144_v8, %v23328_v19  ;;  %v11283_v22 = vpop.f32.mrb[77].mxu0  ;;  %v23485_v19 = vld [vmem:[%s25496_s5] ss:$0 sm:$0xff] }
 0xc71   : > { %v11798_v46 = vrot.slane %v23470_v48, 1  ;;  %v11284_v35 = vadd.f32 %v11283_v22, %v23320_v34  ;;  %v17145_v59 = vpop.f32.mrb[78].mxu0 }
 0xc72   : > { %v11794_v28 = vrot.slane %v11687_v42, 1  ;;  %v11796_v57 = vrot.slane %v11688_v11, 1  ;;  %v11295_v25 = vadd.f32 %v17145_v59, %v23331_v63  ;;  %v11286_v45 = vpop.f32.mrb[79].mxu0  ;;  %v11542_v62 = vrot.slane %v23475_v32, 6 }
 0xc73   : > { %v11538_v38 = vrot.slane %v11284_v35, 6  ;;  %v11287_v5 = vadd.f32 %v11286_v45, %v23323_v17  ;;  %v11793_v40 = vsel %vm2731_vm3, %v11791_v29, %v11792_v55 }
 0xc74   : > { %v11544_v0 = vrot.slane %v11295_v25, 6  ;;  %v11795_v34 = vsel %vm2731_vm3, %v11792_v55, %v11794_v28  ;;  %v11949_v50 = vmax.f32 %v11685_v27, %v11793_v40  ;;  %v11797_v8 = vsel %vm2731_vm3, %v11794_v28, %v11796_v57 }
 0xc75   : > { %v11539_v63 = vsel %vm11526_vm11, %v11536_v1, %v11538_v38  ;;  %v11540_v22 = vrot.slane %v11287_v5, 6  ;;  %v11950_v59 = vmax.f32 %v11686_v23, %v11795_v34  ;;  %v11799_v47 = vsel %vm2731_vm3, %v11796_v57, %v11798_v46 }
 0xc76   : > { %v11690_v17 = vmax.f32 %v11271_v2, %v11539_v63  ;;  %v11545_v45 = vsel %vm11526_vm11, %v11542_v62, %v11544_v0  ;;  %v12009_v13 = vadd.f32 %v23485_v19, %v11949_v50  ;;  %v11951_v12 = vmax.f32 %v11687_v42, %v11797_v8 }
 0xc77   : > { %v23494_v31 = vmax.f32 %v11284_v35, %v11545_v45  ;;  %v11541_v29 = vsel %vm11526_vm11, %v11538_v38, %v11540_v22  ;;  %v11543_v27 = vsel %vm11526_vm11, %v11540_v22, %v11542_v62  ;;  %v17148_v55 = vpop.f32.mrb[80].mxu0  ;;  %v12010_v28 = vadd.f32 %v23485_v19, %v11950_v59 }
 0xc78   : > { %v11800_v1 = vrot.slane %v11690_v17, 1  ;;  %v23499_v40 = vmax.f32 %v11276_v58, %v11541_v29  ;;  %v23501_v23 = vmax.f32 %v11279_v43, %v11543_v27  ;;  %v23504_v2 = vadd.f32 %v17148_v55, %v23344_v3  ;;  %v11299_v57 = vpop.f32.mrb[81].mxu0 }
 0xc79   : > { %v11806_v42 = vrot.slane %v23494_v31, 1  ;;  %v11300_v35 = vadd.f32 %v11299_v57, %v23336_v21  ;;  %v17149_v34 = vpop.f32.mrb[82].mxu0  ;;  %v12062_v38 = vmax.f32 %v12009_v13, 0.0  ;;  %v12063_v50 = vmax.f32 %v12010_v28, 0.0 }
 0xc7a   : > { %v11802_v62 = vrot.slane %v23499_v40, 1  ;;  %v11804_v8 = vrot.slane %v23501_v23, 1  ;;  %v11550_v58 = vrot.slane %v23504_v2, 6  ;;  %v11311_v43 = vadd.f32 %v17149_v34, %v23347_v52  ;;  %v11302_v63 = vpop.f32.mrb[83].mxu0 }
 0xc7b   : > { %v11546_v22 = vrot.slane %v11300_v35, 6  ;;  %v11303_v3 = vadd.f32 %v11302_v63, %v23339_v24  ;;  %v23513_v59 = vpack.c.bf16 %v12063_v50, %v12062_v38  ;;  %v11952_v45 = vmax.f32 %v11688_v11, %v11799_v47 }
 0xc7c   : > { %v11552_v29 = vrot.slane %v11311_v43, 6  ;;  %v12011_v21 = vadd.f32 %v23485_v19, %v11951_v12  ;;  %v11801_v13 = vsel %vm2731_vm3, %v11798_v46, %v11800_v1  ;;  %v11803_v27 = vsel %vm2731_vm3, %v11800_v1, %v11802_v62 }
 0xc7d   : > { %v11547_v55 = vsel %vm11526_vm11, %v11544_v0, %v11546_v22  ;;  %v11548_v28 = vrot.slane %v11303_v3, 6  ;;  %v12012_v57 = vadd.f32 %v23485_v19, %v11952_v45  ;;  %v11953_v52 = vmax.f32 %v23470_v48, %v11801_v13 }
 0xc7e   : > { %v23521_v34 = vmax.f32 %v11287_v5, %v11547_v55  ;;  %v11553_v24 = vsel %vm11526_vm11, %v11550_v58, %v11552_v29  ;;  %v12064_v38 = vmax.f32 %v12011_v21, 0.0  ;;  %v11954_v47 = vmax.f32 %v11690_v17, %v11803_v27 }
 0xc7f   : > { %v23524_v11 = vmax.f32 %v11300_v35, %v11553_v24  ;;  %v11549_v12 = vsel %vm11526_vm11, %v11546_v22, %v11548_v28  ;;  %v11551_v46 = vsel %vm11526_vm11, %v11548_v28, %v11550_v58  ;;  %v17152_v1 = vpop.f32.mrb[84].mxu0  ;;  %v12065_v50 = vmax.f32 %v12012_v57, 0.0 }
 0xc80   : > { %v11808_v0 = vrot.slane %v23521_v34, 1  ;;  %v23530_v63 = vmax.f32 %v23475_v32, %v11549_v12  ;;  %v23532_v48 = vmax.f32 %v11295_v25, %v11551_v46  ;;  %v23535_v5 = vadd.f32 %v17152_v1, %v23360_v36  ;;  %v11315_v45 = vpop.f32.mrb[85].mxu0 }
 0xc81   : > { %v11316_v17 = vadd.f32 %v11315_v45, %v23352_v16  ;;  %v17153_v35 = vpop.f32.mrb[86].mxu0  ;;  %v23538_v21 = vpack.c.bf16 %v12065_v50, %v12064_v38  ;;  %v12013_v58 = vadd.f32 %v23485_v19, %v11953_v52  ;;  %v12014_v55 = vadd.f32 %v23485_v19, %v11954_v47 }
 0xc82   : > { %v11810_v22 = vrot.slane %v23530_v63, 1  ;;  %v11558_v13 = vrot.slane %v23535_v5, 6  ;;  %v23544_v32 = vadd.f32 %v17153_v35, %v23363_v10  ;;  %v11318_v25 = vpop.f32.mrb[87].mxu0  ;;  %v11805_v57 = vsel %vm2731_vm3, %v11802_v62, %v11804_v8 }
 0xc83   : > { %v11554_v27 = vrot.slane %v11316_v17, 6  ;;  %v11319_v36 = vadd.f32 %v11318_v25, %v23355_v14  ;;  %v12066_v28 = vmax.f32 %v12013_v58, 0.0  ;;  %v11807_v52 = vsel %vm2731_vm3, %v11804_v8, %v11806_v42 }
 0xc84   : > { %v11560_v16 = vrot.slane %v23544_v32, 6  ;;  %v11809_v24 = vsel %vm2731_vm3, %v11806_v42, %v11808_v0  ;;  %v12067_v10 = vmax.f32 %v12014_v55, 0.0  ;;  %v11955_v46 = vmax.f32 %v23499_v40, %v11805_v57 }
 0xc85   : > { %v11555_v38 = vsel %vm11526_vm11, %v11552_v29, %v11554_v27  ;;  %v11556_v12 = vrot.slane %v11319_v36, 6  ;;  %v11956_v47 = vmax.f32 %v23501_v23, %v11807_v52  ;;  %v11811_v50 = vsel %vm2731_vm3, %v11808_v0, %v11810_v22 }
 0xc86   : > { %v23554_v1 = vmax.f32 %v11303_v3, %v11555_v38  ;;  %v11561_v14 = vsel %vm11526_vm11, %v11558_v13, %v11560_v16  ;;  %v23563_v29 = vpack.c.bf16 %v12067_v10, %v12066_v28  ;;  %v11812_v35 = vrot.slane %v23532_v48, 1 }
 0xc87   : > { %v11557_v62 = vsel %vm11526_vm11, %v11554_v27, %v11556_v12  ;;  %v11559_v8 = vsel %vm11526_vm11, %v11556_v12, %v11558_v13  ;;  %v17156_v45 = vpop.f32.mrb[88].mxu0  ;;  %v23561_v42 = vmax.f32 %v11316_v17, %v11561_v14  ;;  %v11814_v58 = vrot.slane %v23524_v11, 1 }
 0xc88   : > { %v23567_v40 = vmax.f32 %v23504_v2, %v11557_v62  ;;  %v23569_v3 = vmax.f32 %v11311_v43, %v11559_v8  ;;  %v23572_v23 = vadd.f32 %v17156_v45, %v23376_v15  ;;  %v11331_v0 = vpop.f32.mrb[89].mxu0  ;;  %v12015_v17 = vadd.f32 %v23485_v19, %v11955_v46 }
 0xc89   : > { %v11332_v13 = vadd.f32 %v11331_v0, %v23368_v61  ;;  %v17157_v25 = vpop.f32.mrb[90].mxu0  ;;  %v12016_v27 = vadd.f32 %v23485_v19, %v11956_v47  ;;  %v11816_v55 = vrot.slane %v23554_v1, 1  ;;  %v25545_v15 = vrot.slane %v23561_v42, 1 }
 0xc8a   : > { %v11566_v2 = vrot.slane %v23572_v23, 6  ;;  %v23581_v43 = vadd.f32 %v17157_v25, %v23379_v49  ;;  %v11334_v28 = vpop.f32.mrb[91].mxu0  ;;  %v12068_v38 = vmax.f32 %v12015_v17, 0.0  ;;  %v11957_v10 = vmax.f32 %v23494_v31, %v11809_v24 }
 0xc8b   : > { %v11562_v57 = vrot.slane %v11332_v13, 6  ;;  %v11335_v52 = vadd.f32 %v11334_v28, %v23371_v39  ;;  %v12069_v61 = vmax.f32 %v12016_v27, 0.0  ;;  %v11958_v46 = vmax.f32 %v23521_v34, %v11811_v50 }
 0xc8c   : > { %v11568_v12 = vrot.slane %v23581_v43, 6  ;;  %v23589_v14 = vsel %vm2731_vm3, %v11810_v22, %v11812_v35  ;;  %v23597_v39 = vsel %vm2731_vm3, %v11812_v35, %v11814_v58  ;;  %v12017_v31 = vadd.f32 %v23485_v19, %v11957_v10 }
 0xc8d   : > { %v11563_v49 = vsel %vm11526_vm11, %v11560_v16, %v11562_v57  ;;  %v11564_v47 = vrot.slane %v11335_v52, 6  ;;  %v23592_v62 = vpack.c.bf16 %v12069_v61, %v12068_v38  ;;  %v12018_v34 = vadd.f32 %v23485_v19, %v11958_v46 }
 0xc8e   : > { %v11569_v8 = vsel %vm11526_vm11, %v11566_v2, %v11568_v12  ;;  %v11702_v45 = vmax.f32 %v11319_v36, %v11563_v49  ;;  %v11959_v0 = vmax.f32 %v23530_v63, %v23589_v14  ;;  %v12070_v38 = vmax.f32 %v12017_v31, 0.0 }
 0xc8f   : > { %v23602_v24 = vmax.f32 %v11332_v13, %v11569_v8  ;;  %v11565_v22 = vsel %vm11526_vm11, %v11562_v57, %v11564_v47  ;;  %v11567_v16 = vsel %vm11526_vm11, %v11564_v47, %v11566_v2  ;;  %v17160_v50 = vpop.f32.mrb[92].mxu0  ;;  %v12071_v2 = vmax.f32 %v12018_v34, 0.0 }
 0xc90   : > { %v11703_v35 = vmax.f32 %v23535_v5, %v11565_v22  ;;  %v23610_v25 = vadd.f32 %v17160_v50, %v23391_v18  ;;  %v11347_v36 = vpop.f32.mrb[93].mxu0  ;;  %v11824_v17 = vrot.slane %v11702_v45, 1  ;;  %v11704_v27 = vmax.f32 %v23544_v32, %v11567_v16 }
 0xc91   : > { %v11830_v13 = vrot.slane %v23602_v24, 1  ;;  %v11348_v28 = vadd.f32 %v11347_v36, %v23384_v20  ;;  %v17161_v57 = vpop.f32.mrb[94].mxu0  ;;  %v23628_v34 = vpack.c.bf16 %v12071_v2, %v12070_v38 }
 0xc92   : > { %v11826_v61 = vrot.slane %v11703_v35, 1  ;;  %v11574_v10 = vrot.slane %v23610_v25, 6  ;;  %v23617_v46 = vadd.f32 %v17161_v57, %v23393_v54  ;;  %v11350_v5 = vpop.f32.mrb[95].mxu0  ;;  %v11825_v18 = vsel %vm2731_vm3, %v25545_v15, %v11824_v17 }
 0xc93   : > { %v11570_v49 = vrot.slane %v11348_v28, 6  ;;  %v23623_v32 = vadd.f32 %v11350_v5, %v23387_v7  ;;  %v11965_v20 = vmax.f32 %v23561_v42, %v11825_v18  ;;  %v11828_v47 = vrot.slane %v11704_v27, 1 }
 0xc94   : > { %v11576_v8 = vrot.slane %v23617_v46, 6  ;;  %v11827_v31 = vsel %vm2731_vm3, %v11824_v17, %v11826_v61  ;;  %v11960_v54 = vmax.f32 %v23532_v48, %v23597_v39 }
 0xc95   : > { %v11571_v22 = vsel %vm11526_vm11, %v11568_v12, %v11570_v49  ;;  %v11572_v16 = vrot.slane %v23623_v32, 6  ;;  %v11966_v50 = vmax.f32 %v11702_v45, %v11827_v31  ;;  %v12025_v7 = vadd.f32 %v23485_v19, %v11965_v20 }
 0xc96   : > { %v11577_v36 = vsel %vm11526_vm11, %v11574_v10, %v11576_v8  ;;  %v11829_v57 = vsel %vm2731_vm3, %v11826_v61, %v11828_v47  ;;  %v11831_v5 = vsel %vm2731_vm3, %v11828_v47, %v11830_v13  ;;  %v23638_v18 = vmax.f32 %v11335_v52, %v11571_v22 }
 0xc97   : > { %v23640_v17 = vmax.f32 %v11348_v28, %v11577_v36  ;;  %v11573_v38 = vsel %vm11526_vm11, %v11570_v49, %v11572_v16  ;;  %v11575_v2 = vsel %vm11526_vm11, %v11572_v16, %v11574_v10  ;;  %v17164_v12 = vpop.f32.mrb[96].mxu0  ;;  %v12026_v15 = vadd.f32 %v23485_v19, %v11966_v50 }
 0xc98   : > { %v11818_v45 = vrot.slane %v23567_v40, 1  ;;  %v23647_v20 = vmax.f32 %v23572_v23, %v11573_v38  ;;  %v23650_v61 = vadd.f32 %v17164_v12, %v23405_v37  ;;  %v11363_v47 = vpop.f32.mrb[97].mxu0  ;;  %v11967_v52 = vmax.f32 %v11703_v35, %v11829_v57 }
 0xc99   : > { %v11364_v28 = vadd.f32 %v11363_v47, %v23399_v56  ;;  %v17165_v31 = vpop.f32.mrb[98].mxu0  ;;  %v12078_v22 = vmax.f32 %v12025_v7, 0.0  ;;  %v12079_v49 = vmax.f32 %v12026_v15, 0.0  ;;  %v11968_v36 = vmax.f32 %v11704_v27, %v11831_v5 }
 0xc9a   : > { %v11834_v10 = vrot.slane %v23647_v20, 1  ;;  %v11582_v16 = vrot.slane %v23650_v61, 6  ;;  %v23656_v50 = vadd.f32 %v17165_v31, %v23407_v44  ;;  %v11366_v23 = vpop.f32.mrb[99].mxu0  ;;  %v12027_v38 = vadd.f32 %v23485_v19, %v11967_v52 }
 0xc9b   : > { %v11578_v37 = vrot.slane %v11364_v28, 6  ;;  %v23660_v12 = vadd.f32 %v11366_v23, %v23401_v51  ;;  %v12123_v35 = vpack.c.bf16 %v12079_v49, %v12078_v22  ;;  %v12028_v56 = vadd.f32 %v23485_v19, %v11968_v36 }
 0xc9c   : > { %v11584_v15 = vrot.slane %v23656_v50, 6  ;;  %v12080_v27 = vmax.f32 %v12027_v38, 0.0  ;;  %v11832_v7 = vrot.slane %v23638_v18, 1  ;;  %v11708_v57 = vmax.f32 %v23581_v43, %v11575_v2 }
 0xc9d   : > { %v11838_v44 = vrot.slane %v23640_v17, 1  ;;  %v11579_v5 = vsel %vm11526_vm11, %v11576_v8, %v11578_v37  ;;  %v11580_v47 = vrot.slane %v23660_v12, 6  ;;  %16490 = vmatprep.subr.bf16.mxu0 %v12123_v35  ;;  %v12081_v52 = vmax.f32 %v12028_v56, 0.0 }
 0xc9e   : > { %v11585_v51 = vsel %vm11526_vm11, %v11582_v16, %v11584_v15  ;;  %16491 = vmatpush3.bf16.msra.mxu0 %v23513_v59  ;;  %v11833_v31 = vsel %vm2731_vm3, %v11830_v13, %v11832_v7  ;;  %v11835_v22 = vsel %vm2731_vm3, %v11832_v7, %v11834_v10  ;;  %v11836_v49 = vrot.slane %v11708_v57, 1 }
 0xc9f   : > { %v23673_v36 = vmax.f32 %v11364_v28, %v11585_v51  ;;  %v11581_v43 = vsel %vm11526_vm11, %v11578_v37, %v11580_v47  ;;  %v11583_v2 = vsel %vm11526_vm11, %v11580_v47, %v11582_v16  ;;  %v17168_v8 = vpop.f32.mrb[100].mxu0  ;;  %v12124_v23 = vpack.c.bf16 %v12081_v52, %v12080_v27 }
 0xca0   : > { %v23678_v38 = vmax.f32 %v23610_v25, %v11581_v43  ;;  %v23681_v35 = vadd.f32 %v17168_v8, %v23413_v26  ;;  %v11379_v59 = vpop.f32.mrb[101].mxu0  ;;  %v11969_v13 = vmax.f32 %v23602_v24, %v11833_v31  ;;  %v11970_v56 = vmax.f32 %v23638_v18, %v11835_v22 }
 0xca1   : > { %v11820_v28 = vrot.slane %v23569_v3, 1  ;;  %16492 = vmatprep.subr.bf16.mxu0 %v12124_v23  ;;  %v11380_v37 = vadd.f32 %v11379_v59, %v23409_v4  ;;  %v17169_v7 = vpop.f32.mrb[102].mxu0  ;;  %v11837_v16 = vsel %vm2731_vm3, %v11834_v10, %v11836_v49  ;;  %v11839_v27 = vsel %vm2731_vm3, %v11836_v49, %v11838_v44 }
 0xca2   : > { %v11842_v25 = vrot.slane %v23678_v38, 1  ;;  %v11590_v26 = vrot.slane %v23681_v35, 6  ;;  %v23692_v47 = vadd.f32 %v17169_v7, %v23415_v53  ;;  %v11382_v24 = vpop.f32.mrb[103].mxu0  ;;  %16493 = vmatpush3.bf16.msra.mxu0 %v23538_v21  ;;  %v12029_v18 = vadd.f32 %v23485_v19, %v11969_v13 }
 0xca3   : > { %v11586_v52 = vrot.slane %v11380_v37, 6  ;;  %v11383_v4 = vadd.f32 %v11382_v24, %v23411_v41  ;;  %v12030_v51 = vadd.f32 %v23485_v19, %v11970_v56  ;;  %v11971_v10 = vmax.f32 %v23647_v20, %v11837_v16 }
 0xca4   : > { %v11592_v31 = vrot.slane %v23692_v47, 6  ;;  %v12082_v22 = vmax.f32 %v12029_v18, 0.0  ;;  %v11972_v49 = vmax.f32 %v11708_v57, %v11839_v27  ;;  %v11710_v43 = vmax.f32 %v23623_v32, %v11579_v5 }
 0xca5   : > { %v23702_v53 = vsel %vm11526_vm11, %v11584_v15, %v11586_v52  ;;  %v11588_v8 = vrot.slane %v11383_v4, 6  ;;  %v12083_v21 = vmax.f32 %v12030_v51, 0.0  ;;  %v12031_v23 = vadd.f32 %v23485_v19, %v11971_v10 }
 0xca6   : > { %v11593_v59 = vsel %vm11526_vm11, %v11590_v26, %v11592_v31  ;;  %v12032_v41 = vadd.f32 %v23485_v19, %v11972_v49  ;;  %v11840_v13 = vrot.slane %v11710_v43, 1  ;;  %v23708_v20 = vmax.f32 %v23617_v46, %v11583_v2 }
 0xca7   : > { %v23710_v56 = vmax.f32 %v11380_v37, %v11593_v59  ;;  %v11589_v57 = vsel %vm11526_vm11, %v11586_v52, %v11588_v8  ;;  %v23714_v32 = vsel %vm11526_vm11, %v11588_v8, %v11590_v26  ;;  %v12125_v15 = vpack.c.bf16 %v12083_v21, %v12082_v22  ;;  %v17172_v5 = vpop.f32.mrb[104].mxu0 }
 0xca8   : > { %v23717_v7 = vmax.f32 %v23650_v61, %v11589_v57  ;;  %v23720_v16 = vadd.f32 %v17172_v5, %v23421_v6  ;;  %v12084_v27 = vmax.f32 %v12031_v23, 0.0  ;;  %v12085_v24 = vmax.f32 %v12032_v41, 0.0  ;;  %v11395_v18 = vpop.f32.mrb[105].mxu0 }
 0xca9   : > { %16494 = vmatprep.subr.bf16.mxu0 %v12125_v15  ;;  %v11396_v46 = vadd.f32 %v11395_v18, %v23417_v30  ;;  %v17173_v2 = vpop.f32.mrb[106].mxu0  ;;  %v11841_v37 = vsel %vm2731_vm3, %v11838_v44, %v11840_v13  ;;  %v11843_v26 = vsel %vm2731_vm3, %v11840_v13, %v11842_v25  ;;  %v12019_v61 = vadd.f32 %v23485_v19, %v11959_v0 }
 0xcaa   : > { %v11846_v52 = vrot.slane %v23673_v36, 1  ;;  %v11854_v6 = vrot.slane %v23710_v56, 1  ;;  %16495 = vmatpush3.bf16.msra.mxu0 %v23563_v29  ;;  %v12126_v51 = vpack.c.bf16 %v12085_v24, %v12084_v27  ;;  %v23733_v10 = vadd.f32 %v17173_v2, %v23423_v60  ;;  %v11398_v30 = vpop.f32.mrb[107].mxu0 }
 0xcab   : > { %v11594_v22 = vrot.slane %v11396_v46, 6  ;;  %v11399_v44 = vadd.f32 %v11398_v30, %v23419_v9  ;;  %v11973_v49 = vmax.f32 %v23640_v17, %v11841_v37  ;;  %v11974_v8 = vmax.f32 %v11710_v43, %v11843_v26  ;;  %v25703_v26 = vld [vmem:[#allocation49_spill] sm:$0xff] }
 0xcac   : > { %v11850_v63 = vrot.slane %v23717_v7, 1  ;;  %v11598_v14 = vrot.slane %v23720_v16, 6  ;;  %16496 = vmatprep.subr.bf16.mxu0 %v12126_v51  ;;  %v11600_v0 = vrot.slane %v23733_v10, 6  ;;  %v11844_v29 = vrot.slane %v23708_v20, 1 }
 0xcad   : > { %v11595_v21 = vsel %vm11526_vm11, %v11592_v31, %v11594_v22  ;;  %v11596_v60 = vrot.slane %v11399_v44, 6  ;;  %v12033_v23 = vadd.f32 %v23485_v19, %v11973_v49  ;;  %v12034_v59 = vadd.f32 %v23485_v19, %v11974_v8  ;;  %v25704_v49 = vld [vmem:[#allocation53_spill] sm:$0xff] }
 0xcae   : > { %v23744_v9 = vmax.f32 %v11383_v4, %v11595_v21  ;;  %v11601_v17 = vsel %vm11526_vm11, %v11598_v14, %v11600_v0  ;;  %16497 = vmatpush3.bf16.msra.mxu0 %v23592_v62  ;;  %v11845_v43 = vsel %vm2731_vm3, %v11842_v25, %v11844_v29  ;;  %v11847_v41 = vsel %vm2731_vm3, %v11844_v29, %v11846_v52 }
 0xcaf   : > { %v23752_v13 = vmax.f32 %v11396_v46, %v11601_v17  ;;  %v11597_v31 = vsel %vm11526_vm11, %v11594_v22, %v11596_v60  ;;  %v11599_v57 = vsel %vm11526_vm11, %v11596_v60, %v11598_v14  ;;  %v17176_v15 = vpop.f32.mrb[108].mxu0  ;;  %v12020_v4 = vadd.f32 %v23485_v19, %v11960_v54 }
 0xcb0   : > { %v23761_v62 = vmax.f32 %v23681_v35, %v11597_v31  ;;  %v23764_v25 = vmax.f32 %v23692_v47, %v11599_v57  ;;  %v12086_v5 = vmax.f32 %v12033_v23, 0.0  ;;  %v12087_v27 = vmax.f32 %v12034_v59, 0.0  ;;  %v11411_v24 = vpop.f32.mrb[109].mxu0 }
 0xcb1   : > { %v23767_v18 = vadd.f32 %v17176_v15, %v23429_v33  ;;  %v11975_v46 = vmax.f32 %v23678_v38, %v11845_v43  ;;  %v11976_v2 = vmax.f32 %v23708_v20, %v11847_v41  ;;  %v17177_v37 = vpop.f32.mrb[110].mxu0  ;;  %v12072_v48 = vmax.f32 %v12019_v61, 0.0  ;;  %v25705_v61 = vld [vmem:[#allocation46_spill] sm:$0xff] }
 0xcb2   : > { %v11856_v39 = vrot.slane %v23744_v9, 1  ;;  %v11862_v54 = vrot.slane %v23752_v13, 1  ;;  %v12127_v35 = vpack.c.bf16 %v12087_v27, %v12086_v5  ;;  %v11412_v47 = vadd.f32 %v11411_v24, %v25703_v26  ;;  %v11414_v51 = vpop.f32.mrb[111].mxu0 }
 0xcb3   : > { %v11606_v30 = vrot.slane %v23767_v18, 6  ;;  %v12035_v22 = vadd.f32 %v23485_v19, %v11975_v46  ;;  %v12036_v33 = vadd.f32 %v23485_v19, %v11976_v2  ;;  %v23778_v38 = vadd.f32 %v17177_v37, %v25704_v49 }
 0xcb4   : > { %16498 = vmatprep.subr.bf16.mxu0 %v12127_v35  ;;  %v11602_v20 = vrot.slane %v11412_v47, 6  ;;  %v23781_v8 = vadd.f32 %v11414_v51, %v25705_v61  ;;  %v12073_v14 = vmax.f32 %v12020_v4, 0.0  ;;  %v11714_v29 = vmax.f32 %v23660_v12, %v23702_v53  ;;  %v25706_v51 = vld [vmem:[#allocation54_spill] sm:$0xff] }
 0xcb5   : > { %16499 = vmatpush3.bf16.msra.mxu0 %v23628_v34  ;;  %v12088_v21 = vmax.f32 %v12035_v22, 0.0  ;;  %v12089_v60 = vmax.f32 %v12036_v33, 0.0  ;;  %v11608_v23 = vrot.slane %v23778_v38, 6  ;;  %v11817_v59 = vsel %vm2731_vm3, %v11814_v58, %v11816_v55  ;;  %v25707_v61 = vld [vmem:[#allocation50_spill] sm:$0xff] }
 0xcb6   : > { %v11603_v17 = vsel %vm11526_vm11, %v11600_v0, %v11602_v20  ;;  %v11604_v43 = vrot.slane %v23781_v8, 6  ;;  %v12120_v41 = vpack.c.bf16 %v12073_v14, %v12072_v48  ;;  %v11848_v31 = vrot.slane %v11714_v29, 1 }
 0xcb7   : > { %v12128_v57 = vpack.c.bf16 %v12089_v60, %v12088_v21  ;;  %v23794_v12 = vmax.f32 %v11399_v44, %v11603_v17  ;;  %v11609_v34 = vsel %vm11526_vm11, %v11606_v30, %v11608_v23  ;;  %v11819_v53 = vsel %vm2731_vm3, %v11816_v55, %v11818_v45  ;;  %v17180_v15 = vpop.f32.mrb[112].mxu0 }
 0xcb8   : > { %v23802_v4 = vmax.f32 %v11412_v47, %v11609_v34  ;;  %v11605_v58 = vsel %vm11526_vm11, %v11602_v20, %v11604_v43  ;;  %v11607_v0 = vsel %vm11526_vm11, %v11604_v43, %v11606_v30  ;;  %v11849_v44 = vsel %vm2731_vm3, %v11846_v52, %v11848_v31  ;;  %v11427_v5 = vpop.f32.mrb[113].mxu0 }
 0xcb9   : > { %v11858_v27 = vrot.slane %v23761_v62, 1  ;;  %16500 = vmatprep.subr.bf16.mxu0 %v12128_v57  ;;  %v23811_v24 = vmax.f32 %v23720_v16, %v11605_v58  ;;  %v23814_v55 = vmax.f32 %v23733_v10, %v11607_v0  ;;  %v11851_v46 = vsel %vm2731_vm3, %v11848_v31, %v11850_v63  ;;  %v17181_v2 = vpop.f32.mrb[114].mxu0  ;;  %v25709_v57 = vld [vmem:[#allocation57_spill] sm:$0xff] }
 0xcba   : > { %v11860_v37 = vrot.slane %v23764_v25, 1  ;;  %16501 = vmatpush3.bf16.msra.mxu0 %v12120_v41  ;;  %v11977_v52 = vmax.f32 %v23673_v36, %v11849_v44  ;;  %v11978_v48 = vmax.f32 %v11714_v29, %v11851_v46  ;;  %v11961_v35 = vmax.f32 %v23524_v11, %v11817_v59  ;;  %v11430_v26 = vpop.f32.mrb[115].mxu0  ;;  %v25708_v29 = vld [vmem:[#allocation61_spill] sm:$0xff] }
 0xcbb   : > { %v11864_v16 = vrot.slane %v23794_v12, 1  ;;  %v11870_v47 = vrot.slane %v23802_v4, 1  ;;  %v11962_v10 = vmax.f32 %v23554_v1, %v11819_v53  ;;  %v23826_v30 = vadd.f32 %v17180_v15, %v25706_v51 }
 0xcbc   : > { %v12037_v22 = vadd.f32 %v23485_v19, %v11977_v52  ;;  %v12038_v33 = vadd.f32 %v23485_v19, %v11978_v48  ;;  %v12021_v49 = vadd.f32 %v23485_v19, %v11961_v35  ;;  %v11716_v36 = vmax.f32 %v23656_v50, %v23714_v32 }
 0xcbd   : > { %v12022_v11 = vadd.f32 %v23485_v19, %v11962_v10  ;;  %v11614_v20 = vrot.slane %v23826_v30, 6  ;;  %v11428_v14 = vadd.f32 %v11427_v5, %v25707_v61  ;;  %v23837_v1 = vadd.f32 %v17181_v2, %v25708_v29 }
 0xcbe   : > { %v12090_v21 = vmax.f32 %v12037_v22, 0.0  ;;  %v12091_v60 = vmax.f32 %v12038_v33, 0.0  ;;  %v12074_v59 = vmax.f32 %v12021_v49, 0.0  ;;  %v11852_v17 = vrot.slane %v11716_v36, 1 }
 0xcbf   : > { %v12075_v43 = vmax.f32 %v12022_v11, 0.0  ;;  %v11610_v41 = vrot.slane %v11428_v14, 6  ;;  %v11616_v31 = vrot.slane %v23837_v1, 6  ;;  %v23841_v34 = vadd.f32 %v11430_v26, %v25709_v57  ;;  %v17184_v50 = vpop.f32.mrb[116].mxu0 }
 0xcc0   : > { %v12129_v32 = vpack.c.bf16 %v12091_v60, %v12090_v21  ;;  %v11853_v53 = vsel %vm2731_vm3, %v11850_v63, %v11852_v17  ;;  %v11855_v15 = vsel %vm2731_vm3, %v11852_v17, %v11854_v6  ;;  %v11821_v58 = vsel %vm2731_vm3, %v11818_v45, %v11820_v28  ;;  %v11443_v0 = vpop.f32.mrb[117].mxu0 }
 0xcc1   : > { %v12121_v44 = vpack.c.bf16 %v12075_v43, %v12074_v59  ;;  %v11979_v5 = vmax.f32 %v23717_v7, %v11853_v53  ;;  %v11980_v46 = vmax.f32 %v11716_v36, %v11855_v15  ;;  %v11611_v2 = vsel %vm11526_vm11, %v11608_v23, %v11610_v41  ;;  %v17185_v52 = vpop.f32.mrb[118].mxu0  ;;  %v25712_v15 = vld [vmem:[#allocation58_spill] sm:$0xff] }
 0xcc2   : > { %16502 = vmatprep.subr.bf16.mxu0 %v12129_v32  ;;  %v23857_v63 = vmax.f32 %v23781_v8, %v11611_v2  ;;  %v11617_v48 = vsel %vm11526_vm11, %v11614_v20, %v11616_v31  ;;  %v11612_v35 = vrot.slane %v23841_v34, 6  ;;  %v25710_v45 = vrot.slane %v23561_v42, 1  ;;  %v11446_v26 = vpop.f32.mrb[119].mxu0  ;;  %v25711_v32 = vld [vmem:[#allocation62_spill] sm:$0xff]  ;;  %v25714_v2 = vld [vmem:[#allocation65_spill] sm:$0xff] }
 0xcc3   : > { %16503 = vmatpush3.bf16.msra.mxu0 %v12121_v44  ;;  %v12039_v23 = vadd.f32 %v23485_v19, %v11979_v5  ;;  %v12040_v10 = vadd.f32 %v23485_v19, %v11980_v46  ;;  %v23870_v8 = vmax.f32 %v11428_v14, %v11617_v48  ;;  %v11963_v51 = vmax.f32 %v23567_v40, %v11821_v58  ;;  %v25713_v44 = vld [vmem:[#allocation66_spill] sm:$0xff] }
 0xcc4   : > { %v11823_v7 = vsel %vm2731_vm3, %v11820_v28, %v25710_v45  ;;  %v11866_v22 = vrot.slane %v23811_v24, 1  ;;  %v11613_v33 = vsel %vm11526_vm11, %v11610_v41, %v11612_v35  ;;  %v11615_v42 = vsel %vm11526_vm11, %v11612_v35, %v11614_v20 }
 0xcc5   : > { %v11964_v49 = vmax.f32 %v23569_v3, %v11823_v7  ;;  %v11868_v28 = vrot.slane %v23814_v55, 1  ;;  %v12092_v36 = vmax.f32 %v12039_v23, 0.0  ;;  %v12093_v11 = vmax.f32 %v12040_v10, 0.0 }
 0xcc6   : > { %v23879_v61 = vmax.f32 %v23767_v18, %v11613_v33  ;;  %v23882_v14 = vmax.f32 %v23778_v38, %v11615_v42  ;;  %v12023_v40 = vadd.f32 %v23485_v19, %v11963_v51  ;;  %v11857_v3 = vsel %vm2731_vm3, %v11854_v6, %v11856_v39  ;;  %v19138_v51 = vld [vmem:[%s25497_s6 + $0x24] ss:$16 sps:$4 sm:$0xff]  }
 0xcc7   : > { %v12024_v29 = vadd.f32 %v23485_v19, %v11964_v49  ;;  %v12130_v20 = vpack.c.bf16 %v12093_v11, %v12092_v36  ;;  %v11872_v21 = vrot.slane %v23857_v63, 1  ;;  %v11859_v18 = vsel %vm2731_vm3, %v11856_v39, %v11858_v27  ;;  %v17188_v60 = vpop.f32.mrb[120].mxu0 }
 0xcc8   : > { %v11981_v38 = vmax.f32 %v23710_v56, %v11857_v3  ;;  %v11878_v59 = vrot.slane %v23870_v8, 1  ;;  %v12076_v17 = vmax.f32 %v12023_v40, 0.0  ;;  %v11982_v41 = vmax.f32 %v23744_v9, %v11859_v18  ;;  %v11459_v57 = vpop.f32.mrb[121].mxu0 }
 0xcc9   : > { %v12077_v43 = vmax.f32 %v12024_v29, 0.0  ;;  %16504 = vmatprep.subr.bf16.mxu0 %v12130_v20  ;;  %v23902_v53 = vadd.f32 %v17184_v50, %v25711_v32  ;;  %v11444_v58 = vadd.f32 %v11443_v0, %v25712_v15  ;;  %v23906_v39 = vadd.f32 %v17185_v52, %v25713_v44  ;;  %v17189_v56 = vpop.f32.mrb[122].mxu0  ;;  %v19133_v0 = vld [vmem:[%s25497_s6] ss:$16 sps:$4 sm:$0xff]  }
 0xcca   : > { %v12041_v6 = vadd.f32 %v23485_v19, %v11981_v38  ;;  %v12042_v46 = vadd.f32 %v23485_v19, %v11982_v41  ;;  %v23910_v48 = vadd.f32 %v11446_v26, %v25714_v2  ;;  %v11861_v9 = vsel %vm2731_vm3, %v11858_v27, %v11860_v37  ;;  %v11462_v50 = vpop.f32.mrb[123].mxu0  ;;  %v25716_v32 = vld [vmem:[#allocation8_spill] sm:$0xff] }
 0xccb   : > { %v12122_v5 = vpack.c.bf16 %v12077_v43, %v12076_v17  ;;  %v11622_v35 = vrot.slane %v23902_v53, 6  ;;  %v11618_v45 = vrot.slane %v11444_v58, 6  ;;  %v11624_v7 = vrot.slane %v23906_v39, 6 }
 0xccc   : > { %v12094_v52 = vmax.f32 %v12041_v6, 0.0  ;;  %v12095_v26 = vmax.f32 %v12042_v46, 0.0  ;;  %v11620_v23 = vrot.slane %v23910_v48, 6  ;;  %v11863_v27 = vsel %vm2731_vm3, %v11860_v37, %v11862_v54  ;;  %v25718_v46 = vld [vmem:[#allocation9_spill] sm:$0xff] }
 0xccd   : > { %16505 = vmatpush3.bf16.msra.mxu0 %v12122_v5  ;;  %v11983_v10 = vmax.f32 %v23761_v62, %v11861_v9  ;;  %v25715_v33 = vmov 0   ;;  %v11619_v42 = vsel %vm11526_vm11, %v11616_v31, %v11618_v45  ;;  %v11625_v49 = vsel %vm11526_vm11, %v11622_v35, %v11624_v7 }
 0xcce   : > { %12513 = vmatprep.subr.bf16.mxu0 %v25715_v33  ;;  %v11984_v36 = vmax.f32 %v23764_v25, %v11863_v27  ;;  %v11865_v62 = vsel %vm2731_vm3, %v11862_v54, %v11864_v16  ;;  %v12131_v37 = vpack.c.bf16 %v12095_v26, %v12094_v52  ;;  %v23944_v11 = vmax.f32 %v23841_v34, %v11619_v42 }
 0xccf   : > { %v23946_v40 = vmax.f32 %v11444_v58, %v11625_v49  ;;  %v11621_v29 = vsel %vm11526_vm11, %v11618_v45, %v11620_v23  ;;  %v11623_v31 = vsel %vm11526_vm11, %v11620_v23, %v11622_v35  ;;  %v12043_v25 = vadd.f32 %v23485_v19, %v11983_v10  ;;  %v25717_v58 = vld [vmem:[#allocation69_spill] sm:$0xff] }
 0xcd0   : > { %12434 = vmatmul.mubr.bf16.vlgmr.msra.gmra.mrb[124].mxu0 %v19133_v0  ;;  %v23951_v3 = vmax.f32 %v23826_v30, %v11621_v29  ;;  %v12044_v20 = vadd.f32 %v23485_v19, %v11984_v36  ;;  %v11874_v54 = vrot.slane %v23879_v61, 1  ;;  %v23958_v18 = vmax.f32 %v23837_v1, %v11623_v31 }
 0xcd1   : > { %12514 = vmatpush1.bf16.msra.mxu0 %v12131_v37  ;;  %v11886_v34 = vrot.slane %v23946_v40, 1  ;;  %12441 = vmatprep.mubr.bf16.mxu0 %v19138_v51  ;;  %v11867_v30 = vsel %vm2731_vm3, %v11864_v16, %v11866_v22  ;;  %v12096_v17 = vmax.f32 %v12043_v25, 0.0  ;;  %v11985_v41 = vmax.f32 %v23752_v13, %v11865_v62  ;;  %v19136_v16 = vld [vmem:[%s25497_s6 + $0x20] ss:$16 sps:$4 sm:$0xff]  }
 0xcd2   : > { %12515 = vmatprep.subr.bf16.mxu0 %v25715_v33  ;;  %v11882_v38 = vrot.slane %v23951_v3, 1  ;;  %v12097_v43 = vmax.f32 %v12044_v20, 0.0  ;;  %v11884_v6 = vrot.slane %v23958_v18, 1  ;;  %v11986_v1 = vmax.f32 %v23794_v12, %v11867_v30 }
 0xcd3   : > { %v11468_v15 = vadd.f32 %v17188_v60, %v25716_v32  ;;  %v11460_v44 = vadd.f32 %v11459_v57, %v25717_v58  ;;  %v12045_v5 = vadd.f32 %v23485_v19, %v11985_v41  ;;  %v11463_v2 = vadd.f32 %v11462_v50, %v25718_v46  ;;  %v19141_v50 = vld [vmem:[%s25497_s6 + $0x44] ss:$16 sps:$4 sm:$0xff]  }
 0xcd4   : > { %v12132_v56 = vpack.c.bf16 %v12097_v43, %v12096_v17  ;;  %v11869_v13 = vsel %vm2731_vm3, %v11866_v22, %v11868_v28  ;;  %v23985_v12 = vsel %vm2731_vm3, %v11882_v38, %v11884_v6  ;;  %v23990_v60 = vsel %vm2731_vm3, %v11884_v6, %v11886_v34 }
 0xcd5   : > { %v12046_v57 = vadd.f32 %v23485_v19, %v11986_v1  ;;  %v11630_v9 = vrot.slane %v11468_v15, 6  ;;  %v11995_v22 = vmax.f32 %v23951_v3, %v23985_v12  ;;  %v11996_v0 = vmax.f32 %v23958_v18, %v23990_v60  ;;  %v19144_v15 = vld [vmem:[%s25497_s6 + $0x64] ss:$16 sps:$4 sm:$0xff]   ;;  %v19142_v18 = vld [vmem:[%s25497_s6 + $0x60] ss:$16 sps:$4 sm:$0xff]  }
 0xcd6   : > { %12516 = vmatpush1.bf16.msra.mxu0 %v12132_v56  ;;  %v12098_v52 = vmax.f32 %v12045_v5, 0.0  ;;  %v11626_v35 = vrot.slane %v11460_v44, 6  ;;  %v11628_v23 = vrot.slane %v11463_v2, 6  ;;  %v11871_v27 = vsel %vm2731_vm3, %v11868_v28, %v11870_v47  ;;  %v19304_v2 = vld [vmem:[%s25496_s5] ss:$0 sm:$0xff] }
 0xcd7   : > { %12517 = vmatprep.subr.bf16.mxu0 %v25715_v33  ;;  %v12099_v45 = vmax.f32 %v12046_v57, 0.0  ;;  %v24001_v26 = vmax.f32 %v11460_v44, %v11630_v9  ;;  %v11987_v51 = vmax.f32 %v23811_v24, %v11869_v13  ;;  %v11988_v42 = vmax.f32 %v23814_v55, %v11871_v27 }
 0xcd8   : > { %12442 = vmatmul.mubr.bf16.gmra.mrb[128].mxu0 %v19136_v16  ;;  %v11627_v10 = vsel %vm11526_vm11, %v11624_v7, %v11626_v35  ;;  %v11873_v49 = vsel %vm2731_vm3, %v11870_v47, %v11872_v21  ;;  %v11876_v36 = vrot.slane %v23882_v14, 1  ;;  %v11629_v28 = vsel %vm11526_vm11, %v11626_v35, %v11628_v23 }
 0xcd9   : > { %v12133_v62 = vpack.c.bf16 %v12099_v45, %v12098_v52  ;;  %v24018_v37 = vmax.f32 %v23910_v48, %v11627_v10  ;;  %12449 = vmatprep.mubr.bf16.mxu0 %v19141_v50  ;;  %v11631_v7 = vsel %vm11526_vm11, %v11628_v23, %v11630_v9  ;;  %v11735_v24 = vmax.f32 %v23902_v53, %v11629_v28 }
 0xcda   : > { %v12047_v55 = vadd.f32 %v23485_v19, %v11987_v51  ;;  %v12048_v29 = vadd.f32 %v23485_v19, %v11988_v42  ;;  %v11880_v31 = vrot.slane %v23944_v11, 1  ;;  %v11736_v47 = vmax.f32 %v23906_v39, %v11631_v7  ;;  %v19139_v39 = vld [vmem:[%s25497_s6 + $0x40] ss:$16 sps:$4 sm:$0xff]  }
 0xcdb   : > { %12518 = vmatpush1.bf16.msra.mxu0 %v12133_v62  ;;  %v11875_v48 = vsel %vm2731_vm3, %v11872_v21, %v11874_v54  ;;  %v11890_v25 = vrot.slane %v11735_v24, 1  ;;  %v11989_v30 = vmax.f32 %v23802_v4, %v11873_v49  ;;  %v11894_v17 = vrot.slane %v24001_v26, 1  ;;  %v19147_v49 = vld [vmem:[%s25497_s6 + $0x84] ss:$16 sps:$4 sm:$0xff]  }
 0xcdc   : > { %12519 = vmatprep.subr.bf16.mxu0 %v25715_v33  ;;  %v12100_v20 = vmax.f32 %v12047_v55, 0.0  ;;  %v12101_v53 = vmax.f32 %v12048_v29, 0.0  ;;  %v11892_v43 = vrot.slane %v11736_v47, 1  ;;  %v11990_v41 = vmax.f32 %v23857_v63, %v11875_v48  ;;  %v19145_v48 = vld [vmem:[%s25497_s6 + $0x80] ss:$16 sps:$4 sm:$0xff]  }
 0xcdd   : > { %v11877_v21 = vsel %vm2731_vm3, %v11874_v54, %v11876_v36  ;;  %v12049_v1 = vadd.f32 %v23485_v19, %v11989_v30  ;;  %v11879_v4 = vsel %vm2731_vm3, %v11876_v36, %v11878_v59  ;;  %v11888_v44 = vrot.slane %v24018_v37, 1 }
 0xcde   : > { %v12134_v6 = vpack.c.bf16 %v12101_v53, %v12100_v20  ;;  %v11991_v32 = vmax.f32 %v23879_v61, %v11877_v21  ;;  %v11893_v58 = vsel %vm2731_vm3, %v11890_v25, %v11892_v43  ;;  %v11895_v63 = vsel %vm2731_vm3, %v11892_v43, %v11894_v17  ;;  %v19150_v20 = vld [vmem:[%s25497_s6 + $0xa4] ss:$16 sps:$4 sm:$0xff]   ;;  %v19148_v53 = vld [vmem:[%s25497_s6 + $0xa0] ss:$16 sps:$4 sm:$0xff]  }
 0xcdf   : > { %v12050_v54 = vadd.f32 %v23485_v19, %v11990_v41  ;;  %v11999_v56 = vmax.f32 %v11735_v24, %v11893_v58  ;;  %v12000_v16 = vmax.f32 %v11736_v47, %v11895_v63  ;;  %v11992_v5 = vmax.f32 %v23882_v14, %v11879_v4  ;;  %v19151_v41 = vld [vmem:[%s25497_s6 + $0xc0] ss:$16 sps:$4 sm:$0xff]   ;;  %v19156_v21 = vld [vmem:[%s25497_s6 + $0xe4] ss:$16 sps:$4 sm:$0xff]   ;;  %v19164_v63 = vld [vmem:[%s25497_s6 + $0xc] ss:$16 sps:$4 sm:$0xff]  }
 0xce0   : > { %12520 = vmatpush1.bf16.msra.mxu0 %v12134_v6  ;;  %v12102_v61 = vmax.f32 %v12049_v1, 0.0  ;;  %v12051_v13 = vadd.f32 %v19304_v2, %v11991_v32  ;;  %v11881_v19 = vsel %vm2731_vm3, %v11878_v59, %v11880_v31  ;;  %v11883_v14 = vsel %vm2731_vm3, %v11880_v31, %v11882_v38  ;;  %v19154_v6 = vld [vmem:[%s25497_s6 + $0xe0] ss:$16 sps:$4 sm:$0xff]   ;;  %v19159_v1 = vld [vmem:[%s25497_s6 + $0x104] ss:$16 sps:$4 sm:$0xff]  }
 0xce1   : > { %12450 = vmatmul.mubr.bf16.gmra.mrb[132].mxu0 %v19139_v39  ;;  %12521 = vmatprep.subr.bf16.mxu0 %v25715_v33  ;;  %v12103_v46 = vmax.f32 %v12050_v54, 0.0  ;;  %v12052_v12 = vadd.f32 %v19304_v2, %v11992_v5  ;;  %v11993_v57 = vmax.f32 %v23870_v8, %v11881_v19  ;;  %v12055_v9 = vadd.f32 %v19304_v2, %v11995_v22  ;;  %v12178_v4 = vld [vmem:[%s25497_s6 + $0x120] sm:$0x11]  ;;  %v19162_v54 = vld [vmem:[%s25497_s6 + $0x8] ss:$16 sps:$4 sm:$0xff]  }
 0xce2   : > { %12457 = vmatprep.mubr.bf16.mxu0 %v19144_v15  ;;  %v12104_v52 = vmax.f32 %v12051_v13, 0.0  ;;  %v11994_v35 = vmax.f32 %v23944_v11, %v11883_v14  ;;  %v12056_v45 = vadd.f32 %v19304_v2, %v11996_v0  ;;  %v11889_v3 = vsel %vm2731_vm3, %v11886_v34, %v11888_v44  ;;  %v19157_v32 = vld [vmem:[%s25497_s6 + $0x100] ss:$16 sps:$4 sm:$0xff]   ;;  %v19168_v5 = vld [vmem:[%s25497_s6 + $0x48] ss:$16 sps:$4 sm:$0xff]  }
 0xce3   : > { %v12135_v50 = vpack.c.bf16 %v12103_v46, %v12102_v61  ;;  %v12105_v23 = vmax.f32 %v12052_v12, 0.0  ;;  %v12053_v27 = vadd.f32 %v19304_v2, %v11993_v57  ;;  %v12108_v59 = vmax.f32 %v12055_v9, 0.0  ;;  %v19173_v61 = vld [vmem:[%s25497_s6 + $0x6c] ss:$16 sps:$4 sm:$0xff]   ;;  %v19171_v46 = vld [vmem:[%s25497_s6 + $0x68] ss:$16 sps:$4 sm:$0xff]  }
 0xce4   : > { %v12054_v38 = vadd.f32 %v19304_v2, %v11994_v35  ;;  %v12109_v10 = vmax.f32 %v12056_v45, 0.0  ;;  %v11891_v8 = vsel %vm2731_vm3, %v11888_v44, %v11890_v25  ;;  %v11997_v22 = vmax.f32 %v23946_v40, %v11889_v3  ;;  %v19167_v44 = vld [vmem:[%s25497_s6 + $0x2c] ss:$16 sps:$4 sm:$0xff]   ;;  %v19174_v13 = vld [vmem:[%s25497_s6 + $0x88] ss:$16 sps:$4 sm:$0xff]  }
 0xce5   : > { %12522 = vmatpush1.bf16.msra.mxu0 %v12135_v50  ;;  %v12136_v11 = vpack.c.bf16 %v12105_v23, %v12104_v52  ;;  %v12106_v60 = vmax.f32 %v12053_v27, 0.0  ;;  %v11998_v0 = vmax.f32 %v24018_v37, %v11891_v8  ;;  %v12059_v51 = vadd.f32 %v19304_v2, %v11999_v56  ;;  %v19165_v56 = vld [vmem:[%s25497_s6 + $0x28] ss:$16 sps:$4 sm:$0xff]   ;;  %v19179_v19 = vld [vmem:[%s25497_s6 + $0xac] ss:$16 sps:$4 sm:$0xff]  }
 0xce6   : > { %12523 = vmatprep.subr.bf16.mxu0 %v25715_v33  ;;  %v12107_v42 = vmax.f32 %v12054_v38, 0.0  ;;  %v12138_v34 = vpack.c.bf16 %v12109_v10, %v12108_v59  ;;  %v12057_v36 = vadd.f32 %v19304_v2, %v11997_v22  ;;  %v12060_v62 = vadd.f32 %v19304_v2, %v12000_v16  ;;  %v19170_v16 = vld [vmem:[%s25497_s6 + $0x4c] ss:$16 sps:$4 sm:$0xff]   ;;  %v19177_v12 = vld [vmem:[%s25497_s6 + $0xa8] ss:$16 sps:$4 sm:$0xff]  }
 0xce7   : > { %v12058_v40 = vadd.f32 %v19304_v2, %v11998_v0  ;;  %v12112_v28 = vmax.f32 %v12059_v51, 0.0  ;;  %v12001_v37 = vmax.f32 %v24001_v26, %v11894_v17  ;;  %v19153_v17 = vld [vmem:[%s25497_s6 + $0xc4] ss:$16 sps:$4 sm:$0xff]   ;;  %v12397_v43 = vsel %vm12395_vm12, 65535, %v25715_v33  ;;  %v19182_v14 = vld [vmem:[%s25497_s6 + $0xcc] ss:$16 sps:$4 sm:$0xff]  }
 0xce8   : > { %v12137_v7 = vpack.c.bf16 %v12107_v42, %v12106_v60  ;;  %v12113_v24 = vmax.f32 %v12060_v62, 0.0  ;;  %v12110_v55 = vmax.f32 %v12057_v36, 0.0  ;;  %v16162_v15 = vcombine.high %v12178_v4, %v12178_v4  ;;  %v19180_v57 = vld [vmem:[%s25497_s6 + $0xc8] ss:$16 sps:$4 sm:$0xff]   ;;  %v19185_v9 = vld [vmem:[%s25497_s6 + $0xec] ss:$16 sps:$4 sm:$0xff]  }
 0xce9   : > { %12524 = vmatpush1.bf16.msra.mxu0 %v12136_v11  ;;  %v12111_v29 = vmax.f32 %v12058_v40, 0.0  ;;  %v12061_v25 = vadd.f32 %v19304_v2, %v12001_v37  ;;  %v16161_v58 = vcombine.low %v12178_v4, %v12178_v4  ;;  %v19176_v2 = vld [vmem:[%s25497_s6 + $0x8c] ss:$16 sps:$4 sm:$0xff]   ;;  %v19183_v50 = vld [vmem:[%s25497_s6 + $0xe8] ss:$16 sps:$4 sm:$0xff]  }
 0xcea   : > { %12458 = vmatmul.mubr.bf16.gmra.mrb[136].mxu0 %v19142_v18  ;;  %12525 = vmatprep.subr.bf16.mxu0 %v25715_v33  ;;  %v12140_v31 = vpack.c.bf16 %v12113_v24, %v12112_v28  ;;  %v19188_v52 = vld [vmem:[%s25497_s6 + $0x10c] ss:$16 sps:$4 sm:$0xff]   ;;  %v19186_v45 = vld [vmem:[%s25497_s6 + $0x108] ss:$16 sps:$4 sm:$0xff]  }
 0xceb   : > { %12465 = vmatprep.mubr.bf16.mxu0 %v19147_v49  ;;  %v12139_v47 = vpack.c.bf16 %v12111_v29, %v12110_v55  ;;  %v12114_v26 = vmax.f32 %v12061_v25, 0.0  ;;  %v12179_v35 = vld [vmem:[%s25497_s6 + $0x128] sm:$0x11] }
 0xcec   : > { %v16164_v23 = vcombine.high %v12179_v35, %v12179_v35  ;;  %v16163_v27 = vcombine.low %v12179_v35, %v12179_v35 }
 0xced   : > { %12526 = vmatpush1.bf16.msra.mxu0 %v12137_v7  ;;  %v12141_v30 = vpack.c.bf16 %v12114_v26, %v12114_v26 }
 0xcee   : > { %12527 = vmatprep.subr.bf16.mxu0 %v25715_v33 }
 0xcef   : > { %v12399_v39 = vand.u32 %v12397_v43, %v12141_v30 }
 0xcf1   : > { %12528 = vmatpush1.bf16.msra.mxu0 %v12138_v34 }
 0xcf2   : > { %12466 = vmatmul.mubr.bf16.gmra.mrb[140].mxu0 %v19145_v48  ;;  %12529 = vmatprep.subr.bf16.mxu0 %v25715_v33 }
 0xcf3   : > { %12473 = vmatprep.mubr.bf16.mxu0 %v19150_v20 }
 0xcf5   : > { %12530 = vmatpush1.bf16.msra.mxu0 %v12139_v47 }
 0xcf6   : > { %12531 = vmatprep.subr.bf16.mxu0 %v25715_v33 }
 0xcf9   : > { %12532 = vmatpush1.bf16.msra.mxu0 %v12140_v31 }
 0xcfa   : > { %12474 = vmatmul.mubr.bf16.gmra.mrb[144].mxu0 %v19148_v53  ;;  %12533 = vmatprep.subr.bf16.mxu0 %v25715_v33 }
 0xcfb   : > { %12481 = vmatprep.mubr.bf16.mxu0 %v19153_v17 }
 0xcfd   : > { %12534 = vmatpush1.bf16.msra.mxu0 %v12399_v39 }
 0xd02   : > { %12482 = vmatmul.mubr.bf16.gmra.mrb[148].mxu0 %v19151_v41 }
 0xd03   : > { %12489 = vmatprep.mubr.bf16.mxu0 %v19156_v21 }
 0xd0a   : > { %12490 = vmatmul.mubr.bf16.gmra.mrb[152].mxu0 %v19154_v6 }
 0xd0b   : > { %12497 = vmatprep.mubr.bf16.mxu0 %v19159_v1 }
 0xd12   : > { %12498 = vmatmul.mubr.bf16.gmra.mrb[156].mxu0 %v19157_v32 }
 0xd13   : > { %12505 = vmatprep.mubr.bf16.mxu0 %v16162_v15 }
 0xd1a   : > { %12506 = vmatmul.mubr.bf16.gmra.mrb[160].mxu0 %v16161_v58 }
 0xd1b   : > { %16165 = vmatprep.mubr.msk.bf16.mxu0 %vm12364_vm13, %v19164_v63 }
 0xd22   : > { %12546 = vmatmul.mubr.bf16.vlgmr.msra.gmra.mrb[164].mxu0 %v19162_v54 }
 0xd23   : > { %16166 = vmatprep.mubr.msk.bf16.mxu0 %vm12364_vm13, %v19167_v44 }
 0xd2a   : > { %12554 = vmatmul.mubr.bf16.gmra.mrb[168].mxu0 %v19165_v56 }
 0xd2b   : > { %16167 = vmatprep.mubr.msk.bf16.mxu0 %vm12364_vm13, %v19170_v16 }
 0xd32   : > { %12562 = vmatmul.mubr.bf16.gmra.mrb[172].mxu0 %v19168_v5 }
 0xd33   : > { %16168 = vmatprep.mubr.msk.bf16.mxu0 %vm12364_vm13, %v19173_v61  ;;  %v19191_v61 = vld [vmem:[%s25498_s7 + $0x40] sm:$0xff]  }
 0xd34   : > { %16566 = vmatprep.subr.bf16.mxu0 %v19191_v61 }
 0xd3a   : > { %12570 = vmatmul.mubr.bf16.gmra.mrb[176].mxu0 %v19171_v46  ;;  %v19192_v46 = vld [vmem:[%s25498_s7] sm:$0xff]  }
 0xd3b   : > { %16169 = vmatprep.mubr.msk.bf16.mxu0 %vm12364_vm13, %v19176_v2  ;;  %v19193_v2 = vld [vmem:[%s25498_s7 + $0x48] sm:$0xff]   ;;  %16567 = vmatpush3.bf16.msra.mxu0 %v19192_v46 }
 0xd3c   : > { %16568 = vmatprep.subr.bf16.mxu0 %v19193_v2 }
 0xd42   : > { %12578 = vmatmul.mubr.bf16.gmra.mrb[180].mxu0 %v19174_v13  ;;  %v19194_v13 = vld [vmem:[%s25498_s7 + $0x8] sm:$0xff]  }
 0xd43   : > { %16170 = vmatprep.mubr.msk.bf16.mxu0 %vm12364_vm13, %v19179_v19  ;;  %16569 = vmatpush3.bf16.msra.mxu0 %v19194_v13 }
 0xd4a   : > { %12586 = vmatmul.mubr.bf16.gmra.mrb[184].mxu0 %v19177_v12  ;;  %v19195_v12 = vld [vmem:[%s25498_s7 + $0x50] sm:$0xff]  }
 0xd4b   : > { %16171 = vmatprep.mubr.msk.bf16.mxu0 %vm12364_vm13, %v19182_v14  ;;  %16570 = vmatprep.subr.bf16.mxu0 %v19195_v12 }
 0xd52   : > { %12594 = vmatmul.mubr.bf16.gmra.mrb[188].mxu0 %v19180_v57 }
 0xd53   : > { %16172 = vmatprep.mubr.msk.bf16.mxu0 %vm12364_vm13, %v19185_v9 }
 0xd5a   : > { %12602 = vmatmul.mubr.bf16.gmra.mrb[192].mxu0 %v19183_v50 }
 0xd5b   : > { %16173 = vmatprep.mubr.msk.bf16.mxu0 %vm12364_vm13, %v19188_v52  ;;  %v19196_v52 = vld [vmem:[%s25498_s7 + $0x10] sm:$0xff]  }
 0xd5c   : > { %16571 = vmatpush3.bf16.msra.mxu0 %v19196_v52 }
 0xd62   : > { %12610 = vmatmul.mubr.bf16.gmra.mrb[196].mxu0 %v19186_v45  ;;  %v19197_v45 = vld [vmem:[%s25498_s7 + $0x58] sm:$0xff]  }
 0xd63   : > { %16174 = vmatprep.mubr.msk.bf16.mxu0 %vm12364_vm13, %v16164_v23  ;;  %v19198_v23 = vld [vmem:[%s25498_s7 + $0x18] sm:$0xff]   ;;  %16572 = vmatprep.subr.bf16.mxu0 %v19197_v45 }
 0xd64   : > { %16573 = vmatpush3.bf16.msra.mxu0 %v19198_v23 }
 0xd6a   : > { %12618 = vmatmul.mubr.bf16.gmra.mrb[52].mxu0 %v16163_v27 }
 0xda3   : > { %v16506_v59 = vpop.f32.mrb[124].mxu0 }
 0xda4   : > { %v16507_v3 = vpop.f32.mrb[125].mxu0 }
 0xda5   : > { %v24191_v38 = vadd.f32 %v16507_v3, %v16506_v59  ;;  %v16509_v10 = vpop.f32.mrb[126].mxu0  ;;  %v19199_v59 = vld [vmem:[%s25498_s7 + $0x60] sm:$0xff]  }
 0xda6   : > { %v16510_v8 = vpop.f32.mrb[127].mxu0  ;;  %16574 = vmatprep.subr.bf16.mxu0 %v19199_v59 }
 0xda7   : > { %v24193_v22 = vadd.f32 %v16510_v8, %v16509_v10 }
 0xdab   : > { %v16512_v11 = vpop.f32.mrb[128].mxu0 }
 0xdac   : > { %v16513_v18 = vpop.f32.mrb[129].mxu0 }
 0xdad   : > { %v24195_v60 = vadd.f32 %v16513_v18, %v16512_v11  ;;  %v16515_v0 = vpop.f32.mrb[130].mxu0  ;;  %v19200_v18 = vld [vmem:[%s25498_s7 + $0x20] sm:$0xff]  }
 0xdae   : > { %v16516_v51 = vpop.f32.mrb[131].mxu0  ;;  %16575 = vmatpush3.bf16.msra.mxu0 %v19200_v18 }
 0xdaf   : > { %v24197_v42 = vadd.f32 %v16516_v51, %v16515_v0  ;;  %v19201_v0 = vld [vmem:[%s25498_s7 + $0x68] sm:$0xff]  }
 0xdb0   : > { %v19202_v51 = vld [vmem:[%s25498_s7 + $0x28] sm:$0xff]   ;;  %16576 = vmatprep.subr.bf16.mxu0 %v19201_v0 }
 0xdb2   : > { %16577 = vmatpush3.bf16.msra.mxu0 %v19202_v51 }
 0xdb4   : > { %v16518_v34 = vpop.f32.mrb[132].mxu0 }
 0xdb5   : > { %v16519_v49 = vpop.f32.mrb[133].mxu0 }
 0xdb6   : > { %v24199_v36 = vadd.f32 %v16519_v49, %v16518_v34  ;;  %v16521_v62 = vpop.f32.mrb[134].mxu0  ;;  %v19203_v49 = vld [vmem:[%s25498_s7 + $0x70] sm:$0xff]  }
 0xdb7   : > { %v16522_v40 = vpop.f32.mrb[135].mxu0  ;;  %16578 = vmatprep.subr.bf16.mxu0 %v19203_v49 }
 0xdb8   : > { %v24201_v28 = vadd.f32 %v16522_v40, %v16521_v62 }
 0xdbd   : > { %v16524_v7 = vpop.f32.mrb[136].mxu0 }
 0xdbe   : > { %v16525_v24 = vpop.f32.mrb[137].mxu0 }
 0xdbf   : > { %v24203_v55 = vadd.f32 %v16525_v24, %v16524_v7  ;;  %v16527_v29 = vpop.f32.mrb[138].mxu0 }
 0xdc0   : > { %v16528_v37 = vpop.f32.mrb[139].mxu0 }
 0xdc1   : > { %v24205_v31 = vadd.f32 %v16528_v37, %v16527_v29  ;;  %v19204_v37 = vld [vmem:[%s25498_s7 + $0x30] sm:$0xff]  }
 0xdc2   : > { %16579 = vmatpush3.bf16.msra.mxu0 %v19204_v37 }
 0xdc5   : > { %v16530_v47 = vpop.f32.mrb[140].mxu0 }
 0xdc6   : > { %v16531_v48 = vpop.f32.mrb[141].mxu0 }
 0xdc7   : > { %v24207_v25 = vadd.f32 %v16531_v48, %v16530_v47  ;;  %v16533_v20 = vpop.f32.mrb[142].mxu0 }
 0xdc8   : > { %v16534_v26 = vpop.f32.mrb[143].mxu0 }
 0xdc9   : > { %v24209_v53 = vadd.f32 %v16534_v26, %v16533_v20 }
 0xdcd   : > { %v16536_v30 = vpop.f32.mrb[144].mxu0 }
 0xdce   : > { %v16537_v17 = vpop.f32.mrb[145].mxu0 }
 0xdcf   : > { %v24211_v43 = vadd.f32 %v16537_v17, %v16536_v30  ;;  %v16539_v39 = vpop.f32.mrb[146].mxu0 }
 0xdd0   : > { %v16540_v41 = vpop.f32.mrb[147].mxu0 }
 0xdd1   : > { %v24213_v21 = vadd.f32 %v16540_v41, %v16539_v39  ;;  %v19206_v41 = vld [vmem:[%s25498_s7 + $0x38] sm:$0xff]  }
 0xdd5   : > { %v16542_v6 = vpop.f32.mrb[148].mxu0 }
 0xdd6   : > { %v16543_v1 = vpop.f32.mrb[149].mxu0 }
 0xdd7   : > { %v24215_v4 = vadd.f32 %v16543_v1, %v16542_v6  ;;  %v16545_v32 = vpop.f32.mrb[150].mxu0 }
 0xdd8   : > { %v16546_v15 = vpop.f32.mrb[151].mxu0 }
 0xdd9   : > { %v24217_v58 = vadd.f32 %v16546_v15, %v16545_v32 }
 0xddd   : > { %v16548_v63 = vpop.f32.mrb[152].mxu0 }
 0xdde   : > { %v16549_v54 = vpop.f32.mrb[153].mxu0 }
 0xddf   : > { %v24219_v44 = vadd.f32 %v16549_v54, %v16548_v63  ;;  %v16551_v56 = vpop.f32.mrb[154].mxu0 }
 0xde0   : > { %v16552_v16 = vpop.f32.mrb[155].mxu0 }
 0xde1   : > { %v24221_v5 = vadd.f32 %v16552_v16, %v16551_v56 }
 0xde5   : > { %v16554_v19 = vpop.f32.mrb[156].mxu0 }
 0xde6   : > { %v16555_v14 = vpop.f32.mrb[157].mxu0 }
 0xde7   : > { %v24238_v57 = vadd.f32 %v16555_v14, %v16554_v19  ;;  %v16557_v9 = vpop.f32.mrb[158].mxu0 }
 0xde8   : > { %v16558_v50 = vpop.f32.mrb[159].mxu0 }
 0xde9   : > { %v24243_v35 = vadd.f32 %v16558_v50, %v16557_v9 }
 0xded   : > { %v16560_v27 = vpop.f32.mrb[160].mxu0 }
 0xdee   : > { %v16561_v3 = vpop.f32.mrb[161].mxu0 }
 0xdef   : > { %v24254_v10 = vadd.f32 %v16561_v3, %v16560_v27  ;;  %v16563_v8 = vpop.f32.mrb[162].mxu0 }
 0xdf0   : > { %v16564_v11 = vpop.f32.mrb[163].mxu0 }
 0xdf5   : > { %v12547_v34 = vpop.f32.mrb[164].mxu0 }
 0xdf6   : > { %v12548_v62 = vadd.f32 %v24191_v38, %v12547_v34  ;;  %v12549_v40 = vpop.f32.mrb[165].mxu0  ;;  %v19205_v38 = vld [vmem:[%s25498_s7 + $0x78] sm:$0xff]  }
 0xdf7   : > { %v12550_v7 = vpop.f32.mrb[166].mxu0  ;;  %16580 = vmatprep.subr.bf16.mxu0 %v19205_v38 }
 0xdf8   : > { %v12551_v24 = vadd.f32 %v24193_v22, %v12550_v7  ;;  %v12552_v29 = vpop.f32.mrb[167].mxu0  ;;  %16581 = vmatpush3.bf16.msra.mxu0 %v19206_v41 }
 0xdfa   : > { %v24273_v47 = vpack.c.bf16 %v12551_v24, %v12548_v62 }
 0xdfc   : > { %v12647_v1 = vshll.u32 %v24273_v47, 16 }
 0xdfd   : > { %v12555_v48 = vpop.f32.mrb[168].mxu0 }
 0xdfe   : > { %v12556_v20 = vadd.f32 %v24195_v60, %v12555_v48  ;;  %v12557_v26 = vpop.f32.mrb[169].mxu0  ;;  %v12649_v2 = vrot.slane %v12647_v1, 1 }
 0xdff   : > { %v12558_v30 = vpop.f32.mrb[170].mxu0 }
 0xe00   : > { %v24279_v22 = vpack.c.bf16 %v12556_v20, %v12551_v24  ;;  %v12559_v17 = vadd.f32 %v24197_v42, %v12558_v30  ;;  %v12560_v39 = vpop.f32.mrb[171].mxu0 }
 0xe02   : > { %v24285_v6 = vpack.c.bf16 %v12559_v17, %v12556_v20  ;;  %v12786_v63 = vshrl.u32 %v24279_v22, 16  ;;  %v12789_v54 = vshll.u32 %v24279_v22, 16  ;;  %v12754_v19 = vrot.slane %v24279_v22, 2 }
 0xe04   : > { %v12652_v46 = vshll.u32 %v24285_v6, 16  ;;  %v12788_v9 = vrot.slane %v12786_v63, 2  ;;  %v12791_v50 = vrot.slane %v12789_v54, 3  ;;  %v12656_v20 = vshrl.u32 %v24285_v6, 16 }
 0xe05   : > { %v12563_v60 = vpop.f32.mrb[172].mxu0 }
 0xe06   : > { %v12564_v32 = vadd.f32 %v24199_v36, %v12563_v60  ;;  %v12565_v15 = vpop.f32.mrb[173].mxu0  ;;  %v12654_v45 = vrot.slane %v12652_v46, 1  ;;  %v12792_v51 = vor.u32 %v12791_v50, %v12788_v9 }
 0xe07   : > { %v12566_v42 = vpop.f32.mrb[174].mxu0 }
 0xe08   : > { %v24291_v56 = vpack.c.bf16 %v12564_v32, %v12559_v17  ;;  %v12567_v16 = vadd.f32 %v24201_v28, %v12566_v42  ;;  %v12568_v61 = vpop.f32.mrb[175].mxu0  ;;  %v12645_v28 = vshrl.u32 %v24273_v47, 16  ;;  %v12658_v1 = vor.u32 %v12656_v20, %v12654_v45 }
 0xe0a   : > { %v24295_v13 = vpack.c.bf16 %v12567_v16, %v12564_v32  ;;  %v12755_v36 = vrot.slane %v24291_v56, 2  ;;  %v12794_v12 = vshrl.u32 %v24291_v56, 16  ;;  %v12797_v14 = vshll.u32 %v24291_v56, 16 }
 0xe0b   : > { %v12650_v11 = vor.u32 %v12649_v2, %v12645_v28 }
 0xe0c   : > { %v12756_v52 = vsel %vm9170_vm9, %v12754_v19, %v12755_v36  ;;  %v12796_v27 = vrot.slane %v12794_v12, 2  ;;  %v12799_v59 = vrot.slane %v12797_v14, 3  ;;  %v12660_v7 = vshll.u32 %v24295_v13, 16 }
 0xe0d   : > { %v12571_v23 = vpop.f32.mrb[176].mxu0  ;;  %12769 = vrot.lane.b32.xlu0 %v12756_v52, %s19373_s30  ;;  %v12655_v62 = vsel %vm8548_vm7, %v12650_v11, %v12654_v45  ;;  %v12664_v15 = vshrl.u32 %v24295_v13, 16 }
 0xe0e   : > { %v12572_v3 = vadd.f32 %v24203_v55, %v12571_v23  ;;  %v12573_v8 = vpop.f32.mrb[177].mxu0  ;;  %v12800_v0 = vor.u32 %v12799_v59, %v12796_v27  ;;  %v12662_v26 = vrot.slane %v12660_v7, 1 }
 0xe0f   : > { %v12574_v18 = vpop.f32.mrb[178].mxu0 }
 0xe10   : > { %v24309_v34 = vpack.c.bf16 %v12572_v3, %v12567_v16  ;;  %v12575_v49 = vadd.f32 %v24205_v31, %v12574_v18  ;;  %v12576_v40 = vpop.f32.mrb[179].mxu0  ;;  %v24316_v24 = vsel %vm9254_vm10, %v12792_v51, %v12800_v0  ;;  %v12663_v16 = vsel %vm8548_vm7, %v12658_v1, %v12662_v26 }
 0xe11   : > { %12707 = vrot.lane.b32.xlu0 %v12655_v62, %s19373_s30  ;;  %v12666_v19 = vor.u32 %v12664_v15, %v12662_v26 }
 0xe12   : > { %v24318_v55 = vpack.c.bf16 %v12575_v49, %v12572_v3  ;;  %v12757_v29 = vrot.slane %v24309_v34, 2  ;;  %v12806_v37 = vshll.u32 %v24309_v34, 16  ;;  %v12803_v48 = vshrl.u32 %v24309_v34, 16 }
 0xe14   : > { %v12758_v31 = vsel %vm9170_vm9, %v12755_v36, %v12757_v29  ;;  %v12668_v30 = vshll.u32 %v24318_v55, 16  ;;  %v12808_v17 = vrot.slane %v12806_v37, 3  ;;  %v12805_v39 = vrot.slane %v12803_v48, 2 }
 0xe15   : > { %v12579_v38 = vpop.f32.mrb[180].mxu0  ;;  %12771 = vrot.lane.b32.xlu1 %v12758_v31, %s19373_s30  ;;  %v12672_v28 = vshrl.u32 %v24318_v55, 16 }
 0xe16   : > { %v12580_v41 = vadd.f32 %v24207_v25, %v12579_v38  ;;  %v12581_v60 = vpop.f32.mrb[181].mxu0  ;;  %v12809_v63 = vor.u32 %v12808_v17, %v12805_v39  ;;  %v12670_v46 = vrot.slane %v12668_v30, 1 }
 0xe17   : > { %v12582_v32 = vpop.f32.mrb[182].mxu0  ;;  %v19207_v60 = vld [vmem:[%s25498_s7 + $0xc0] sm:$0xff]  }
 0xe18   : > { %v24333_v54 = vpack.c.bf16 %v12580_v41, %v12575_v49  ;;  %v12583_v42 = vadd.f32 %v24209_v53, %v12582_v32  ;;  %v12584_v61 = vpop.f32.mrb[183].mxu0  ;;  %v24339_v2 = vsel %vm9254_vm10, %v12800_v0, %v12809_v63  ;;  %v12671_v53 = vsel %vm8548_vm7, %v12666_v19, %v12670_v46  ;;  %16630 = vmatprep.subr.bf16.mxu0 %v19207_v60 }
 0xe19   : > { %12709 = vrot.lane.b32.xlu1 %v12663_v16, %s19373_s30  ;;  %v12674_v11 = vor.u32 %v12672_v28, %v12670_v46 }
 0xe1a   : > { %v24341_v25 = vpack.c.bf16 %v12583_v42, %v12580_v41  ;;  %v12759_v36 = vrot.slane %v24333_v54, 2  ;;  %v12815_v9 = vshll.u32 %v24333_v54, 16  ;;  %v12812_v50 = vshrl.u32 %v24333_v54, 16 }
 0xe1c   : > { %v12760_v52 = vsel %vm9170_vm9, %v12757_v29, %v12759_v36  ;;  %v12676_v45 = vshll.u32 %v24341_v25, 16  ;;  %v12817_v27 = vrot.slane %v12815_v9, 3  ;;  %v12814_v59 = vrot.slane %v12812_v50, 2 }
 0xe1d   : > { %v12587_v23 = vpop.f32.mrb[184].mxu0  ;;  %12711 = vrot.lane.b32.xlu1 %v12671_v53, %s19373_s30  ;;  %12773 = vrot.lane.b32.xlu0 %v12760_v52, %s19373_s30 }
 0xe1e   : > { %v12588_v3 = vadd.f32 %v24211_v43, %v12587_v23  ;;  %v12589_v8 = vpop.f32.mrb[185].mxu0  ;;  %v12678_v18 = vrot.slane %v12676_v45, 1  ;;  %v12818_v51 = vor.u32 %v12817_v27, %v12814_v59 }
 0xe1f   : > { %v12590_v0 = vpop.f32.mrb[186].mxu0 }
 0xe20   : > { %v24357_v49 = vpack.c.bf16 %v12588_v3, %v12583_v42  ;;  %v12591_v62 = vadd.f32 %v24213_v21, %v12590_v0  ;;  %v12679_v40 = vsel %vm8548_vm7, %v12674_v11, %v12678_v18  ;;  %v12592_v7 = vpop.f32.mrb[187].mxu0  ;;  %v24363_v29 = vsel %vm9254_vm10, %v12809_v63, %v12818_v51 }
 0xe21   : > { %12713 = vrot.lane.b32.xlu1 %v12679_v40, %s19373_s30  ;;  %v12680_v21 = vshrl.u32 %v24341_v25, 16 }
 0xe22   : > { %v24365_v31 = vpack.c.bf16 %v12591_v62, %v12588_v3  ;;  %v12761_v43 = vrot.slane %v24357_v49, 2  ;;  %v12824_v20 = vshll.u32 %v24357_v49, 16  ;;  %v12821_v26 = vshrl.u32 %v24357_v49, 16 }
 0xe23   : > { %v12682_v15 = vor.u32 %v12680_v21, %v12678_v18 }
 0xe24   : > { %v12762_v30 = vsel %vm9170_vm9, %v12759_v36, %v12761_v43  ;;  %v12684_v38 = vshll.u32 %v24365_v31, 16  ;;  %v12826_v39 = vrot.slane %v12824_v20, 3  ;;  %v12823_v41 = vrot.slane %v12821_v26, 2 }
 0xe25   : > { %v12595_v17 = vpop.f32.mrb[188].mxu0  ;;  %12775 = vrot.lane.b32.xlu0 %v12762_v30, %s19373_s30 }
 0xe26   : > { %v12596_v1 = vadd.f32 %v24215_v4, %v12595_v17  ;;  %v12597_v32 = vpop.f32.mrb[189].mxu0  ;;  %v12686_v63 = vrot.slane %v12684_v38, 1  ;;  %v12827_v16 = vor.u32 %v12826_v39, %v12823_v41 }
 0xe27   : > { %v12598_v42 = vpop.f32.mrb[190].mxu0 }
 0xe28   : > { %v24382_v61 = vpack.c.bf16 %v12596_v1, %v12591_v62  ;;  %v12599_v46 = vadd.f32 %v24217_v58, %v12598_v42  ;;  %v12687_v19 = vsel %vm8548_vm7, %v12682_v15, %v12686_v63  ;;  %v12600_v36 = vpop.f32.mrb[191].mxu0  ;;  %v24388_v53 = vsel %vm9254_vm10, %v12818_v51, %v12827_v16 }
 0xe29   : > { %12715 = vrot.lane.b32.xlu1 %v12687_v19, %s19373_s30  ;;  %v12688_v58 = vshrl.u32 %v24365_v31, 16 }
 0xe2a   : > { %v24390_v52 = vpack.c.bf16 %v12599_v46, %v12596_v1  ;;  %v12763_v4 = vrot.slane %v24382_v61, 2  ;;  %v12833_v28 = vshll.u32 %v24382_v61, 16  ;;  %v12830_v45 = vshrl.u32 %v24382_v61, 16 }
 0xe2b   : > { %v12690_v0 = vor.u32 %v12688_v58, %v12686_v63 }
 0xe2c   : > { %v12764_v23 = vsel %vm9170_vm9, %v12761_v43, %v12763_v4  ;;  %v12692_v27 = vshll.u32 %v24390_v52, 16  ;;  %v12835_v3 = vrot.slane %v12833_v28, 3  ;;  %v12832_v8 = vrot.slane %v12830_v45, 2 }
 0xe2d   : > { %v12603_v59 = vpop.f32.mrb[192].mxu0  ;;  %12777 = vrot.lane.b32.xlu0 %v12764_v23, %s19373_s30 }
 0xe2e   : > { %v24404_v11 = vadd.f32 %v24219_v44, %v12603_v59  ;;  %v12605_v18 = vpop.f32.mrb[193].mxu0  ;;  %v12694_v51 = vrot.slane %v12692_v27, 1  ;;  %v12836_v40 = vor.u32 %v12835_v3, %v12832_v8 }
 0xe2f   : > { %v12606_v62 = vpop.f32.mrb[194].mxu0 }
 0xe30   : > { %v24407_v7 = vpack.c.bf16 %v24404_v11, %v12599_v46  ;;  %v12607_v43 = vadd.f32 %v24221_v5, %v12606_v62  ;;  %v12695_v30 = vsel %vm8548_vm7, %v12690_v0, %v12694_v51  ;;  %v12608_v21 = vpop.f32.mrb[195].mxu0  ;;  %v24413_v38 = vsel %vm9254_vm10, %v12827_v16, %v12836_v40 }
 0xe31   : > { %12717 = vrot.lane.b32.xlu1 %v12695_v30, %s19373_s30  ;;  %v12696_v5 = vshrl.u32 %v24390_v52, 16  ;;  %v12857_v62 = vrot.slane %v24291_v56, 3 }
 0xe32   : > { %v24416_v44 = vpack.c.bf16 %v12607_v43, %v24404_v11  ;;  %v12765_v17 = vrot.slane %v24407_v7, 2  ;;  %v12842_v39 = vshll.u32 %v24407_v7, 16  ;;  %v12839_v41 = vshrl.u32 %v24407_v7, 16 }
 0xe33   : > { %v12698_v46 = vor.u32 %v12696_v5, %v12694_v51  ;;  %v12887_v5 = vrot.slane %v12797_v14, 1 }
 0xe34   : > { %v12766_v60 = vsel %vm9170_vm9, %v12763_v4, %v12765_v17  ;;  %v12700_v1 = vshll.u32 %v24416_v44, 16  ;;  %v12844_v15 = vrot.slane %v12842_v39, 3  ;;  %v12841_v63 = vrot.slane %v12839_v41, 2 }
 0xe35   : > { %v12611_v32 = vpop.f32.mrb[196].mxu0  ;;  %12779 = vrot.lane.b32.xlu0 %v12766_v60, %s19373_s30  ;;  %v12704_v3 = vshrl.u32 %v24416_v44, 16  ;;  %v12856_v60 = vrot.slane %v24279_v22, 3  ;;  %v12888_v14 = vor.u32 %v12887_v5, %v12794_v12 }
 0xe36   : > { %v12612_v42 = vadd.f32 %v24238_v57, %v12611_v32  ;;  %v12613_v16 = vpop.f32.mrb[197].mxu0  ;;  %v12702_v19 = vrot.slane %v12700_v1, 1  ;;  %v12845_v4 = vor.u32 %v12844_v15, %v12841_v63 }
 0xe37   : > { %v12614_v36 = vpop.f32.mrb[198].mxu0  ;;  %v12858_v63 = vsel %vm1502_vm1, %v12856_v60, %v12857_v62  ;;  %v12889_v16 = vrot.slane %v12806_v37, 1  ;;  %v12892_v37 = vrot.slane %v12815_v9, 1 }
 0xe38   : > { %v24430_v23 = vpack.c.bf16 %v12612_v42, %v12607_v43  ;;  %v24433_v58 = vadd.f32 %v24243_v35, %v12614_v36  ;;  %v12703_v27 = vsel %vm8548_vm7, %v12698_v46, %v12702_v19  ;;  %v12616_v59 = vpop.f32.mrb[199].mxu0  ;;  %v24439_v8 = vsel %vm9254_vm10, %v12836_v40, %v12845_v4 }
 0xe39   : > { %12719 = vrot.lane.b32.xlu1 %v12703_v27, %s19373_s30  ;;  %v12706_v0 = vor.u32 %v12704_v3, %v12702_v19  ;;  %v12859_v42 = vrot.slane %v24309_v34, 3  ;;  %v12890_v19 = vsel %vm8548_vm7, %v12888_v14, %v12889_v16  ;;  %v12861_v36 = vrot.slane %v24333_v54, 3 }
 0xe3a   : > { %v12767_v57 = vrot.slane %v24430_v23, 2  ;;  %v12851_v18 = vshll.u32 %v24430_v23, 16  ;;  %v12848_v51 = vshrl.u32 %v24430_v23, 16  ;;  %v12863_v59 = vrot.slane %v24357_v49, 3 }
 0xe3b   : > { %v12860_v46 = vsel %vm1502_vm1, %v12857_v62, %v12859_v42  ;;  %v12862_v27 = vsel %vm1502_vm1, %v12859_v42, %v12861_v36  ;;  %v12895_v3 = vrot.slane %v12824_v20, 1  ;;  %v12894_v9 = vor.u32 %v12892_v37, %v12812_v50 }
 0xe3c   : > { %v12768_v35 = vsel %vm9170_vm9, %v12765_v17, %v12767_v57  ;;  %v12853_v43 = vrot.slane %v12851_v18, 3  ;;  %v12850_v40 = vrot.slane %v12848_v51, 2  ;;  %v12867_v62 = vrot.slane %v24407_v7, 3 }
 0xe3d   : > { %v12619_v30 = vpop.f32.mrb[52].mxu0  ;;  %12721 = vrot.lane.b32.xlu1 %v12706_v0, %s19373_s30  ;;  %12781 = vrot.lane.b32.xlu0 %v12768_v35, %s19373_s30  ;;  %v12865_v0 = vrot.slane %v24382_v61, 3  ;;  %v12898_v35 = vrot.slane %v12833_v28, 1  ;;  %v12897_v20 = vor.u32 %v12895_v3, %v12821_v26  ;;  %v12904_v60 = vrot.slane %v12851_v18, 1 }
 0xe3e   : > { %v12620_v21 = vadd.f32 %v24254_v10, %v12619_v30  ;;  %v12621_v1 = vpop.f32.mrb[53].mxu0  ;;  %v24454_v32 = vor.u32 %v12853_v43, %v12850_v40  ;;  %v12901_v30 = vrot.slane %v12842_v39, 1 }
 0xe3f   : > { %v12622_v17 = vpop.f32.mrb[54].mxu0  ;;  %v12866_v50 = vsel %vm1502_vm1, %v12863_v59, %v12865_v0  ;;  %v12899_v43 = vsel %vm8548_vm7, %v12897_v20, %v12898_v35  ;;  %v12900_v28 = vor.u32 %v12898_v35, %v12830_v45  ;;  %v12868_v40 = vsel %vm1502_vm1, %v12865_v0, %v12867_v62  ;;  %v19213_v35 = vld [vmem:[%s25498_s7 + $0xd8] sm:$0xff]  }
 0xe40   : > { %v24457_v15 = vpack.c.bf16 %v12620_v21, %v24433_v58  ;;  %v12623_v10 = vpop.f32.mrb[55].mxu0  ;;  %v24467_v22 = vsel %vm9254_vm10, %v12845_v4, %v24454_v32  ;;  %v12891_v4 = vor.u32 %v12889_v16, %v12803_v48  ;;  %v12896_v48 = vsel %vm8548_vm7, %v12894_v9, %v12895_v3  ;;  %v19211_v9 = vld [vmem:[%s25498_s7 + $0xd0] sm:$0xff]  }
 0xe41   : > { %12871 = vrot.lane.b32.xlu1 %v12858_v63, %s19373_s30  ;;  %12783 = vrot.lane.b32.xlu0 %v12767_v57, %s19373_s30  ;;  %v12864_v57 = vsel %vm1502_vm1, %v12861_v36, %v12863_v59  ;;  %v12902_v26 = vsel %vm8548_vm7, %v12900_v28, %v12901_v30  ;;  %v12869_v21 = vrot.slane %v24430_v23, 3  ;;  %v12903_v39 = vor.u32 %v12901_v30, %v12839_v41  ;;  %v19215_v30 = vld [vmem:[%s25498_s7 + $0xe0] sm:$0xff]  }
 0xe42   : > { %v12893_v12 = vsel %vm8548_vm7, %v12891_v4, %v12892_v37  ;;  %v12908_v5 = vshll.u32 %v24457_v15, 16  ;;  %v12906_v18 = vor.u32 %v12904_v60, %v12848_v51  ;;  %v12912_v41 = vshrl.u32 %v24457_v15, 16  ;;  %v19209_v4 = vld [vmem:[%s25498_s7 + $0xc8] sm:$0xff]  }
 0xe43   : > { %v12870_v1 = vsel %vm1502_vm1, %v12867_v62, %v12869_v21  ;;  %v12905_v45 = vsel %vm8548_vm7, %v12903_v39, %v12904_v60  ;;  %v12732_v16 = vrot.slane %v24285_v6, 1  ;;  %v12731_v10 = vrot.slane %v24273_v47, 1  ;;  %v19214_v62 = vld [vmem:[%s25498_s7 + $0x98] sm:$0xff]  }
 0xe44   : > { %v12910_v17 = vrot.slane %v12908_v5, 1  ;;  %v12734_v37 = vrot.slane %v24295_v13, 1  ;;  %v12736_v0 = vrot.slane %v24318_v55, 1  ;;  %v19218_v5 = vld [vmem:[%s25498_s7 + $0xa8] sm:$0xff]   ;;  %vm14691_vm1 = vcmask 256000  }
 0xe45   : > { %12873 = vrot.lane.b32.xlu1 %v12860_v46, %s19373_s30  ;;  %12915 = vrot.lane.b32.xlu0 %v12890_v19, %s19373_s30  ;;  %v12733_v46 = vsel %vm2731_vm3, %v12731_v10, %v12732_v16  ;;  %v19208_v19 = vld [vmem:[%s25498_s7 + $0x80] sm:$0xff]  }
 0xe46   : > { %v12911_v63 = vsel %vm8548_vm7, %v12906_v18, %v12910_v17  ;;  %v12914_v42 = vor.u32 %v12912_v41, %v12910_v17  ;;  %v12735_v3 = vsel %vm2731_vm3, %v12732_v16, %v12734_v37  ;;  %v19221_v41 = vld [vmem:[%s25498_s7 + $0xf8] sm:$0xff]  }
 0xe47   : > { %v19222_v16 = vld [vmem:[%s25498_s7 + $0xb8] sm:$0xff]  }
 0xe49   : > { %12875 = vrot.lane.b32.xlu1 %v12862_v27, %s19373_s30  ;;  %12917 = vrot.lane.b32.xlu0 %v12893_v12, %s19373_s30  ;;  %v19210_v12 = vld [vmem:[%s25498_s7 + $0x88] sm:$0xff]  }
 0xe4d   : > { %12877 = vrot.lane.b32.xlu1 %v12864_v57, %s19373_s30  ;;  %12919 = vrot.lane.b32.xlu0 %v12896_v48, %s19373_s30 }
 0xe51   : > { %12879 = vrot.lane.b32.xlu1 %v12866_v50, %s19373_s30  ;;  %12921 = vrot.lane.b32.xlu0 %v12899_v43, %s19373_s30  ;;  %v12737_v43 = vsel %vm2731_vm3, %v12734_v37, %v12736_v0 }
 0xe55   : > { %12881 = vrot.lane.b32.xlu1 %v12868_v40, %s19373_s30  ;;  %12923 = vrot.lane.b32.xlu0 %v12902_v26, %s19373_s30  ;;  %v12738_v26 = vrot.slane %v24341_v25, 1 }
 0xe59   : > { %12883 = vrot.lane.b32.xlu1 %v12870_v1, %s19373_s30  ;;  %12925 = vrot.lane.b32.xlu0 %v12905_v45, %s19373_s30  ;;  %v12739_v1 = vsel %vm2731_vm3, %v12736_v0, %v12738_v26  ;;  %v19219_v45 = vld [vmem:[%s25498_s7 + $0xf0] sm:$0xff]  }
 0xe5d   : > { %12885 = vrot.lane.b32.xlu1 %v12869_v21, %s19373_s30  ;;  %12927 = vrot.lane.b32.xlu0 %v12911_v63, %s19373_s30  ;;  %v19217_v21 = vld [vmem:[%s25498_s7 + $0xe8] sm:$0xff]   ;;  %v12740_v63 = vrot.slane %v24365_v31, 1 }
 0xe61   : > { %12929 = vrot.lane.b32.xlu0 %v12914_v42, %s19373_s30  ;;  %s19374_s30 = smov [#allocation2]  }
 0xe62   : > { %s19309_s24 = sshll.u32 %s19374_s30, 4  ;;  %s19310_s24 = int_to_ptr.vmem [resolvable:$false] %s19309_s24 }
 0xe63   : > { %s19311_s17 = scalar_lea.vmem %s19310_s24, 32  ;;  %p19312_p0 = scmp.lt.s32.totalorder %s25451_s27, %s19310_s24 }
 0xe64   : > { %p19313_p1 = scmp.lt.s32.totalorder %s19311_s17, %s19305_s16 }
 0xe66   : > { %p19314_p2 = por %p19313_p1, %p19312_p0 }
 0xe68   : > { %p19315_p3 = pnand %p19314_p2, %p19308_p13 }
 0xe7f   : > { %v12770_v14 = vpop.permute.xlu0 %12769 }
 0xe80   : > { %v12975_v51 = vsel %vm12947_vm14, %v12733_v46, %v12770_v14  ;;  %v12741_v14 = vsel %vm2731_vm3, %v12738_v26, %v12740_v63  ;;  %v19223_v46 = vld [vmem:[%s25498_s7 + $0x100] sm:$0xff]  }
 0xe81   : > { %13406 = vmatprep.mubr.bf16.mxu0 %v12975_v51 }
 0xe83   : > { %v12708_v36 = vpop.permute.xlu0 %12707 }
 0xe84   : > { %v12949_v27 = vsel %vm12947_vm14, %v24273_v47, %v12708_v36  ;;  %v19212_v47 = vld [vmem:[%s25498_s7 + $0x90] sm:$0xff]  }
 0xe85   : > { %13407 = vmatmul.mubr.bf16.vlgmr.msra.gmra.mrb[56].mxu0 %v12949_v27 }
 0xe86   : > { %16631 = vmatpush3.bf16.msra.mxu0 %v19208_v19 }
 0xe87   : > { %v12772_v59 = vpop.permute.xlu1 %12771  ;;  %16632 = vmatprep.subr.bf16.mxu0 %v19209_v4 }
 0xe88   : > { %v12979_v57 = vsel %vm12947_vm14, %v12735_v3, %v12772_v59  ;;  %v12744_v59 = vrot.slane %v24416_v44, 1 }
 0xe89   : > { %13414 = vmatprep.mubr.bf16.mxu0 %v12979_v57 }
 0xe8a   : > { %16633 = vmatpush3.bf16.msra.mxu0 %v19210_v12 }
 0xe8b   : > { %v12710_v48 = vpop.permute.xlu1 %12709  ;;  %16634 = vmatprep.subr.bf16.mxu0 %v19211_v9 }
 0xe8c   : > { %v12952_v20 = vsel %vm12947_vm14, %v24285_v6, %v12710_v48  ;;  %v19216_v6 = vld [vmem:[%s25498_s7 + $0xa0] sm:$0xff]  }
 0xe8d   : > { %13415 = vmatmul.mubr.bf16.gmra.mrb[60].mxu0 %v12952_v20 }
 0xe8e   : > { %16635 = vmatpush3.bf16.msra.mxu0 %v19212_v47 }
 0xe8f   : > { %v12774_v50 = vpop.permute.xlu0 %12773  ;;  %16636 = vmatprep.subr.bf16.mxu0 %v19213_v35  ;;  %v12712_v40 = vpop.permute.xlu1 %12711 }
 0xe90   : > { %v12983_v28 = vsel %vm12947_vm14, %v12737_v43, %v12774_v50  ;;  %v12955_v60 = vsel %vm12947_vm14, %v24295_v13, %v12712_v40  ;;  %v19220_v13 = vld [vmem:[%s25498_s7 + $0xb0] sm:$0xff]  }
 0xe91   : > { %13422 = vmatprep.mubr.bf16.mxu0 %v12983_v28  ;;  %v19225_v40 = vld [vmem:[%s25498_s7 + $0x110] sm:$0xff]  }
 0xe92   : > { %16637 = vmatpush3.bf16.msra.mxu0 %v19214_v62 }
 0xe93   : > { %16638 = vmatprep.subr.bf16.mxu0 %v19215_v30  ;;  %v12714_v18 = vpop.permute.xlu1 %12713 }
 0xe94   : > { %v12958_v42 = vsel %vm12947_vm14, %v24318_v55, %v12714_v18  ;;  %v12742_v55 = vrot.slane %v24390_v52, 1 }
 0xe95   : > { %13423 = vmatmul.mubr.bf16.gmra.mrb[200].mxu0 %v12955_v60 }
 0xe96   : > { %16639 = vmatpush3.bf16.msra.mxu0 %v19216_v6  ;;  %v12743_v4 = vsel %vm2731_vm3, %v12740_v63, %v12742_v55  ;;  %v12745_v57 = vsel %vm2731_vm3, %v12742_v55, %v12744_v59 }
 0xe97   : > { %v12776_v39 = vpop.permute.xlu0 %12775  ;;  %16640 = vmatprep.subr.bf16.mxu0 %v19217_v21  ;;  %v19226_v21 = vld [vmem:[%s25498_s7 + $0x118] sm:$0xff]  }
 0xe98   : > { %v12987_v17 = vsel %vm12947_vm14, %v12739_v1, %v12776_v39 }
 0xe99   : > { %13430 = vmatprep.mubr.bf16.mxu0 %v12987_v17 }
 0xe9a   : > { %16641 = vmatpush3.bf16.msra.mxu0 %v19218_v5 }
 0xe9b   : > { %16642 = vmatprep.subr.bf16.mxu0 %v19219_v45  ;;  %v12716_v19 = vpop.permute.xlu1 %12715 }
 0xe9c   : > { %v12961_v36 = vsel %vm12947_vm14, %v24341_v25, %v12716_v19 }
 0xe9d   : > { %13431 = vmatmul.mubr.bf16.gmra.mrb[204].mxu0 %v12958_v42 }
 0xe9e   : > { %16643 = vmatpush3.bf16.msra.mxu0 %v19220_v13 }
 0xe9f   : > { %v12778_v10 = vpop.permute.xlu0 %12777  ;;  %16644 = vmatprep.subr.bf16.mxu0 %v19221_v41 }
 0xea0   : > { %v12991_v51 = vsel %vm12947_vm14, %v12741_v14, %v12778_v10 }
 0xea1   : > { %13438 = vmatprep.mubr.bf16.mxu0 %v12991_v51 }
 0xea2   : > { %16645 = vmatpush3.bf16.msra.mxu0 %v19222_v16 }
 0xea3   : > { %17190 = vmatprep.subr.bf16.mxu0 %v19223_v46  ;;  %v12718_v12 = vpop.permute.xlu1 %12717 }
 0xea4   : > { %v12964_v3 = vsel %vm12947_vm14, %v24365_v31, %v12718_v12  ;;  %v12632_v31 = vpack.c.bf16 %v24404_v11, %v24404_v11 }
 0xea5   : > { %13439 = vmatmul.mubr.bf16.gmra.mrb[208].mxu0 %v12961_v36 }
 0xea7   : > { %v12780_v37 = vpop.permute.xlu0 %12779 }
 0xea8   : > { %v12995_v27 = vsel %vm12947_vm14, %v12743_v4, %v12780_v37  ;;  %v12932_v37 = vrot.slane %v24291_v56, 1 }
 0xea9   : > { %13446 = vmatprep.mubr.bf16.mxu0 %v12995_v27 }
 0xeab   : > { %v12720_v25 = vpop.permute.xlu1 %12719 }
 0xeac   : > { %v12967_v0 = vsel %vm12947_vm14, %v24390_v52, %v12720_v25  ;;  %v19224_v52 = vld [vmem:[%s25498_s7 + $0x108] sm:$0xff]  }
 0xead   : > { %13447 = vmatmul.mubr.bf16.gmra.mrb[212].mxu0 %v12964_v3  ;;  %v12945_v3 = vrot.slane %v24457_v15, 1 }
 0xeaf   : > { %v12782_v9 = vpop.permute.xlu0 %12781  ;;  %v12722_v44 = vpop.permute.xlu1 %12721 }
 0xeb0   : > { %v12999_v47 = vsel %vm12947_vm14, %v12745_v57, %v12782_v9  ;;  %v12971_v62 = vsel %vm12947_vm14, %v12632_v31, %v12722_v44 }
 0xeb1   : > { %13454 = vmatprep.mubr.bf16.mxu0 %v12999_v47 }
 0xeb3   : > { %v12784_v48 = vpop.permute.xlu0 %12783  ;;  %v12872_v43 = vpop.permute.xlu1 %12871 }
 0xeb4   : > { %v13003_v35 = vsel %vm12947_vm14, %v12744_v59, %v12784_v48  ;;  %v13007_v28 = vsel %vm12947_vm14, %v24316_v24, %v12872_v43 }
 0xeb5   : > { %13455 = vmatmul.mubr.bf16.gmra.mrb[216].mxu0 %v12967_v0 }
 0xeb6   : > { %13462 = vmatprep.mubr.bf16.mxu0 %v13003_v35 }
 0xeb7   : > { %v12916_v20 = vpop.permute.xlu0 %12915  ;;  %v12874_v6 = vpop.permute.xlu1 %12873 }
 0xeb8   : > { %v13038_v50 = vsel %vm12947_vm14, %v24291_v56, %v12916_v20  ;;  %v13011_v24 = vsel %vm12947_vm14, %v24339_v2, %v12874_v6  ;;  %v12939_v56 = vrot.slane %v24382_v61, 1 }
 0xebb   : > { %v12918_v30 = vpop.permute.xlu0 %12917  ;;  %v12876_v5 = vpop.permute.xlu1 %12875 }
 0xebc   : > { %v13041_v11 = vsel %vm12947_vm14, %v24309_v34, %v12918_v30  ;;  %v13015_v1 = vsel %vm12947_vm14, %v24363_v29, %v12876_v5 }
 0xebd   : > { %13463 = vmatmul.mubr.bf16.gmra.mrb[220].mxu0 %v12971_v62 }
 0xebe   : > { %13502 = vmatprep.mubr.bf16.mxu0 %v13038_v50 }
 0xebf   : > { %v12920_v26 = vpop.permute.xlu0 %12919  ;;  %v12878_v17 = vpop.permute.xlu1 %12877 }
 0xec0   : > { %v13044_v60 = vsel %vm12947_vm14, %v24333_v54, %v12920_v26  ;;  %v13019_v18 = vsel %vm12947_vm14, %v24388_v53, %v12878_v17 }
 0xec3   : > { %v12922_v39 = vpop.permute.xlu0 %12921  ;;  %v12880_v63 = vpop.permute.xlu1 %12879 }
 0xec4   : > { %v13047_v45 = vsel %vm12947_vm14, %v24357_v49, %v12922_v39  ;;  %v13023_v29 = vsel %vm12947_vm14, %v24413_v38, %v12880_v63  ;;  %v12642_v38 = vpack.c.bf16 %v24433_v58, %v24433_v58  ;;  %v12935_v58 = vrot.slane %v24333_v54, 1  ;;  %v19232_v63 = vld [vmem:[%s25500_s9 + $0x4] ss:$28 sps:$4 sm:$0xff]  }
 0xec5   : > { %13503 = vmatmul.mubr.bf16.vlgmr.msra.gmra.mrb[224].mxu0 %v13007_v28 }
 0xec6   : > { %13510 = vmatprep.mubr.bf16.mxu0 %v13041_v11  ;;  %17191 = vmatpush3.bf16.msra.mxu0 %v19223_v46 }
 0xec7   : > { %17192 = vmatprep.subr.bf16.mxu0 %v19224_v52  ;;  %v12924_v2 = vpop.permute.xlu0 %12923  ;;  %v12882_v16 = vpop.permute.xlu1 %12881 }
 0xec8   : > { %v13050_v13 = vsel %vm12947_vm14, %v24382_v61, %v12924_v2  ;;  %v13027_v53 = vsel %vm12947_vm14, %v24439_v8, %v12882_v16  ;;  %v12933_v8 = vrot.slane %v24309_v34, 1 }
 0xeca   : > { %17193 = vmatpush3.bf16.msra.mxu0 %v19224_v52  ;;  %v12934_v27 = vsel %vm2731_vm3, %v12932_v37, %v12933_v8  ;;  %v12936_v12 = vsel %vm2731_vm3, %v12933_v8, %v12935_v58 }
 0xecb   : > { %17194 = vmatprep.subr.bf16.mxu0 %v19225_v40  ;;  %v12926_v41 = vpop.permute.xlu0 %12925  ;;  %v12884_v46 = vpop.permute.xlu1 %12883 }
 0xecc   : > { %v13053_v42 = vsel %vm12947_vm14, %v24407_v7, %v12926_v41  ;;  %v13031_v19 = vsel %vm12947_vm14, %v24467_v22, %v12884_v46  ;;  %v12937_v22 = vrot.slane %v24357_v49, 1  ;;  %v12943_v49 = vrot.slane %v24430_v23, 1  ;;  %v19235_v41 = vld [vmem:[%s25500_s9 + $0x3c] ss:$28 sps:$4 sm:$0xff]  }
 0xecd   : > { %13511 = vmatmul.mubr.bf16.gmra.mrb[228].mxu0 %v13011_v24 }
 0xece   : > { %13518 = vmatprep.mubr.bf16.mxu0 %v13044_v60  ;;  %17195 = vmatpush3.bf16.msra.mxu0 %v19225_v40  ;;  %v12938_v34 = vsel %vm2731_vm3, %v12935_v58, %v12937_v22  ;;  %v12940_v59 = vsel %vm2731_vm3, %v12937_v22, %v12939_v56  ;;  %v12946_v61 = vsel %vm2731_vm3, %v12943_v49, %v12945_v3 }
 0xecf   : > { %17196 = vmatprep.subr.bf16.mxu0 %v19226_v21  ;;  %v12928_v10 = vpop.permute.xlu0 %12927  ;;  %v12886_v36 = vpop.permute.xlu1 %12885 }
 0xed0   : > { %v13056_v14 = vsel %vm12947_vm14, %v24430_v23, %v12928_v10  ;;  %v13035_v4 = vsel %vm12947_vm14, %v24454_v32, %v12886_v36  ;;  %v12941_v32 = vrot.slane %v24407_v7, 1  ;;  %v19227_v7 = vld [vmem:[%s25500_s9 + $0x10] ss:$28 sps:$4 sm:$0xff]  }
 0xed1   : > { %v19229_v23 = vld [vmem:[%s25500_s9 + $0x14] ss:$28 sps:$4 sm:$0xff]  }
 0xed2   : > { %17197 = vmatpush3.bf16.msra.mxu0 %v19226_v21  ;;  %v12942_v54 = vsel %vm2731_vm3, %v12939_v56, %v12941_v32  ;;  %v12944_v9 = vsel %vm2731_vm3, %v12941_v32, %v12943_v49  ;;  %14158 = vmatprep.subr.bf16.mxu1 %v19229_v23 }
 0xed3   : > { %v12930_v51 = vpop.permute.xlu0 %12929  ;;  %14159 = vmatpush1.bf16.msra.mxu1 %v19227_v7  ;;  %13952 = vmatprep.subr.bf16.mxu0 %v19232_v63 }
 0xed4   : > { %v13060_v55 = vsel %vm12947_vm14, %v12642_v38, %v12930_v51 }
 0xed5   : > { %13519 = vmatmul.mubr.bf16.gmra.mrb[232].mxu0 %v13015_v1 }
 0xed6   : > { %13526 = vmatprep.mubr.bf16.mxu0 %v13047_v45 }
 0xedd   : > { %13527 = vmatmul.mubr.bf16.gmra.mrb[236].mxu0 %v13019_v18 }
 0xede   : > { %13534 = vmatprep.mubr.bf16.mxu0 %v13050_v13  ;;  %v19230_v13 = vld [vmem:[%s25500_s9] ss:$28 sps:$4 sm:$0xff]  }
 0xee5   : > { %13535 = vmatmul.mubr.bf16.gmra.mrb[240].mxu0 %v13023_v29  ;;  %v19236_v29 = vld [vmem:[%s25500_s9 + $0x48] ss:$28 sps:$4 sm:$0xff]  }
 0xee6   : > { %13542 = vmatprep.mubr.bf16.mxu0 %v13053_v42  ;;  %v19238_v42 = vld [vmem:[%s25500_s9 + $0x4c] ss:$28 sps:$4 sm:$0xff]  }
 0xee7   : > { %14160 = vmatprep.subr.bf16.mxu1 %v19238_v42 }
 0xee8   : > { %14161 = vmatpush1.bf16.msra.mxu1 %v19236_v29 }
 0xeed   : > { %13543 = vmatmul.mubr.bf16.gmra.mrb[244].mxu0 %v13027_v53  ;;  %v19233_v53 = vld [vmem:[%s25500_s9 + $0x38] ss:$28 sps:$4 sm:$0xff]  }
 0xeee   : > { %13550 = vmatprep.mubr.bf16.mxu0 %v13056_v14 }
 0xef5   : > { %13551 = vmatmul.mubr.bf16.gmra.mrb[248].mxu0 %v13031_v19 }
 0xef6   : > { %13558 = vmatprep.mubr.bf16.mxu0 %v13060_v55 }
 0xefd   : > { %13559 = vmatmul.mubr.bf16.gmra.mrb[252].mxu0 %v13035_v4 }
 0xefe   : > { %17198 = vmatprep.mubr.msk.bf16.mxu0 %vm12947_vm14, %v12934_v27 }
 0xf05   : > { %17199 = vmatmul.mubr.msk.bf16.vlgmr.msra.gmra.mrb[0].mxu0 %vm12947_vm14, %v12936_v12 }
 0xf06   : > { %17202 = vmatprep.mubr.msk.bf16.mxu0 %vm12947_vm14, %v12938_v34  ;;  %13953 = vmatpush1.bf16.msra.mxu0 %v19230_v13 }
 0xf07   : > { %13954 = vmatprep.subr.bf16.mxu0 %v19235_v41 }
 0xf0a   : > { %13955 = vmatpush1.bf16.msra.mxu0 %v19233_v53 }
 0xf0d   : > { %17203 = vmatmul.mubr.msk.bf16.gmra.mrb[4].mxu0 %vm12947_vm14, %v12940_v59 }
 0xf0e   : > { %17206 = vmatprep.mubr.msk.bf16.mxu0 %vm12947_vm14, %v12942_v54 }
 0xf15   : > { %17207 = vmatmul.mubr.msk.bf16.gmra.mrb[8].mxu0 %vm12947_vm14, %v12944_v9 }
 0xf16   : > { %17210 = vmatprep.mubr.msk.bf16.mxu0 %vm12947_vm14, %v12946_v61 }
 0xf1d   : > { %17211 = vmatmul.mubr.msk.bf16.gmra.mrb[12].mxu0 %vm12947_vm14, %v12945_v3 }
 0xf1e   : > { %13984 = vmatprep.mubr.bf16.mxu0 %v25715_v33 }
 0xf58   : > { %v16582_v15 = vpop.f32.mrb[56].mxu0 }
 0xf59   : > { %v16583_v57 = vpop.f32.mrb[57].mxu0 }
 0xf5a   : > { %v24686_v47 = vadd.f32 %v16583_v57, %v16582_v15  ;;  %v16585_v25 = vpop.f32.mrb[58].mxu0 }
 0xf5b   : > { %v16586_v48 = vpop.f32.mrb[59].mxu0 }
 0xf5c   : > { %v16587_v0 = vadd.f32 %v16586_v48, %v16585_v25 }
 0xf60   : > { %v16588_v35 = vpop.f32.mrb[60].mxu0 }
 0xf61   : > { %v16589_v44 = vpop.f32.mrb[61].mxu0 }
 0xf62   : > { %v24688_v31 = vadd.f32 %v16589_v44, %v16588_v35  ;;  %v16591_v20 = vpop.f32.mrb[62].mxu0  ;;  %v19241_v44 = vld [vmem:[%s25500_s9 + $0xc] ss:$28 sps:$4 sm:$0xff]  }
 0xf63   : > { %v16592_v62 = vpop.f32.mrb[63].mxu0  ;;  %14055 = vmatprep.subr.bf16.mxu0 %v19241_v44 }
 0xf64   : > { %v24690_v50 = vadd.f32 %v16592_v62, %v16591_v20 }
 0xf68   : > { %v16594_v43 = vpop.f32.mrb[200].mxu0 }
 0xf69   : > { %v16595_v30 = vpop.f32.mrb[201].mxu0 }
 0xf6a   : > { %v24692_v52 = vadd.f32 %v16595_v30, %v16594_v43  ;;  %v16597_v28 = vpop.f32.mrb[202].mxu0 }
 0xf6b   : > { %v16598_v11 = vpop.f32.mrb[203].mxu0 }
 0xf6c   : > { %v24694_v40 = vadd.f32 %v16598_v11, %v16597_v28 }
 0xf70   : > { %v16600_v6 = vpop.f32.mrb[204].mxu0 }
 0xf71   : > { %v16601_v26 = vpop.f32.mrb[205].mxu0 }
 0xf72   : > { %v24696_v21 = vadd.f32 %v16601_v26, %v16600_v6  ;;  %v16603_v24 = vpop.f32.mrb[206].mxu0 }
 0xf73   : > { %v16604_v60 = vpop.f32.mrb[207].mxu0 }
 0xf74   : > { %v24698_v5 = vadd.f32 %v16604_v60, %v16603_v24 }
 0xf78   : > { %v16606_v39 = vpop.f32.mrb[208].mxu0 }
 0xf79   : > { %v16607_v1 = vpop.f32.mrb[209].mxu0 }
 0xf7a   : > { %v24700_v45 = vadd.f32 %v16607_v1, %v16606_v39  ;;  %v16609_v17 = vpop.f32.mrb[210].mxu0 }
 0xf7b   : > { %v16610_v2 = vpop.f32.mrb[211].mxu0 }
 0xf7c   : > { %v24702_v18 = vadd.f32 %v16610_v2, %v16609_v17 }
 0xf80   : > { %v16612_v16 = vpop.f32.mrb[212].mxu0 }
 0xf81   : > { %v16613_v10 = vpop.f32.mrb[213].mxu0 }
 0xf82   : > { %v24722_v14 = vadd.f32 %v16613_v10, %v16612_v16  ;;  %v16615_v46 = vpop.f32.mrb[214].mxu0 }
 0xf83   : > { %v16616_v51 = vpop.f32.mrb[215].mxu0 }
 0xf84   : > { %v16617_v38 = vadd.f32 %v16616_v51, %v16615_v46 }
 0xf88   : > { %v16618_v19 = vpop.f32.mrb[216].mxu0 }
 0xf89   : > { %v16619_v55 = vpop.f32.mrb[217].mxu0 }
 0xf8a   : > { %v24724_v36 = vadd.f32 %v16619_v55, %v16618_v19  ;;  %v16621_v8 = vpop.f32.mrb[218].mxu0 }
 0xf8b   : > { %v16622_v37 = vpop.f32.mrb[219].mxu0 }
 0xf8c   : > { %v24726_v4 = vadd.f32 %v16622_v37, %v16621_v8 }
 0xf90   : > { %v16624_v27 = vpop.f32.mrb[220].mxu0 }
 0xf91   : > { %v16625_v58 = vpop.f32.mrb[221].mxu0 }
 0xf92   : > { %v24728_v22 = vadd.f32 %v16625_v58, %v16624_v27  ;;  %v16627_v12 = vpop.f32.mrb[222].mxu0 }
 0xf93   : > { %v16628_v34 = vpop.f32.mrb[223].mxu0 }
 0xf98   : > { %v16646_v56 = vpop.f32.mrb[224].mxu0 }
 0xf99   : > { %v16647_v32 = vpop.f32.mrb[225].mxu0 }
 0xf9a   : > { %v16648_v59 = vadd.f32 %v16647_v32, %v16646_v56  ;;  %v16649_v54 = vpop.f32.mrb[226].mxu0 }
 0xf9b   : > { %v16650_v49 = vpop.f32.mrb[227].mxu0 }
 0xf9c   : > { %v16651_v3 = vadd.f32 %v16650_v49, %v16649_v54  ;;  %v13505_v9 = vadd.f32 %v16648_v59, %v24686_v47 }
 0xf9e   : > { %v24731_v61 = vadd.f32 %v16651_v3, %v16587_v0 }
 0xfa0   : > { %v16652_v7 = vpop.f32.mrb[228].mxu0 }
 0xfa1   : > { %v16653_v23 = vpop.f32.mrb[229].mxu0 }
 0xfa2   : > { %v16654_v15 = vadd.f32 %v16653_v23, %v16652_v7  ;;  %v16655_v57 = vpop.f32.mrb[230].mxu0 }
 0xfa3   : > { %v16656_v25 = vpop.f32.mrb[231].mxu0 }
 0xfa4   : > { %v16657_v48 = vadd.f32 %v16656_v25, %v16655_v57  ;;  %v13513_v35 = vadd.f32 %v16654_v15, %v24688_v31 }
 0xfa6   : > { %v13516_v20 = vadd.f32 %v16657_v48, %v24690_v50 }
 0xfa8   : > { %v16658_v62 = vpop.f32.mrb[232].mxu0 }
 0xfa9   : > { %v16659_v43 = vpop.f32.mrb[233].mxu0 }
 0xfaa   : > { %v16660_v47 = vadd.f32 %v16659_v43, %v16658_v62  ;;  %v16661_v0 = vpop.f32.mrb[234].mxu0 }
 0xfab   : > { %v16662_v30 = vpop.f32.mrb[235].mxu0 }
 0xfac   : > { %v16663_v28 = vadd.f32 %v16662_v30, %v16661_v0  ;;  %v13521_v11 = vadd.f32 %v16660_v47, %v24692_v52 }
 0xfae   : > { %v24740_v6 = vadd.f32 %v16663_v28, %v24694_v40 }
 0xfb0   : > { %v16664_v26 = vpop.f32.mrb[236].mxu0 }
 0xfb1   : > { %v16665_v31 = vpop.f32.mrb[237].mxu0 }
 0xfb2   : > { %v16666_v24 = vadd.f32 %v16665_v31, %v16664_v26  ;;  %v16667_v60 = vpop.f32.mrb[238].mxu0 }
 0xfb3   : > { %v16668_v39 = vpop.f32.mrb[239].mxu0 }
 0xfb4   : > { %v16669_v1 = vadd.f32 %v16668_v39, %v16667_v60  ;;  %v13529_v50 = vadd.f32 %v16666_v24, %v24696_v21 }
 0xfb6   : > { %v13532_v17 = vadd.f32 %v16669_v1, %v24698_v5 }
 0xfb8   : > { %v16670_v2 = vpop.f32.mrb[240].mxu0 }
 0xfb9   : > { %v16671_v13 = vpop.f32.mrb[241].mxu0 }
 0xfba   : > { %v16672_v63 = vadd.f32 %v16671_v13, %v16670_v2  ;;  %v16673_v41 = vpop.f32.mrb[242].mxu0 }
 0xfbb   : > { %v16674_v29 = vpop.f32.mrb[243].mxu0 }
 0xfbc   : > { %v16675_v42 = vadd.f32 %v16674_v29, %v16673_v41  ;;  %v24745_v52 = vadd.f32 %v16672_v63, %v24700_v45 }
 0xfbe   : > { %v24748_v40 = vadd.f32 %v16675_v42, %v24702_v18 }
 0xfc0   : > { %v16676_v16 = vpop.f32.mrb[244].mxu0 }
 0xfc1   : > { %v16677_v10 = vpop.f32.mrb[245].mxu0 }
 0xfc2   : > { %v16678_v53 = vadd.f32 %v16677_v10, %v16676_v16  ;;  %v16679_v46 = vpop.f32.mrb[246].mxu0 }
 0xfc3   : > { %v16680_v51 = vpop.f32.mrb[247].mxu0 }
 0xfc4   : > { %v16681_v21 = vadd.f32 %v16680_v51, %v16679_v46  ;;  %v13545_v5 = vadd.f32 %v16678_v53, %v24722_v14 }
 0xfc6   : > { %v24751_v19 = vadd.f32 %v16681_v21, %v16617_v38 }
 0xfc8   : > { %v16682_v55 = vpop.f32.mrb[248].mxu0 }
 0xfc9   : > { %v16683_v8 = vpop.f32.mrb[249].mxu0 }
 0xfca   : > { %v16684_v37 = vadd.f32 %v16683_v8, %v16682_v55  ;;  %v16685_v27 = vpop.f32.mrb[250].mxu0 }
 0xfcb   : > { %v16686_v58 = vpop.f32.mrb[251].mxu0 }
 0xfcc   : > { %v16687_v45 = vadd.f32 %v16686_v58, %v16685_v27  ;;  %v24754_v12 = vadd.f32 %v16684_v37, %v24724_v36 }
 0xfce   : > { %v24757_v18 = vadd.f32 %v16687_v45, %v24726_v4 }
 0xfd0   : > { %v16688_v34 = vpop.f32.mrb[252].mxu0 }
 0xfd1   : > { %v16689_v56 = vpop.f32.mrb[253].mxu0 }
 0xfd2   : > { %v16690_v32 = vadd.f32 %v16689_v56, %v16688_v34  ;;  %v16691_v59 = vpop.f32.mrb[254].mxu0 }
 0xfd3   : > { %v16692_v54 = vpop.f32.mrb[255].mxu0 }
 0xfd4   : > { %v24760_v14 = vadd.f32 %v16690_v32, %v24728_v22 }
 0xfd8   : > { %v17200_v38 = vpop.f32.mrb[0].mxu0 }
 0xfd9   : > { %v13609_v49 = vadd.f32 %v17200_v38, %v13513_v35  ;;  %v13600_v3 = vpop.f32.mrb[1].mxu0 }
 0xfda   : > { %v13601_v7 = vadd.f32 %v13600_v3, %v13505_v9  ;;  %v17201_v23 = vpop.f32.mrb[2].mxu0 }
 0xfdb   : > { %v13612_v15 = vadd.f32 %v17201_v23, %v13516_v20  ;;  %v13603_v57 = vpop.f32.mrb[3].mxu0  ;;  %v13677_v25 = vrot.slane %v13609_v49, 4 }
 0xfdc   : > { %v13604_v36 = vadd.f32 %v13603_v57, %v24731_v61 }
 0xfdd   : > { %v13679_v4 = vrot.slane %v13612_v15, 4 }
 0xfde   : > { %v13676_v48 = vrot.slane %v13604_v36, 4 }
 0xfdf   : > { %v13680_v44 = vsel %vm1501_vm0, %v13677_v25, %v13679_v4 }
 0xfe0   : > { %v13678_v62 = vsel %vm1501_vm0, %v13676_v48, %v13677_v25  ;;  %v13718_v43 = vmax.f32 %v13604_v36, %v13680_v44  ;;  %v17204_v47 = vpop.f32.mrb[4].mxu0 }
 0xfe1   : > { %v13717_v22 = vmax.f32 %v13601_v7, %v13678_v62  ;;  %v13625_v0 = vadd.f32 %v17204_v47, %v13529_v50  ;;  %v13616_v30 = vpop.f32.mrb[5].mxu0 }
 0xfe2   : > { %v13746_v35 = vrot.slane %v13718_v43, 1  ;;  %v13617_v28 = vadd.f32 %v13616_v30, %v13521_v11  ;;  %v17205_v9 = vpop.f32.mrb[6].mxu0 }
 0xfe3   : > { %v13745_v26 = vrot.slane %v13717_v22, 1  ;;  %v24765_v20 = vadd.f32 %v17205_v9, %v13532_v17  ;;  %v13619_v31 = vpop.f32.mrb[7].mxu0  ;;  %v13685_v39 = vrot.slane %v13625_v0, 4  ;;  %v24775_v17 = vld [vmem:[%s25499_s8] ss:$0 sm:$0xff] }
 0xfe4   : > { %v13681_v61 = vrot.slane %v13617_v28, 4  ;;  %v13620_v24 = vadd.f32 %v13619_v31, %v24740_v6 }
 0xfe5   : > { %v13747_v60 = vsel %vm2731_vm3, %v13745_v26, %v13746_v35  ;;  %v13687_v1 = vrot.slane %v24765_v20, 4 }
 0xfe6   : > { %v13786_v2 = vmax.f32 %v13717_v22, %v13747_v60  ;;  %v13682_v13 = vsel %vm1501_vm0, %v13679_v4, %v13681_v61  ;;  %v13683_v50 = vrot.slane %v13620_v24, 4 }
 0xfe7   : > { %v13719_v63 = vmax.f32 %v13609_v49, %v13682_v13  ;;  %v13688_v11 = vsel %vm1501_vm0, %v13685_v39, %v13687_v1 }
 0xfe8   : > { %v13684_v41 = vsel %vm1501_vm0, %v13681_v61, %v13683_v50  ;;  %v13686_v6 = vsel %vm1501_vm0, %v13683_v50, %v13685_v39  ;;  %v24779_v29 = vmax.f32 %v13620_v24, %v13688_v11  ;;  %v17208_v42 = vpop.f32.mrb[8].mxu0  ;;  %v13807_v37 = vadd.f32 %v24775_v17, %v13786_v2  ;;  %v19239_v61 = vld [vmem:[%s25500_s9 + $0x8] ss:$28 sps:$4 sm:$0xff]  }
 0xfe9   : > { %v13748_v16 = vrot.slane %v13719_v63, 1  ;;  %v13720_v10 = vmax.f32 %v13612_v15, %v13684_v41  ;;  %v13721_v53 = vmax.f32 %v13617_v28, %v13686_v6  ;;  %v24781_v46 = vadd.f32 %v17208_v42, %v13545_v5  ;;  %v13632_v51 = vpop.f32.mrb[9].mxu0  ;;  %v19244_v2 = vld [vmem:[%s25500_s9 + $0x44] ss:$28 sps:$4 sm:$0xff]  }
 0xfea   : > { %v13754_v21 = vrot.slane %v24779_v29, 1  ;;  %v13633_v55 = vadd.f32 %v13632_v51, %v24745_v52  ;;  %v17209_v8 = vpop.f32.mrb[10].mxu0 }
 0xfeb   : > { %v13749_v27 = vsel %vm2731_vm3, %v13746_v35, %v13748_v16  ;;  %v13750_v58 = vrot.slane %v13720_v10, 1  ;;  %v13752_v45 = vrot.slane %v13721_v53, 1  ;;  %v13635_v34 = vpop.f32.mrb[11].mxu0  ;;  %v24788_v59 = vadd.f32 %v17209_v8, %v24751_v19 }
 0xfec   : > { %v13787_v56 = vmax.f32 %v13718_v43, %v13749_v27  ;;  %v13689_v32 = vrot.slane %v13633_v55, 4  ;;  %v13636_v5 = vadd.f32 %v13635_v34, %v24748_v40  ;;  %v13693_v15 = vrot.slane %v24781_v46, 4 }
 0xfed   : > { %v13751_v54 = vsel %vm2731_vm3, %v13748_v16, %v13750_v58  ;;  %v13753_v38 = vsel %vm2731_vm3, %v13750_v58, %v13752_v45  ;;  %v13755_v52 = vsel %vm2731_vm3, %v13752_v45, %v13754_v21  ;;  %v13695_v19 = vrot.slane %v24788_v59, 4 }
 0xfee   : > { %v13808_v49 = vadd.f32 %v24775_v17, %v13787_v56  ;;  %v13788_v3 = vmax.f32 %v13719_v63, %v13751_v54  ;;  %v13789_v7 = vmax.f32 %v13720_v10, %v13753_v38  ;;  %v13790_v23 = vmax.f32 %v13721_v53, %v13755_v52 }
 0xfef   : > { %v13690_v57 = vsel %vm1501_vm0, %v13687_v1, %v13689_v32  ;;  %v13691_v36 = vrot.slane %v13636_v5, 4  ;;  %v13821_v40 = vmax.f32 %v13807_v37, 0.0  ;;  %v13696_v22 = vsel %vm1501_vm0, %v13693_v15, %v13695_v19 }
 0xff0   : > { %v13822_v25 = vmax.f32 %v13808_v49, 0.0  ;;  %v13809_v4 = vadd.f32 %v24775_v17, %v13788_v3  ;;  %v13810_v48 = vadd.f32 %v24775_v17, %v13789_v7  ;;  %v17212_v44 = vpop.f32.mrb[12].mxu0  ;;  %v13723_v62 = vmax.f32 %v13625_v0, %v13690_v57 }
 0xff1   : > { %v13692_v43 = vsel %vm1501_vm0, %v13689_v32, %v13691_v36  ;;  %v13694_v47 = vsel %vm1501_vm0, %v13691_v36, %v13693_v15  ;;  %v13648_v30 = vpop.f32.mrb[13].mxu0  ;;  %v13811_v28 = vadd.f32 %v24775_v17, %v13790_v23  ;;  %v24810_v39 = vmax.f32 %v13636_v5, %v13696_v22 }
 0xff2   : > { %v24803_v35 = vpack.c.bf16 %v13822_v25, %v13821_v40  ;;  %v13823_v9 = vmax.f32 %v13809_v4, 0.0  ;;  %v13824_v26 = vmax.f32 %v13810_v48, 0.0  ;;  %v17213_v31 = vpop.f32.mrb[14].mxu0  ;;  %v13756_v24 = vrot.slane %v13723_v62, 1 }
 0xff3   : > { %v13724_v0 = vmax.f32 %v24765_v20, %v13692_v43  ;;  %v13725_v60 = vmax.f32 %v13633_v55, %v13694_v47  ;;  %v13651_v1 = vpop.f32.mrb[15].mxu0  ;;  %v13657_v50 = vadd.f32 %v17212_v44, %v24760_v14  ;;  %v13649_v63 = vadd.f32 %v13648_v30, %v24754_v12 }
 0xff4   : > { %v24815_v13 = vpack.c.bf16 %v13824_v26, %v13823_v9  ;;  %v13652_v11 = vadd.f32 %v13651_v1, %v24757_v18  ;;  %16234 = vmatmul.mubr.msk.bf16.vlgmr.msra.gmra.mrb[16].mxu0 %vm13930_vm15, %v24803_v35  ;;  %v13757_v20 = vsel %vm2731_vm3, %v13754_v21, %v13756_v24  ;;  %v13762_v42 = vrot.slane %v24810_v39, 1  ;;  %16248 = vmatmul.mubr.msk.bf16.vlgmr.msra.gmra.mrb[124].mxu1 %vm13930_vm15, %v24803_v35  ;;  %v19242_v18 = vld [vmem:[%s25500_s9 + $0x40] ss:$28 sps:$4 sm:$0xff]  }
 0xff5   : > { %v13758_v41 = vrot.slane %v13724_v0, 1  ;;  %v13760_v6 = vrot.slane %v13725_v60, 1  ;;  %13994 = vmatprep.mubr.bf16.mxu0 %v25715_v33  ;;  %v13791_v14 = vmax.f32 %v24779_v29, %v13757_v20  ;;  %v13701_v16 = vrot.slane %v13657_v50, 4  ;;  %14200 = vmatprep.mubr.bf16.mxu1 %v25715_v33  ;;  %v19246_v20 = vld [vmem:[%s25500_s9 + $0x50] ss:$28 sps:$4 sm:$0xff]  }
 0xff6   : > { %v13697_v12 = vrot.slane %v13649_v63, 4  ;;  %v13699_v10 = vrot.slane %v13652_v11, 4  ;;  %14056 = vmatpush1.bf16.msra.mxu0 %v19239_v61  ;;  %v13825_v56 = vmax.f32 %v13811_v28, 0.0  ;;  %v25719_v7 = vmov 0.0  }
 0xff7   : > { %v13759_v53 = vsel %vm2731_vm3, %v13756_v24, %v13758_v41  ;;  %v13761_v51 = vsel %vm2731_vm3, %v13758_v41, %v13760_v6  ;;  %v13763_v21 = vsel %vm2731_vm3, %v13760_v6, %v13762_v42  ;;  %14057 = vmatprep.subr.bf16.mxu0 %v19244_v2  ;;  %v13812_v55 = vadd.f32 %v24775_v17, %v13791_v14  ;;  %v19248_v41 = vld [vmem:[%s25502_s11 + $0x140] sm:$0xff]   ;;  %v19251_v6 = vld [vmem:[%s25502_s11 + $0x48] sm:$0xff]  }
 0xff8   : > { %v13792_v29 = vmax.f32 %v13723_v62, %v13759_v53  ;;  %v13793_v8 = vmax.f32 %v13724_v0, %v13761_v51  ;;  %v13794_v37 = vmax.f32 %v13725_v60, %v13763_v21  ;;  %v13698_v27 = vsel %vm1501_vm0, %v13695_v19, %v13697_v12  ;;  %v19253_v14 = vld [vmem:[%s25502_s11 + $0x8] sm:$0xff]   ;;  %v19258_v53 = vld [vmem:[%s25502_s11 + $0x110] sm:$0xff]   ;;  %v19259_v51 = vld [vmem:[%s25502_s11 + $0x58] sm:$0xff]  }
 0xff9   : > { %v13700_v58 = vsel %vm1501_vm0, %v13697_v12, %v13699_v10  ;;  %v13702_v45 = vsel %vm1501_vm0, %v13699_v10, %v13701_v16  ;;  %v13730_v34 = vmax.f32 %v13652_v11, %v13701_v16  ;;  %v13826_v32 = vmax.f32 %v13812_v55, 0.0  ;;  %v19254_v16 = vld [vmem:[%s25502_s11 + $0x108] sm:$0xff]   ;;  %v19255_v12 = vld [vmem:[%s25502_s11 + $0x50] sm:$0xff]   ;;  %v19260_v21 = vld [vmem:[%s25502_s11 + $0x158] sm:$0xff]  }
 0xffa   : > { %v13813_v5 = vadd.f32 %v24775_v17, %v13792_v29  ;;  %v13814_v54 = vadd.f32 %v24775_v17, %v13793_v8  ;;  %14058 = vmatpush1.bf16.msra.mxu0 %v19242_v18  ;;  %v13727_v38 = vmax.f32 %v24781_v46, %v13698_v27  ;;  %v13728_v52 = vmax.f32 %v24788_v59, %v13700_v58  ;;  %v19256_v10 = vld [vmem:[%s25502_s11 + $0x150] sm:$0xff]   ;;  %v19261_v55 = vld [vmem:[%s25502_s11 + $0x18] sm:$0xff]   ;;  %v19263_v8 = vld [vmem:[%s25502_s11 + $0x60] sm:$0xff]  }
 0xffb   : > { %v13729_v49 = vmax.f32 %v13649_v63, %v13702_v45  ;;  %v13770_v3 = vrot.slane %v13730_v34, 1  ;;  %17214 = vmatprep.subr.bf16.mxu0 %v25719_v7  ;;  %v24844_v23 = vpack.c.bf16 %v13826_v32, %v13825_v56  ;;  %v13815_v46 = vadd.f32 %v24775_v17, %v13794_v37  ;;  %v19257_v18 = vld [vmem:[%s25502_s11 + $0x10] sm:$0xff]   ;;  %v19262_v29 = vld [vmem:[%s25502_s11 + $0x118] sm:$0xff]   ;;  %v19264_v37 = vld [vmem:[%s25502_s11 + $0x160] sm:$0xff]  }
 0xffc   : > { %v13827_v15 = vmax.f32 %v13813_v5, 0.0  ;;  %v13828_v57 = vmax.f32 %v13814_v54, 0.0  ;;  %16235 = vmatmul.mubr.msk.bf16.gmra.mrb[20].mxu0 %vm13930_vm15, %v24815_v13  ;;  %v13764_v19 = vrot.slane %v13727_v38, 1  ;;  %v13766_v36 = vrot.slane %v13728_v52, 1  ;;  %16249 = vmatmul.mubr.msk.bf16.gmra.mrb[128].mxu1 %vm13930_vm15, %v24815_v13  ;;  %v19265_v27 = vld [vmem:[%s25502_s11 + $0x20] sm:$0xff]   ;;  %v19267_v58 = vld [vmem:[%s25502_s11 + $0x68] sm:$0xff]  }
 0xffd   : > { %v13768_v40 = vrot.slane %v13729_v49, 1  ;;  %v13799_v25 = vmax.f32 %v13730_v34, %v13770_v3  ;;  %14004 = vmatprep.mubr.bf16.mxu0 %v25715_v33  ;;  %14210 = vmatprep.mubr.bf16.mxu1 %v25715_v33  ;;  %v13829_v24 = vmax.f32 %v13815_v46, 0.0  ;;  %v19266_v45 = vld [vmem:[%s25502_s11 + $0x120] sm:$0xff]   ;;  %v19268_v34 = vld [vmem:[%s25502_s11 + $0x168] sm:$0xff]   ;;  %v19271_v32 = vld [vmem:[%s25502_s11 + $0x70] sm:$0xff]  }
 0xffe   : > { %v24852_v59 = vpack.c.bf16 %v13828_v57, %v13827_v15  ;;  %v13765_v4 = vsel %vm2731_vm3, %v13762_v42, %v13764_v19  ;;  %v13767_v48 = vsel %vm2731_vm3, %v13764_v19, %v13766_v36  ;;  %v19252_v42 = vld [vmem:[%s25502_s11 + $0x148] sm:$0xff]   ;;  %v19272_v54 = vld [vmem:[%s25502_s11 + $0x170] sm:$0xff]   ;;  %v19278_v15 = vld [vmem:[%s25502_s11 + $0x138] sm:$0xff]  }
 0xfff   : > { %v13769_v44 = vsel %vm2731_vm3, %v13766_v36, %v13768_v40  ;;  %v13771_v62 = vsel %vm2731_vm3, %v13768_v40, %v13770_v3  ;;  %v13795_v43 = vmax.f32 %v24810_v39, %v13765_v4  ;;  %v13796_v47 = vmax.f32 %v13727_v38, %v13767_v48  ;;  %v19269_v56 = vld [vmem:[%s25502_s11 + $0x28] sm:$0xff]   ;;  %v19273_v38 = vld [vmem:[%s25502_s11 + $0x30] sm:$0xff]   ;;  %v19276_v3 = vld [vmem:[%s25502_s11 + $0x178] sm:$0xff]  }
0x1000   : > { %v13797_v22 = vmax.f32 %v13728_v52, %v13769_v44  ;;  %v13798_v30 = vmax.f32 %v13729_v49, %v13771_v62  ;;  %v13820_v28 = vadd.f32 %v24775_v17, %v13799_v25  ;;  %v19270_v5 = vld [vmem:[%s25502_s11 + $0x128] sm:$0xff]   ;;  %v19275_v52 = vld [vmem:[%s25502_s11 + $0x78] sm:$0xff]   ;;  %v19274_v49 = vld [vmem:[%s25502_s11 + $0x130] sm:$0xff]  }
0x1001   : > { %v13816_v9 = vadd.f32 %v24775_v17, %v13795_v43  ;;  %v13817_v26 = vadd.f32 %v24775_v17, %v13796_v47  ;;  %v19279_v57 = vld [vmem:[%s25502_s11 + $0xc0] sm:$0xff]   ;;  %v14357_v25 = vld [vmem:[%s25501_s10 + $0x38] sm:$0xff]  ;;  %v14351_v4 = vld [vmem:[%s25501_s10 + $0x8] sm:$0xff] }
0x1002   : > { %v13818_v31 = vadd.f32 %v24775_v17, %v13797_v22  ;;  %v13819_v61 = vadd.f32 %v24775_v17, %v13798_v30  ;;  %v13834_v0 = vmax.f32 %v13820_v28, 0.0  ;;  %v19245_v17 = vld [vmem:[%s25500_s9 + $0x18] ss:$28 sps:$4 sm:$0xff]   ;;  %v14350_v36 = vld [vmem:[%s25501_s10] sm:$0xff]  ;;  %v14355_v43 = vld [vmem:[%s25501_s10 + $0x28] sm:$0xff] }
0x1003   : > { %v13830_v60 = vmax.f32 %v13816_v9, 0.0  ;;  %v13831_v1 = vmax.f32 %v13817_v26, 0.0  ;;  %v14354_v40 = vld [vmem:[%s25501_s10 + $0x20] sm:$0xff]  ;;  %v14361_v48 = vld [vmem:[%s25501_s10 + $0x58] sm:$0xff] }
0x1004   : > { %v13832_v2 = vmax.f32 %v13818_v31, 0.0  ;;  %v13833_v50 = vmax.f32 %v13819_v61, 0.0  ;;  %16236 = vmatmul.mubr.msk.bf16.gmra.mrb[24].mxu0 %vm13930_vm15, %v24844_v23  ;;  %16250 = vmatmul.mubr.msk.bf16.gmra.mrb[132].mxu1 %vm13930_vm15, %v24844_v23  ;;  %v14358_v44 = vld [vmem:[%s25501_s10 + $0x40] sm:$0xff] }
0x1005   : > { %14014 = vmatprep.mubr.bf16.mxu0 %v25715_v33  ;;  %v24870_v39 = vpack.c.bf16 %v13830_v60, %v13829_v24  ;;  %14220 = vmatprep.mubr.bf16.mxu1 %v25715_v33  ;;  %v14362_v22 = vld [vmem:[%s25501_s10 + $0x60] sm:$0xff] }
0x1006   : > { %v24872_v63 = vpack.c.bf16 %v13832_v2, %v13831_v1  ;;  %v24874_v11 = vpack.c.bf16 %v13834_v0, %v13833_v50 }
0x100c   : > { %16237 = vmatmul.mubr.msk.bf16.gmra.mrb[28].mxu0 %vm13930_vm15, %v24852_v59  ;;  %16251 = vmatmul.mubr.msk.bf16.gmra.mrb[136].mxu1 %vm13930_vm15, %v24852_v59 }
0x100d   : > { %14024 = vmatprep.mubr.bf16.mxu0 %v25715_v33  ;;  %14230 = vmatprep.mubr.bf16.mxu1 %v25715_v33 }
0x1014   : > { %16238 = vmatmul.mubr.msk.bf16.gmra.mrb[32].mxu0 %vm13930_vm15, %v24870_v39  ;;  %16252 = vmatmul.mubr.msk.bf16.gmra.mrb[140].mxu1 %vm13930_vm15, %v24870_v39 }
0x1015   : > { %14034 = vmatprep.mubr.bf16.mxu0 %v25715_v33  ;;  %14240 = vmatprep.mubr.bf16.mxu1 %v25715_v33 }
0x101c   : > { %16239 = vmatmul.mubr.msk.bf16.gmra.mrb[36].mxu0 %vm13930_vm15, %v24872_v63  ;;  %16253 = vmatmul.mubr.msk.bf16.gmra.mrb[144].mxu1 %vm13930_vm15, %v24872_v63 }
0x101d   : > { %14044 = vmatprep.mubr.bf16.mxu0 %v25715_v33  ;;  %14250 = vmatprep.mubr.bf16.mxu1 %v25715_v33 }
0x1024   : > { %16240 = vmatmul.mubr.msk.bf16.gmra.mrb[40].mxu0 %vm13930_vm15, %v24874_v11  ;;  %16254 = vmatmul.mubr.msk.bf16.gmra.mrb[148].mxu1 %vm13930_vm15, %v24874_v11 }
0x1025   : > { %14087 = vmatprep.mubr.bf16.mxu0 %v25715_v33 }
0x102c   : > { %16241 = vmatmul.mubr.msk.bf16.vlgmr.msra.gmra.mrb[44].mxu0 %vm13930_vm15, %v24803_v35 }
0x102d   : > { %14097 = vmatprep.mubr.bf16.mxu0 %v25715_v33  ;;  %17215 = vmatpush3.bf16.msra.mxu0 %v19245_v17 }
0x102e   : > { %17216 = vmatprep.subr.bf16.mxu0 %v25719_v7 }
0x1031   : > { %17217 = vmatpush3.bf16.msra.mxu0 %v19246_v20  ;;  %v14368_v20 = vld [vmem:[%s25501_s10 + $0x90] sm:$0xff] }
0x1032   : > { %16759 = vmatprep.subr.bf16.mxu0 %v19248_v41 }
0x1034   : > { %16242 = vmatmul.mubr.msk.bf16.gmra.mrb[48].mxu0 %vm13930_vm15, %v24815_v13 }
0x1035   : > { %14107 = vmatprep.mubr.bf16.mxu0 %v25715_v33 }
0x103c   : > { %16243 = vmatmul.mubr.msk.bf16.gmra.mrb[64].mxu0 %vm13930_vm15, %v24844_v23 }
0x103d   : > { %14117 = vmatprep.mubr.bf16.mxu0 %v25715_v33 }
0x1044   : > { %16244 = vmatmul.mubr.msk.bf16.gmra.mrb[68].mxu0 %vm13930_vm15, %v24852_v59 }
0x1045   : > { %14127 = vmatprep.mubr.bf16.mxu0 %v25715_v33 }
0x104c   : > { %16245 = vmatmul.mubr.msk.bf16.gmra.mrb[72].mxu0 %vm13930_vm15, %v24870_v39 }
0x104d   : > { %14137 = vmatprep.mubr.bf16.mxu0 %v25715_v33 }
0x1054   : > { %16246 = vmatmul.mubr.msk.bf16.gmra.mrb[76].mxu0 %vm13930_vm15, %v24872_v63 }
0x1055   : > { %14147 = vmatprep.mubr.bf16.mxu0 %v25715_v33  ;;  %v19247_v33 = vld [vmem:[%s25502_s11 + $0x40] sm:$0xff]  }
0x1056   : > { %16715 = vmatprep.subr.bf16.mxu1 %v19247_v33  ;;  %v14365_v33 = vld [vmem:[%s25501_s10 + $0x78] sm:$0xff] }
0x105c   : > { %16247 = vmatmul.mubr.msk.bf16.gmra.mrb[80].mxu0 %vm13930_vm15, %v24874_v11 }
0x105d   : > { %17218 = vmatprep.mubr.msk.bf16.mxu0 %vm19372_vm5, %v25719_v7 }
0x1064   : > { %17219 = vmatmul.mubr.msk.bf16.vlgmr.msra.gmra.mrb[84].mxu0 %vm13930_vm15, %v24803_v35  ;;  %v19249_v35 = vld [vmem:[%s25502_s11] sm:$0xff]  }
0x1065   : > { %17222 = vmatprep.mubr.msk.bf16.mxu0 %vm19372_vm5, %v25719_v7  ;;  %16716 = vmatpush3.bf16.msra.mxu1 %v19249_v35  ;;  %v14369_v35 = vld [vmem:[%s25501_s10 + $0x98] sm:$0xff] }
0x1066   : > { %16717 = vmatprep.subr.bf16.mxu1 %v19251_v6 }
0x1069   : > { %16718 = vmatpush3.bf16.msra.mxu1 %v19253_v14 }
0x106a   : > { %16719 = vmatprep.subr.bf16.mxu1 %v19255_v12  ;;  %v14372_v12 = vld [vmem:[%s25501_s10 + $0xb0] sm:$0xff] }
0x106c   : > { %17223 = vmatmul.mubr.msk.bf16.gmra.mrb[88].mxu0 %vm13930_vm15, %v24815_v13  ;;  %v19250_v13 = vld [vmem:[%s25502_s11 + $0x100] sm:$0xff]  }
0x106d   : > { %17226 = vmatprep.mubr.msk.bf16.mxu0 %vm19372_vm5, %v25719_v7  ;;  %16760 = vmatpush3.bf16.msra.mxu0 %v19250_v13  ;;  %v14371_v13 = vld [vmem:[%s25501_s10 + $0xa8] sm:$0xff] }
0x106e   : > { %16761 = vmatprep.subr.bf16.mxu0 %v19252_v42  ;;  %16720 = vmatpush3.bf16.msra.mxu1 %v19257_v18 }
0x106f   : > { %16721 = vmatprep.subr.bf16.mxu1 %v19259_v51 }
0x1071   : > { %16762 = vmatpush3.bf16.msra.mxu0 %v19254_v16  ;;  %v14375_v16 = vld [vmem:[%s25501_s10 + $0xc8] sm:$0xff] }
0x1072   : > { %16763 = vmatprep.subr.bf16.mxu0 %v19256_v10  ;;  %16722 = vmatpush3.bf16.msra.mxu1 %v19261_v55 }
0x1073   : > { %16723 = vmatprep.subr.bf16.mxu1 %v19263_v8 }
0x1074   : > { %17227 = vmatmul.mubr.msk.bf16.gmra.mrb[92].mxu0 %vm13930_vm15, %v24844_v23  ;;  %v19277_v23 = vld [vmem:[%s25502_s11 + $0x38] sm:$0xff]  }
0x1075   : > { %17230 = vmatprep.mubr.msk.bf16.mxu0 %vm19372_vm5, %v25719_v7  ;;  %16764 = vmatpush3.bf16.msra.mxu0 %v19258_v53 }
0x1076   : > { %16765 = vmatprep.subr.bf16.mxu0 %v19260_v21  ;;  %16724 = vmatpush3.bf16.msra.mxu1 %v19265_v27  ;;  %v14376_v21 = vld [vmem:[%s25501_s10 + $0xd0] sm:$0xff] }
0x1077   : > { %16725 = vmatprep.subr.bf16.mxu1 %v19267_v58 }
0x1079   : > { %16766 = vmatpush3.bf16.msra.mxu0 %v19262_v29 }
0x107a   : > { %16767 = vmatprep.subr.bf16.mxu0 %v19264_v37  ;;  %16726 = vmatpush3.bf16.msra.mxu1 %v19269_v56 }
0x107b   : > { %16727 = vmatprep.subr.bf16.mxu1 %v19271_v32 }
0x107c   : > { %17231 = vmatmul.mubr.msk.bf16.gmra.mrb[96].mxu0 %vm13930_vm15, %v24852_v59 }
0x107d   : > { %17234 = vmatprep.mubr.msk.bf16.mxu0 %vm19372_vm5, %v25719_v7  ;;  %16768 = vmatpush3.bf16.msra.mxu0 %v19266_v45 }
0x107e   : > { %16769 = vmatprep.subr.bf16.mxu0 %v19268_v34  ;;  %16728 = vmatpush3.bf16.msra.mxu1 %v19273_v38 }
0x107f   : > { %16729 = vmatprep.subr.bf16.mxu1 %v19275_v52 }
0x1081   : > { %16770 = vmatpush3.bf16.msra.mxu0 %v19270_v5 }
0x1082   : > { %16771 = vmatprep.subr.bf16.mxu0 %v19272_v54  ;;  %16730 = vmatpush3.bf16.msra.mxu1 %v19277_v23 }
0x1083   : > { %16737 = vmatprep.subr.bf16.mxu1 %v19279_v57  ;;  %v14379_v57 = vld [vmem:[%s25501_s10 + $0xe8] sm:$0xff] }
0x1084   : > { %17235 = vmatmul.mubr.msk.bf16.gmra.mrb[100].mxu0 %vm13930_vm15, %v24870_v39 }
0x1085   : > { %17238 = vmatprep.mubr.msk.bf16.mxu0 %vm19372_vm5, %v25719_v7  ;;  %16772 = vmatpush3.bf16.msra.mxu0 %v19274_v49 }
0x1086   : > { %16773 = vmatprep.subr.bf16.mxu0 %v19276_v3  ;;  %v14378_v3 = vld [vmem:[%s25501_s10 + $0xe0] sm:$0xff] }
0x1089   : > { %16774 = vmatpush3.bf16.msra.mxu0 %v19278_v15  ;;  %v14382_v15 = vld [vmem:[%s25501_s10 + $0x100] sm:$0xff] }
0x108c   : > { %17239 = vmatmul.mubr.msk.bf16.gmra.mrb[104].mxu0 %vm13930_vm15, %v24872_v63 }
0x108d   : > { %17242 = vmatprep.mubr.msk.bf16.mxu0 %vm19372_vm5, %v25719_v7 }
0x1094   : > { %17243 = vmatmul.mubr.msk.bf16.gmra.mrb[108].mxu0 %vm13930_vm15, %v24874_v11  ;;  %v14364_v11 = vld [vmem:[%s25501_s10 + $0x70] sm:$0xff] }
0x10c7   : > { %v13986_v19 = vpop.f32.mrb[16].mxu0  ;;  %v14192_v46 = vpop.f32.mrb[124].mxu1 }
0x10c8   : > { %v13988_v59 = vpop.f32.mrb[17].mxu0  ;;  %v14194_v62 = vpop.f32.mrb[125].mxu1  ;;  %v14448_v30 = vmul.f32 %v14350_v36, %v13986_v19  ;;  %v14452_v31 = vmul.f32 %v14354_v40, %v14192_v46  ;;  %v14383_v36 = vld [vmem:[%s25501_s10 + $0x108] sm:$0xff]  ;;  %v14385_v40 = vld [vmem:[%s25501_s10 + $0x118] sm:$0xff] }
0x10c9   : > { %v13990_v47 = vpop.f32.mrb[18].mxu0  ;;  %v14196_v9 = vpop.f32.mrb[126].mxu1  ;;  %v14449_v61 = vmul.f32 %v14351_v4, %v13988_v59  ;;  %v14453_v1 = vmul.f32 %v14355_v43, %v14194_v62  ;;  %v14389_v4 = vld [vmem:[%s25501_s10 + $0x138] sm:$0xff] }
0x10ca   : > { %v14455_v28 = vmul.f32 %v14357_v25, %v13990_v47  ;;  %v13992_v26 = vpop.f32.mrb[19].mxu0  ;;  %v14459_v24 = vmul.f32 %v14361_v48, %v14196_v9  ;;  %v14198_v60 = vpop.f32.mrb[127].mxu1  ;;  %v14386_v48 = vld [vmem:[%s25501_s10 + $0x120] sm:$0xff] }
0x10cb   : > { %v14456_v0 = vmul.f32 %v14358_v44, %v13992_v26  ;;  %v14460_v50 = vmul.f32 %v14362_v22, %v14198_v60  ;;  %v14390_v22 = vld [vmem:[%s25501_s10 + $0x140] sm:$0xff] }
0x10cc   : > { %v14546_v2 = vadd.f32 %v14455_v28, %v14448_v30  ;;  %v14626_v39 = vadd.f32 %v14459_v24, %v14452_v31 }
0x10cd   : > { %v14566_v63 = vadd.f32 %v14456_v0, %v14449_v61  ;;  %v14646_v17 = vadd.f32 %v14460_v50, %v14453_v1 }
0x10cf   : > { %v13996_v41 = vpop.f32.mrb[20].mxu0  ;;  %v14202_v42 = vpop.f32.mrb[128].mxu1 }
0x10d0   : > { %v14462_v6 = vmul.f32 %v14364_v11, %v13996_v41  ;;  %v13998_v14 = vpop.f32.mrb[21].mxu0  ;;  %v14466_v10 = vmul.f32 %v14368_v20, %v14202_v42  ;;  %v14204_v53 = vpop.f32.mrb[129].mxu1  ;;  %v14393_v41 = vld [vmem:[%s25501_s10 + $0x158] sm:$0xff] }
0x10d1   : > { %v14463_v18 = vmul.f32 %v14365_v33, %v13998_v14  ;;  %v14000_v51 = vpop.f32.mrb[22].mxu0  ;;  %v14467_v29 = vmul.f32 %v14369_v35, %v14204_v53  ;;  %v14206_v37 = vpop.f32.mrb[130].mxu1  ;;  %v14396_v33 = vld [vmem:[%s25501_s10 + $0x170] sm:$0xff] }
0x10d2   : > { %v14547_v55 = vadd.f32 %v14546_v2, %v14462_v6  ;;  %v14469_v8 = vmul.f32 %v14371_v13, %v14000_v51  ;;  %v14002_v27 = vpop.f32.mrb[23].mxu0  ;;  %v14627_v58 = vadd.f32 %v14626_v39, %v14466_v10  ;;  %v14473_v34 = vmul.f32 %v14375_v16, %v14206_v37  ;;  %v14208_v32 = vpop.f32.mrb[131].mxu1  ;;  %v14397_v13 = vld [vmem:[%s25501_s10 + $0x178] sm:$0xff]  ;;  %v14399_v6 = vld [vmem:[%s25501_s10 + $0x188] sm:$0xff]  ;;  %v14400_v10 = vld [vmem:[%s25501_s10 + $0x190] sm:$0xff] }
0x10d3   : > { %v14567_v45 = vadd.f32 %v14566_v63, %v14463_v18  ;;  %v14470_v56 = vmul.f32 %v14372_v12, %v14002_v27  ;;  %v14647_v5 = vadd.f32 %v14646_v17, %v14467_v29  ;;  %v14474_v38 = vmul.f32 %v14376_v21, %v14208_v32  ;;  %v14392_v17 = vld [vmem:[%s25501_s10 + $0x150] sm:$0xff]  ;;  %v14403_v12 = vld [vmem:[%s25501_s10 + $0x1a8] sm:$0xff] }
0x10d4   : > { %v14548_v54 = vadd.f32 %v14547_v55, %v14469_v8  ;;  %v14628_v52 = vadd.f32 %v14627_v58, %v14473_v34  ;;  %v14404_v55 = vld [vmem:[%s25501_s10 + $0x1b0] sm:$0xff] }
0x10d5   : > { %v14568_v49 = vadd.f32 %v14567_v45, %v14470_v56  ;;  %v14648_v23 = vadd.f32 %v14647_v5, %v14474_v38 }
0x10d7   : > { %v14006_v19 = vpop.f32.mrb[24].mxu0  ;;  %v14212_v46 = vpop.f32.mrb[132].mxu1 }
0x10d8   : > { %v14476_v25 = vmul.f32 %v14378_v3, %v14006_v19  ;;  %v14008_v59 = vpop.f32.mrb[25].mxu0  ;;  %v14480_v44 = vmul.f32 %v14382_v15, %v14212_v46  ;;  %v14214_v43 = vpop.f32.mrb[133].mxu1  ;;  %v14407_v19 = vld [vmem:[%s25501_s10 + $0x1c8] sm:$0xff] }
0x10d9   : > { %v14477_v62 = vmul.f32 %v14379_v57, %v14008_v59  ;;  %v14010_v47 = vpop.f32.mrb[26].mxu0  ;;  %v14481_v28 = vmul.f32 %v14383_v36, %v14214_v43  ;;  %v14216_v26 = vpop.f32.mrb[134].mxu1  ;;  %v14410_v57 = vld [vmem:[%s25501_s10 + $0x1e0] sm:$0xff] }
0x10da   : > { %v14549_v30 = vadd.f32 %v14548_v54, %v14476_v25  ;;  %v14483_v9 = vmul.f32 %v14385_v40, %v14010_v47  ;;  %v14012_v31 = vpop.f32.mrb[27].mxu0  ;;  %v14629_v61 = vadd.f32 %v14628_v52, %v14480_v44  ;;  %v14487_v0 = vmul.f32 %v14389_v4, %v14216_v26  ;;  %v14218_v1 = vpop.f32.mrb[135].mxu1  ;;  %v14411_v40 = vld [vmem:[%s25501_s10 + $0x1e8] sm:$0xff]  ;;  %v14413_v25 = vld [vmem:[%s25501_s10 + $0x1f8] sm:$0xff]  ;;  %v14414_v44 = vld [vmem:[%s25501_s10 + $0x200] sm:$0xff] }
0x10db   : > { %v14569_v24 = vadd.f32 %v14568_v49, %v14477_v62  ;;  %v14484_v60 = vmul.f32 %v14386_v48, %v14012_v31  ;;  %v14649_v2 = vadd.f32 %v14648_v23, %v14481_v28  ;;  %v14488_v39 = vmul.f32 %v14390_v22, %v14218_v1  ;;  %v14406_v23 = vld [vmem:[%s25501_s10 + $0x1c0] sm:$0xff]  ;;  %v14417_v48 = vld [vmem:[%s25501_s10 + $0x218] sm:$0xff] }
0x10dc   : > { %v14550_v50 = vadd.f32 %v14549_v30, %v14483_v9  ;;  %v14630_v63 = vadd.f32 %v14629_v61, %v14487_v0  ;;  %v14418_v30 = vld [vmem:[%s25501_s10 + $0x220] sm:$0xff] }
0x10dd   : > { %v14570_v11 = vadd.f32 %v14569_v24, %v14484_v60  ;;  %v14650_v20 = vadd.f32 %v14649_v2, %v14488_v39 }
0x10df   : > { %v14016_v35 = vpop.f32.mrb[28].mxu0  ;;  %v14222_v14 = vpop.f32.mrb[136].mxu1 }
0x10e0   : > { %v14490_v42 = vmul.f32 %v14392_v17, %v14016_v35  ;;  %v14018_v16 = vpop.f32.mrb[29].mxu0  ;;  %v14494_v18 = vmul.f32 %v14396_v33, %v14222_v14  ;;  %v14224_v51 = vpop.f32.mrb[137].mxu1  ;;  %v14421_v35 = vld [vmem:[%s25501_s10 + $0x238] sm:$0xff] }
0x10e1   : > { %v14491_v53 = vmul.f32 %v14393_v41, %v14018_v16  ;;  %v14020_v21 = vpop.f32.mrb[30].mxu0  ;;  %v14495_v8 = vmul.f32 %v14397_v13, %v14224_v51  ;;  %v14226_v27 = vpop.f32.mrb[138].mxu1  ;;  %v14424_v41 = vld [vmem:[%s25501_s10 + $0x250] sm:$0xff] }
0x10e2   : > { %v14551_v29 = vadd.f32 %v14550_v50, %v14490_v42  ;;  %v14497_v37 = vmul.f32 %v14399_v6, %v14020_v21  ;;  %v14022_v58 = vpop.f32.mrb[31].mxu0  ;;  %v14631_v45 = vadd.f32 %v14630_v63, %v14494_v18  ;;  %v14501_v56 = vmul.f32 %v14403_v12, %v14226_v27  ;;  %v14228_v5 = vpop.f32.mrb[139].mxu1  ;;  %v14425_v6 = vld [vmem:[%s25501_s10 + $0x258] sm:$0xff]  ;;  %v14427_v42 = vld [vmem:[%s25501_s10 + $0x268] sm:$0xff]  ;;  %v14428_v18 = vld [vmem:[%s25501_s10 + $0x270] sm:$0xff] }
0x10e3   : > { %v14571_v34 = vadd.f32 %v14570_v11, %v14491_v53  ;;  %v14498_v32 = vmul.f32 %v14400_v10, %v14022_v58  ;;  %v14651_v54 = vadd.f32 %v14650_v20, %v14495_v8  ;;  %v14502_v52 = vmul.f32 %v14404_v55, %v14228_v5  ;;  %v14420_v20 = vld [vmem:[%s25501_s10 + $0x230] sm:$0xff]  ;;  %v14431_v10 = vld [vmem:[%s25501_s10 + $0x288] sm:$0xff] }
0x10e4   : > { %v14552_v38 = vadd.f32 %v14551_v29, %v14497_v37  ;;  %v14632_v49 = vadd.f32 %v14631_v45, %v14501_v56  ;;  %v14432_v29 = vld [vmem:[%s25501_s10 + $0x290] sm:$0xff] }
0x10e5   : > { %v14572_v3 = vadd.f32 %v14571_v34, %v14498_v32  ;;  %v14652_v15 = vadd.f32 %v14651_v54, %v14502_v52 }
0x10e7   : > { %v14026_v36 = vpop.f32.mrb[32].mxu0  ;;  %v14232_v59 = vpop.f32.mrb[140].mxu1 }
0x10e8   : > { %v14504_v46 = vmul.f32 %v14406_v23, %v14026_v36  ;;  %v14028_v4 = vpop.f32.mrb[33].mxu0  ;;  %v14508_v62 = vmul.f32 %v14410_v57, %v14232_v59  ;;  %v14234_v47 = vpop.f32.mrb[141].mxu1  ;;  %v14435_v36 = vld [vmem:[%s25501_s10 + $0x2a8] sm:$0xff] }
0x10e9   : > { %v14505_v43 = vmul.f32 %v14407_v19, %v14028_v4  ;;  %v14030_v22 = vpop.f32.mrb[34].mxu0  ;;  %v14509_v9 = vmul.f32 %v14411_v40, %v14234_v47  ;;  %v14236_v31 = vpop.f32.mrb[142].mxu1  ;;  %v14438_v19 = vld [vmem:[%s25501_s10 + $0x2c0] sm:$0xff] }
0x10ea   : > { %v14553_v28 = vadd.f32 %v14552_v38, %v14504_v46  ;;  %v14511_v26 = vmul.f32 %v14413_v25, %v14030_v22  ;;  %v14032_v61 = vpop.f32.mrb[35].mxu0  ;;  %v14633_v24 = vadd.f32 %v14632_v49, %v14508_v62  ;;  %v14515_v60 = vmul.f32 %v14417_v48, %v14236_v31  ;;  %v14238_v2 = vpop.f32.mrb[143].mxu1  ;;  %v14439_v25 = vld [vmem:[%s25501_s10 + $0x2c8] sm:$0xff]  ;;  %v14441_v46 = vld [vmem:[%s25501_s10 + $0x2d8] sm:$0x7] }
0x10eb   : > { %v14573_v0 = vadd.f32 %v14572_v3, %v14505_v43  ;;  %v14512_v1 = vmul.f32 %v14414_v44, %v14032_v61  ;;  %v14653_v50 = vadd.f32 %v14652_v15, %v14509_v9  ;;  %v14516_v63 = vmul.f32 %v14418_v30, %v14238_v2  ;;  %v14434_v15 = vld [vmem:[%s25501_s10 + $0x2a0] sm:$0xff]  ;;  %v14445_v44 = vld [vmem:[%s25501_s10 + $0x2f8] sm:$0x7] }
0x10ec   : > { %v14554_v39 = vadd.f32 %v14553_v28, %v14511_v26  ;;  %v14634_v11 = vadd.f32 %v14633_v24, %v14515_v60  ;;  %v14442_v62 = vld [vmem:[%s25501_s10 + $0x2e0] sm:$0x7] }
0x10ed   : > { %v14574_v17 = vadd.f32 %v14573_v0, %v14512_v1  ;;  %v14654_v33 = vadd.f32 %v14653_v50, %v14516_v63  ;;  %v14446_v28 = vld [vmem:[%s25501_s10 + $0x300] sm:$0x7] }
0x10ef   : > { %v14036_v13 = vpop.f32.mrb[36].mxu0  ;;  %v14242_v16 = vpop.f32.mrb[144].mxu1 }
0x10f0   : > { %v14518_v14 = vmul.f32 %v14420_v20, %v14036_v13  ;;  %v14038_v12 = vpop.f32.mrb[37].mxu0  ;;  %v14522_v53 = vmul.f32 %v14424_v41, %v14242_v16  ;;  %v14244_v21 = vpop.f32.mrb[145].mxu1  ;;  %v14352_v16 = vld [vmem:[%s25501_s10 + $0x10] sm:$0xff] }
0x10f1   : > { %v14519_v51 = vmul.f32 %v14421_v35, %v14038_v12  ;;  %v14040_v55 = vpop.f32.mrb[38].mxu0  ;;  %v14523_v37 = vmul.f32 %v14425_v6, %v14244_v21  ;;  %v14246_v58 = vpop.f32.mrb[146].mxu1  ;;  %v14359_v12 = vld [vmem:[%s25501_s10 + $0x48] sm:$0xff]  ;;  %v14360_v21 = vld [vmem:[%s25501_s10 + $0x50] sm:$0xff] }
0x10f2   : > { %v14555_v8 = vadd.f32 %v14554_v39, %v14518_v14  ;;  %v14525_v27 = vmul.f32 %v14427_v42, %v14040_v55  ;;  %v14042_v45 = vpop.f32.mrb[39].mxu0  ;;  %v14635_v34 = vadd.f32 %v14634_v11, %v14522_v53  ;;  %v14529_v32 = vmul.f32 %v14431_v10, %v14246_v58  ;;  %v14248_v54 = vpop.f32.mrb[147].mxu1 }
0x10f3   : > { %v14575_v56 = vadd.f32 %v14574_v17, %v14519_v51  ;;  %v14526_v5 = vmul.f32 %v14428_v18, %v14042_v45  ;;  %v14655_v38 = vadd.f32 %v14654_v33, %v14523_v37  ;;  %v14530_v49 = vmul.f32 %v14432_v29, %v14248_v54  ;;  %v14353_v51 = vld [vmem:[%s25501_s10 + $0x18] sm:$0xff] }
0x10f4   : > { %v14556_v52 = vadd.f32 %v14555_v8, %v14525_v27  ;;  %v14636_v3 = vadd.f32 %v14635_v34, %v14529_v32 }
0x10f5   : > { %v14576_v23 = vadd.f32 %v14575_v56, %v14526_v5  ;;  %v14656_v57 = vadd.f32 %v14655_v38, %v14530_v49 }
0x10f7   : > { %v14046_v40 = vpop.f32.mrb[40].mxu0  ;;  %v14252_v4 = vpop.f32.mrb[148].mxu1 }
0x10f8   : > { %v14532_v59 = vmul.f32 %v14434_v15, %v14046_v40  ;;  %v14048_v48 = vpop.f32.mrb[41].mxu0  ;;  %v14536_v43 = vmul.f32 %v14438_v19, %v14252_v4  ;;  %v14254_v22 = vpop.f32.mrb[149].mxu1 }
0x10f9   : > { %v14533_v47 = vmul.f32 %v14435_v36, %v14048_v48  ;;  %v14050_v30 = vpop.f32.mrb[42].mxu0  ;;  %v14537_v26 = vmul.f32 %v14439_v25, %v14254_v22  ;;  %v14256_v61 = vpop.f32.mrb[150].mxu1  ;;  %v14367_v36 = vld [vmem:[%s25501_s10 + $0x88] sm:$0xff] }
0x10fa   : > { %v14557_v9 = vadd.f32 %v14556_v52, %v14532_v59  ;;  %v14539_v31 = vmul.f32 %v14441_v46, %v14050_v30  ;;  %v14052_v24 = vpop.f32.mrb[43].mxu0  ;;  %v14637_v0 = vadd.f32 %v14636_v3, %v14536_v43  ;;  %v14543_v1 = vmul.f32 %v14445_v44, %v14256_v61  ;;  %v14258_v50 = vpop.f32.mrb[151].mxu1  ;;  %v14373_v59 = vld [vmem:[%s25501_s10 + $0xb8] sm:$0xff]  ;;  %v14374_v43 = vld [vmem:[%s25501_s10 + $0xc0] sm:$0xff] }
0x10fb   : > { %v14577_v60 = vadd.f32 %v14576_v23, %v14533_v47  ;;  %v14540_v2 = vmul.f32 %v14442_v62, %v14052_v24  ;;  %v14657_v39 = vadd.f32 %v14656_v57, %v14537_v26  ;;  %v14544_v11 = vmul.f32 %v14446_v28, %v14258_v50  ;;  %v14366_v57 = vld [vmem:[%s25501_s10 + $0x80] sm:$0xff] }
0x10fc   : > { %v14558_v63 = vsel %vm6522_vm4, %v14539_v31, 0.0  ;;  %v14638_v20 = vsel %vm6522_vm4, %v14543_v1, 0.0 }
0x10fd   : > { %v14559_v17 = vadd.f32 %v14558_v63, %v14557_v9  ;;  %v14578_v33 = vsel %vm6522_vm4, %v14540_v2, 0.0  ;;  %v14639_v41 = vadd.f32 %v14638_v20, %v14637_v0  ;;  %v14658_v13 = vsel %vm6522_vm4, %v14544_v11, 0.0  ;;  %v19280_v63 = vld [vmem:[%s25502_s11 + $0x80] sm:$0xff]  }
0x10fe   : > { %v14579_v35 = vadd.f32 %v14578_v33, %v14577_v60  ;;  %v14659_v42 = vadd.f32 %v14658_v13, %v14657_v39  ;;  %v14380_v33 = vld [vmem:[%s25501_s10 + $0xf0] sm:$0xff]  ;;  %v14381_v13 = vld [vmem:[%s25501_s10 + $0xf8] sm:$0xff] }
0x10ff   : > { %v14560_v6 = vrot.slane %v14559_v17, 4  ;;  %v14089_v14 = vpop.f32.mrb[44].mxu0  ;;  %v14640_v10 = vrot.slane %v14639_v41, 4 }
0x1100   : > { %v14580_v18 = vrot.slane %v14579_v35, 4  ;;  %v14091_v53 = vpop.f32.mrb[45].mxu0  ;;  %v14660_v29 = vrot.slane %v14659_v42, 4  ;;  %v14450_v58 = vmul.f32 %v14352_v16, %v14089_v14 }
0x1101   : > { %v14561_v55 = vadd.f32 %v14560_v6, %v14559_v17  ;;  %v14093_v8 = vpop.f32.mrb[46].mxu0  ;;  %v14641_v37 = vadd.f32 %v14640_v10, %v14639_v41  ;;  %v14451_v5 = vmul.f32 %v14353_v51, %v14091_v53  ;;  %v19281_v41 = vld [vmem:[%s25502_s11 + $0xc8] sm:$0xff]   ;;  %v19283_v51 = vld [vmem:[%s25502_s11 + $0xd0] sm:$0xff]  }
0x1102   : > { %v14581_v27 = vadd.f32 %v14580_v18, %v14579_v35  ;;  %v14457_v45 = vmul.f32 %v14359_v12, %v14093_v8  ;;  %v14095_v34 = vpop.f32.mrb[47].mxu0  ;;  %v14661_v32 = vadd.f32 %v14660_v29, %v14659_v42  ;;  %v14387_v42 = vld [vmem:[%s25501_s10 + $0x128] sm:$0xff]  ;;  %v14388_v12 = vld [vmem:[%s25501_s10 + $0x130] sm:$0xff] }
0x1103   : > { %v14562_v56 = vrot.slane %v14561_v55, 2  ;;  %v14458_v54 = vmul.f32 %v14360_v21, %v14095_v34  ;;  %v14642_v38 = vrot.slane %v14641_v37, 2  ;;  %v19282_v10 = vld [vmem:[%s25502_s11 + $0x88] sm:$0xff]   ;;  %v14394_v34 = vld [vmem:[%s25501_s10 + $0x160] sm:$0xff] }
0x1104   : > { %v14582_v52 = vrot.slane %v14581_v27, 2  ;;  %v14586_v49 = vadd.f32 %v14457_v45, %v14450_v58  ;;  %v14662_v23 = vrot.slane %v14661_v32, 2  ;;  %v19284_v58 = vld [vmem:[%s25502_s11 + $0x90] sm:$0xff]  }
0x1105   : > { %v14563_v3 = vadd.f32 %v14562_v56, %v14561_v55  ;;  %v14606_v15 = vadd.f32 %v14458_v54, %v14451_v5  ;;  %v14643_v19 = vadd.f32 %v14642_v38, %v14641_v37  ;;  %v19285_v56 = vld [vmem:[%s25502_s11 + $0xd8] sm:$0xff]  }
0x1106   : > { %v14583_v40 = vadd.f32 %v14582_v52, %v14581_v27  ;;  %v14663_v4 = vadd.f32 %v14662_v23, %v14661_v32  ;;  %v14395_v32 = vld [vmem:[%s25501_s10 + $0x168] sm:$0xff]  ;;  %v14401_v54 = vld [vmem:[%s25501_s10 + $0x198] sm:$0xff] }
0x1107   : > { %v14564_v25 = vrot.slane %v14563_v3, 1  ;;  %v14099_v46 = vpop.f32.mrb[48].mxu0  ;;  %v14644_v48 = vrot.slane %v14643_v19, 1 }
0x1108   : > { %v14464_v44 = vmul.f32 %v14366_v57, %v14099_v46  ;;  %v14101_v62 = vpop.f32.mrb[49].mxu0  ;;  %v14584_v47 = vrot.slane %v14583_v40, 1  ;;  %v14664_v9 = vrot.slane %v14663_v4, 1  ;;  %v19287_v57 = vld [vmem:[%s25502_s11 + $0xe0] sm:$0xff]  }
0x1109   : > { %v14565_v22 = vadd.f32 %v14564_v25, %v14563_v3  ;;  %v14465_v30 = vmul.f32 %v14367_v36, %v14101_v62  ;;  %v14103_v28 = vpop.f32.mrb[50].mxu0  ;;  %v14645_v26 = vadd.f32 %v14644_v48, %v14643_v19  ;;  %v19286_v3 = vld [vmem:[%s25502_s11 + $0x98] sm:$0xff]   ;;  %v19289_v62 = vld [vmem:[%s25502_s11 + $0xe8] sm:$0xff]  }
0x110a   : > { %v14587_v31 = vadd.f32 %v14586_v49, %v14464_v44  ;;  %v14471_v61 = vmul.f32 %v14373_v59, %v14103_v28  ;;  %v14105_v24 = vpop.f32.mrb[51].mxu0  ;;  %v14585_v0 = vadd.f32 %v14584_v47, %v14583_v40  ;;  %v14665_v2 = vadd.f32 %v14664_v9, %v14663_v4  ;;  %v14402_v49 = vld [vmem:[%s25501_s10 + $0x1a0] sm:$0xff]  ;;  %v14408_v44 = vld [vmem:[%s25501_s10 + $0x1d0] sm:$0xff] }
0x110b   : > { %v14607_v60 = vadd.f32 %v14606_v15, %v14465_v30  ;;  %v14472_v1 = vmul.f32 %v14374_v43, %v14105_v24  ;;  %v14700_v11 = vpack.c.bf16 %v14565_v22, %v14565_v22  ;;  %v14704_v35 = vpack.c.bf16 %v14645_v26, %v14645_v26  ;;  %v19288_v4 = vld [vmem:[%s25502_s11 + $0xa0] sm:$0xff]   ;;  %v14409_v43 = vld [vmem:[%s25501_s10 + $0x1d8] sm:$0xff]  ;;  %v14415_v22 = vld [vmem:[%s25501_s10 + $0x208] sm:$0xff] }
0x110c   : > { %v14588_v50 = vadd.f32 %v14587_v31, %v14471_v61  ;;  %v14701_v39 = vpack.c.bf16 %v14585_v0, %v14585_v0  ;;  %v14705_v20 = vpack.c.bf16 %v14665_v2, %v14665_v2  ;;  %v14416_v9 = vld [vmem:[%s25501_s10 + $0x210] sm:$0xff]  ;;  %v19290_v26 = vld [vmem:[%s25502_s11 + $0xa8] sm:$0xff]  }
0x110d   : > { %v14608_v17 = vadd.f32 %v14607_v60, %v14472_v1  ;;  %v19291_v24 = vld [vmem:[%s25502_s11 + $0xf0] sm:$0xff]  }
0x110e   : > { %15143 = vmatprep.mubr.bf16.mxu1 %v14701_v39  ;;  %15223 = vmatprep.mubr.bf16.mxu0 %v14705_v20  ;;  %v19293_v20 = vld [vmem:[%s25502_s11 + $0xf8] sm:$0xff]  }
0x110f   : > { %v14109_v6 = vpop.f32.mrb[64].mxu0  ;;  %15144 = vmatmul.mubr.bf16.vlgmr.msra.gmra.mrb[152].mxu1 %v14700_v11  ;;  %15224 = vmatmul.mubr.bf16.vlgmr.msra.gmra.mrb[112].mxu0 %v14704_v35  ;;  %v14429_v35 = vld [vmem:[%s25501_s10 + $0x278] sm:$0xff] }
0x1110   : > { %v14478_v14 = vmul.f32 %v14380_v33, %v14109_v6  ;;  %v14111_v16 = vpop.f32.mrb[65].mxu0  ;;  %16738 = vmatpush3.bf16.msra.mxu1 %v19280_v63  ;;  %v19292_v63 = vld [vmem:[%s25502_s11 + $0xb0] sm:$0xff]   ;;  %v14423_v33 = vld [vmem:[%s25501_s10 + $0x248] sm:$0xff] }
0x1111   : > { %v14479_v18 = vmul.f32 %v14381_v13, %v14111_v16  ;;  %v14113_v53 = vpop.f32.mrb[66].mxu0  ;;  %16739 = vmatprep.subr.bf16.mxu1 %v19281_v41 }
0x1112   : > { %v14589_v21 = vadd.f32 %v14588_v50, %v14478_v14  ;;  %v14485_v55 = vmul.f32 %v14387_v42, %v14113_v53  ;;  %v14115_v29 = vpop.f32.mrb[67].mxu0  ;;  %v14430_v42 = vld [vmem:[%s25501_s10 + $0x280] sm:$0xff]  ;;  %v19294_v14 = vld [vmem:[%s25502_s11 + $0xb8] sm:$0xff]  }
0x1113   : > { %v14609_v8 = vadd.f32 %v14608_v17, %v14479_v18  ;;  %v14486_v37 = vmul.f32 %v14388_v12, %v14115_v29  ;;  %v14422_v17 = vld [vmem:[%s25501_s10 + $0x240] sm:$0xff] }
0x1114   : > { %v14590_v27 = vadd.f32 %v14589_v21, %v14485_v55  ;;  %16740 = vmatpush3.bf16.msra.mxu1 %v19282_v10 }
0x1115   : > { %v14610_v45 = vadd.f32 %v14609_v8, %v14486_v37  ;;  %16741 = vmatprep.subr.bf16.mxu1 %v19283_v51  ;;  %v14436_v8 = vld [vmem:[%s25501_s10 + $0x2b0] sm:$0xff]  ;;  %v14437_v37 = vld [vmem:[%s25501_s10 + $0x2b8] sm:$0xff] }
0x1117   : > { %v14119_v5 = vpop.f32.mrb[68].mxu0 }
0x1118   : > { %v14492_v38 = vmul.f32 %v14394_v34, %v14119_v5  ;;  %v14121_v52 = vpop.f32.mrb[69].mxu0  ;;  %16742 = vmatpush3.bf16.msra.mxu1 %v19284_v58  ;;  %v14443_v58 = vld [vmem:[%s25501_s10 + $0x2e8] sm:$0x7] }
0x1119   : > { %v14493_v23 = vmul.f32 %v14395_v32, %v14121_v52  ;;  %v14123_v15 = vpop.f32.mrb[70].mxu0  ;;  %16743 = vmatprep.subr.bf16.mxu1 %v19285_v56  ;;  %v14444_v56 = vld [vmem:[%s25501_s10 + $0x2f0] sm:$0x7] }
0x111a   : > { %v14591_v19 = vadd.f32 %v14590_v27, %v14492_v38  ;;  %v14499_v36 = vmul.f32 %v14401_v54, %v14123_v15  ;;  %v14125_v40 = vpop.f32.mrb[71].mxu0 }
0x111b   : > { %v14611_v25 = vadd.f32 %v14610_v45, %v14493_v23  ;;  %v14500_v46 = vmul.f32 %v14402_v49, %v14125_v40 }
0x111c   : > { %v14592_v59 = vadd.f32 %v14591_v19, %v14499_v36  ;;  %16744 = vmatpush3.bf16.msra.mxu1 %v19286_v3  ;;  %v14356_v19 = vld [vmem:[%s25501_s10 + $0x30] sm:$0xff] }
0x111d   : > { %v14612_v48 = vadd.f32 %v14611_v25, %v14500_v46  ;;  %16745 = vmatprep.subr.bf16.mxu1 %v19287_v57  ;;  %v14363_v46 = vld [vmem:[%s25501_s10 + $0x68] sm:$0xff] }
0x111f   : > { %v14129_v47 = vpop.f32.mrb[72].mxu0 }
0x1120   : > { %v14506_v30 = vmul.f32 %v14408_v44, %v14129_v47  ;;  %v14131_v28 = vpop.f32.mrb[73].mxu0  ;;  %16746 = vmatpush3.bf16.msra.mxu1 %v19288_v4 }
0x1121   : > { %v14507_v31 = vmul.f32 %v14409_v43, %v14131_v28  ;;  %v14133_v61 = vpop.f32.mrb[74].mxu0  ;;  %16747 = vmatprep.subr.bf16.mxu1 %v19289_v62 }
0x1122   : > { %v14593_v0 = vadd.f32 %v14592_v59, %v14506_v30  ;;  %v14513_v60 = vmul.f32 %v14415_v22, %v14133_v61  ;;  %v14135_v1 = vpop.f32.mrb[75].mxu0 }
0x1123   : > { %v14613_v2 = vadd.f32 %v14612_v48, %v14507_v31  ;;  %v14514_v50 = vmul.f32 %v14416_v9, %v14135_v1 }
0x1124   : > { %v14594_v39 = vadd.f32 %v14593_v0, %v14513_v60  ;;  %16748 = vmatpush3.bf16.msra.mxu1 %v19290_v26 }
0x1125   : > { %v14614_v11 = vadd.f32 %v14613_v2, %v14514_v50  ;;  %16749 = vmatprep.subr.bf16.mxu1 %v19291_v24  ;;  %v14370_v24 = vld [vmem:[%s25501_s10 + $0xa0] sm:$0xff]  ;;  %v14377_v2 = vld [vmem:[%s25501_s10 + $0xd8] sm:$0xff] }
0x1127   : > { %v14139_v41 = vpop.f32.mrb[76].mxu0 }
0x1128   : > { %v14520_v13 = vmul.f32 %v14422_v17, %v14139_v41  ;;  %v14141_v6 = vpop.f32.mrb[77].mxu0  ;;  %16750 = vmatpush3.bf16.msra.mxu1 %v19292_v63 }
0x1129   : > { %v14521_v16 = vmul.f32 %v14423_v33, %v14141_v6  ;;  %v14143_v12 = vpop.f32.mrb[78].mxu0  ;;  %16751 = vmatprep.subr.bf16.mxu1 %v19293_v20 }
0x112a   : > { %v14595_v10 = vadd.f32 %v14594_v39, %v14520_v13  ;;  %v14527_v18 = vmul.f32 %v14429_v35, %v14143_v12  ;;  %v14145_v53 = vpop.f32.mrb[79].mxu0  ;;  %v14384_v12 = vld [vmem:[%s25501_s10 + $0x110] sm:$0xff] }
0x112b   : > { %v14615_v51 = vadd.f32 %v14614_v11, %v14521_v16  ;;  %v14528_v21 = vmul.f32 %v14430_v42, %v14145_v53  ;;  %v14391_v53 = vld [vmem:[%s25501_s10 + $0x148] sm:$0xff] }
0x112c   : > { %v14596_v55 = vadd.f32 %v14595_v10, %v14527_v18  ;;  %16752 = vmatpush3.bf16.msra.mxu1 %v19294_v14  ;;  %v19295_v14 = vld [vmem:[%s25502_s11 + $0x180] sm:$0xff]  }
0x112d   : > { %v14616_v29 = vadd.f32 %v14615_v51, %v14528_v21  ;;  %17246 = vmatprep.subr.bf16.mxu1 %v25719_v7 }
0x112f   : > { %v14149_v27 = vpop.f32.mrb[80].mxu0 }
0x1130   : > { %v14534_v45 = vmul.f32 %v14436_v8, %v14149_v27  ;;  %v14151_v34 = vpop.f32.mrb[81].mxu0 }
0x1131   : > { %v14535_v32 = vmul.f32 %v14437_v37, %v14151_v34  ;;  %v14153_v5 = vpop.f32.mrb[82].mxu0 }
0x1132   : > { %v14597_v54 = vadd.f32 %v14596_v55, %v14534_v45  ;;  %v14541_v38 = vmul.f32 %v14443_v58, %v14153_v5  ;;  %v14155_v52 = vpop.f32.mrb[83].mxu0  ;;  %v19296_v55 = vld [vmem:[%s25502_s11 + $0x188] sm:$0xff]   ;;  %v14405_v5 = vld [vmem:[%s25501_s10 + $0x1b8] sm:$0xff] }
0x1133   : > { %v14617_v49 = vadd.f32 %v14616_v29, %v14535_v32  ;;  %v14542_v3 = vmul.f32 %v14444_v56, %v14155_v52  ;;  %v14398_v56 = vld [vmem:[%s25501_s10 + $0x180] sm:$0xff] }
0x1134   : > { %v14598_v23 = vsel %vm6522_vm4, %v14541_v38, 0.0 }
0x1135   : > { %v14599_v15 = vadd.f32 %v14598_v23, %v14597_v54  ;;  %v14618_v57 = vsel %vm6522_vm4, %v14542_v3, 0.0 }
0x1136   : > { %v14619_v36 = vadd.f32 %v14618_v57, %v14617_v49 }
0x1137   : > { %v14600_v40 = vrot.slane %v14599_v15, 4  ;;  %v14295_v25 = vpop.f32.mrb[84].mxu0 }
0x1138   : > { %v14620_v59 = vrot.slane %v14619_v36, 4  ;;  %v14454_v4 = vmul.f32 %v14356_v19, %v14295_v25  ;;  %v17220_v48 = vpop.f32.mrb[85].mxu0  ;;  %v14419_v25 = vld [vmem:[%s25501_s10 + $0x228] sm:$0xff] }
0x1139   : > { %v14601_v44 = vadd.f32 %v14600_v40, %v14599_v15  ;;  %v14298_v62 = vpop.f32.mrb[86].mxu0 }
0x113a   : > { %v14621_v43 = vadd.f32 %v14620_v59, %v14619_v36  ;;  %v14461_v47 = vmul.f32 %v14363_v46, %v14298_v62  ;;  %v17221_v22 = vpop.f32.mrb[87].mxu0  ;;  %v14666_v9 = vsel %vm13930_vm15, %v14454_v4, 0.0  ;;  %v14412_v36 = vld [vmem:[%s25501_s10 + $0x1f0] sm:$0xff] }
0x113b   : > { %v14602_v30 = vrot.slane %v14601_v44, 2 }
0x113c   : > { %v14622_v28 = vrot.slane %v14621_v43, 2  ;;  %v14667_v26 = vsel %vm13930_vm15, %v14461_v47, 0.0 }
0x113d   : > { %v14603_v31 = vadd.f32 %v14602_v30, %v14601_v44  ;;  %v14668_v61 = vadd.f32 %v14667_v26, %v14666_v9  ;;  %v14426_v30 = vld [vmem:[%s25501_s10 + $0x260] sm:$0xff]  ;;  %v14433_v9 = vld [vmem:[%s25501_s10 + $0x298] sm:$0xff] }
0x113e   : > { %v14623_v0 = vadd.f32 %v14622_v28, %v14621_v43 }
0x113f   : > { %v14604_v60 = vrot.slane %v14603_v31, 1  ;;  %v14303_v1 = vpop.f32.mrb[88].mxu0 }
0x1140   : > { %v14468_v50 = vmul.f32 %v14370_v24, %v14303_v1  ;;  %v17224_v39 = vpop.f32.mrb[89].mxu0  ;;  %v14624_v63 = vrot.slane %v14623_v0, 1 }
0x1141   : > { %v14306_v11 = vpop.f32.mrb[90].mxu0  ;;  %v14605_v17 = vadd.f32 %v14604_v60, %v14603_v31  ;;  %v14440_v39 = vld [vmem:[%s25501_s10 + $0x2d0] sm:$0xff] }
0x1142   : > { %v14669_v20 = vsel %vm13930_vm15, %v14468_v50, 0.0  ;;  %v14475_v33 = vmul.f32 %v14377_v2, %v14306_v11  ;;  %v17225_v41 = vpop.f32.mrb[91].mxu0  ;;  %v14625_v35 = vadd.f32 %v14624_v63, %v14623_v0  ;;  %v14447_v11 = vld [vmem:[%s25501_s10 + $0x308] sm:$0x7] }
0x1143   : > { %v14670_v13 = vadd.f32 %v14669_v20, %v14668_v61  ;;  %v14702_v10 = vpack.c.bf16 %v14605_v17, %v14605_v17 }
0x1144   : > { %v14671_v6 = vsel %vm13930_vm15, %v14475_v33, 0.0  ;;  %v14703_v42 = vpack.c.bf16 %v14625_v35, %v14625_v35 }
0x1145   : > { %v14672_v16 = vadd.f32 %v14671_v6, %v14670_v13 }
0x1146   : > { %15183 = vmatprep.mubr.bf16.mxu1 %v14703_v42 }
0x1147   : > { %v14311_v18 = vpop.f32.mrb[92].mxu0  ;;  %15184 = vmatmul.mubr.bf16.vlgmr.msra.gmra.mrb[156].mxu1 %v14702_v10 }
0x1148   : > { %v14482_v51 = vmul.f32 %v14384_v12, %v14311_v18  ;;  %v17228_v21 = vpop.f32.mrb[93].mxu0  ;;  %17247 = vmatpush3.bf16.msra.mxu1 %v19295_v14  ;;  %17250 = vmatprep.mubr.msk.bf16.mxu1 %vm19372_vm5, %v25719_v7 }
0x1149   : > { %v14314_v29 = vpop.f32.mrb[94].mxu0  ;;  %17248 = vmatprep.subr.bf16.mxu1 %v25719_v7 }
0x114a   : > { %v14673_v8 = vsel %vm13930_vm15, %v14482_v51, 0.0  ;;  %v14489_v37 = vmul.f32 %v14391_v53, %v14314_v29  ;;  %v17229_v27 = vpop.f32.mrb[95].mxu0  ;;  %v19298_v29 = vld [vmem:[%s25504_s13 + $0x8] sm:$0xff]  }
0x114b   : > { %v14674_v58 = vadd.f32 %v14673_v8, %v14672_v16  ;;  %v19299_v8 = vld [vmem:[%s25504_s13 + $0x10] ss:$0 sps:$4 sm:$0xff]  }
0x114c   : > { %v14675_v45 = vsel %vm13930_vm15, %v14489_v37, 0.0  ;;  %17249 = vmatpush3.bf16.msra.mxu1 %v19296_v55  ;;  %v19297_v55 = vld [vmem:[%s25504_s13] sm:$0xff]   ;;  %v15299_v37 = vsel %vm1501_vm0, %v19299_v8, 0  ;;  %vm15294_vm0 = vcmask 326656  }
0x114d   : > { %v14676_v34 = vadd.f32 %v14675_v45, %v14674_v58  ;;  %17254 = vmatprep.subr.bf16.mxu1 %v25719_v7 }
0x114f   : > { %v14319_v32 = vpop.f32.mrb[96].mxu0 }
0x1150   : > { %v14496_v54 = vmul.f32 %v14398_v56, %v14319_v32  ;;  %v17232_v38 = vpop.f32.mrb[97].mxu0 }
0x1151   : > { %v14322_v52 = vpop.f32.mrb[98].mxu0 }
0x1152   : > { %v14677_v49 = vsel %vm13930_vm15, %v14496_v54, 0.0  ;;  %v14503_v3 = vmul.f32 %v14405_v5, %v14322_v52  ;;  %v17233_v23 = vpop.f32.mrb[99].mxu0 }
0x1153   : > { %v14678_v15 = vadd.f32 %v14677_v49, %v14676_v34  ;;  %v14807_v49 = vld [vmem:[%s25503_s12] sm:$0x1] }
0x1154   : > { %v14679_v57 = vsel %vm13930_vm15, %v14503_v3, 0.0 }
0x1155   : > { %v14680_v19 = vadd.f32 %v14679_v57, %v14678_v15 }
0x1157   : > { %v14327_v40 = vpop.f32.mrb[100].mxu0 }
0x1158   : > { %v14510_v46 = vmul.f32 %v14412_v36, %v14327_v40  ;;  %v17236_v59 = vpop.f32.mrb[101].mxu0 }
0x1159   : > { %v14330_v4 = vpop.f32.mrb[102].mxu0 }
0x115a   : > { %v14681_v48 = vsel %vm13930_vm15, %v14510_v46, 0.0  ;;  %v14517_v44 = vmul.f32 %v14419_v25, %v14330_v4  ;;  %v17237_v62 = vpop.f32.mrb[103].mxu0 }
0x115b   : > { %v14682_v43 = vadd.f32 %v14681_v48, %v14680_v19 }
0x115c   : > { %v14683_v47 = vsel %vm13930_vm15, %v14517_v44, 0.0 }
0x115d   : > { %v14684_v22 = vadd.f32 %v14683_v47, %v14682_v43  ;;  %v15278_v43 = vld [vmem:[%s25505_s14] sm:$0x1] }
0x115f   : > { %v14335_v28 = vpop.f32.mrb[104].mxu0 }
0x1160   : > { %v14524_v26 = vmul.f32 %v14426_v30, %v14335_v28  ;;  %v17240_v31 = vpop.f32.mrb[105].mxu0 }
0x1161   : > { %v14338_v61 = vpop.f32.mrb[106].mxu0 }
0x1162   : > { %v14685_v24 = vsel %vm13930_vm15, %v14524_v26, 0.0  ;;  %v14531_v0 = vmul.f32 %v14433_v9, %v14338_v61  ;;  %v17241_v60 = vpop.f32.mrb[107].mxu0 }
0x1163   : > { %v14686_v1 = vadd.f32 %v14685_v24, %v14684_v22 }
0x1164   : > { %v14687_v2 = vsel %vm13930_vm15, %v14531_v0, 0.0 }
0x1165   : > { %v14688_v50 = vadd.f32 %v14687_v2, %v14686_v1 }
0x1167   : > { %v14343_v63 = vpop.f32.mrb[108].mxu0 }
0x1168   : > { %v14538_v17 = vmul.f32 %v14440_v39, %v14343_v63  ;;  %v17244_v20 = vpop.f32.mrb[109].mxu0 }
0x1169   : > { %v14346_v33 = vpop.f32.mrb[110].mxu0 }
0x116a   : > { %v14689_v41 = vsel %vm13930_vm15, %v14538_v17, 0.0  ;;  %v14545_v35 = vmul.f32 %v14447_v11, %v14346_v33  ;;  %v17245_v13 = vpop.f32.mrb[111].mxu0 }
0x116b   : > { %v14690_v6 = vadd.f32 %v14689_v41, %v14688_v50 }
0x116c   : > { %v14692_v42 = vsel %vm14691_vm1, %v14545_v35, 0.0 }
0x116d   : > { %v14693_v14 = vadd.f32 %v14692_v42, %v14690_v6 }
0x116f   : > { %v14694_v16 = vrot.slane %v14693_v14, 4 }
0x1171   : > { %v14695_v12 = vadd.f32 %v14694_v16, %v14693_v14 }
0x1173   : > { %v14696_v10 = vrot.slane %v14695_v12, 2 }
0x1175   : > { %v14697_v18 = vadd.f32 %v14696_v10, %v14695_v12 }
0x1177   : > { %v14698_v53 = vrot.slane %v14697_v18, 1 }
0x1179   : > { %v14699_v51 = vadd.f32 %v14698_v53, %v14697_v18 }
0x117b   : > { %v14706_v21 = vpack.c.bf16 %v14699_v51, %v14699_v51 }
0x117d   : > { %17251 = vmatmul.mubr.msk.bf16.vlgmr.msra.gmra.mrb[160].mxu1 %vm13930_vm15, %v14706_v21 }
0x117e   : > { %17260 = vmatprep.mubr.msk.bf16.mxu1 %vm19372_vm5, %v25719_v7  ;;  %17255 = vmatpush3.bf16.msra.mxu1 %v19297_v55 }
0x117f   : > { %17256 = vmatprep.subr.bf16.mxu1 %v25719_v7 }
0x1182   : > { %17257 = vmatpush3.bf16.msra.mxu1 %v19298_v29 }
0x1183   : > { %17258 = vmatprep.subr.bf16.mxu1 %v25719_v7 }
0x1186   : > { %17259 = vmatpush3.bf16.msra.mxu1 %v15299_v37 }
0x11e2   : > { %v16731_v27 = vpop.f32.mrb[152].mxu1  ;;  %v16775_v58 = vpop.f32.mrb[112].mxu0 }
0x11e3   : > { %v16732_v45 = vpop.f32.mrb[153].mxu1  ;;  %v16776_v56 = vpop.f32.mrb[113].mxu0 }
0x11e4   : > { %v16733_v34 = vadd.f32 %v16732_v45, %v16731_v27  ;;  %v16734_v32 = vpop.f32.mrb[154].mxu1  ;;  %v16777_v5 = vadd.f32 %v16776_v56, %v16775_v58  ;;  %v16778_v54 = vpop.f32.mrb[114].mxu0 }
0x11e5   : > { %v16735_v38 = vpop.f32.mrb[155].mxu1  ;;  %v16779_v52 = vpop.f32.mrb[115].mxu0 }
0x11e6   : > { %v15146_v7 = vadd.f32 %v16733_v34, %v14807_v49 }
0x121a   : > { %v16753_v3 = vpop.f32.mrb[156].mxu1 }
0x121b   : > { %v16754_v23 = vpop.f32.mrb[157].mxu1 }
0x121c   : > { %v16755_v15 = vadd.f32 %v16754_v23, %v16753_v3  ;;  %v16756_v57 = vpop.f32.mrb[158].mxu1 }
0x121d   : > { %v16757_v19 = vpop.f32.mrb[159].mxu1 }
0x121e   : > { %v15186_v36 = vadd.f32 %v16755_v15, %v15146_v7 }
0x1220   : > { %v15226_v40 = vadd.f32 %v16777_v5, %v15186_v36 }
0x1250   : > { %v15265_v25 = vpop.f32.mrb[160].mxu1 }
0x1251   : > { %v15266_v46 = vadd.f32 %v15265_v25, %v15226_v40  ;;  %v17252_v59 = vpop.f32.mrb[161].mxu1 }
0x1252   : > { %v15268_v4 = vpop.f32.mrb[162].mxu1 }
0x1253   : > { %v15271_v48 = vmax.f32 %v15266_v46, 0.0  ;;  %v17253_v44 = vpop.f32.mrb[163].mxu1 }
0x1255   : > { %v15272_v62 = vpack.c.bf16 %v15271_v48, %v15271_v48 }
0x1257   : > { %17261 = vmatmul.mubr.msk.bf16.vlgmr.msra.gmra.mrb[164].mxu1 %vm15294_vm0, %v15272_v62 }
0x132a   : > { %v15335_v47 = vpop.f32.mrb[164].mxu1 }
0x132b   : > { %v15336_v22 = vadd.f32 %v15335_v47, %v15278_v43  ;;  %v17262_v30 = vpop.f32.mrb[165].mxu1 }
0x132c   : > { %v15338_v28 = vpop.f32.mrb[166].mxu1 }
0x132d   : > { %v17263_v9 = vpop.f32.mrb[167].mxu1  ;;  %15342 = vst.msk [vmem:[%s486_s1] sm:$0x1] %vm15341_vm2, %v15336_v22 }
0x132e   : > { %19318 = shalt.err (!%p19315_p3)
}
0x132f   : > { %s19319_s20 = scalar_lea.hbm %s25449_s26, 16  ;;  %s19323_s0 = scalar_lea.hbm %s25506_s15, 32 }
0x1330   : > { %p19320_p4 = scmp.ne.s32.totalorder %s25449_s26, %s19319_s20  ;;  %p19324_p9 = scmp.lt.u32.totalorder %s25449_s26, %s25506_s15 }
0x1331   : > { %p19325_p10 = scmp.lt.u32.totalorder %s19323_s0, %s19319_s20  ;;  %p19327_p12 = scmp.lt.u32.totalorder %s19319_s20, %s25449_s26 }
0x1332   : > { %p19321_p7 = pnand %p19320_p4, %p19493_p5 }
0x1333   : > { %p19326_p11 = por %p19325_p10, %p19324_p9 }
0x1334   : > { %p19322_p8 = pneg %p19321_p7 }
0x1335   : > { %p19328_p13 = por %p19327_p12, %p19326_p11 }
0x1337   : > { %p19329_p0 = pnand %p19328_p13, %p19322_p8 }
0x1339   : > { %19332 = shalt.err (!%p19329_p0)
}
0x133a   : > { %18333 = dma.vmem_to_hbm [thread:$0]  (%p19493_p5), %s25451_s27, 16, %s25449_s26, %s15344_s22  }
0x133b PF: > { %p18339_p1 = scmp.ge.s32.totalorder %s19367_s21, 2  ;;  %s15368_s16 = sand.u32 1, %s19355_s18  }
0x133c   : > { %s15369_s24 = scalar_lea.sflag [#allocation3], %s15368_s16 }
0x133d   : > { %p18336_p2 = pnand %p18339_p1, %p19497_p6 }
0x133f   : > { %19350 = dma.done.wait (!%p18336_p2), %s15369_s24, 16  }
0x1340   : > { %19352 = vsyncadd (!%p18336_p2), %s15369_s24, 4294967280  ;;  %s25720_s21 = sld [smem:[#allocation6_spill]]  ;;  %s25721_s17 = sld [smem:[#allocation5_spill]] }
0x1341   : > { %s25722_s20 = sld [smem:[#allocation7_spill]]  ;;  %s25723_s18 = smov %s19359_s19 }
0x1346   : > { %p25_p3 = scmp.ge.s32.totalorder %s25720_s21, 4   ;;  %s25724_s19 = smov %s25721_s17 }
0x1348   :  { %27 = sbr.rel (!%p25_p3) target bundleno = 6 (0x6), region = 115 }
0x134f   :  { %15373 = vsyncpa [#allocation3], 1 }
0x1350   :  { %15375 = vsyncpa [#allocation3 + $0x1], 1 }

</bundles_post_ra>
